<compile_context>
chip_gen: v5e
topology: v5e:2x2
jax: 0.10.0
libtpu: 0.0.40
codegen_flags: <defaults>
</compile_context>

<pallas_src>
import functools

import numpy as np

import jax
import jax.numpy as jnp
from jax.experimental import pallas as pl
from jax.experimental.pallas import tpu as pltpu


# ------------------------- in-kernel building blocks -------------------------

def _fire(x, H, W, sq_w_ref, sq_b_ref, ex_w_ref, ex_b_ref, spad_ref):
    """Fused FireBlock on a flat [H*W, Cin] f32 map -> [H*W, Ce1+Ce3] f32.

    squeeze 1x1 (+folded BN) + ReLU, then ONE combined expand matmul:
    LHS  = [H*W, 9*Csq] im2col slab of the squeeze map (built in VMEM from a
           row-padded bf16 scratch copy, horizontal wrap masked to zero),
    RHS  = [9*Csq, Ce1+Ce3] combined weight (expand1x1 folded at the centre
           tap), so the e1||e3 channel concat is just the output column layout.
    """
    HW = H * W
    Csq = sq_w_ref.shape[1]

    # squeeze 1x1 (+ folded BN) + ReLU; bf16 MXU inputs, f32 accumulation.
    s = jnp.dot(x.astype(jnp.bfloat16), sq_w_ref[...],
                preferred_element_type=jnp.float32)
    s = jnp.maximum(s + sq_b_ref[...], 0.0).astype(jnp.bfloat16)   # [HW, Csq]

    # Row-padded squeeze map (W+1 zero slots at each end) in a bf16 scratch;
    # only the pad rows are zero-filled, the middle is overwritten by s.
    zpad = jnp.zeros((W + 1, Csq), jnp.bfloat16)
    spad_ref[0:W + 1, :] = zpad
    spad_ref[W + 1:W + 1 + HW, :] = s
    spad_ref[W + 1 + HW:HW + 2 * W + 2, :] = zpad

    # Horizontal-wrap masks, computed once per fire.
    col = jax.lax.broadcasted_iota(jnp.int32, (HW, 1), 0) % W
    first_col = col == 0
    last_col = col == W - 1

    # Nine shifted windows of the padded squeeze map -> one lane-concat slab.
    wins = []
    for t in range(9):
        di, dj = divmod(t, 3)
        win = spad_ref[di * W + dj:di * W + dj + HW, :]
        if dj == 0:        # neighbour column w-1 < 0
            win = jnp.where(first_col, jnp.zeros_like(win), win)
        elif dj == 2:      # neighbour column w+1 >= W
            win = jnp.where(last_col, jnp.zeros_like(win), win)
        wins.append(win)
    slab = jnp.concatenate(wins, axis=1)                     # [HW, 9*Csq] bf16

    e = jnp.dot(slab, ex_w_ref[...], preferred_element_type=jnp.float32)
    return jnp.maximum(e + ex_b_ref[...], 0.0)               # [HW, Ce1+Ce3]


def _maxpool_3x3_s2_ceil(x, H, W, sel, pad_ref):
    """MaxPool(3, stride=2, ceil_mode=True) on a flat [H*W, C] post-ReLU map.

    The 3x3 window max is taken at every input position from shifted windows
    of a tail-padded bf16 scratch copy (zero padding is exact because x >= 0
    post-ReLU); the stride-2 subsample is then a tiny matmul with a constant
    0/1 selection matrix `sel` ([Ho*Wo, H*W]), which keeps everything in VMEM
    and avoids strided loads.
    """
    HW, C = x.shape
    col = jax.lax.broadcasted_iota(jnp.int32, (HW, 1), 0) % W

    pad_ref[0:HW, :] = x.astype(jnp.bfloat16)
    pad_ref[HW:HW + 2 * W + 2, :] = jnp.zeros((2 * W + 2, C), jnp.bfloat16)

    full = pad_ref[0:HW, :]
    for t in range(1, 9):
        di, dj = divmod(t, 3)
        tap = pad_ref[di * W + dj:di * W + dj + HW, :]
        if dj == 1:        # window column w+1 >= W
            tap = jnp.where(col >= W - 1, jnp.zeros_like(tap), tap)
        elif dj == 2:      # window column w+2 >= W
            tap = jnp.where(col >= W - 2, jnp.zeros_like(tap), tap)
        full = jnp.maximum(full, tap)

    # Stride-2 spatial subsample as a selection matmul (exact: one 1.0/row).
    return jnp.dot(sel, full, preferred_element_type=jnp.float32)


def _squeezenet_kernel(dims, patches_ref, w1_ref, b1_ref,
                       sel1_ref, sel2_ref, sel3_ref,
                       f1sw, f1sb, f1ew, f1eb,
                       f2sw, f2sb, f2ew, f2eb,
                       f3sw, f3sb, f3ew, f3eb,
                       f4sw, f4sb, f4ew, f4eb,
                       cls_w_ref, cls_b_ref,
                       o_ref,
                       spad12, spad34, ppad1, ppad2, ppad3):
    """Whole ModifiedSqueezenet forward for one image; all layers VMEM-resident."""
    (H1, W1), (H2, W2), (H3, W3), (H4, W4) = dims

    # conv1 (3x3 stride 2, no pad) as matmul over host-built patches + bias + ReLU.
    x = jnp.dot(patches_ref[0], w1_ref[...], preferred_element_type=jnp.float32)
    x = jnp.maximum(x + b1_ref[...], 0.0)                        # [H1*W1, 64]

    x = _maxpool_3x3_s2_ceil(x, H1, W1, sel1_ref[...], ppad1)    # [H2*W2, 64]
    x = _fire(x, H2, W2, f1sw, f1sb, f1ew, f1eb, spad12)         # [H2*W2, 128]
    x = _fire(x, H2, W2, f2sw, f2sb, f2ew, f2eb, spad12)         # [H2*W2, 128]
    x = _maxpool_3x3_s2_ceil(x, H2, W2, sel2_ref[...], ppad2)    # [H3*W3, 128]
    x = _fire(x, H3, W3, f3sw, f3sb, f3ew, f3eb, spad34)         # [H3*W3, 256]
    x = _fire(x, H3, W3, f4sw, f4sb, f4ew, f4eb, spad34)         # [H3*W3, 256]
    x = _maxpool_3x3_s2_ceil(x, H3, W3, sel3_ref[...], ppad3)    # [H4*W4, 256]

    # classifier: dropout(id) -> 1x1 conv -> ReLU -> global avg pool.
    y = jnp.dot(x.astype(jnp.bfloat16), cls_w_ref[...],
                preferred_element_type=jnp.float32)
    y = jnp.maximum(y + cls_b_ref[...], 0.0)                     # [H4*W4, Cpad]
    o_ref[0] = jnp.mean(y, axis=0, keepdims=True)                # [1, Cpad]


# ------------------------------ host wrapper ---------------------------------

def _const_spec(arr):
    """Full-array BlockSpec for a (2D) weight that is constant over the grid."""
    return pl.BlockSpec(arr.shape, lambda n: (0, 0))


def _pool_selection_matrix(H, W):
    """0/1 matrix selecting the stride-2 window starts (ceil_mode output size)."""
    Ho = -(-(H - 3) // 2) + 1
    Wo = -(-(W - 3) // 2) + 1
    S = np.zeros((Ho * Wo, H * W), np.float32)
    rows = np.arange(Ho * Wo)
    S[rows, (2 * (rows // Wo)) * W + 2 * (rows % Wo)] = 1.0
    return jnp.asarray(S, dtype=jnp.bfloat16), Ho, Wo


def modified_squeezenet_forward(x_nchw, params):
    # TODO(synk): nn.Dropout layers are eval-mode identities (no RNG dropout).
    x = jnp.transpose(x_nchw, (0, 2, 3, 1)).astype(jnp.bfloat16)  # NCHW -> NHWC
    N, H, W, Cin = x.shape

    # conv1 im2col stays as tiny XLA glue on the raw network input (Cin=3 only);
    # everything downstream is fused inside the single Pallas kernel.
    # TODO(synk): could be moved in-kernel with shifted strided VMEM reads.
    k, s = 3, 2
    H1 = (H - k) // s + 1
    W1 = (W - k) // s + 1
    taps = [x[:, di:di + s * H1:s, dj:dj + s * W1:s, :]
            for di in range(k) for dj in range(k)]
    a = jnp.stack(taps, axis=3).reshape(N, H1 * W1, k * k * Cin)   # tap-major
    Kp = params["conv1_w"].shape[0]           # K padded 27 -> 32 sublanes
    a = jnp.pad(a, ((0, 0), (0, 0), (0, Kp - k * k * Cin)))

    sel1, H2, W2 = _pool_selection_matrix(H1, W1)
    sel2, H3, W3 = _pool_selection_matrix(H2, W2)
    sel3, H4, W4 = _pool_selection_matrix(H3, W3)

    f1, f2 = params["fire1"], params["fire2"]
    f3, f4 = params["fire3"], params["fire4"]
    weights = [params["conv1_w"], params["conv1_b"], sel1, sel2, sel3,
               f1["sq_w"], f1["sq_b"], f1["ex_w"], f1["ex_b"],
               f2["sq_w"], f2["sq_b"], f2["ex_w"], f2["ex_b"],
               f3["sq_w"], f3["sq_b"], f3["ex_w"], f3["ex_b"],
               f4["sq_w"], f4["sq_b"], f4["ex_w"], f4["ex_b"],
               params["cls_w"], params["cls_b"]]

    c1out = params["conv1_w"].shape[1]
    Cpad = params["cls_w"].shape[1]
    dims = ((H1, W1), (H2, W2), (H3, W3), (H4, W4))

    # Advisory cost estimate (all matmuls + selection matmuls).
    flops = 2 * H1 * W1 * Kp * c1out
    flops += 2 * (H2 * W2) * (H1 * W1) * c1out
    for f, hw in ((f1, H2 * W2), (f2, H2 * W2), (f3, H3 * W3), (f4, H3 * W3)):
        cin, csq = f["sq_w"].shape
        kexp, cexp = f["ex_w"].shape
        flops += 2 * hw * (cin * csq + kexp * cexp)
    flops += 2 * (H3 * W3) * (H2 * W2) * f2["ex_w"].shape[1]
    flops += 2 * (H4 * W4) * (H3 * W3) * f4["ex_w"].shape[1]
    flops += 2 * (H4 * W4) * params["cls_w"].shape[0] * Cpad
    weight_bytes = sum(int(np.prod(w.shape)) * w.dtype.itemsize for w in weights)
    ce = pl.CostEstimate(flops=N * flops, transcendentals=0,
                         bytes_accessed=int(a.size) * 2 + weight_bytes
                         + N * Cpad * 4)

    out = pl.pallas_call(
        functools.partial(_squeezenet_kernel, dims),
        out_shape=jax.ShapeDtypeStruct((N, 1, Cpad), jnp.float32),
        grid=(N,),
        in_specs=[pl.BlockSpec((1, H1 * W1, Kp), lambda n: (n, 0, 0))]
                 + [_const_spec(w) for w in weights],
        out_specs=pl.BlockSpec((1, 1, Cpad), lambda n: (n, 0, 0)),
        scratch_shapes=[
            # row-padded squeeze maps (fire1/2 share, fire3/4 share)
            pltpu.VMEM(((H2 + 2) * W2 + 2, f1["sq_w"].shape[1]), jnp.bfloat16),
            pltpu.VMEM(((H3 + 2) * W3 + 2, f3["sq_w"].shape[1]), jnp.bfloat16),
            # tail-padded maps for the three max pools
            pltpu.VMEM((H1 * W1 + 2 * W1 + 2, c1out), jnp.bfloat16),
            pltpu.VMEM((H2 * W2 + 2 * W2 + 2, f2["ex_w"].shape[1]), jnp.bfloat16),
            pltpu.VMEM((H3 * W3 + 2 * W3 + 2, f4["ex_w"].shape[1]), jnp.bfloat16),
        ],
        compiler_params=pltpu.CompilerParams(
            dimension_semantics=("parallel",)),
        cost_estimate=ce,
    )(a, *weights)
    return out[:, 0, :params["num_classes"]]


# --------------------- parameter prep (BN fold, layouts) ---------------------

def _fold_bn(w_pt, b, bn):
    gamma, beta, mean, var, eps = bn
    scale = gamma / jnp.sqrt(var + eps)
    return w_pt * scale[:, None, None, None], (b - mean) * scale + beta


def _prep_fire(p):
    """Fold BN, build the combined [9*Csq, Ce1+Ce3] expand weight (e1 at centre tap)."""
    sw, sb = _fold_bn(p["sq_w"], p["sq_b"], p["sq_bn"])
    e1w, e1b = _fold_bn(p["e1_w"], p["e1_b"], p["e1_bn"])
    e3w, e3b = _fold_bn(p["e3_w"], p["e3_b"], p["e3_bn"])
    Csq, Cin = sw.shape[:2]
    Ce1, Ce3 = e1w.shape[0], e3w.shape[0]

    # expand3x3: [Ce3, Csq, 3, 3] -> rows ordered (kh, kw, csq)
    w_e3 = jnp.transpose(e3w, (2, 3, 1, 0)).reshape(9 * Csq, Ce3)
    # expand1x1 folded at the centre tap (t = 4) rows, zero elsewhere.
    w_e1 = jnp.zeros((9 * Csq, Ce1), jnp.float32)
    w_e1 = w_e1.at[4 * Csq:5 * Csq, :].set(e1w.reshape(Ce1, Csq).T)
    ex_w = jnp.concatenate([w_e1, w_e3], axis=1)               # [9*Csq, Ce1+Ce3]
    ex_b = jnp.concatenate([e1b, e3b]).reshape(1, Ce1 + Ce3)

    return dict(
        sq_w=sw.reshape(Csq, Cin).T.astype(jnp.bfloat16),      # [Cin, Csq]
        sq_b=sb.reshape(1, Csq).astype(jnp.float32),
        ex_w=ex_w.astype(jnp.bfloat16),
        ex_b=ex_b.astype(jnp.float32),
    )


def prepare_params(params, num_classes):
    """Fold eval-mode BN, reshape to kernel layouts, cast weights to bf16."""
    c1w, c1b = params["conv1_w"], params["conv1_b"]
    cout1, cin1, kh, kw = c1w.shape
    K = kh * kw * cin1
    Kp = ((K + 7) // 8) * 8                                    # 27 -> 32 sublanes
    w1 = jnp.transpose(c1w, (2, 3, 1, 0)).reshape(K, cout1)
    w1 = jnp.pad(w1, ((0, Kp - K), (0, 0)))

    clw, clb = params["cls_w"], params["cls_b"]
    ncls, cin_cls = clw.shape[0], clw.shape[1]
    cpad = max(128, ((ncls + 127) // 128) * 128)               # lane-dense Cout
    wc = jnp.pad(clw.reshape(ncls, cin_cls).T, ((0, 0), (0, cpad - ncls)))
    bc = jnp.pad(clb, (0, cpad - ncls))

    return dict(
        conv1_w=w1.astype(jnp.bfloat16),
        conv1_b=c1b.reshape(1, cout1).astype(jnp.float32),
        fire1=_prep_fire(params["fire1"]),
        fire2=_prep_fire(params["fire2"]),
        fire3=_prep_fire(params["fire3"]),
        fire4=_prep_fire(params["fire4"]),
        cls_w=wc.astype(jnp.bfloat16),
        cls_b=bc.reshape(1, cpad).astype(jnp.float32),
        num_classes=num_classes,
    )


# ------------------------------ parameter init --------------------------------

def _bn_init(key, c):
    k1, k2, k3, k4 = jax.random.split(key, 4)
    gamma = jax.random.uniform(k1, (c,), minval=0.5, maxval=1.5)
    beta = 0.1 * jax.random.normal(k2, (c,))
    mean = 0.1 * jax.random.normal(k3, (c,))
    var = jax.random.uniform(k4, (c,), minval=0.5, maxval=1.5)
    return (gamma.astype(jnp.float32), beta.astype(jnp.float32),
            mean.astype(jnp.float32), var.astype(jnp.float32), 1e-5)


def _conv_init(key, cout, cin, kh, kw):
    k1, k2 = jax.random.split(key)
    fan_in = cin * kh * kw
    w = jax.random.normal(k1, (cout, cin, kh, kw)) / jnp.sqrt(fan_in)
    b = 0.01 * jax.random.normal(k2, (cout,))
    return w.astype(jnp.float32), b.astype(jnp.float32)


def _fire_init(key, inp, sq, e1, e3):
    ks = jax.random.split(key, 6)
    sw, sb = _conv_init(ks[0], sq, inp, 1, 1)
    e1w, e1b = _conv_init(ks[1], e1, sq, 1, 1)
    e3w, e3b = _conv_init(ks[2], e3, sq, 3, 3)
    return dict(sq_w=sw, sq_b=sb, sq_bn=_bn_init(ks[3], sq),
                e1_w=e1w, e1_b=e1b, e1_bn=_bn_init(ks[4], e1),
                e3_w=e3w, e3_b=e3b, e3_bn=_bn_init(ks[5], e3))


def init_params(key, num_classes):
    ks = jax.random.split(key, 6)
    c1w, c1b = _conv_init(ks[0], 64, 3, 3, 3)
    clw, clb = _conv_init(ks[5], num_classes, 256, 1, 1)
    return dict(
        conv1_w=c1w, conv1_b=c1b,
        fire1=_fire_init(ks[1], 64, 16, 64, 64),
        fire2=_fire_init(ks[2], 128, 16, 64, 64),
        fire3=_fire_init(ks[3], 128, 32, 128, 128),
        fire4=_fire_init(ks[4], 256, 32, 128, 128),
        cls_w=clw, cls_b=clb,
    )


if __name__ == "__main__":
    key = jax.random.PRNGKey(0)
    pkey, xkey = jax.random.split(key)
    num_classes = 10
    raw_params = init_params(pkey, num_classes)
    params = prepare_params(raw_params, num_classes)
    # PyTorch-style NCHW input; 33x33 keeps all pools >= 1 spatial element.
    x = jax.random.normal(xkey, (2, 3, 33, 33), dtype=jnp.float32)
    fwd = jax.jit(functools.partial(modified_squeezenet_forward, params=params))
    out = jax.block_until_ready(fwd(x))
    assert out.shape == (2, num_classes), out.shape
    assert bool(jnp.all(jnp.isfinite(out)))
    print("KERNEL_OK")
</pallas_src>

<mosaic_0001>
module attributes {stable_mosaic.version = 11 : i64} {
  func.func @_squeezenet_kernel(%arg0: i32, %arg1: memref<1x256x32xbf16, #tpu.memory_space<vmem>>, %arg2: memref<32x64xbf16, #tpu.memory_space<vmem>>, %arg3: memref<1x64xf32, #tpu.memory_space<vmem>>, %arg4: memref<64x256xbf16, #tpu.memory_space<vmem>>, %arg5: memref<16x64xbf16, #tpu.memory_space<vmem>>, %arg6: memref<4x16xbf16, #tpu.memory_space<vmem>>, %arg7: memref<64x16xbf16, #tpu.memory_space<vmem>>, %arg8: memref<1x16xf32, #tpu.memory_space<vmem>>, %arg9: memref<144x128xbf16, #tpu.memory_space<vmem>>, %arg10: memref<1x128xf32, #tpu.memory_space<vmem>>, %arg11: memref<128x16xbf16, #tpu.memory_space<vmem>>, %arg12: memref<1x16xf32, #tpu.memory_space<vmem>>, %arg13: memref<144x128xbf16, #tpu.memory_space<vmem>>, %arg14: memref<1x128xf32, #tpu.memory_space<vmem>>, %arg15: memref<128x32xbf16, #tpu.memory_space<vmem>>, %arg16: memref<1x32xf32, #tpu.memory_space<vmem>>, %arg17: memref<288x256xbf16, #tpu.memory_space<vmem>>, %arg18: memref<1x256xf32, #tpu.memory_space<vmem>>, %arg19: memref<256x32xbf16, #tpu.memory_space<vmem>>, %arg20: memref<1x32xf32, #tpu.memory_space<vmem>>, %arg21: memref<288x256xbf16, #tpu.memory_space<vmem>>, %arg22: memref<1x256xf32, #tpu.memory_space<vmem>>, %arg23: memref<256x128xbf16, #tpu.memory_space<vmem>>, %arg24: memref<1x128xf32, #tpu.memory_space<vmem>>, %arg25: memref<1x1x128xf32, #tpu.memory_space<vmem>>, %arg26: memref<82x16xbf16, #tpu.memory_space<vmem>>, %arg27: memref<26x32xbf16, #tpu.memory_space<vmem>>, %arg28: memref<290x64xbf16, #tpu.memory_space<vmem>>, %arg29: memref<82x128xbf16, #tpu.memory_space<vmem>>, %arg30: memref<26x256xbf16, #tpu.memory_space<vmem>>) attributes {dimension_semantics = [#tpu.dimension_semantics<parallel>], iteration_bounds = array<i64: 2>, scalar_prefetch = 0 : i64, scratch_operands = 5 : i64, tpu.core_type = #tpu.core_type<tc>, window_params = [{transform_indices = @transform_0, window_bounds = array<i64: 1, 256, 32>}, {pipeline_mode = #tpu.pipeline_mode<synchronous>, transform_indices = @transform_1, window_bounds = array<i64: 32, 64>}, {pipeline_mode = #tpu.pipeline_mode<synchronous>, transform_indices = @transform_2, window_bounds = array<i64: 1, 64>}, {pipeline_mode = #tpu.pipeline_mode<synchronous>, transform_indices = @transform_3, window_bounds = array<i64: 64, 256>}, {pipeline_mode = #tpu.pipeline_mode<synchronous>, transform_indices = @transform_4, window_bounds = array<i64: 16, 64>}, {pipeline_mode = #tpu.pipeline_mode<synchronous>, transform_indices = @transform_5, window_bounds = array<i64: 4, 16>}, {pipeline_mode = #tpu.pipeline_mode<synchronous>, transform_indices = @transform_6, window_bounds = array<i64: 64, 16>}, {pipeline_mode = #tpu.pipeline_mode<synchronous>, transform_indices = @transform_7, window_bounds = array<i64: 1, 16>}, {pipeline_mode = #tpu.pipeline_mode<synchronous>, transform_indices = @transform_8, window_bounds = array<i64: 144, 128>}, {pipeline_mode = #tpu.pipeline_mode<synchronous>, transform_indices = @transform_9, window_bounds = array<i64: 1, 128>}, {pipeline_mode = #tpu.pipeline_mode<synchronous>, transform_indices = @transform_10, window_bounds = array<i64: 128, 16>}, {pipeline_mode = #tpu.pipeline_mode<synchronous>, transform_indices = @transform_11, window_bounds = array<i64: 1, 16>}, {pipeline_mode = #tpu.pipeline_mode<synchronous>, transform_indices = @transform_12, window_bounds = array<i64: 144, 128>}, {pipeline_mode = #tpu.pipeline_mode<synchronous>, transform_indices = @transform_13, window_bounds = array<i64: 1, 128>}, {pipeline_mode = #tpu.pipeline_mode<synchronous>, transform_indices = @transform_14, window_bounds = array<i64: 128, 32>}, {pipeline_mode = #tpu.pipeline_mode<synchronous>, transform_indices = @transform_15, window_bounds = array<i64: 1, 32>}, {pipeline_mode = #tpu.pipeline_mode<synchronous>, transform_indices = @transform_16, window_bounds = array<i64: 288, 256>}, {pipeline_mode = #tpu.pipeline_mode<synchronous>, transform_indices = @transform_17, window_bounds = array<i64: 1, 256>}, {pipeline_mode = #tpu.pipeline_mode<synchronous>, transform_indices = @transform_18, window_bounds = array<i64: 256, 32>}, {pipeline_mode = #tpu.pipeline_mode<synchronous>, transform_indices = @transform_19, window_bounds = array<i64: 1, 32>}, {pipeline_mode = #tpu.pipeline_mode<synchronous>, transform_indices = @transform_20, window_bounds = array<i64: 288, 256>}, {pipeline_mode = #tpu.pipeline_mode<synchronous>, transform_indices = @transform_21, window_bounds = array<i64: 1, 256>}, {pipeline_mode = #tpu.pipeline_mode<synchronous>, transform_indices = @transform_22, window_bounds = array<i64: 256, 128>}, {pipeline_mode = #tpu.pipeline_mode<synchronous>, transform_indices = @transform_23, window_bounds = array<i64: 1, 128>}, {transform_indices = @transform_24, window_bounds = array<i64: 1, 1, 128>}]} {
    %c0 = arith.constant 0 : index
    %c0_0 = arith.constant 0 : index
    %c0_1 = arith.constant 0 : index
    %0 = vector.load %arg1[%c0, %c0_0, %c0_1] : memref<1x256x32xbf16, #tpu.memory_space<vmem>>, vector<1x256x32xbf16>
    %1 = vector.shape_cast %0 : vector<1x256x32xbf16> to vector<256x32xbf16>
    %c0_2 = arith.constant 0 : index
    %c0_3 = arith.constant 0 : index
    %2 = vector.load %arg2[%c0_2, %c0_3] : memref<32x64xbf16, #tpu.memory_space<vmem>>, vector<32x64xbf16>
    %cst = arith.constant dense<0.000000e+00> : vector<256x64xf32>
    %3 = tpu.matmul %1, %2, %cst {dimension_numbers = #tpu.dot_dimension_numbers<[1], [0], [0], [1], [0, 0, 1, 1], [], []>} : vector<256x32xbf16>, vector<32x64xbf16>, vector<256x64xf32> -> vector<256x64xf32>
    %c0_4 = arith.constant 0 : index
    %c0_5 = arith.constant 0 : index
    %4 = vector.load %arg3[%c0_4, %c0_5] : memref<1x64xf32, #tpu.memory_space<vmem>>, vector<1x64xf32>
    %5 = vector.broadcast %4 : vector<1x64xf32> to vector<256x64xf32>
    %6 = arith.addf %3, %5 : vector<256x64xf32>
    %cst_6 = arith.constant 0.000000e+00 : f32
    %7 = vector.broadcast %cst_6 : f32 to vector<256x64xf32>
    %8 = arith.maximumf %6, %7 : vector<256x64xf32>
    %c0_7 = arith.constant 0 : index
    %c0_8 = arith.constant 0 : index
    %9 = vector.load %arg4[%c0_7, %c0_8] : memref<64x256xbf16, #tpu.memory_space<vmem>>, vector<64x256xbf16>
    %10 = tpu.iota {dimensions = array<i32: 0>} : vector<256x1xi32>
    %c16_i32 = arith.constant 16 : i32
    %c0_i32 = arith.constant 0 : i32
    %11 = arith.cmpi eq, %c16_i32, %c0_i32 : i32
    %c1_i32 = arith.constant 1 : i32
    %12 = arith.select %11, %c1_i32, %c16_i32 : i32
    %13 = vector.broadcast %12 : i32 to vector<256x1xi32>
    %14 = arith.remsi %10, %13 : vector<256x1xi32>
    %c0_i32_9 = arith.constant 0 : i32
    %15 = vector.broadcast %c0_i32_9 : i32 to vector<256x1xi32>
    %16 = arith.cmpi ne, %14, %15 : vector<256x1xi32>
    %c0_i32_10 = arith.constant 0 : i32
    %17 = vector.broadcast %c0_i32_10 : i32 to vector<256x1xi32>
    %18 = arith.cmpi slt, %14, %17 : vector<256x1xi32>
    %c0_i32_11 = arith.constant 0 : i32
    %19 = arith.cmpi slt, %12, %c0_i32_11 : i32
    %20 = vector.broadcast %19 : i1 to vector<256x1xi1>
    %21 = vector.broadcast %20 : vector<256x1xi1> to vector<256x1xi1>
    %22 = arith.xori %18, %21 : vector<256x1xi1>
    %23 = arith.andi %22, %16 : vector<256x1xi1>
    %24 = vector.broadcast %12 : i32 to vector<256x1xi32>
    %25 = arith.addi %14, %24 : vector<256x1xi32>
    %26 = arith.select %23, %25, %14 : vector<256x1xi1>, vector<256x1xi32>
    %27 = arith.truncf %8 : vector<256x64xf32> to vector<256x64xbf16>
    %c0_12 = arith.constant 0 : index
    %c0_13 = arith.constant 0 : index
    %28 = vector.load %arg28[%c0_12, %c0_13] : memref<290x64xbf16, #tpu.memory_space<vmem>>, vector<256x64xbf16>
    tpu.vector_store %arg28[%c0_12, %c0_13], %27 {strides = array<i32>} : memref<290x64xbf16, #tpu.memory_space<vmem>>, vector<256x64xbf16>,
    %cst_14 = arith.constant 0.000000e+00 : bf16
    %29 = vector.broadcast %cst_14 : bf16 to vector<34x64xbf16>
    %c256 = arith.constant 256 : index
    %c0_15 = arith.constant 0 : index
    %30 = vector.load %arg28[%c256, %c0_15] : memref<290x64xbf16, #tpu.memory_space<vmem>>, vector<34x64xbf16>
    tpu.vector_store %arg28[%c256, %c0_15], %29 {strides = array<i32>} : memref<290x64xbf16, #tpu.memory_space<vmem>>, vector<34x64xbf16>,
    %c0_16 = arith.constant 0 : index
    %c0_17 = arith.constant 0 : index
    %31 = vector.load %arg28[%c0_16, %c0_17] : memref<290x64xbf16, #tpu.memory_space<vmem>>, vector<256x64xbf16>
    %c1 = arith.constant 1 : index
    %c0_18 = arith.constant 0 : index
    %32 = vector.load %arg28[%c1, %c0_18] : memref<290x64xbf16, #tpu.memory_space<vmem>>, vector<256x64xbf16>
    %c15_i32 = arith.constant 15 : i32
    %33 = vector.broadcast %c15_i32 : i32 to vector<256x1xi32>
    %34 = arith.cmpi sge, %26, %33 : vector<256x1xi32>
    %cst_19 = arith.constant 0.000000e+00 : bf16
    %35 = vector.broadcast %cst_19 : bf16 to vector<256x64xbf16>
    %36 = vector.shape_cast %34 : vector<256x1xi1> to vector<256x1xi1>
    %37 = vector.broadcast %36 : vector<256x1xi1> to vector<256x64xi1>
    %38 = arith.select %37, %35, %32 : vector<256x64xi1>, vector<256x64xbf16>
    %39 = arith.maximumf %31, %38 : vector<256x64xbf16>
    %c2 = arith.constant 2 : index
    %c0_20 = arith.constant 0 : index
    %40 = vector.load %arg28[%c2, %c0_20] : memref<290x64xbf16, #tpu.memory_space<vmem>>, vector<256x64xbf16>
    %c14_i32 = arith.constant 14 : i32
    %41 = vector.broadcast %c14_i32 : i32 to vector<256x1xi32>
    %42 = arith.cmpi sge, %26, %41 : vector<256x1xi32>
    %cst_21 = arith.constant 0.000000e+00 : bf16
    %43 = vector.broadcast %cst_21 : bf16 to vector<256x64xbf16>
    %44 = vector.shape_cast %42 : vector<256x1xi1> to vector<256x1xi1>
    %45 = vector.broadcast %44 : vector<256x1xi1> to vector<256x64xi1>
    %46 = arith.select %45, %43, %40 : vector<256x64xi1>, vector<256x64xbf16>
    %47 = arith.maximumf %39, %46 : vector<256x64xbf16>
    %c16 = arith.constant 16 : index
    %c0_22 = arith.constant 0 : index
    %48 = vector.load %arg28[%c16, %c0_22] : memref<290x64xbf16, #tpu.memory_space<vmem>>, vector<256x64xbf16>
    %49 = arith.maximumf %47, %48 : vector<256x64xbf16>
    %c17 = arith.constant 17 : index
    %c0_23 = arith.constant 0 : index
    %50 = vector.load %arg28[%c17, %c0_23] : memref<290x64xbf16, #tpu.memory_space<vmem>>, vector<256x64xbf16>
    %c15_i32_24 = arith.constant 15 : i32
    %51 = vector.broadcast %c15_i32_24 : i32 to vector<256x1xi32>
    %52 = arith.cmpi sge, %26, %51 : vector<256x1xi32>
    %cst_25 = arith.constant 0.000000e+00 : bf16
    %53 = vector.broadcast %cst_25 : bf16 to vector<256x64xbf16>
    %54 = vector.shape_cast %52 : vector<256x1xi1> to vector<256x1xi1>
    %55 = vector.broadcast %54 : vector<256x1xi1> to vector<256x64xi1>
    %56 = arith.select %55, %53, %50 : vector<256x64xi1>, vector<256x64xbf16>
    %57 = arith.maximumf %49, %56 : vector<256x64xbf16>
    %c18 = arith.constant 18 : index
    %c0_26 = arith.constant 0 : index
    %58 = vector.load %arg28[%c18, %c0_26] : memref<290x64xbf16, #tpu.memory_space<vmem>>, vector<256x64xbf16>
    %c14_i32_27 = arith.constant 14 : i32
    %59 = vector.broadcast %c14_i32_27 : i32 to vector<256x1xi32>
    %60 = arith.cmpi sge, %26, %59 : vector<256x1xi32>
    %cst_28 = arith.constant 0.000000e+00 : bf16
    %61 = vector.broadcast %cst_28 : bf16 to vector<256x64xbf16>
    %62 = vector.shape_cast %60 : vector<256x1xi1> to vector<256x1xi1>
    %63 = vector.broadcast %62 : vector<256x1xi1> to vector<256x64xi1>
    %64 = arith.select %63, %61, %58 : vector<256x64xi1>, vector<256x64xbf16>
    %65 = arith.maximumf %57, %64 : vector<256x64xbf16>
    %c32 = arith.constant 32 : index
    %c0_29 = arith.constant 0 : index
    %66 = vector.load %arg28[%c32, %c0_29] : memref<290x64xbf16, #tpu.memory_space<vmem>>, vector<256x64xbf16>
    %67 = arith.maximumf %65, %66 : vector<256x64xbf16>
    %c33 = arith.constant 33 : index
    %c0_30 = arith.constant 0 : index
    %68 = vector.load %arg28[%c33, %c0_30] : memref<290x64xbf16, #tpu.memory_space<vmem>>, vector<256x64xbf16>
    %c15_i32_31 = arith.constant 15 : i32
    %69 = vector.broadcast %c15_i32_31 : i32 to vector<256x1xi32>
    %70 = arith.cmpi sge, %26, %69 : vector<256x1xi32>
    %cst_32 = arith.constant 0.000000e+00 : bf16
    %71 = vector.broadcast %cst_32 : bf16 to vector<256x64xbf16>
    %72 = vector.shape_cast %70 : vector<256x1xi1> to vector<256x1xi1>
    %73 = vector.broadcast %72 : vector<256x1xi1> to vector<256x64xi1>
    %74 = arith.select %73, %71, %68 : vector<256x64xi1>, vector<256x64xbf16>
    %75 = arith.maximumf %67, %74 : vector<256x64xbf16>
    %c34 = arith.constant 34 : index
    %c0_33 = arith.constant 0 : index
    %76 = vector.load %arg28[%c34, %c0_33] : memref<290x64xbf16, #tpu.memory_space<vmem>>, vector<256x64xbf16>
    %c14_i32_34 = arith.constant 14 : i32
    %77 = vector.broadcast %c14_i32_34 : i32 to vector<256x1xi32>
    %78 = arith.cmpi sge, %26, %77 : vector<256x1xi32>
    %cst_35 = arith.constant 0.000000e+00 : bf16
    %79 = vector.broadcast %cst_35 : bf16 to vector<256x64xbf16>
    %80 = vector.shape_cast %78 : vector<256x1xi1> to vector<256x1xi1>
    %81 = vector.broadcast %80 : vector<256x1xi1> to vector<256x64xi1>
    %82 = arith.select %81, %79, %76 : vector<256x64xi1>, vector<256x64xbf16>
    %83 = arith.maximumf %75, %82 : vector<256x64xbf16>
    %cst_36 = arith.constant dense<0.000000e+00> : vector<64x64xf32>
    %84 = tpu.matmul %9, %83, %cst_36 {dimension_numbers = #tpu.dot_dimension_numbers<[1], [0], [0], [1], [0, 0, 1, 1], [], []>} : vector<64x256xbf16>, vector<256x64xbf16>, vector<64x64xf32> -> vector<64x64xf32>
    %85 = arith.truncf %84 : vector<64x64xf32> to vector<64x64xbf16>
    %c0_37 = arith.constant 0 : index
    %c0_38 = arith.constant 0 : index
    %86 = vector.load %arg7[%c0_37, %c0_38] : memref<64x16xbf16, #tpu.memory_space<vmem>>, vector<64x16xbf16>
    %cst_39 = arith.constant dense<0.000000e+00> : vector<64x16xf32>
    %87 = tpu.matmul %85, %86, %cst_39 {dimension_numbers = #tpu.dot_dimension_numbers<[1], [0], [0], [1], [0, 0, 1, 1], [], []>} : vector<64x64xbf16>, vector<64x16xbf16>, vector<64x16xf32> -> vector<64x16xf32>
    %c0_40 = arith.constant 0 : index
    %c0_41 = arith.constant 0 : index
    %88 = vector.load %arg8[%c0_40, %c0_41] : memref<1x16xf32, #tpu.memory_space<vmem>>, vector<1x16xf32>
    %89 = vector.broadcast %88 : vector<1x16xf32> to vector<64x16xf32>
    %90 = arith.addf %87, %89 : vector<64x16xf32>
    %cst_42 = arith.constant 0.000000e+00 : f32
    %91 = vector.broadcast %cst_42 : f32 to vector<64x16xf32>
    %92 = arith.maximumf %90, %91 : vector<64x16xf32>
    %93 = arith.truncf %92 : vector<64x16xf32> to vector<64x16xbf16>
    %cst_43 = arith.constant 0.000000e+00 : bf16
    %94 = vector.broadcast %cst_43 : bf16 to vector<9x16xbf16>
    %c0_44 = arith.constant 0 : index
    %c0_45 = arith.constant 0 : index
    %95 = vector.load %arg26[%c0_44, %c0_45] : memref<82x16xbf16, #tpu.memory_space<vmem>>, vector<9x16xbf16>
    tpu.vector_store %arg26[%c0_44, %c0_45], %94 {strides = array<i32>} : memref<82x16xbf16, #tpu.memory_space<vmem>>, vector<9x16xbf16>,
    %c9 = arith.constant 9 : index
    %c0_46 = arith.constant 0 : index
    %96 = vector.load %arg26[%c9, %c0_46] : memref<82x16xbf16, #tpu.memory_space<vmem>>, vector<64x16xbf16>
    tpu.vector_store %arg26[%c9, %c0_46], %93 {strides = array<i32>} : memref<82x16xbf16, #tpu.memory_space<vmem>>, vector<64x16xbf16>,
    %c73 = arith.constant 73 : index
    %c0_47 = arith.constant 0 : index
    %97 = vector.load %arg26[%c73, %c0_47] : memref<82x16xbf16, #tpu.memory_space<vmem>>, vector<9x16xbf16>
    tpu.vector_store %arg26[%c73, %c0_47], %94 {strides = array<i32>} : memref<82x16xbf16, #tpu.memory_space<vmem>>, vector<9x16xbf16>,
    %98 = tpu.iota {dimensions = array<i32: 0>} : vector<64x1xi32>
    %c8_i32 = arith.constant 8 : i32
    %c0_i32_48 = arith.constant 0 : i32
    %99 = arith.cmpi eq, %c8_i32, %c0_i32_48 : i32
    %c1_i32_49 = arith.constant 1 : i32
    %100 = arith.select %99, %c1_i32_49, %c8_i32 : i32
    %101 = vector.broadcast %100 : i32 to vector<64x1xi32>
    %102 = arith.remsi %98, %101 : vector<64x1xi32>
    %c0_i32_50 = arith.constant 0 : i32
    %103 = vector.broadcast %c0_i32_50 : i32 to vector<64x1xi32>
    %104 = arith.cmpi ne, %102, %103 : vector<64x1xi32>
    %c0_i32_51 = arith.constant 0 : i32
    %105 = vector.broadcast %c0_i32_51 : i32 to vector<64x1xi32>
    %106 = arith.cmpi slt, %102, %105 : vector<64x1xi32>
    %c0_i32_52 = arith.constant 0 : i32
    %107 = arith.cmpi slt, %100, %c0_i32_52 : i32
    %108 = vector.broadcast %107 : i1 to vector<64x1xi1>
    %109 = vector.broadcast %108 : vector<64x1xi1> to vector<64x1xi1>
    %110 = arith.xori %106, %109 : vector<64x1xi1>
    %111 = arith.andi %110, %104 : vector<64x1xi1>
    %112 = vector.broadcast %100 : i32 to vector<64x1xi32>
    %113 = arith.addi %102, %112 : vector<64x1xi32>
    %114 = arith.select %111, %113, %102 : vector<64x1xi1>, vector<64x1xi32>
    %c0_i32_53 = arith.constant 0 : i32
    %115 = vector.broadcast %c0_i32_53 : i32 to vector<64x1xi32>
    %116 = arith.cmpi eq, %114, %115 : vector<64x1xi32>
    %c7_i32 = arith.constant 7 : i32
    %117 = vector.broadcast %c7_i32 : i32 to vector<64x1xi32>
    %118 = arith.cmpi eq, %114, %117 : vector<64x1xi32>
    %c0_54 = arith.constant 0 : index
    %c0_55 = arith.constant 0 : index
    %119 = vector.load %arg26[%c0_54, %c0_55] : memref<82x16xbf16, #tpu.memory_space<vmem>>, vector<64x16xbf16>
    %cst_56 = arith.constant 0.000000e+00 : bf16
    %120 = vector.broadcast %cst_56 : bf16 to vector<64x16xbf16>
    %121 = vector.shape_cast %116 : vector<64x1xi1> to vector<64x1xi1>
    %122 = vector.broadcast %121 : vector<64x1xi1> to vector<64x16xi1>
    %123 = arith.select %122, %120, %119 : vector<64x16xi1>, vector<64x16xbf16>
    %c1_57 = arith.constant 1 : index
    %c0_58 = arith.constant 0 : index
    %124 = vector.load %arg26[%c1_57, %c0_58] : memref<82x16xbf16, #tpu.memory_space<vmem>>, vector<64x16xbf16>
    %c2_59 = arith.constant 2 : index
    %c0_60 = arith.constant 0 : index
    %125 = vector.load %arg26[%c2_59, %c0_60] : memref<82x16xbf16, #tpu.memory_space<vmem>>, vector<64x16xbf16>
    %cst_61 = arith.constant 0.000000e+00 : bf16
    %126 = vector.broadcast %cst_61 : bf16 to vector<64x16xbf16>
    %127 = vector.shape_cast %118 : vector<64x1xi1> to vector<64x1xi1>
    %128 = vector.broadcast %127 : vector<64x1xi1> to vector<64x16xi1>
    %129 = arith.select %128, %126, %125 : vector<64x16xi1>, vector<64x16xbf16>
    %c8 = arith.constant 8 : index
    %c0_62 = arith.constant 0 : index
    %130 = vector.load %arg26[%c8, %c0_62] : memref<82x16xbf16, #tpu.memory_space<vmem>>, vector<64x16xbf16>
    %cst_63 = arith.constant 0.000000e+00 : bf16
    %131 = vector.broadcast %cst_63 : bf16 to vector<64x16xbf16>
    %132 = vector.shape_cast %116 : vector<64x1xi1> to vector<64x1xi1>
    %133 = vector.broadcast %132 : vector<64x1xi1> to vector<64x16xi1>
    %134 = arith.select %133, %131, %130 : vector<64x16xi1>, vector<64x16xbf16>
    %c9_64 = arith.constant 9 : index
    %c0_65 = arith.constant 0 : index
    %135 = vector.load %arg26[%c9_64, %c0_65] : memref<82x16xbf16, #tpu.memory_space<vmem>>, vector<64x16xbf16>
    %c10 = arith.constant 10 : index
    %c0_66 = arith.constant 0 : index
    %136 = vector.load %arg26[%c10, %c0_66] : memref<82x16xbf16, #tpu.memory_space<vmem>>, vector<64x16xbf16>
    %cst_67 = arith.constant 0.000000e+00 : bf16
    %137 = vector.broadcast %cst_67 : bf16 to vector<64x16xbf16>
    %138 = vector.shape_cast %118 : vector<64x1xi1> to vector<64x1xi1>
    %139 = vector.broadcast %138 : vector<64x1xi1> to vector<64x16xi1>
    %140 = arith.select %139, %137, %136 : vector<64x16xi1>, vector<64x16xbf16>
    %c16_68 = arith.constant 16 : index
    %c0_69 = arith.constant 0 : index
    %141 = vector.load %arg26[%c16_68, %c0_69] : memref<82x16xbf16, #tpu.memory_space<vmem>>, vector<64x16xbf16>
    %cst_70 = arith.constant 0.000000e+00 : bf16
    %142 = vector.broadcast %cst_70 : bf16 to vector<64x16xbf16>
    %143 = vector.shape_cast %116 : vector<64x1xi1> to vector<64x1xi1>
    %144 = vector.broadcast %143 : vector<64x1xi1> to vector<64x16xi1>
    %145 = arith.select %144, %142, %141 : vector<64x16xi1>, vector<64x16xbf16>
    %c17_71 = arith.constant 17 : index
    %c0_72 = arith.constant 0 : index
    %146 = vector.load %arg26[%c17_71, %c0_72] : memref<82x16xbf16, #tpu.memory_space<vmem>>, vector<64x16xbf16>
    %c18_73 = arith.constant 18 : index
    %c0_74 = arith.constant 0 : index
    %147 = vector.load %arg26[%c18_73, %c0_74] : memref<82x16xbf16, #tpu.memory_space<vmem>>, vector<64x16xbf16>
    %cst_75 = arith.constant 0.000000e+00 : bf16
    %148 = vector.broadcast %cst_75 : bf16 to vector<64x16xbf16>
    %149 = vector.shape_cast %118 : vector<64x1xi1> to vector<64x1xi1>
    %150 = vector.broadcast %149 : vector<64x1xi1> to vector<64x16xi1>
    %151 = arith.select %150, %148, %147 : vector<64x16xi1>, vector<64x16xbf16>
    %152 = tpu.concatenate %123, %124, %129, %134, %135, %140, %145, %146, %151 in 1 : vector<64x16xbf16>, vector<64x16xbf16>, vector<64x16xbf16>, vector<64x16xbf16>, vector<64x16xbf16>, vector<64x16xbf16>, vector<64x16xbf16>, vector<64x16xbf16>, vector<64x16xbf16> -> vector<64x144xbf16>
    %c0_76 = arith.constant 0 : index
    %c0_77 = arith.constant 0 : index
    %153 = vector.load %arg9[%c0_76, %c0_77] : memref<144x128xbf16, #tpu.memory_space<vmem>>, vector<144x128xbf16>
    %cst_78 = arith.constant dense<0.000000e+00> : vector<64x128xf32>
    %154 = tpu.matmul %152, %153, %cst_78 {dimension_numbers = #tpu.dot_dimension_numbers<[1], [0], [0], [1], [0, 0, 1, 1], [], []>} : vector<64x144xbf16>, vector<144x128xbf16>, vector<64x128xf32> -> vector<64x128xf32>
    %c0_79 = arith.constant 0 : index
    %c0_80 = arith.constant 0 : index
    %155 = vector.load %arg10[%c0_79, %c0_80] : memref<1x128xf32, #tpu.memory_space<vmem>>, vector<1x128xf32>
    %156 = vector.broadcast %155 : vector<1x128xf32> to vector<64x128xf32>
    %157 = arith.addf %154, %156 : vector<64x128xf32>
    %cst_81 = arith.constant 0.000000e+00 : f32
    %158 = vector.broadcast %cst_81 : f32 to vector<64x128xf32>
    %159 = arith.maximumf %157, %158 : vector<64x128xf32>
    %160 = arith.truncf %159 : vector<64x128xf32> to vector<64x128xbf16>
    %c0_82 = arith.constant 0 : index
    %c0_83 = arith.constant 0 : index
    %161 = vector.load %arg11[%c0_82, %c0_83] : memref<128x16xbf16, #tpu.memory_space<vmem>>, vector<128x16xbf16>
    %cst_84 = arith.constant dense<0.000000e+00> : vector<64x16xf32>
    %162 = tpu.matmul %160, %161, %cst_84 {dimension_numbers = #tpu.dot_dimension_numbers<[1], [0], [0], [1], [0, 0, 1, 1], [], []>} : vector<64x128xbf16>, vector<128x16xbf16>, vector<64x16xf32> -> vector<64x16xf32>
    %c0_85 = arith.constant 0 : index
    %c0_86 = arith.constant 0 : index
    %163 = vector.load %arg12[%c0_85, %c0_86] : memref<1x16xf32, #tpu.memory_space<vmem>>, vector<1x16xf32>
    %164 = vector.broadcast %163 : vector<1x16xf32> to vector<64x16xf32>
    %165 = arith.addf %162, %164 : vector<64x16xf32>
    %cst_87 = arith.constant 0.000000e+00 : f32
    %166 = vector.broadcast %cst_87 : f32 to vector<64x16xf32>
    %167 = arith.maximumf %165, %166 : vector<64x16xf32>
    %168 = arith.truncf %167 : vector<64x16xf32> to vector<64x16xbf16>
    %cst_88 = arith.constant 0.000000e+00 : bf16
    %169 = vector.broadcast %cst_88 : bf16 to vector<9x16xbf16>
    %c0_89 = arith.constant 0 : index
    %c0_90 = arith.constant 0 : index
    %170 = vector.load %arg26[%c0_89, %c0_90] : memref<82x16xbf16, #tpu.memory_space<vmem>>, vector<9x16xbf16>
    tpu.vector_store %arg26[%c0_89, %c0_90], %169 {strides = array<i32>} : memref<82x16xbf16, #tpu.memory_space<vmem>>, vector<9x16xbf16>,
    %c9_91 = arith.constant 9 : index
    %c0_92 = arith.constant 0 : index
    %171 = vector.load %arg26[%c9_91, %c0_92] : memref<82x16xbf16, #tpu.memory_space<vmem>>, vector<64x16xbf16>
    tpu.vector_store %arg26[%c9_91, %c0_92], %168 {strides = array<i32>} : memref<82x16xbf16, #tpu.memory_space<vmem>>, vector<64x16xbf16>,
    %c73_93 = arith.constant 73 : index
    %c0_94 = arith.constant 0 : index
    %172 = vector.load %arg26[%c73_93, %c0_94] : memref<82x16xbf16, #tpu.memory_space<vmem>>, vector<9x16xbf16>
    tpu.vector_store %arg26[%c73_93, %c0_94], %169 {strides = array<i32>} : memref<82x16xbf16, #tpu.memory_space<vmem>>, vector<9x16xbf16>,
    %173 = tpu.iota {dimensions = array<i32: 0>} : vector<64x1xi32>
    %c8_i32_95 = arith.constant 8 : i32
    %c0_i32_96 = arith.constant 0 : i32
    %174 = arith.cmpi eq, %c8_i32_95, %c0_i32_96 : i32
    %c1_i32_97 = arith.constant 1 : i32
    %175 = arith.select %174, %c1_i32_97, %c8_i32_95 : i32
    %176 = vector.broadcast %175 : i32 to vector<64x1xi32>
    %177 = arith.remsi %173, %176 : vector<64x1xi32>
    %c0_i32_98 = arith.constant 0 : i32
    %178 = vector.broadcast %c0_i32_98 : i32 to vector<64x1xi32>
    %179 = arith.cmpi ne, %177, %178 : vector<64x1xi32>
    %c0_i32_99 = arith.constant 0 : i32
    %180 = vector.broadcast %c0_i32_99 : i32 to vector<64x1xi32>
    %181 = arith.cmpi slt, %177, %180 : vector<64x1xi32>
    %c0_i32_100 = arith.constant 0 : i32
    %182 = arith.cmpi slt, %175, %c0_i32_100 : i32
    %183 = vector.broadcast %182 : i1 to vector<64x1xi1>
    %184 = vector.broadcast %183 : vector<64x1xi1> to vector<64x1xi1>
    %185 = arith.xori %181, %184 : vector<64x1xi1>
    %186 = arith.andi %185, %179 : vector<64x1xi1>
    %187 = vector.broadcast %175 : i32 to vector<64x1xi32>
    %188 = arith.addi %177, %187 : vector<64x1xi32>
    %189 = arith.select %186, %188, %177 : vector<64x1xi1>, vector<64x1xi32>
    %c0_i32_101 = arith.constant 0 : i32
    %190 = vector.broadcast %c0_i32_101 : i32 to vector<64x1xi32>
    %191 = arith.cmpi eq, %189, %190 : vector<64x1xi32>
    %c7_i32_102 = arith.constant 7 : i32
    %192 = vector.broadcast %c7_i32_102 : i32 to vector<64x1xi32>
    %193 = arith.cmpi eq, %189, %192 : vector<64x1xi32>
    %c0_103 = arith.constant 0 : index
    %c0_104 = arith.constant 0 : index
    %194 = vector.load %arg26[%c0_103, %c0_104] : memref<82x16xbf16, #tpu.memory_space<vmem>>, vector<64x16xbf16>
    %cst_105 = arith.constant 0.000000e+00 : bf16
    %195 = vector.broadcast %cst_105 : bf16 to vector<64x16xbf16>
    %196 = vector.shape_cast %191 : vector<64x1xi1> to vector<64x1xi1>
    %197 = vector.broadcast %196 : vector<64x1xi1> to vector<64x16xi1>
    %198 = arith.select %197, %195, %194 : vector<64x16xi1>, vector<64x16xbf16>
    %c1_106 = arith.constant 1 : index
    %c0_107 = arith.constant 0 : index
    %199 = vector.load %arg26[%c1_106, %c0_107] : memref<82x16xbf16, #tpu.memory_space<vmem>>, vector<64x16xbf16>
    %c2_108 = arith.constant 2 : index
    %c0_109 = arith.constant 0 : index
    %200 = vector.load %arg26[%c2_108, %c0_109] : memref<82x16xbf16, #tpu.memory_space<vmem>>, vector<64x16xbf16>
    %cst_110 = arith.constant 0.000000e+00 : bf16
    %201 = vector.broadcast %cst_110 : bf16 to vector<64x16xbf16>
    %202 = vector.shape_cast %193 : vector<64x1xi1> to vector<64x1xi1>
    %203 = vector.broadcast %202 : vector<64x1xi1> to vector<64x16xi1>
    %204 = arith.select %203, %201, %200 : vector<64x16xi1>, vector<64x16xbf16>
    %c8_111 = arith.constant 8 : index
    %c0_112 = arith.constant 0 : index
    %205 = vector.load %arg26[%c8_111, %c0_112] : memref<82x16xbf16, #tpu.memory_space<vmem>>, vector<64x16xbf16>
    %cst_113 = arith.constant 0.000000e+00 : bf16
    %206 = vector.broadcast %cst_113 : bf16 to vector<64x16xbf16>
    %207 = vector.shape_cast %191 : vector<64x1xi1> to vector<64x1xi1>
    %208 = vector.broadcast %207 : vector<64x1xi1> to vector<64x16xi1>
    %209 = arith.select %208, %206, %205 : vector<64x16xi1>, vector<64x16xbf16>
    %c9_114 = arith.constant 9 : index
    %c0_115 = arith.constant 0 : index
    %210 = vector.load %arg26[%c9_114, %c0_115] : memref<82x16xbf16, #tpu.memory_space<vmem>>, vector<64x16xbf16>
    %c10_116 = arith.constant 10 : index
    %c0_117 = arith.constant 0 : index
    %211 = vector.load %arg26[%c10_116, %c0_117] : memref<82x16xbf16, #tpu.memory_space<vmem>>, vector<64x16xbf16>
    %cst_118 = arith.constant 0.000000e+00 : bf16
    %212 = vector.broadcast %cst_118 : bf16 to vector<64x16xbf16>
    %213 = vector.shape_cast %193 : vector<64x1xi1> to vector<64x1xi1>
    %214 = vector.broadcast %213 : vector<64x1xi1> to vector<64x16xi1>
    %215 = arith.select %214, %212, %211 : vector<64x16xi1>, vector<64x16xbf16>
    %c16_119 = arith.constant 16 : index
    %c0_120 = arith.constant 0 : index
    %216 = vector.load %arg26[%c16_119, %c0_120] : memref<82x16xbf16, #tpu.memory_space<vmem>>, vector<64x16xbf16>
    %cst_121 = arith.constant 0.000000e+00 : bf16
    %217 = vector.broadcast %cst_121 : bf16 to vector<64x16xbf16>
    %218 = vector.shape_cast %191 : vector<64x1xi1> to vector<64x1xi1>
    %219 = vector.broadcast %218 : vector<64x1xi1> to vector<64x16xi1>
    %220 = arith.select %219, %217, %216 : vector<64x16xi1>, vector<64x16xbf16>
    %c17_122 = arith.constant 17 : index
    %c0_123 = arith.constant 0 : index
    %221 = vector.load %arg26[%c17_122, %c0_123] : memref<82x16xbf16, #tpu.memory_space<vmem>>, vector<64x16xbf16>
    %c18_124 = arith.constant 18 : index
    %c0_125 = arith.constant 0 : index
    %222 = vector.load %arg26[%c18_124, %c0_125] : memref<82x16xbf16, #tpu.memory_space<vmem>>, vector<64x16xbf16>
    %cst_126 = arith.constant 0.000000e+00 : bf16
    %223 = vector.broadcast %cst_126 : bf16 to vector<64x16xbf16>
    %224 = vector.shape_cast %193 : vector<64x1xi1> to vector<64x1xi1>
    %225 = vector.broadcast %224 : vector<64x1xi1> to vector<64x16xi1>
    %226 = arith.select %225, %223, %222 : vector<64x16xi1>, vector<64x16xbf16>
    %227 = tpu.concatenate %198, %199, %204, %209, %210, %215, %220, %221, %226 in 1 : vector<64x16xbf16>, vector<64x16xbf16>, vector<64x16xbf16>, vector<64x16xbf16>, vector<64x16xbf16>, vector<64x16xbf16>, vector<64x16xbf16>, vector<64x16xbf16>, vector<64x16xbf16> -> vector<64x144xbf16>
    %c0_127 = arith.constant 0 : index
    %c0_128 = arith.constant 0 : index
    %228 = vector.load %arg13[%c0_127, %c0_128] : memref<144x128xbf16, #tpu.memory_space<vmem>>, vector<144x128xbf16>
    %cst_129 = arith.constant dense<0.000000e+00> : vector<64x128xf32>
    %229 = tpu.matmul %227, %228, %cst_129 {dimension_numbers = #tpu.dot_dimension_numbers<[1], [0], [0], [1], [0, 0, 1, 1], [], []>} : vector<64x144xbf16>, vector<144x128xbf16>, vector<64x128xf32> -> vector<64x128xf32>
    %c0_130 = arith.constant 0 : index
    %c0_131 = arith.constant 0 : index
    %230 = vector.load %arg14[%c0_130, %c0_131] : memref<1x128xf32, #tpu.memory_space<vmem>>, vector<1x128xf32>
    %231 = vector.broadcast %230 : vector<1x128xf32> to vector<64x128xf32>
    %232 = arith.addf %229, %231 : vector<64x128xf32>
    %cst_132 = arith.constant 0.000000e+00 : f32
    %233 = vector.broadcast %cst_132 : f32 to vector<64x128xf32>
    %234 = arith.maximumf %232, %233 : vector<64x128xf32>
    %c0_133 = arith.constant 0 : index
    %c0_134 = arith.constant 0 : index
    %235 = vector.load %arg5[%c0_133, %c0_134] : memref<16x64xbf16, #tpu.memory_space<vmem>>, vector<16x64xbf16>
    %236 = tpu.iota {dimensions = array<i32: 0>} : vector<64x1xi32>
    %c8_i32_135 = arith.constant 8 : i32
    %c0_i32_136 = arith.constant 0 : i32
    %237 = arith.cmpi eq, %c8_i32_135, %c0_i32_136 : i32
    %c1_i32_137 = arith.constant 1 : i32
    %238 = arith.select %237, %c1_i32_137, %c8_i32_135 : i32
    %239 = vector.broadcast %238 : i32 to vector<64x1xi32>
    %240 = arith.remsi %236, %239 : vector<64x1xi32>
    %c0_i32_138 = arith.constant 0 : i32
    %241 = vector.broadcast %c0_i32_138 : i32 to vector<64x1xi32>
    %242 = arith.cmpi ne, %240, %241 : vector<64x1xi32>
    %c0_i32_139 = arith.constant 0 : i32
    %243 = vector.broadcast %c0_i32_139 : i32 to vector<64x1xi32>
    %244 = arith.cmpi slt, %240, %243 : vector<64x1xi32>
    %c0_i32_140 = arith.constant 0 : i32
    %245 = arith.cmpi slt, %238, %c0_i32_140 : i32
    %246 = vector.broadcast %245 : i1 to vector<64x1xi1>
    %247 = vector.broadcast %246 : vector<64x1xi1> to vector<64x1xi1>
    %248 = arith.xori %244, %247 : vector<64x1xi1>
    %249 = arith.andi %248, %242 : vector<64x1xi1>
    %250 = vector.broadcast %238 : i32 to vector<64x1xi32>
    %251 = arith.addi %240, %250 : vector<64x1xi32>
    %252 = arith.select %249, %251, %240 : vector<64x1xi1>, vector<64x1xi32>
    %253 = arith.truncf %234 : vector<64x128xf32> to vector<64x128xbf16>
    %c0_141 = arith.constant 0 : index
    %c0_142 = arith.constant 0 : index
    %254 = vector.load %arg29[%c0_141, %c0_142] : memref<82x128xbf16, #tpu.memory_space<vmem>>, vector<64x128xbf16>
    tpu.vector_store %arg29[%c0_141, %c0_142], %253 {strides = array<i32>} : memref<82x128xbf16, #tpu.memory_space<vmem>>, vector<64x128xbf16>,
    %cst_143 = arith.constant 0.000000e+00 : bf16
    %255 = vector.broadcast %cst_143 : bf16 to vector<18x128xbf16>
    %c64 = arith.constant 64 : index
    %c0_144 = arith.constant 0 : index
    %256 = vector.load %arg29[%c64, %c0_144] : memref<82x128xbf16, #tpu.memory_space<vmem>>, vector<18x128xbf16>
    tpu.vector_store %arg29[%c64, %c0_144], %255 {strides = array<i32>} : memref<82x128xbf16, #tpu.memory_space<vmem>>, vector<18x128xbf16>,
    %c0_145 = arith.constant 0 : index
    %c0_146 = arith.constant 0 : index
    %257 = vector.load %arg29[%c0_145, %c0_146] : memref<82x128xbf16, #tpu.memory_space<vmem>>, vector<64x128xbf16>
    %c1_147 = arith.constant 1 : index
    %c0_148 = arith.constant 0 : index
    %258 = vector.load %arg29[%c1_147, %c0_148] : memref<82x128xbf16, #tpu.memory_space<vmem>>, vector<64x128xbf16>
    %c7_i32_149 = arith.constant 7 : i32
    %259 = vector.broadcast %c7_i32_149 : i32 to vector<64x1xi32>
    %260 = arith.cmpi sge, %252, %259 : vector<64x1xi32>
    %cst_150 = arith.constant 0.000000e+00 : bf16
    %261 = vector.broadcast %cst_150 : bf16 to vector<64x128xbf16>
    %262 = vector.shape_cast %260 : vector<64x1xi1> to vector<64x1xi1>
    %263 = vector.broadcast %262 : vector<64x1xi1> to vector<64x128xi1>
    %264 = arith.select %263, %261, %258 : vector<64x128xi1>, vector<64x128xbf16>
    %265 = arith.maximumf %257, %264 : vector<64x128xbf16>
    %c2_151 = arith.constant 2 : index
    %c0_152 = arith.constant 0 : index
    %266 = vector.load %arg29[%c2_151, %c0_152] : memref<82x128xbf16, #tpu.memory_space<vmem>>, vector<64x128xbf16>
    %c6_i32 = arith.constant 6 : i32
    %267 = vector.broadcast %c6_i32 : i32 to vector<64x1xi32>
    %268 = arith.cmpi sge, %252, %267 : vector<64x1xi32>
    %cst_153 = arith.constant 0.000000e+00 : bf16
    %269 = vector.broadcast %cst_153 : bf16 to vector<64x128xbf16>
    %270 = vector.shape_cast %268 : vector<64x1xi1> to vector<64x1xi1>
    %271 = vector.broadcast %270 : vector<64x1xi1> to vector<64x128xi1>
    %272 = arith.select %271, %269, %266 : vector<64x128xi1>, vector<64x128xbf16>
    %273 = arith.maximumf %265, %272 : vector<64x128xbf16>
    %c8_154 = arith.constant 8 : index
    %c0_155 = arith.constant 0 : index
    %274 = vector.load %arg29[%c8_154, %c0_155] : memref<82x128xbf16, #tpu.memory_space<vmem>>, vector<64x128xbf16>
    %275 = arith.maximumf %273, %274 : vector<64x128xbf16>
    %c9_156 = arith.constant 9 : index
    %c0_157 = arith.constant 0 : index
    %276 = vector.load %arg29[%c9_156, %c0_157] : memref<82x128xbf16, #tpu.memory_space<vmem>>, vector<64x128xbf16>
    %c7_i32_158 = arith.constant 7 : i32
    %277 = vector.broadcast %c7_i32_158 : i32 to vector<64x1xi32>
    %278 = arith.cmpi sge, %252, %277 : vector<64x1xi32>
    %cst_159 = arith.constant 0.000000e+00 : bf16
    %279 = vector.broadcast %cst_159 : bf16 to vector<64x128xbf16>
    %280 = vector.shape_cast %278 : vector<64x1xi1> to vector<64x1xi1>
    %281 = vector.broadcast %280 : vector<64x1xi1> to vector<64x128xi1>
    %282 = arith.select %281, %279, %276 : vector<64x128xi1>, vector<64x128xbf16>
    %283 = arith.maximumf %275, %282 : vector<64x128xbf16>
    %c10_160 = arith.constant 10 : index
    %c0_161 = arith.constant 0 : index
    %284 = vector.load %arg29[%c10_160, %c0_161] : memref<82x128xbf16, #tpu.memory_space<vmem>>, vector<64x128xbf16>
    %c6_i32_162 = arith.constant 6 : i32
    %285 = vector.broadcast %c6_i32_162 : i32 to vector<64x1xi32>
    %286 = arith.cmpi sge, %252, %285 : vector<64x1xi32>
    %cst_163 = arith.constant 0.000000e+00 : bf16
    %287 = vector.broadcast %cst_163 : bf16 to vector<64x128xbf16>
    %288 = vector.shape_cast %286 : vector<64x1xi1> to vector<64x1xi1>
    %289 = vector.broadcast %288 : vector<64x1xi1> to vector<64x128xi1>
    %290 = arith.select %289, %287, %284 : vector<64x128xi1>, vector<64x128xbf16>
    %291 = arith.maximumf %283, %290 : vector<64x128xbf16>
    %c16_164 = arith.constant 16 : index
    %c0_165 = arith.constant 0 : index
    %292 = vector.load %arg29[%c16_164, %c0_165] : memref<82x128xbf16, #tpu.memory_space<vmem>>, vector<64x128xbf16>
    %293 = arith.maximumf %291, %292 : vector<64x128xbf16>
    %c17_166 = arith.constant 17 : index
    %c0_167 = arith.constant 0 : index
    %294 = vector.load %arg29[%c17_166, %c0_167] : memref<82x128xbf16, #tpu.memory_space<vmem>>, vector<64x128xbf16>
    %c7_i32_168 = arith.constant 7 : i32
    %295 = vector.broadcast %c7_i32_168 : i32 to vector<64x1xi32>
    %296 = arith.cmpi sge, %252, %295 : vector<64x1xi32>
    %cst_169 = arith.constant 0.000000e+00 : bf16
    %297 = vector.broadcast %cst_169 : bf16 to vector<64x128xbf16>
    %298 = vector.shape_cast %296 : vector<64x1xi1> to vector<64x1xi1>
    %299 = vector.broadcast %298 : vector<64x1xi1> to vector<64x128xi1>
    %300 = arith.select %299, %297, %294 : vector<64x128xi1>, vector<64x128xbf16>
    %301 = arith.maximumf %293, %300 : vector<64x128xbf16>
    %c18_170 = arith.constant 18 : index
    %c0_171 = arith.constant 0 : index
    %302 = vector.load %arg29[%c18_170, %c0_171] : memref<82x128xbf16, #tpu.memory_space<vmem>>, vector<64x128xbf16>
    %c6_i32_172 = arith.constant 6 : i32
    %303 = vector.broadcast %c6_i32_172 : i32 to vector<64x1xi32>
    %304 = arith.cmpi sge, %252, %303 : vector<64x1xi32>
    %cst_173 = arith.constant 0.000000e+00 : bf16
    %305 = vector.broadcast %cst_173 : bf16 to vector<64x128xbf16>
    %306 = vector.shape_cast %304 : vector<64x1xi1> to vector<64x1xi1>
    %307 = vector.broadcast %306 : vector<64x1xi1> to vector<64x128xi1>
    %308 = arith.select %307, %305, %302 : vector<64x128xi1>, vector<64x128xbf16>
    %309 = arith.maximumf %301, %308 : vector<64x128xbf16>
    %cst_174 = arith.constant dense<0.000000e+00> : vector<16x128xf32>
    %310 = tpu.matmul %235, %309, %cst_174 {dimension_numbers = #tpu.dot_dimension_numbers<[1], [0], [0], [1], [0, 0, 1, 1], [], []>} : vector<16x64xbf16>, vector<64x128xbf16>, vector<16x128xf32> -> vector<16x128xf32>
    %311 = arith.truncf %310 : vector<16x128xf32> to vector<16x128xbf16>
    %c0_175 = arith.constant 0 : index
    %c0_176 = arith.constant 0 : index
    %312 = vector.load %arg15[%c0_175, %c0_176] : memref<128x32xbf16, #tpu.memory_space<vmem>>, vector<128x32xbf16>
    %cst_177 = arith.constant dense<0.000000e+00> : vector<16x32xf32>
    %313 = tpu.matmul %311, %312, %cst_177 {dimension_numbers = #tpu.dot_dimension_numbers<[1], [0], [0], [1], [0, 0, 1, 1], [], []>} : vector<16x128xbf16>, vector<128x32xbf16>, vector<16x32xf32> -> vector<16x32xf32>
    %c0_178 = arith.constant 0 : index
    %c0_179 = arith.constant 0 : index
    %314 = vector.load %arg16[%c0_178, %c0_179] : memref<1x32xf32, #tpu.memory_space<vmem>>, vector<1x32xf32>
    %315 = vector.broadcast %314 : vector<1x32xf32> to vector<16x32xf32>
    %316 = arith.addf %313, %315 : vector<16x32xf32>
    %cst_180 = arith.constant 0.000000e+00 : f32
    %317 = vector.broadcast %cst_180 : f32 to vector<16x32xf32>
    %318 = arith.maximumf %316, %317 : vector<16x32xf32>
    %319 = arith.truncf %318 : vector<16x32xf32> to vector<16x32xbf16>
    %cst_181 = arith.constant 0.000000e+00 : bf16
    %320 = vector.broadcast %cst_181 : bf16 to vector<5x32xbf16>
    %c0_182 = arith.constant 0 : index
    %c0_183 = arith.constant 0 : index
    %321 = vector.load %arg27[%c0_182, %c0_183] : memref<26x32xbf16, #tpu.memory_space<vmem>>, vector<5x32xbf16>
    tpu.vector_store %arg27[%c0_182, %c0_183], %320 {strides = array<i32>} : memref<26x32xbf16, #tpu.memory_space<vmem>>, vector<5x32xbf16>,
    %c5 = arith.constant 5 : index
    %c0_184 = arith.constant 0 : index
    %322 = vector.load %arg27[%c5, %c0_184] : memref<26x32xbf16, #tpu.memory_space<vmem>>, vector<16x32xbf16>
    tpu.vector_store %arg27[%c5, %c0_184], %319 {strides = array<i32>} : memref<26x32xbf16, #tpu.memory_space<vmem>>, vector<16x32xbf16>,
    %c21 = arith.constant 21 : index
    %c0_185 = arith.constant 0 : index
    %323 = vector.load %arg27[%c21, %c0_185] : memref<26x32xbf16, #tpu.memory_space<vmem>>, vector<5x32xbf16>
    tpu.vector_store %arg27[%c21, %c0_185], %320 {strides = array<i32>} : memref<26x32xbf16, #tpu.memory_space<vmem>>, vector<5x32xbf16>,
    %324 = tpu.iota {dimensions = array<i32: 0>} : vector<16x1xi32>
    %c4_i32 = arith.constant 4 : i32
    %c0_i32_186 = arith.constant 0 : i32
    %325 = arith.cmpi eq, %c4_i32, %c0_i32_186 : i32
    %c1_i32_187 = arith.constant 1 : i32
    %326 = arith.select %325, %c1_i32_187, %c4_i32 : i32
    %327 = vector.broadcast %326 : i32 to vector<16x1xi32>
    %328 = arith.remsi %324, %327 : vector<16x1xi32>
    %c0_i32_188 = arith.constant 0 : i32
    %329 = vector.broadcast %c0_i32_188 : i32 to vector<16x1xi32>
    %330 = arith.cmpi ne, %328, %329 : vector<16x1xi32>
    %c0_i32_189 = arith.constant 0 : i32
    %331 = vector.broadcast %c0_i32_189 : i32 to vector<16x1xi32>
    %332 = arith.cmpi slt, %328, %331 : vector<16x1xi32>
    %c0_i32_190 = arith.constant 0 : i32
    %333 = arith.cmpi slt, %326, %c0_i32_190 : i32
    %334 = vector.broadcast %333 : i1 to vector<16x1xi1>
    %335 = vector.broadcast %334 : vector<16x1xi1> to vector<16x1xi1>
    %336 = arith.xori %332, %335 : vector<16x1xi1>
    %337 = arith.andi %336, %330 : vector<16x1xi1>
    %338 = vector.broadcast %326 : i32 to vector<16x1xi32>
    %339 = arith.addi %328, %338 : vector<16x1xi32>
    %340 = arith.select %337, %339, %328 : vector<16x1xi1>, vector<16x1xi32>
    %c0_i32_191 = arith.constant 0 : i32
    %341 = vector.broadcast %c0_i32_191 : i32 to vector<16x1xi32>
    %342 = arith.cmpi eq, %340, %341 : vector<16x1xi32>
    %c3_i32 = arith.constant 3 : i32
    %343 = vector.broadcast %c3_i32 : i32 to vector<16x1xi32>
    %344 = arith.cmpi eq, %340, %343 : vector<16x1xi32>
    %c0_192 = arith.constant 0 : index
    %c0_193 = arith.constant 0 : index
    %345 = vector.load %arg27[%c0_192, %c0_193] : memref<26x32xbf16, #tpu.memory_space<vmem>>, vector<16x32xbf16>
    %cst_194 = arith.constant 0.000000e+00 : bf16
    %346 = vector.broadcast %cst_194 : bf16 to vector<16x32xbf16>
    %347 = vector.shape_cast %342 : vector<16x1xi1> to vector<16x1xi1>
    %348 = vector.broadcast %347 : vector<16x1xi1> to vector<16x32xi1>
    %349 = arith.select %348, %346, %345 : vector<16x32xi1>, vector<16x32xbf16>
    %c1_195 = arith.constant 1 : index
    %c0_196 = arith.constant 0 : index
    %350 = vector.load %arg27[%c1_195, %c0_196] : memref<26x32xbf16, #tpu.memory_space<vmem>>, vector<16x32xbf16>
    %c2_197 = arith.constant 2 : index
    %c0_198 = arith.constant 0 : index
    %351 = vector.load %arg27[%c2_197, %c0_198] : memref<26x32xbf16, #tpu.memory_space<vmem>>, vector<16x32xbf16>
    %cst_199 = arith.constant 0.000000e+00 : bf16
    %352 = vector.broadcast %cst_199 : bf16 to vector<16x32xbf16>
    %353 = vector.shape_cast %344 : vector<16x1xi1> to vector<16x1xi1>
    %354 = vector.broadcast %353 : vector<16x1xi1> to vector<16x32xi1>
    %355 = arith.select %354, %352, %351 : vector<16x32xi1>, vector<16x32xbf16>
    %c4 = arith.constant 4 : index
    %c0_200 = arith.constant 0 : index
    %356 = vector.load %arg27[%c4, %c0_200] : memref<26x32xbf16, #tpu.memory_space<vmem>>, vector<16x32xbf16>
    %cst_201 = arith.constant 0.000000e+00 : bf16
    %357 = vector.broadcast %cst_201 : bf16 to vector<16x32xbf16>
    %358 = vector.shape_cast %342 : vector<16x1xi1> to vector<16x1xi1>
    %359 = vector.broadcast %358 : vector<16x1xi1> to vector<16x32xi1>
    %360 = arith.select %359, %357, %356 : vector<16x32xi1>, vector<16x32xbf16>
    %c5_202 = arith.constant 5 : index
    %c0_203 = arith.constant 0 : index
    %361 = vector.load %arg27[%c5_202, %c0_203] : memref<26x32xbf16, #tpu.memory_space<vmem>>, vector<16x32xbf16>
    %c6 = arith.constant 6 : index
    %c0_204 = arith.constant 0 : index
    %362 = vector.load %arg27[%c6, %c0_204] : memref<26x32xbf16, #tpu.memory_space<vmem>>, vector<16x32xbf16>
    %cst_205 = arith.constant 0.000000e+00 : bf16
    %363 = vector.broadcast %cst_205 : bf16 to vector<16x32xbf16>
    %364 = vector.shape_cast %344 : vector<16x1xi1> to vector<16x1xi1>
    %365 = vector.broadcast %364 : vector<16x1xi1> to vector<16x32xi1>
    %366 = arith.select %365, %363, %362 : vector<16x32xi1>, vector<16x32xbf16>
    %c8_206 = arith.constant 8 : index
    %c0_207 = arith.constant 0 : index
    %367 = vector.load %arg27[%c8_206, %c0_207] : memref<26x32xbf16, #tpu.memory_space<vmem>>, vector<16x32xbf16>
    %cst_208 = arith.constant 0.000000e+00 : bf16
    %368 = vector.broadcast %cst_208 : bf16 to vector<16x32xbf16>
    %369 = vector.shape_cast %342 : vector<16x1xi1> to vector<16x1xi1>
    %370 = vector.broadcast %369 : vector<16x1xi1> to vector<16x32xi1>
    %371 = arith.select %370, %368, %367 : vector<16x32xi1>, vector<16x32xbf16>
    %c9_209 = arith.constant 9 : index
    %c0_210 = arith.constant 0 : index
    %372 = vector.load %arg27[%c9_209, %c0_210] : memref<26x32xbf16, #tpu.memory_space<vmem>>, vector<16x32xbf16>
    %c10_211 = arith.constant 10 : index
    %c0_212 = arith.constant 0 : index
    %373 = vector.load %arg27[%c10_211, %c0_212] : memref<26x32xbf16, #tpu.memory_space<vmem>>, vector<16x32xbf16>
    %cst_213 = arith.constant 0.000000e+00 : bf16
    %374 = vector.broadcast %cst_213 : bf16 to vector<16x32xbf16>
    %375 = vector.shape_cast %344 : vector<16x1xi1> to vector<16x1xi1>
    %376 = vector.broadcast %375 : vector<16x1xi1> to vector<16x32xi1>
    %377 = arith.select %376, %374, %373 : vector<16x32xi1>, vector<16x32xbf16>
    %378 = tpu.concatenate %349, %350, %355, %360, %361, %366, %371, %372, %377 in 1 : vector<16x32xbf16>, vector<16x32xbf16>, vector<16x32xbf16>, vector<16x32xbf16>, vector<16x32xbf16>, vector<16x32xbf16>, vector<16x32xbf16>, vector<16x32xbf16>, vector<16x32xbf16> -> vector<16x288xbf16>
    %c0_214 = arith.constant 0 : index
    %c0_215 = arith.constant 0 : index
    %379 = vector.load %arg17[%c0_214, %c0_215] : memref<288x256xbf16, #tpu.memory_space<vmem>>, vector<288x256xbf16>
    %cst_216 = arith.constant dense<0.000000e+00> : vector<16x256xf32>
    %380 = tpu.matmul %378, %379, %cst_216 {dimension_numbers = #tpu.dot_dimension_numbers<[1], [0], [0], [1], [0, 0, 1, 1], [], []>} : vector<16x288xbf16>, vector<288x256xbf16>, vector<16x256xf32> -> vector<16x256xf32>
    %c0_217 = arith.constant 0 : index
    %c0_218 = arith.constant 0 : index
    %381 = vector.load %arg18[%c0_217, %c0_218] : memref<1x256xf32, #tpu.memory_space<vmem>>, vector<1x256xf32>
    %382 = vector.broadcast %381 : vector<1x256xf32> to vector<16x256xf32>
    %383 = arith.addf %380, %382 : vector<16x256xf32>
    %cst_219 = arith.constant 0.000000e+00 : f32
    %384 = vector.broadcast %cst_219 : f32 to vector<16x256xf32>
    %385 = arith.maximumf %383, %384 : vector<16x256xf32>
    %386 = arith.truncf %385 : vector<16x256xf32> to vector<16x256xbf16>
    %c0_220 = arith.constant 0 : index
    %c0_221 = arith.constant 0 : index
    %387 = vector.load %arg19[%c0_220, %c0_221] : memref<256x32xbf16, #tpu.memory_space<vmem>>, vector<256x32xbf16>
    %cst_222 = arith.constant dense<0.000000e+00> : vector<16x32xf32>
    %388 = tpu.matmul %386, %387, %cst_222 {dimension_numbers = #tpu.dot_dimension_numbers<[1], [0], [0], [1], [0, 0, 1, 1], [], []>} : vector<16x256xbf16>, vector<256x32xbf16>, vector<16x32xf32> -> vector<16x32xf32>
    %c0_223 = arith.constant 0 : index
    %c0_224 = arith.constant 0 : index
    %389 = vector.load %arg20[%c0_223, %c0_224] : memref<1x32xf32, #tpu.memory_space<vmem>>, vector<1x32xf32>
    %390 = vector.broadcast %389 : vector<1x32xf32> to vector<16x32xf32>
    %391 = arith.addf %388, %390 : vector<16x32xf32>
    %cst_225 = arith.constant 0.000000e+00 : f32
    %392 = vector.broadcast %cst_225 : f32 to vector<16x32xf32>
    %393 = arith.maximumf %391, %392 : vector<16x32xf32>
    %394 = arith.truncf %393 : vector<16x32xf32> to vector<16x32xbf16>
    %cst_226 = arith.constant 0.000000e+00 : bf16
    %395 = vector.broadcast %cst_226 : bf16 to vector<5x32xbf16>
    %c0_227 = arith.constant 0 : index
    %c0_228 = arith.constant 0 : index
    %396 = vector.load %arg27[%c0_227, %c0_228] : memref<26x32xbf16, #tpu.memory_space<vmem>>, vector<5x32xbf16>
    tpu.vector_store %arg27[%c0_227, %c0_228], %395 {strides = array<i32>} : memref<26x32xbf16, #tpu.memory_space<vmem>>, vector<5x32xbf16>,
    %c5_229 = arith.constant 5 : index
    %c0_230 = arith.constant 0 : index
    %397 = vector.load %arg27[%c5_229, %c0_230] : memref<26x32xbf16, #tpu.memory_space<vmem>>, vector<16x32xbf16>
    tpu.vector_store %arg27[%c5_229, %c0_230], %394 {strides = array<i32>} : memref<26x32xbf16, #tpu.memory_space<vmem>>, vector<16x32xbf16>,
    %c21_231 = arith.constant 21 : index
    %c0_232 = arith.constant 0 : index
    %398 = vector.load %arg27[%c21_231, %c0_232] : memref<26x32xbf16, #tpu.memory_space<vmem>>, vector<5x32xbf16>
    tpu.vector_store %arg27[%c21_231, %c0_232], %395 {strides = array<i32>} : memref<26x32xbf16, #tpu.memory_space<vmem>>, vector<5x32xbf16>,
    %399 = tpu.iota {dimensions = array<i32: 0>} : vector<16x1xi32>
    %c4_i32_233 = arith.constant 4 : i32
    %c0_i32_234 = arith.constant 0 : i32
    %400 = arith.cmpi eq, %c4_i32_233, %c0_i32_234 : i32
    %c1_i32_235 = arith.constant 1 : i32
    %401 = arith.select %400, %c1_i32_235, %c4_i32_233 : i32
    %402 = vector.broadcast %401 : i32 to vector<16x1xi32>
    %403 = arith.remsi %399, %402 : vector<16x1xi32>
    %c0_i32_236 = arith.constant 0 : i32
    %404 = vector.broadcast %c0_i32_236 : i32 to vector<16x1xi32>
    %405 = arith.cmpi ne, %403, %404 : vector<16x1xi32>
    %c0_i32_237 = arith.constant 0 : i32
    %406 = vector.broadcast %c0_i32_237 : i32 to vector<16x1xi32>
    %407 = arith.cmpi slt, %403, %406 : vector<16x1xi32>
    %c0_i32_238 = arith.constant 0 : i32
    %408 = arith.cmpi slt, %401, %c0_i32_238 : i32
    %409 = vector.broadcast %408 : i1 to vector<16x1xi1>
    %410 = vector.broadcast %409 : vector<16x1xi1> to vector<16x1xi1>
    %411 = arith.xori %407, %410 : vector<16x1xi1>
    %412 = arith.andi %411, %405 : vector<16x1xi1>
    %413 = vector.broadcast %401 : i32 to vector<16x1xi32>
    %414 = arith.addi %403, %413 : vector<16x1xi32>
    %415 = arith.select %412, %414, %403 : vector<16x1xi1>, vector<16x1xi32>
    %c0_i32_239 = arith.constant 0 : i32
    %416 = vector.broadcast %c0_i32_239 : i32 to vector<16x1xi32>
    %417 = arith.cmpi eq, %415, %416 : vector<16x1xi32>
    %c3_i32_240 = arith.constant 3 : i32
    %418 = vector.broadcast %c3_i32_240 : i32 to vector<16x1xi32>
    %419 = arith.cmpi eq, %415, %418 : vector<16x1xi32>
    %c0_241 = arith.constant 0 : index
    %c0_242 = arith.constant 0 : index
    %420 = vector.load %arg27[%c0_241, %c0_242] : memref<26x32xbf16, #tpu.memory_space<vmem>>, vector<16x32xbf16>
    %cst_243 = arith.constant 0.000000e+00 : bf16
    %421 = vector.broadcast %cst_243 : bf16 to vector<16x32xbf16>
    %422 = vector.shape_cast %417 : vector<16x1xi1> to vector<16x1xi1>
    %423 = vector.broadcast %422 : vector<16x1xi1> to vector<16x32xi1>
    %424 = arith.select %423, %421, %420 : vector<16x32xi1>, vector<16x32xbf16>
    %c1_244 = arith.constant 1 : index
    %c0_245 = arith.constant 0 : index
    %425 = vector.load %arg27[%c1_244, %c0_245] : memref<26x32xbf16, #tpu.memory_space<vmem>>, vector<16x32xbf16>
    %c2_246 = arith.constant 2 : index
    %c0_247 = arith.constant 0 : index
    %426 = vector.load %arg27[%c2_246, %c0_247] : memref<26x32xbf16, #tpu.memory_space<vmem>>, vector<16x32xbf16>
    %cst_248 = arith.constant 0.000000e+00 : bf16
    %427 = vector.broadcast %cst_248 : bf16 to vector<16x32xbf16>
    %428 = vector.shape_cast %419 : vector<16x1xi1> to vector<16x1xi1>
    %429 = vector.broadcast %428 : vector<16x1xi1> to vector<16x32xi1>
    %430 = arith.select %429, %427, %426 : vector<16x32xi1>, vector<16x32xbf16>
    %c4_249 = arith.constant 4 : index
    %c0_250 = arith.constant 0 : index
    %431 = vector.load %arg27[%c4_249, %c0_250] : memref<26x32xbf16, #tpu.memory_space<vmem>>, vector<16x32xbf16>
    %cst_251 = arith.constant 0.000000e+00 : bf16
    %432 = vector.broadcast %cst_251 : bf16 to vector<16x32xbf16>
    %433 = vector.shape_cast %417 : vector<16x1xi1> to vector<16x1xi1>
    %434 = vector.broadcast %433 : vector<16x1xi1> to vector<16x32xi1>
    %435 = arith.select %434, %432, %431 : vector<16x32xi1>, vector<16x32xbf16>
    %c5_252 = arith.constant 5 : index
    %c0_253 = arith.constant 0 : index
    %436 = vector.load %arg27[%c5_252, %c0_253] : memref<26x32xbf16, #tpu.memory_space<vmem>>, vector<16x32xbf16>
    %c6_254 = arith.constant 6 : index
    %c0_255 = arith.constant 0 : index
    %437 = vector.load %arg27[%c6_254, %c0_255] : memref<26x32xbf16, #tpu.memory_space<vmem>>, vector<16x32xbf16>
    %cst_256 = arith.constant 0.000000e+00 : bf16
    %438 = vector.broadcast %cst_256 : bf16 to vector<16x32xbf16>
    %439 = vector.shape_cast %419 : vector<16x1xi1> to vector<16x1xi1>
    %440 = vector.broadcast %439 : vector<16x1xi1> to vector<16x32xi1>
    %441 = arith.select %440, %438, %437 : vector<16x32xi1>, vector<16x32xbf16>
    %c8_257 = arith.constant 8 : index
    %c0_258 = arith.constant 0 : index
    %442 = vector.load %arg27[%c8_257, %c0_258] : memref<26x32xbf16, #tpu.memory_space<vmem>>, vector<16x32xbf16>
    %cst_259 = arith.constant 0.000000e+00 : bf16
    %443 = vector.broadcast %cst_259 : bf16 to vector<16x32xbf16>
    %444 = vector.shape_cast %417 : vector<16x1xi1> to vector<16x1xi1>
    %445 = vector.broadcast %444 : vector<16x1xi1> to vector<16x32xi1>
    %446 = arith.select %445, %443, %442 : vector<16x32xi1>, vector<16x32xbf16>
    %c9_260 = arith.constant 9 : index
    %c0_261 = arith.constant 0 : index
    %447 = vector.load %arg27[%c9_260, %c0_261] : memref<26x32xbf16, #tpu.memory_space<vmem>>, vector<16x32xbf16>
    %c10_262 = arith.constant 10 : index
    %c0_263 = arith.constant 0 : index
    %448 = vector.load %arg27[%c10_262, %c0_263] : memref<26x32xbf16, #tpu.memory_space<vmem>>, vector<16x32xbf16>
    %cst_264 = arith.constant 0.000000e+00 : bf16
    %449 = vector.broadcast %cst_264 : bf16 to vector<16x32xbf16>
    %450 = vector.shape_cast %419 : vector<16x1xi1> to vector<16x1xi1>
    %451 = vector.broadcast %450 : vector<16x1xi1> to vector<16x32xi1>
    %452 = arith.select %451, %449, %448 : vector<16x32xi1>, vector<16x32xbf16>
    %453 = tpu.concatenate %424, %425, %430, %435, %436, %441, %446, %447, %452 in 1 : vector<16x32xbf16>, vector<16x32xbf16>, vector<16x32xbf16>, vector<16x32xbf16>, vector<16x32xbf16>, vector<16x32xbf16>, vector<16x32xbf16>, vector<16x32xbf16>, vector<16x32xbf16> -> vector<16x288xbf16>
    %c0_265 = arith.constant 0 : index
    %c0_266 = arith.constant 0 : index
    %454 = vector.load %arg21[%c0_265, %c0_266] : memref<288x256xbf16, #tpu.memory_space<vmem>>, vector<288x256xbf16>
    %cst_267 = arith.constant dense<0.000000e+00> : vector<16x256xf32>
    %455 = tpu.matmul %453, %454, %cst_267 {dimension_numbers = #tpu.dot_dimension_numbers<[1], [0], [0], [1], [0, 0, 1, 1], [], []>} : vector<16x288xbf16>, vector<288x256xbf16>, vector<16x256xf32> -> vector<16x256xf32>
    %c0_268 = arith.constant 0 : index
    %c0_269 = arith.constant 0 : index
    %456 = vector.load %arg22[%c0_268, %c0_269] : memref<1x256xf32, #tpu.memory_space<vmem>>, vector<1x256xf32>
    %457 = vector.broadcast %456 : vector<1x256xf32> to vector<16x256xf32>
    %458 = arith.addf %455, %457 : vector<16x256xf32>
    %cst_270 = arith.constant 0.000000e+00 : f32
    %459 = vector.broadcast %cst_270 : f32 to vector<16x256xf32>
    %460 = arith.maximumf %458, %459 : vector<16x256xf32>
    %c0_271 = arith.constant 0 : index
    %c0_272 = arith.constant 0 : index
    %461 = vector.load %arg6[%c0_271, %c0_272] : memref<4x16xbf16, #tpu.memory_space<vmem>>, vector<4x16xbf16>
    %462 = tpu.iota {dimensions = array<i32: 0>} : vector<16x1xi32>
    %c4_i32_273 = arith.constant 4 : i32
    %c0_i32_274 = arith.constant 0 : i32
    %463 = arith.cmpi eq, %c4_i32_273, %c0_i32_274 : i32
    %c1_i32_275 = arith.constant 1 : i32
    %464 = arith.select %463, %c1_i32_275, %c4_i32_273 : i32
    %465 = vector.broadcast %464 : i32 to vector<16x1xi32>
    %466 = arith.remsi %462, %465 : vector<16x1xi32>
    %c0_i32_276 = arith.constant 0 : i32
    %467 = vector.broadcast %c0_i32_276 : i32 to vector<16x1xi32>
    %468 = arith.cmpi ne, %466, %467 : vector<16x1xi32>
    %c0_i32_277 = arith.constant 0 : i32
    %469 = vector.broadcast %c0_i32_277 : i32 to vector<16x1xi32>
    %470 = arith.cmpi slt, %466, %469 : vector<16x1xi32>
    %c0_i32_278 = arith.constant 0 : i32
    %471 = arith.cmpi slt, %464, %c0_i32_278 : i32
    %472 = vector.broadcast %471 : i1 to vector<16x1xi1>
    %473 = vector.broadcast %472 : vector<16x1xi1> to vector<16x1xi1>
    %474 = arith.xori %470, %473 : vector<16x1xi1>
    %475 = arith.andi %474, %468 : vector<16x1xi1>
    %476 = vector.broadcast %464 : i32 to vector<16x1xi32>
    %477 = arith.addi %466, %476 : vector<16x1xi32>
    %478 = arith.select %475, %477, %466 : vector<16x1xi1>, vector<16x1xi32>
    %479 = arith.truncf %460 : vector<16x256xf32> to vector<16x256xbf16>
    %c0_279 = arith.constant 0 : index
    %c0_280 = arith.constant 0 : index
    %480 = vector.load %arg30[%c0_279, %c0_280] : memref<26x256xbf16, #tpu.memory_space<vmem>>, vector<16x256xbf16>
    tpu.vector_store %arg30[%c0_279, %c0_280], %479 {strides = array<i32>} : memref<26x256xbf16, #tpu.memory_space<vmem>>, vector<16x256xbf16>,
    %cst_281 = arith.constant 0.000000e+00 : bf16
    %481 = vector.broadcast %cst_281 : bf16 to vector<10x256xbf16>
    %c16_282 = arith.constant 16 : index
    %c0_283 = arith.constant 0 : index
    %482 = vector.load %arg30[%c16_282, %c0_283] : memref<26x256xbf16, #tpu.memory_space<vmem>>, vector<10x256xbf16>
    tpu.vector_store %arg30[%c16_282, %c0_283], %481 {strides = array<i32>} : memref<26x256xbf16, #tpu.memory_space<vmem>>, vector<10x256xbf16>,
    %c0_284 = arith.constant 0 : index
    %c0_285 = arith.constant 0 : index
    %483 = vector.load %arg30[%c0_284, %c0_285] : memref<26x256xbf16, #tpu.memory_space<vmem>>, vector<16x256xbf16>
    %c1_286 = arith.constant 1 : index
    %c0_287 = arith.constant 0 : index
    %484 = vector.load %arg30[%c1_286, %c0_287] : memref<26x256xbf16, #tpu.memory_space<vmem>>, vector<16x256xbf16>
    %c3_i32_288 = arith.constant 3 : i32
    %485 = vector.broadcast %c3_i32_288 : i32 to vector<16x1xi32>
    %486 = arith.cmpi sge, %478, %485 : vector<16x1xi32>
    %cst_289 = arith.constant 0.000000e+00 : bf16
    %487 = vector.broadcast %cst_289 : bf16 to vector<16x256xbf16>
    %488 = vector.shape_cast %486 : vector<16x1xi1> to vector<16x1xi1>
    %489 = vector.broadcast %488 : vector<16x1xi1> to vector<16x256xi1>
    %490 = arith.select %489, %487, %484 : vector<16x256xi1>, vector<16x256xbf16>
    %491 = arith.maximumf %483, %490 : vector<16x256xbf16>
    %c2_290 = arith.constant 2 : index
    %c0_291 = arith.constant 0 : index
    %492 = vector.load %arg30[%c2_290, %c0_291] : memref<26x256xbf16, #tpu.memory_space<vmem>>, vector<16x256xbf16>
    %c2_i32 = arith.constant 2 : i32
    %493 = vector.broadcast %c2_i32 : i32 to vector<16x1xi32>
    %494 = arith.cmpi sge, %478, %493 : vector<16x1xi32>
    %cst_292 = arith.constant 0.000000e+00 : bf16
    %495 = vector.broadcast %cst_292 : bf16 to vector<16x256xbf16>
    %496 = vector.shape_cast %494 : vector<16x1xi1> to vector<16x1xi1>
    %497 = vector.broadcast %496 : vector<16x1xi1> to vector<16x256xi1>
    %498 = arith.select %497, %495, %492 : vector<16x256xi1>, vector<16x256xbf16>
    %499 = arith.maximumf %491, %498 : vector<16x256xbf16>
    %c4_293 = arith.constant 4 : index
    %c0_294 = arith.constant 0 : index
    %500 = vector.load %arg30[%c4_293, %c0_294] : memref<26x256xbf16, #tpu.memory_space<vmem>>, vector<16x256xbf16>
    %501 = arith.maximumf %499, %500 : vector<16x256xbf16>
    %c5_295 = arith.constant 5 : index
    %c0_296 = arith.constant 0 : index
    %502 = vector.load %arg30[%c5_295, %c0_296] : memref<26x256xbf16, #tpu.memory_space<vmem>>, vector<16x256xbf16>
    %c3_i32_297 = arith.constant 3 : i32
    %503 = vector.broadcast %c3_i32_297 : i32 to vector<16x1xi32>
    %504 = arith.cmpi sge, %478, %503 : vector<16x1xi32>
    %cst_298 = arith.constant 0.000000e+00 : bf16
    %505 = vector.broadcast %cst_298 : bf16 to vector<16x256xbf16>
    %506 = vector.shape_cast %504 : vector<16x1xi1> to vector<16x1xi1>
    %507 = vector.broadcast %506 : vector<16x1xi1> to vector<16x256xi1>
    %508 = arith.select %507, %505, %502 : vector<16x256xi1>, vector<16x256xbf16>
    %509 = arith.maximumf %501, %508 : vector<16x256xbf16>
    %c6_299 = arith.constant 6 : index
    %c0_300 = arith.constant 0 : index
    %510 = vector.load %arg30[%c6_299, %c0_300] : memref<26x256xbf16, #tpu.memory_space<vmem>>, vector<16x256xbf16>
    %c2_i32_301 = arith.constant 2 : i32
    %511 = vector.broadcast %c2_i32_301 : i32 to vector<16x1xi32>
    %512 = arith.cmpi sge, %478, %511 : vector<16x1xi32>
    %cst_302 = arith.constant 0.000000e+00 : bf16
    %513 = vector.broadcast %cst_302 : bf16 to vector<16x256xbf16>
    %514 = vector.shape_cast %512 : vector<16x1xi1> to vector<16x1xi1>
    %515 = vector.broadcast %514 : vector<16x1xi1> to vector<16x256xi1>
    %516 = arith.select %515, %513, %510 : vector<16x256xi1>, vector<16x256xbf16>
    %517 = arith.maximumf %509, %516 : vector<16x256xbf16>
    %c8_303 = arith.constant 8 : index
    %c0_304 = arith.constant 0 : index
    %518 = vector.load %arg30[%c8_303, %c0_304] : memref<26x256xbf16, #tpu.memory_space<vmem>>, vector<16x256xbf16>
    %519 = arith.maximumf %517, %518 : vector<16x256xbf16>
    %c9_305 = arith.constant 9 : index
    %c0_306 = arith.constant 0 : index
    %520 = vector.load %arg30[%c9_305, %c0_306] : memref<26x256xbf16, #tpu.memory_space<vmem>>, vector<16x256xbf16>
    %c3_i32_307 = arith.constant 3 : i32
    %521 = vector.broadcast %c3_i32_307 : i32 to vector<16x1xi32>
    %522 = arith.cmpi sge, %478, %521 : vector<16x1xi32>
    %cst_308 = arith.constant 0.000000e+00 : bf16
    %523 = vector.broadcast %cst_308 : bf16 to vector<16x256xbf16>
    %524 = vector.shape_cast %522 : vector<16x1xi1> to vector<16x1xi1>
    %525 = vector.broadcast %524 : vector<16x1xi1> to vector<16x256xi1>
    %526 = arith.select %525, %523, %520 : vector<16x256xi1>, vector<16x256xbf16>
    %527 = arith.maximumf %519, %526 : vector<16x256xbf16>
    %c10_309 = arith.constant 10 : index
    %c0_310 = arith.constant 0 : index
    %528 = vector.load %arg30[%c10_309, %c0_310] : memref<26x256xbf16, #tpu.memory_space<vmem>>, vector<16x256xbf16>
    %c2_i32_311 = arith.constant 2 : i32
    %529 = vector.broadcast %c2_i32_311 : i32 to vector<16x1xi32>
    %530 = arith.cmpi sge, %478, %529 : vector<16x1xi32>
    %cst_312 = arith.constant 0.000000e+00 : bf16
    %531 = vector.broadcast %cst_312 : bf16 to vector<16x256xbf16>
    %532 = vector.shape_cast %530 : vector<16x1xi1> to vector<16x1xi1>
    %533 = vector.broadcast %532 : vector<16x1xi1> to vector<16x256xi1>
    %534 = arith.select %533, %531, %528 : vector<16x256xi1>, vector<16x256xbf16>
    %535 = arith.maximumf %527, %534 : vector<16x256xbf16>
    %cst_313 = arith.constant dense<0.000000e+00> : vector<4x256xf32>
    %536 = tpu.matmul %461, %535, %cst_313 {dimension_numbers = #tpu.dot_dimension_numbers<[1], [0], [0], [1], [0, 0, 1, 1], [], []>} : vector<4x16xbf16>, vector<16x256xbf16>, vector<4x256xf32> -> vector<4x256xf32>
    %537 = arith.truncf %536 : vector<4x256xf32> to vector<4x256xbf16>
    %c0_314 = arith.constant 0 : index
    %c0_315 = arith.constant 0 : index
    %538 = vector.load %arg23[%c0_314, %c0_315] : memref<256x128xbf16, #tpu.memory_space<vmem>>, vector<256x128xbf16>
    %cst_316 = arith.constant dense<0.000000e+00> : vector<4x128xf32>
    %539 = tpu.matmul %537, %538, %cst_316 {dimension_numbers = #tpu.dot_dimension_numbers<[1], [0], [0], [1], [0, 0, 1, 1], [], []>} : vector<4x256xbf16>, vector<256x128xbf16>, vector<4x128xf32> -> vector<4x128xf32>
    %c0_317 = arith.constant 0 : index
    %c0_318 = arith.constant 0 : index
    %540 = vector.load %arg24[%c0_317, %c0_318] : memref<1x128xf32, #tpu.memory_space<vmem>>, vector<1x128xf32>
    %541 = vector.broadcast %540 : vector<1x128xf32> to vector<4x128xf32>
    %542 = arith.addf %539, %541 : vector<4x128xf32>
    %cst_319 = arith.constant 0.000000e+00 : f32
    %543 = vector.broadcast %cst_319 : f32 to vector<4x128xf32>
    %544 = arith.maximumf %542, %543 : vector<4x128xf32>
    %cst_320 = arith.constant dense<0.000000e+00> : vector<128xf32>
    %545 = vector.multi_reduction <add>, %544, %cst_320 [0] : vector<4x128xf32> to vector<128xf32>
    %546 = vector.shape_cast %545 : vector<128xf32> to vector<1x128xf32>
    %cst_321 = arith.constant 4.000000e+00 : f32
    %547 = vector.broadcast %cst_321 : f32 to vector<1x128xf32>
    %548 = arith.divf %546, %547 : vector<1x128xf32>
    %c0_322 = arith.constant 0 : index
    %c0_323 = arith.constant 0 : index
    %c0_324 = arith.constant 0 : index
    %549 = vector.load %arg25[%c0_322, %c0_323, %c0_324] : memref<1x1x128xf32, #tpu.memory_space<vmem>>, vector<1x1x128xf32>
    %550 = vector.shape_cast %549 : vector<1x1x128xf32> to vector<1x128xf32>
    %551 = vector.shape_cast %548 : vector<1x128xf32> to vector<1x1x128xf32>
    tpu.vector_store %arg25[%c0_322, %c0_323, %c0_324], %551 {strides = array<i32>} : memref<1x1x128xf32, #tpu.memory_space<vmem>>, vector<1x1x128xf32>,
    return
  }
  func.func @transform_0(%arg0: i32) -> (i32, i32, i32) {
    %c0_i32 = arith.constant 0 : i32
    %c0_i32_0 = arith.constant 0 : i32
    %c0_i32_1 = arith.constant 0 : i32
    return %arg0, %c0_i32, %c0_i32_0 : i32, i32, i32
  }
  func.func @transform_1(%arg0: i32) -> (i32, i32) {
    %c0_i32 = arith.constant 0 : i32
    %c0_i32_0 = arith.constant 0 : i32
    %c0_i32_1 = arith.constant 0 : i32
    return %c0_i32, %c0_i32_0 : i32, i32
  }
  func.func @transform_2(%arg0: i32) -> (i32, i32) {
    %c0_i32 = arith.constant 0 : i32
    %c0_i32_0 = arith.constant 0 : i32
    %c0_i32_1 = arith.constant 0 : i32
    return %c0_i32, %c0_i32_0 : i32, i32
  }
  func.func @transform_3(%arg0: i32) -> (i32, i32) {
    %c0_i32 = arith.constant 0 : i32
    %c0_i32_0 = arith.constant 0 : i32
    %c0_i32_1 = arith.constant 0 : i32
    return %c0_i32, %c0_i32_0 : i32, i32
  }
  func.func @transform_4(%arg0: i32) -> (i32, i32) {
    %c0_i32 = arith.constant 0 : i32
    %c0_i32_0 = arith.constant 0 : i32
    %c0_i32_1 = arith.constant 0 : i32
    return %c0_i32, %c0_i32_0 : i32, i32
  }
  func.func @transform_5(%arg0: i32) -> (i32, i32) {
    %c0_i32 = arith.constant 0 : i32
    %c0_i32_0 = arith.constant 0 : i32
    %c0_i32_1 = arith.constant 0 : i32
    return %c0_i32, %c0_i32_0 : i32, i32
  }
  func.func @transform_6(%arg0: i32) -> (i32, i32) {
    %c0_i32 = arith.constant 0 : i32
    %c0_i32_0 = arith.constant 0 : i32
    %c0_i32_1 = arith.constant 0 : i32
    return %c0_i32, %c0_i32_0 : i32, i32
  }
  func.func @transform_7(%arg0: i32) -> (i32, i32) {
    %c0_i32 = arith.constant 0 : i32
    %c0_i32_0 = arith.constant 0 : i32
    %c0_i32_1 = arith.constant 0 : i32
    return %c0_i32, %c0_i32_0 : i32, i32
  }
  func.func @transform_8(%arg0: i32) -> (i32, i32) {
    %c0_i32 = arith.constant 0 : i32
    %c0_i32_0 = arith.constant 0 : i32
    %c0_i32_1 = arith.constant 0 : i32
    return %c0_i32, %c0_i32_0 : i32, i32
  }
  func.func @transform_9(%arg0: i32) -> (i32, i32) {
    %c0_i32 = arith.constant 0 : i32
    %c0_i32_0 = arith.constant 0 : i32
    %c0_i32_1 = arith.constant 0 : i32
    return %c0_i32, %c0_i32_0 : i32, i32
  }
  func.func @transform_10(%arg0: i32) -> (i32, i32) {
    %c0_i32 = arith.constant 0 : i32
    %c0_i32_0 = arith.constant 0 : i32
    %c0_i32_1 = arith.constant 0 : i32
    return %c0_i32, %c0_i32_0 : i32, i32
  }
  func.func @transform_11(%arg0: i32) -> (i32, i32) {
    %c0_i32 = arith.constant 0 : i32
    %c0_i32_0 = arith.constant 0 : i32
    %c0_i32_1 = arith.constant 0 : i32
    return %c0_i32, %c0_i32_0 : i32, i32
  }
  func.func @transform_12(%arg0: i32) -> (i32, i32) {
    %c0_i32 = arith.constant 0 : i32
    %c0_i32_0 = arith.constant 0 : i32
    %c0_i32_1 = arith.constant 0 : i32
    return %c0_i32, %c0_i32_0 : i32, i32
  }
  func.func @transform_13(%arg0: i32) -> (i32, i32) {
    %c0_i32 = arith.constant 0 : i32
    %c0_i32_0 = arith.constant 0 : i32
    %c0_i32_1 = arith.constant 0 : i32
    return %c0_i32, %c0_i32_0 : i32, i32
  }
  func.func @transform_14(%arg0: i32) -> (i32, i32) {
    %c0_i32 = arith.constant 0 : i32
    %c0_i32_0 = arith.constant 0 : i32
    %c0_i32_1 = arith.constant 0 : i32
    return %c0_i32, %c0_i32_0 : i32, i32
  }
  func.func @transform_15(%arg0: i32) -> (i32, i32) {
    %c0_i32 = arith.constant 0 : i32
    %c0_i32_0 = arith.constant 0 : i32
    %c0_i32_1 = arith.constant 0 : i32
    return %c0_i32, %c0_i32_0 : i32, i32
  }
  func.func @transform_16(%arg0: i32) -> (i32, i32) {
    %c0_i32 = arith.constant 0 : i32
    %c0_i32_0 = arith.constant 0 : i32
    %c0_i32_1 = arith.constant 0 : i32
    return %c0_i32, %c0_i32_0 : i32, i32
  }
  func.func @transform_17(%arg0: i32) -> (i32, i32) {
    %c0_i32 = arith.constant 0 : i32
    %c0_i32_0 = arith.constant 0 : i32
    %c0_i32_1 = arith.constant 0 : i32
    return %c0_i32, %c0_i32_0 : i32, i32
  }
  func.func @transform_18(%arg0: i32) -> (i32, i32) {
    %c0_i32 = arith.constant 0 : i32
    %c0_i32_0 = arith.constant 0 : i32
    %c0_i32_1 = arith.constant 0 : i32
    return %c0_i32, %c0_i32_0 : i32, i32
  }
  func.func @transform_19(%arg0: i32) -> (i32, i32) {
    %c0_i32 = arith.constant 0 : i32
    %c0_i32_0 = arith.constant 0 : i32
    %c0_i32_1 = arith.constant 0 : i32
    return %c0_i32, %c0_i32_0 : i32, i32
  }
  func.func @transform_20(%arg0: i32) -> (i32, i32) {
    %c0_i32 = arith.constant 0 : i32
    %c0_i32_0 = arith.constant 0 : i32
    %c0_i32_1 = arith.constant 0 : i32
    return %c0_i32, %c0_i32_0 : i32, i32
  }
  func.func @transform_21(%arg0: i32) -> (i32, i32) {
    %c0_i32 = arith.constant 0 : i32
    %c0_i32_0 = arith.constant 0 : i32
    %c0_i32_1 = arith.constant 0 : i32
    return %c0_i32, %c0_i32_0 : i32, i32
  }
  func.func @transform_22(%arg0: i32) -> (i32, i32) {
    %c0_i32 = arith.constant 0 : i32
    %c0_i32_0 = arith.constant 0 : i32
    %c0_i32_1 = arith.constant 0 : i32
    return %c0_i32, %c0_i32_0 : i32, i32
  }
  func.func @transform_23(%arg0: i32) -> (i32, i32) {
    %c0_i32 = arith.constant 0 : i32
    %c0_i32_0 = arith.constant 0 : i32
    %c0_i32_1 = arith.constant 0 : i32
    return %c0_i32, %c0_i32_0 : i32, i32
  }
  func.func @transform_24(%arg0: i32) -> (i32, i32, i32) {
    %c0_i32 = arith.constant 0 : i32
    %c0_i32_0 = arith.constant 0 : i32
    %c0_i32_1 = arith.constant 0 : i32
    return %arg0, %c0_i32, %c0_i32_0 : i32, i32, i32
  }
}

</mosaic_0001>

<bundles_post_ra>
// kernel: modified_squeezenet_forward.1
= control target key start
LH: loop header
LB: loop body
LE: loop exit
PB: predicated region body
PF: predicated region fallthrough
CT: control target
= control target key end

     0   :  { %s17310_s0 = inlined_call_operand.vmem [shape: bf16[2,256,32], index: 0, kind: input, shape index: {}]   ;;  %s17311_s1 = inlined_call_operand.vmem [shape: bf16[32,64], index: 1, kind: input, shape index: {}]   ;;  %s17312_s2 = inlined_call_operand.vmem [shape: f32[1,64], index: 2, kind: input, shape index: {}]   ;;  %s17313_s3 = inlined_call_operand.vmem [shape: bf16[64,256], index: 3, kind: input, shape index: {}]   ;;  %s17314_s4 = inlined_call_operand.vmem [shape: bf16[16,64], index: 4, kind: input, shape index: {}]   ;;  %s17315_s5 = inlined_call_operand.vmem [shape: bf16[4,16], index: 5, kind: input, shape index: {}]   ;;  %s17316_s6 = inlined_call_operand.vmem [shape: bf16[64,16], index: 6, kind: input, shape index: {}]   ;;  %s17317_s7 = inlined_call_operand.vmem [shape: f32[1,16], index: 7, kind: input, shape index: {}]   ;;  %s17318_s8 = inlined_call_operand.vmem [shape: bf16[144,128], index: 8, kind: input, shape index: {}]   ;;  %s17319_s9 = inlined_call_operand.vmem [shape: f32[1,128], index: 9, kind: input, shape index: {}]   ;;  %s17320_s10 = inlined_call_operand.vmem [shape: bf16[128,16], index: 10, kind: input, shape index: {}]   ;;  %s17321_s11 = inlined_call_operand.vmem [shape: f32[1,16], index: 11, kind: input, shape index: {}]   ;;  %s17322_s12 = inlined_call_operand.vmem [shape: bf16[144,128], index: 12, kind: input, shape index: {}]   ;;  %s17323_s13 = inlined_call_operand.vmem [shape: f32[1,128], index: 13, kind: input, shape index: {}]   ;;  %s17324_s14 = inlined_call_operand.vmem [shape: bf16[128,32], index: 14, kind: input, shape index: {}]   ;;  %s17325_s15 = inlined_call_operand.vmem [shape: f32[1,32], index: 15, kind: input, shape index: {}]   ;;  %s17326_s16 = inlined_call_operand.vmem [shape: bf16[288,256], index: 16, kind: input, shape index: {}]   ;;  %s17327_s17 = inlined_call_operand.vmem [shape: f32[1,256], index: 17, kind: input, shape index: {}]   ;;  %s17328_s18 = inlined_call_operand.vmem [shape: bf16[256,32], index: 18, kind: input, shape index: {}]   ;;  %s17329_s19 = inlined_call_operand.vmem [shape: f32[1,32], index: 19, kind: input, shape index: {}]   ;;  %s17330_s20 = inlined_call_operand.vmem [shape: bf16[288,256], index: 20, kind: input, shape index: {}]   ;;  %s17331_s21 = inlined_call_operand.vmem [shape: f32[1,256], index: 21, kind: input, shape index: {}]   ;;  %s17332_s22 = inlined_call_operand.vmem [shape: bf16[256,128], index: 22, kind: input, shape index: {}]   ;;  %s17333_s23 = inlined_call_operand.vmem [shape: f32[1,128], index: 23, kind: input, shape index: {}]   ;;  %s17334_s24 = inlined_call_operand.hbm [shape: f32[2,1,128], index: 24, kind: output, shape index: {}]  }
   0x1   :  { %17551 = sst [smem:[#allocation38_spill]] %s17310_s0 }
   0x2   :  { %17552 = sst [smem:[#allocation39_spill]] %s17311_s1 }
   0x3   :  { %17553 = sst [smem:[#allocation40_spill]] %s17312_s2 }
   0x4   :  { %17554 = sst [smem:[#allocation41_spill]] %s17313_s3 }
   0x5   :  { %17555 = sst [smem:[#allocation42_spill]] %s17314_s4 }
   0x6   :  { %17556 = sst [smem:[#allocation43_spill]] %s17315_s5 }
   0x7   :  { %17557 = sst [smem:[#allocation44_spill]] %s17316_s6 }
   0x8   :  { %17558 = sst [smem:[#allocation45_spill]] %s17317_s7 }
   0x9   :  { %17559 = sst [smem:[#allocation46_spill]] %s17318_s8 }
   0xa   :  { %17560 = sst [smem:[#allocation47_spill]] %s17319_s9 }
   0xb   :  { %17561 = sst [smem:[#allocation48_spill]] %s17320_s10 }
   0xc   :  { %17562 = sst [smem:[#allocation49_spill]] %s17321_s11 }
   0xd   :  { %17563 = sst [smem:[#allocation50_spill]] %s17322_s12 }
   0xe   :  { %29 = vsyncpa [#allocation8], 0 }
   0xf   :  { %31 = vsyncpa [#allocation8 + $0x1], 0  ;;  %s10899_s5 = smov 0   ;;  %s10901_s26 = smov 0  }
  0x10   :  { %s10903_s27 = smov 0   ;;  %s10905_s28 = smov 0  }
  0x11 LB: > { %17564 = sst [smem:[#allocation10_spill]] %s10750_s5  ;;  %s10920_s6 = sadd.s32 4294967295, %s10762_s28   ;;  %s10762_s28 = sphi %s10905_s28, %s18616_s28   ;;  %s10758_s27 = sphi %s10903_s27, %s18618_s27   ;;  %s10754_s26 = sphi %s10901_s26, %s18620_s26   ;;  %s10750_s5 = sphi %s10899_s5, %s18619_s5  }
  0x12   : > { %17565 = sst [smem:[#allocation11_spill]] %s10758_s27  ;;  %s9713_s2 = sadd.s32 4294967294, %s10762_s28  }
  0x13   : > { %17566 = sst [smem:[#allocation12_spill]] %s10762_s28  ;;  %s10924_s29 = sadd.s32 1, %s10762_s28  }
  0x14   : > { %17567 = sst [smem:[#allocation13_spill]] %s10924_s29  ;;  %s553_s0 = sadd.s32 1, %s10758_s27 }
  0x15   : > { %s550_s7 = ssub.s32 %s10762_s28, %s10924_s29  ;;  %p563_p0 = scmp.ne.s32.totalorder %s10758_s27, %s10754_s26 }
  0x16   : > { %p551_p1 = scmp.eq.s32.totalorder %s550_s7, 0  ;;  %p564_p2 = scmp.eq.s32.totalorder %s10920_s6, 1 }
  0x17   : > { %p569_p3 = scmp.ne.s32.totalorder %s10754_s26, %s10750_s5  ;;  %p570_p4 = scmp.eq.s32.totalorder %s9713_s2, 1 }
  0x18   : > { %s10935_s30 = scalar_select %p551_p1, %s10758_s27, %s553_s0  }
  0x19   : > { %p10937_p5 = por %p564_p2, %p563_p0  ;;  %p10941_p6 = por %p570_p4, %p569_p3 }
  0x1a   : > { %17568 = sst [smem:[#allocation14_spill]] %s10935_s30  ;;  %p9716_p7 = scmp.ge.s32.totalorder %s10762_s28, 1 }
  0x1b   : > { %s17570_s25 = scalar_select %p10941_p6, 1, 0 }
  0x1c   : > { %p665_p8 = scmp.lt.s32.totalorder %s10762_s28, 3 }
  0x1d   : > { %17571 = sst [smem:[#allocation15_spill]] %s17570_s25 }
  0x1e   : > { %p666_p9 = pnand %p9716_p7, %p665_p8 }
  0x20   : > { %669 = sbr.rel (%p666_p9) target bundleno = 3346 (0xd12), region = 116 }
  0x25   : > { %s17572_s1 = sld [smem:[#allocation39_spill]]  ;;  %p730_p10 = scmp.lt.s32.totalorder %s10920_s6, 1  ;;  %vm17346_vm0 = vcmask 261120   ;;  %v17356_v9 = vmov 0   ;;  %vm17347_vm1 = vcmask 519168   ;;  %v1048_v35 = vlaneseq }
  0x26   : > { %s17573_s25 = sld [smem:[#allocation38_spill]]  ;;  %6723 = vst [vmem:[#allocation5 + $0x20] sm:$0xf] %v17356_v9  ;;  %vm10765_vm4 = vmmov 0   ;;  %vm17345_vm14 = vsmask.f32 256 }
  0x27   : > { %s731_s7 = scalar_select %p730_p10, %s10920_s6, 1  ;;  %6724 = vst [vmem:[#allocation5 + $0x24] sm:$0xf] %v17356_v9  ;;  %v11011_v38 = vshrl.u32 %v1048_v35, 7  ;;  %vm1665_vm5 = vmpackc.low %vm10765_vm4, %vm10765_vm4  ;;  %vm1730_vm15 = vsmask.f32 4368 }
  0x28   : > { %1530 = vst.msk [vmem:[#allocation4 + $0x80] sm:$0xf] %vm17347_vm1, %v17356_v9  ;;  %v1697_v57 = vsel %vm1665_vm5, 65537, %v17356_v9  ;;  %vm2705_vm4 = vcmask 1044484   ;;  %vm11091_vm5 = vmor %vm17345_vm14, %vm1730_vm15  ;;  %s18165_s8 = sld [smem:[#allocation44_spill]]  ;;  %s17505_s4 = smov 32  }
  0x29   : > { %s10432_s30 = sshll.u32 %s731_s7, 7  ;;  %1531 = vst.msk [vmem:[#allocation4 + $0x84] sm:$0xf] %vm17347_vm1, %v17356_v9  ;;  %v11014_v40 = vadd.s32 56, %v11011_v38  ;;  %v1058_v42 = vadd.s32 72, %v11011_v38  ;;  %v1060_v52 = vadd.s32 88, %v11011_v38 }
  0x2a   : > { %1532 = vst.msk [vmem:[#allocation4 + $0x88] sm:$0xf] %vm17347_vm1, %v17356_v9  ;;  %s18135_s7 = sld [smem:[#allocation41_spill]]  ;;  %s17501_s28 = smov 80  }
  0x2b   : > { %v10450_v0 = vld [vmem:[%s17572_s1 + $0x8] sm:$0xff]  ;;  %v10449_v1 = vld [vmem:[%s17572_s1] sm:$0xff]  ;;  %1533 = vst.msk [vmem:[#allocation4 + $0x8c] sm:$0xf] %vm17347_vm1, %v17356_v9  ;;  %v1134_v45 = vand.u32 15, %v11014_v40  ;;  %v1148_v47 = vand.u32 15, %v1058_v42 }
  0x2c   : > { %925 = vmatpush.bf16.msra.mxu0 %v10450_v0  ;;  %s10958_s5 = scalar_lea.vmem %s17573_s25, %s10432_s30  ;;  %6725 = vst [vmem:[#allocation5 + $0x28] sm:$0x1] %v17356_v9  ;;  %s17574_s30 = sld [smem:[#allocation40_spill]]  ;;  %v1162_v54 = vand.u32 15, %v1060_v52  ;;  %v1733_v0 = vshrl.u32 %v1697_v57, 16 }
  0x2d   : > { %v10433_v2 = vld [vmem:[%s10958_s5] sm:$0xff]  ;;  %v10434_v3 = vld [vmem:[%s10958_s5 + $0x8] sm:$0xff]  ;;  %v10435_v4 = vld [vmem:[%s10958_s5 + $0x10] sm:$0xff]  ;;  %9003 = vst [vmem:[#allocation6 + $0x18] sm:$0xff] %v17356_v9  ;;  %vm11022_vm2 = vcmp.ge.s32.totalorder %v1134_v45, 15  ;;  %vm11026_vm3 = vcmp.ge.s32.totalorder %v1148_v47, 15 }
  0x2e   : > { %v10436_v5 = vld [vmem:[%s10958_s5 + $0x18] sm:$0xff]  ;;  %v10437_v6 = vld [vmem:[%s10958_s5 + $0x20] sm:$0xff]  ;;  %v10438_v7 = vld [vmem:[%s10958_s5 + $0x28] sm:$0xff]  ;;  %9004 = vst [vmem:[#allocation6 + $0x8] sm:$0x11] %v17356_v9  ;;  %vm11039_vm8 = vcmp.ge.s32.totalorder %v1134_v45, 14 }
  0x2f   : > { %v10439_v8 = vld [vmem:[%s10958_s5 + $0x30] sm:$0xff]  ;;  %v10440_v10 = vld [vmem:[%s10958_s5 + $0x38] sm:$0xff]  ;;  %v10441_v12 = vld [vmem:[%s10958_s5 + $0x40] sm:$0xff]  ;;  %17575 = vst [vmem:[#allocation16_spill] sm:$0xff] %v11011_v38  ;;  %vm11044_vm9 = vcmp.ge.s32.totalorder %v1148_v47, 14  ;;  %vm11048_vm10 = vcmp.ge.s32.totalorder %v1162_v54, 15 }
  0x30   : > { %926 = vmatpush.bf16.msra.mxu0 %v10449_v1  ;;  %v10442_v21 = vld [vmem:[%s10958_s5 + $0x48] sm:$0xff]  ;;  %v10443_v30 = vld [vmem:[%s10958_s5 + $0x50] sm:$0xff]  ;;  %17576 = vst [vmem:[#allocation17_spill] sm:$0xff] %v11014_v40  ;;  %v10444_v43 = vld [vmem:[%s10958_s5 + $0x58] sm:$0xff]  ;;  %s17517_s25 = smov 96   ;;  %s18193_s27 = sld [smem:[#allocation46_spill]] }
  0x31   : > { %vm1672_vm6 = vmpackc.low %vm11022_vm2, %vm11022_vm2  ;;  %vm2704_vm2 = vcmask 1040384   ;;  %s17503_s1 = smov 16   ;;  %s17515_s2 = smov 112  }
  0x32   : > { %v10992_v11 = vld [vmem:[%s17574_s30] ss:$0 sm:$0xff]  ;;  %vm1674_vm7 = vmpackc.low %vm11026_vm3, %vm11026_vm3  ;;  %v11054_v62 = vsel %vm1672_vm6, 65537, %v17356_v9  ;;  %vm11081_vm3 = vcmp.ge.s32.totalorder %v1162_v54, 14  ;;  %s18241_s0 = smov 48   ;;  %s18252_s10 = sld [smem:[#allocation48_spill]] }
  0x33   : > { %9791 = vmatmul.msk.bf16.vlgmr.msra.gmra.mxu0 %vm17346_vm0, %v10433_v2  ;;  %v1706_v61 = vsel %vm1674_vm7, 65537, %v17356_v9  ;;  %vm2647_vm11 = vmpackc.low %vm11039_vm8, %vm11039_vm8  ;;  %v1795_v2 = vshrl.u32 %v11054_v62, 16  ;;  %s18256_s9 = sld [smem:[#allocation47_spill]] }
  0x34   : > { %vm2649_vm12 = vmpackc.low %vm11044_vm9, %vm11044_vm9  ;;  %v1813_v1 = vshrl.u32 %v1706_v61, 16  ;;  %s18257_s11 = sld [smem:[#allocation49_spill]] }
  0x35   : > { %vm1676_vm13 = vmpackc.low %vm11048_vm10, %vm11048_vm10  ;;  %s18274_s12 = sld [smem:[#allocation50_spill]] }
  0x36   : > { %vm2651_vm6 = vmpackc.low %vm11081_vm3, %vm11081_vm3  ;;  %s18194_s29 = smov %s18193_s27 }
  0x37   : > { %vm11112_vm7 = vmor %vm2704_vm2, %vm2705_vm4  ;;  %v2683_v45 = vsel %vm2651_vm6, 65537, %v17356_v9 }
  0x43   : > { %9792 = vmatmul.msk.bf16.gmra.mxu0 %vm17346_vm0, %v10434_v3  ;;  %v10445_v3 = vld [vmem:[%s10958_s5 + $0x60] sm:$0xff] }
  0x53   : > { %9793 = vmatmul.msk.bf16.gmra.mxu0 %vm17346_vm0, %v10435_v4 }
  0x63   : > { %9794 = vmatmul.msk.bf16.gmra.mxu0 %vm17346_vm0, %v10436_v5  ;;  %v11069_v5 = vsel %vm2649_vm12, 65537, %v17356_v9 }
  0x73   : > { %9795 = vmatmul.msk.bf16.gmra.mxu0 %vm17346_vm0, %v10437_v6  ;;  %v11072_v6 = vsel %vm2647_vm11, 65537, %v17356_v9 }
  0x74   : > { %17587 = vst [vmem:[#allocation18_spill] sm:$0xff] %v11072_v6 }
  0x83   : > { %9796 = vmatmul.msk.bf16.gmra.mxu0 %vm17346_vm0, %v10438_v7 }
  0x93   : > { %9797 = vmatmul.msk.bf16.gmra.mxu0 %vm17346_vm0, %v10439_v8  ;;  %v1735_v8 = vrot.slane %v1733_v0, 7  ;;  %v10446_v0 = vld [vmem:[%s10958_s5 + $0x68] sm:$0xff] }
  0xa3   : > { %9798 = vmatmul.msk.bf16.gmra.mxu0 %vm17346_vm0, %v10440_v10  ;;  %v1736_v10 = vshll.u32 %v1697_v57, 16 }
  0xb0   : > { %v928_v13 = vpop.f32.mrf.mxu0 }
  0xb1   : > { %v929_v14 = vadd.f32 %v10992_v11, %v928_v13  ;;  %v1815_v13 = vrot.slane %v1813_v1, 7 }
  0xb3   : > { %v1008_v15 = vmax.f32 %v929_v14, 0.0  ;;  %9799 = vmatmul.msk.bf16.gmra.mxu0 %vm17346_vm0, %v10441_v12  ;;  %v1708_v12 = vsel %vm1676_vm13, 65537, %v17356_v9  ;;  %v11076_v14 = vrot.slane %v1795_v2, 7 }
  0xb5   : > { %v1465_v16 = vpack.c.bf16 %v1008_v15, %v1008_v15 }
  0xb7   : > { %1498 = vst.msk [vmem:[#allocation4] sm:$0xf] %vm17347_vm1, %v1465_v16  ;;  %v2733_v16 = vrot.slane %v11069_v5, 7 }
  0xb8   : > { %v930_v17 = vpop.f32.mrf.mxu0 }
  0xb9   : > { %v931_v18 = vadd.f32 %v10992_v11, %v930_v17  ;;  %v17355_v17 = vrot.slane %v11072_v6, 7 }
  0xbb   : > { %v1009_v19 = vmax.f32 %v931_v18, 0.0  ;;  %v1831_v18 = vshrl.u32 %v1708_v12, 16 }
  0xbd   : > { %v1466_v20 = vpack.c.bf16 %v1009_v19, %v1009_v19  ;;  %v1833_v35 = vrot.slane %v1831_v18, 7 }
  0xbf   : > { %1499 = vst.msk [vmem:[#allocation4 + $0x4] sm:$0xf] %vm17347_vm1, %v1466_v20  ;;  %v1820_v20 = vrot.slane %v1815_v13, 4 }
  0xc0   : > { %v933_v22 = vpop.f32.mrf.mxu0 }
  0xc1   : > { %v934_v23 = vadd.f32 %v10992_v11, %v933_v22 }
  0xc3   : > { %v1010_v24 = vmax.f32 %v934_v23, 0.0  ;;  %9800 = vmatmul.msk.bf16.gmra.mxu0 %vm17346_vm0, %v10442_v21  ;;  %v1802_v21 = vrot.slane %v11076_v14, 4  ;;  %v1062_v23 = vadd.s32 104, %v11011_v38 }
  0xc5   : > { %v1467_v25 = vpack.c.bf16 %v1010_v24, %v1010_v24  ;;  %v2735_v24 = vrot.slane %v2733_v16, 4 }
  0xc7   : > { %1500 = vst.msk [vmem:[#allocation4 + $0x8] sm:$0xf] %vm17347_vm1, %v1467_v25  ;;  %v17590_v25 = vmov 0 }
  0xc8   : > { %v935_v26 = vpop.f32.mrf.mxu0  ;;  %v17591_v25 = vsel %vm11091_vm5, 4294967295, %v17590_v25 }
  0xc9   : > { %v936_v27 = vadd.f32 %v10992_v11, %v935_v26  ;;  %v11095_v26 = vor.u32 %v1736_v10, %v1735_v8 }
  0xcb   : > { %v1011_v28 = vmax.f32 %v936_v27, 0.0  ;;  %v2729_v27 = vrot.slane %v17355_v17, 4 }
  0xcd   : > { %v1468_v29 = vpack.c.bf16 %v1011_v28, %v1011_v28  ;;  %v1176_v28 = vand.u32 15, %v1062_v23 }
  0xcf   : > { %1501 = vst.msk [vmem:[#allocation4 + $0xc] sm:$0xf] %vm17347_vm1, %v1468_v29  ;;  %v11101_v29 = vunpack.c.l.b16 %v17356_v9  ;;  %vm1582_vm8 = vcmp.ge.s32.totalorder %v1176_v28, 15  ;;  %vm11136_vm10 = vcmp.ge.s32.totalorder %v1176_v28, 14 }
  0xd0   : > { %v938_v31 = vpop.f32.mrf.mxu0  ;;  %vm1678_vm9 = vmpackc.low %vm1582_vm8, %vm1582_vm8 }
  0xd1   : > { %v939_v32 = vadd.f32 %v10992_v11, %v938_v31  ;;  %17592 = vst [vmem:[#allocation19_spill] sm:$0xff] %v11101_v29  ;;  %v1816_v31 = vshll.u32 %v1706_v61, 16  ;;  %vm2653_vm11 = vmpackc.low %vm11136_vm10, %vm11136_vm10 }
  0xd2   : > { %v2685_v5 = vsel %vm2653_vm11, 65537, %v17356_v9 }
  0xd3   : > { %v1012_v33 = vmax.f32 %v939_v32, 0.0  ;;  %9801 = vmatmul.msk.bf16.gmra.mxu0 %vm17346_vm0, %v10443_v30  ;;  %v11103_v30 = vrot.slane %v1697_v57, 7  ;;  %v1818_v49 = vor.u32 %v1816_v31, %v1815_v13 }
  0xd5   : > { %v1469_v34 = vpack.c.bf16 %v1012_v33, %v1012_v33  ;;  %17593 = vst [vmem:[#allocation20_spill] sm:$0xff] %v11103_v30  ;;  %v11109_v33 = vunpack.c.h.b16 %v17356_v9  ;;  %v2737_v42 = vsel %vm11112_vm7, %v2735_v24, %v11103_v30 }
  0xd6   : > { %v2872_v54 = vunpack.c.l.b16 %v2737_v42  ;;  %v2873_v58 = vunpack.c.h.b16 %v2737_v42 }
  0xd7   : > { %1502 = vst.msk [vmem:[#allocation4 + $0x10] sm:$0xf] %vm17347_vm1, %v1469_v34  ;;  %v17595_v34 = vmov 0 }
  0xd8   : > { %v940_v36 = vpop.f32.mrf.mxu0  ;;  %17594 = vst [vmem:[#allocation21_spill] sm:$0xff] %v11109_v33  ;;  %v17596_v34 = vsel %vm11112_vm7, 4294967295, %v17595_v34  ;;  %vm11173_vm2 = vcmp.ne.s32.totalorder %v2872_v54, %v11101_v29  ;;  %vm11178_vm3 = vcmp.ne.s32.totalorder %v2873_v58, %v11109_v33 }
  0xd9   : > { %v941_v37 = vadd.f32 %v10992_v11, %v940_v36  ;;  %17597 = vst [vmem:[#allocation22_spill] sm:$0xff] %v17596_v34  ;;  %v1828_v36 = vsel %vm11091_vm5, %v1820_v20, %v11095_v26  ;;  %v17666_v20 = vmov 0 }
  0xda   : > { %v2089_v52 = vunpack.c.l.b16 %v1828_v36 }
  0xdb   : > { %v1013_v39 = vmax.f32 %v941_v37, 0.0  ;;  %v1810_v37 = vsel %vm11091_vm5, %v1802_v21, %v11095_v26 }
  0xdc   : > { %v2076_v60 = vunpack.c.h.b16 %v1810_v37  ;;  %vm11154_vm12 = vcmp.ne.s32.totalorder %v2089_v52, %v11101_v29  ;;  %v17619_v52 = vmov 0 }
  0xdd   : > { %v1470_v41 = vpack.c.bf16 %v1013_v39, %v1013_v39 }
  0xde   : > { %vm11188_vm4 = vcmp.ne.s32.totalorder %v2076_v60, %v11109_v33 }
  0xdf   : > { %1503 = vst.msk [vmem:[#allocation4 + $0x14] sm:$0xf] %vm17347_vm1, %v1470_v41  ;;  %v1834_v41 = vshll.u32 %v1708_v12, 16 }
  0xe0   : > { %v943_v44 = vpop.f32.mrf.mxu0 }
  0xe1   : > { %v944_v46 = vadd.f32 %v10992_v11, %v943_v44  ;;  %v11129_v44 = vrot.slane %v11103_v30, 4  ;;  %v1836_v57 = vor.u32 %v1834_v41, %v1833_v35 }
  0xe3   : > { %v1014_v48 = vmax.f32 %v944_v46, 0.0  ;;  %9802 = vmatmul.msk.bf16.gmra.mxu0 %vm17346_vm0, %v10444_v43  ;;  %v11126_v43 = vrot.slane %v1735_v8, 4  ;;  %17598 = vst [vmem:[#allocation23_spill] sm:$0xff] %v11129_v44  ;;  %v2731_v46 = vsel %vm11112_vm7, %v2729_v27, %v11103_v30  ;;  %v1838_v8 = vrot.slane %v1833_v35, 4 }
  0xe4   : > { %v2858_v61 = vunpack.c.l.b16 %v2731_v46 }
  0xe5   : > { %v1471_v50 = vpack.c.bf16 %v1014_v48, %v1014_v48  ;;  %v1710_v48 = vsel %vm1678_vm9, 65537, %v17356_v9  ;;  %v1837_v19 = vsel %vm11091_vm5, %v11126_v43, %v1836_v57 }
  0xe6   : > { %v1849_v51 = vshrl.u32 %v1710_v48, 16  ;;  %v1852_v2 = vshll.u32 %v1710_v48, 16  ;;  %vm11207_vm6 = vcmp.ne.s32.totalorder %v2858_v61, %v11101_v29  ;;  %v2097_v41 = vunpack.c.h.b16 %v1837_v19 }
  0xe7   : > { %1504 = vst.msk [vmem:[#allocation4 + $0x18] sm:$0xf] %vm17347_vm1, %v1471_v50  ;;  %v2075_v50 = vunpack.c.l.b16 %v1810_v37  ;;  %v11219_v37 = vsel %vm11091_vm5, %v1838_v8, %v11095_v26  ;;  %v17630_v8 = vmov 0 }
  0xe8   : > { %v945_v53 = vpop.f32.mrf.mxu0  ;;  %v11145_v1 = vrot.slane %v1849_v51, 7  ;;  %v2103_v57 = vunpack.c.l.b16 %v11219_v37  ;;  %v2104_v58 = vunpack.c.h.b16 %v11219_v37  ;;  %v17636_v37 = vmov 0 }
  0xe9   : > { %v946_v55 = vadd.f32 %v10992_v11, %v945_v53  ;;  %v2090_v53 = vunpack.c.h.b16 %v1828_v36  ;;  %vm11164_vm15 = vcmp.ne.s32.totalorder %v2075_v50, %v11101_v29 }
  0xea   : > { %vm11234_vm9 = vmpackc.low %vm11188_vm4, %vm11164_vm15  ;;  %vm11266_vm4 = vcmp.ne.s32.totalorder %v2097_v41, %v11109_v33 }
  0xeb   : > { %v1015_v59 = vmax.f32 %v946_v55, 0.0  ;;  %vm11159_vm13 = vcmp.ne.s32.totalorder %v2090_v53, %v11109_v33  ;;  %v17620_v52 = vsel %vm11234_vm9, 4294967295, %v17619_v52 }
  0xed   : > { %v1472_v63 = vpack.c.bf16 %v1015_v59, %v1015_v59  ;;  %v2739_v59 = vrot.slane %v2683_v45, 7 }
  0xef   : > { %1505 = vst.msk [vmem:[#allocation4 + $0x1c] sm:$0xf] %vm17347_vm1, %v1472_v63  ;;  %v11141_v63 = vadd.s32 40, %v11011_v38  ;;  %v2741_v18 = vrot.slane %v2739_v59, 4 }
  0xf0   : > { %v948_v4 = vpop.f32.mrf.mxu0 }
  0xf1   : > { %v949_v7 = vadd.f32 %v10992_v11, %v948_v4  ;;  %17601 = vst [vmem:[#allocation24_spill] sm:$0xff] %v11141_v63  ;;  %v2859_v4 = vunpack.c.h.b16 %v2731_v46  ;;  %v1064_v46 = vadd.s32 120, %v11011_v38 }
  0xf3   : > { %v1016_v15 = vmax.f32 %v949_v7, 0.0  ;;  %9803 = vmatmul.msk.bf16.gmra.mxu0 %vm17346_vm0, %v10445_v3  ;;  %v1819_v3 = vsel %vm11091_vm5, %v11126_v43, %v1818_v49  ;;  %vm11212_vm8 = vcmp.ne.s32.totalorder %v2859_v4, %v11109_v33  ;;  %v2745_v49 = vrot.slane %v2685_v5, 7 }
  0xf4   : > { %v2082_v24 = vunpack.c.l.b16 %v1819_v3  ;;  %v2083_v27 = vunpack.c.h.b16 %v1819_v3  ;;  %v17628_v3 = vmov 0  ;;  %v17634_v5 = vmov 0 }
  0xf5   : > { %v1473_v22 = vpack.c.bf16 %v1016_v15, %v1016_v15  ;;  %v17629_v3 = vsel %vm11266_vm4, 4294967295, %v17628_v3 }
  0xf6   : > { %vm11239_vm10 = vcmp.ne.s32.totalorder %v2082_v24, %v11101_v29  ;;  %vm11244_vm11 = vcmp.ne.s32.totalorder %v2083_v27, %v11109_v33  ;;  %v1856_v27 = vrot.slane %v11145_v1, 4 }
  0xf7   : > { %1506 = vst.msk [vmem:[#allocation4 + $0x20] sm:$0xf] %vm17347_vm1, %v1473_v22  ;;  %v2734_v22 = vsel %vm11112_vm7, %v11129_v44, %v2733_v16  ;;  %v1854_v16 = vor.u32 %v1852_v2, %v11145_v1  ;;  %v17626_v2 = vmov 0 }
  0xf8   : > { %v950_v32 = vpop.f32.mrf.mxu0  ;;  %v2865_v42 = vunpack.c.l.b16 %v2734_v22  ;;  %v2866_v48 = vunpack.c.h.b16 %v2734_v22 }
  0xf9   : > { %v951_v39 = vadd.f32 %v10992_v11, %v950_v32  ;;  %v11204_v32 = vsel %vm11112_vm7, %v11129_v44, %v2739_v59  ;;  %v11252_v56 = vsel %vm11091_vm5, %v11126_v43, %v1854_v16 }
  0xfa   : > { %v2879_v50 = vunpack.c.l.b16 %v11204_v32 }
  0xfb   : > { %v1017_v47 = vmax.f32 %v951_v39, 0.0  ;;  %v2096_v39 = vunpack.c.l.b16 %v1837_v19 }
  0xfc   : > { %vm11290_vm4 = vcmp.ne.s32.totalorder %v2879_v50, %v11101_v29 }
  0xfd   : > { %v1474_v55 = vpack.c.bf16 %v1017_v47, %v1017_v47  ;;  %v11225_v47 = vsel %vm11112_vm7, %v2741_v18, %v11103_v30  ;;  %vm11261_vm15 = vcmp.ne.s32.totalorder %v2096_v39, %v11101_v29  ;;  %v11287_v18 = vsel %vm11112_vm7, %v11129_v44, %v2745_v49 }
  0xfe   : > { %v11228_v51 = vld [vmem:[#allocation4 + $0x20] sm:$0xf]  ;;  %v2886_v61 = vunpack.c.l.b16 %v11225_v47  ;;  %v17627_v2 = vsel %vm11261_vm15, 4294967295, %v17626_v2 }
  0xff   : > { %1507 = vst.msk [vmem:[#allocation4 + $0x24] sm:$0xf] %vm17347_vm1, %v1474_v55  ;;  %v1190_v55 = vand.u32 15, %v1064_v46  ;;  %v2258_v13 = vsel %vm11234_vm9, 0, %v11228_v51  ;;  %v2893_v46 = vunpack.c.l.b16 %v11287_v18  ;;  %v11412_v39 = vunpack.c.l.bf16 %v11228_v51 }
 0x100   : > { %v953_v7 = vpop.f32.mrf.mxu0  ;;  %17618 = vst [vmem:[#allocation25_spill] sm:$0xff] %v11228_v51  ;;  %v11316_v1 = vunpack.c.l.bf16 %v2258_v13 }
 0x101   : > { %v954_v15 = vadd.f32 %v10992_v11, %v953_v7  ;;  %vm1584_vm14 = vcmp.ge.s32.totalorder %v1190_v55, 15  ;;  %v2880_v7 = vunpack.c.h.b16 %v11204_v32  ;;  %v2747_v32 = vrot.slane %v2745_v49, 4  ;;  %17661 = vst [vmem:[#allocation29_spill] sm:$0xff] %v11412_v39 }
 0x102   : > { %17638 = vst [vmem:[#allocation27_spill] sm:$0xff] %v11316_v1 }
 0x103   : > { %v1018_v31 = vmax.f32 %v954_v15, 0.0  ;;  %9804 = vmatmul.msk.bf16.gmra.mxu0 %vm17346_vm0, %v10446_v0  ;;  %v2887_v0 = vunpack.c.h.b16 %v11225_v47  ;;  %vm11276_vm0 = vmpackc.low %vm11244_vm11, %vm11239_vm10  ;;  %v2110_v15 = vunpack.c.l.b16 %v11252_v56  ;;  %vm11330_vm10 = vcmp.ne.s32.totalorder %v2866_v48, %v11109_v33  ;;  %v10447_v48 = vld [vmem:[%s10958_s5 + $0x70] sm:$0xff] }
 0x104   : > { %v17631_v8 = vsel %vm11276_vm0, 4294967295, %v17630_v8  ;;  %v2894_v47 = vunpack.c.h.b16 %v11287_v18  ;;  %vm11357_vm15 = vcmp.ne.s32.totalorder %v2880_v7, %v11109_v33 }
 0x105   : > { %v1475_v45 = vpack.c.bf16 %v1018_v31, %v1018_v31  ;;  %v2111_v31 = vunpack.c.h.b16 %v11252_v56 }
 0x106   : > { %v11256_v59 = vld [vmem:[#allocation4 + $0x24] sm:$0xf] }
 0x107   : > { %1508 = vst.msk [vmem:[#allocation4 + $0x28] sm:$0xf] %vm17347_vm1, %v1475_v45  ;;  %vm1680_vm1 = vmpackc.low %vm1584_vm14, %vm1584_vm14  ;;  %v2259_v22 = vsel %vm11276_vm0, 0, %v11256_v59  ;;  %vm17668_vm0 = vcmask 1046528  }
 0x108   : > { %17625 = vst [vmem:[#allocation26_spill] sm:$0xff] %v11256_v59  ;;  %v955_v60 = vpop.f32.mrf.mxu0  ;;  %v1712_v24 = vsel %vm1680_vm1, 65537, %v17356_v9  ;;  %vm11304_vm14 = vmpackc.low %vm11159_vm13, %vm11154_vm12  ;;  %v11318_v10 = vunpack.c.l.bf16 %v2259_v22  ;;  %vm11320_vm12 = vcmp.ge.s32.totalorder %v1190_v55, 14  ;;  %vm11325_vm13 = vcmp.ne.s32.totalorder %v2865_v42, %v11101_v29 }
 0x109   : > { %v956_v4 = vadd.f32 %v10992_v11, %v955_v60  ;;  %v17635_v5 = vsel %vm11304_vm14, 4294967295, %v17634_v5  ;;  %v1867_v16 = vshrl.u32 %v1712_v24, 16  ;;  %vm11312_vm1 = vmpackc.low %vm11178_vm3, %vm11173_vm2  ;;  %v1870_v45 = vshll.u32 %v1712_v24, 16 }
 0x10a   : > { %v17637_v37 = vsel %vm11312_vm1, 4294967295, %v17636_v37  ;;  %vm11344_vm2 = vmpackc.low %vm11212_vm8, %vm11207_vm6  ;;  %v17646_v42 = vmov 0  ;;  %vm17648_vm3 = vcmask 519168   ;;  %v2399_v53 = vrot.slane %v11318_v10, 1 }
 0x10b   : > { %v1019_v23 = vmax.f32 %v956_v4, 0.0  ;;  %v11334_v21 = vrot.slane %v1867_v16, 7  ;;  %v17647_v42 = vsel %vm11344_vm2, 4294967295, %v17646_v42  ;;  %vm2655_vm11 = vmpackc.low %vm11320_vm12, %vm11320_vm12  ;;  %v11368_v55 = vsel %vm11091_vm5, %v1856_v27, %v11095_v26 }
 0x10c   : > { %v2687_v4 = vsel %vm2655_vm11, 65537, %v17356_v9  ;;  %vm11373_vm6 = vcmp.ne.s32.totalorder %v2103_v57, %v11101_v29  ;;  %vm11378_vm8 = vcmp.ne.s32.totalorder %v2104_v58, %v11109_v33  ;;  %vm11388_vm12 = vmpackc.low %vm11330_vm10, %vm11325_vm13  ;;  %v11396_v24 = vsel %vm11112_vm7, %v2747_v32, %v11103_v30  ;;  %v10448_v58 = vld [vmem:[%s10958_s5 + $0x78] sm:$0xff]  ;;  %s17495_s5 = smov 48  }
 0x10d   : > { %v1476_v12 = vpack.c.bf16 %v1019_v23, %v1019_v23  ;;  %v1872_v60 = vor.u32 %v1870_v45, %v11334_v21  ;;  %v17655_v23 = vmov 0  ;;  %vm11404_vm11 = vcmp.ne.s32.totalorder %v2887_v0, %v11109_v33 }
 0x10e   : > { %v11338_v49 = vld [vmem:[#allocation4 + $0x28] sm:$0xf]  ;;  %v17656_v23 = vsel %vm11388_vm12, 4294967295, %v17655_v23  ;;  %v17354_v10 = vrot.slane %v11316_v1, 1  ;;  %v11415_v32 = vunpack.c.l.bf16 %v11256_v59  ;;  %vm17663_vm13 = vcmask 261120  }
 0x10f   : > { %17645 = vst [vmem:[#allocation28_spill] sm:$0xff] %v11338_v49  ;;  %v2260_v50 = vsel %vm11304_vm14, 0, %v11338_v49  ;;  %v3043_v36 = vsel %vm11312_vm1, 0, %v11338_v49  ;;  %v11424_v0 = vsel %vm11091_vm5, %v11126_v43, %v1872_v60  ;;  %vm17664_vm10 = vnez %v17627_v2 }
 0x110   : > { %1509 = vst.msk [vmem:[#allocation4 + $0x2c] sm:$0xf] %vm17648_vm3, %v1476_v12  ;;  %v958_v54 = vpop.f32.mrf.mxu0  ;;  %v11382_v22 = vunpack.c.l.bf16 %v2260_v50  ;;  %vm11399_vm3 = vcmp.ne.s32.totalorder %v2886_v61, %v11101_v29  ;;  %v11408_v16 = vunpack.c.l.bf16 %v3043_v36  ;;  %v2751_v12 = vrot.slane %v2687_v4, 7 }
 0x111   : > { %v959_v57 = vadd.f32 %v10992_v11, %v958_v54  ;;  %17662 = vst [vmem:[#allocation30_spill] sm:$0xff] %v11415_v32  ;;  %v3041_v61 = vsel %vm11344_vm2, 0, %v11228_v51  ;;  %vm17665_vm1 = vnez %v17629_v3  ;;  %v2400_v45 = vsel %vm17668_vm0, %v17354_v10, %v2399_v53 }
 0x112   : > { %vm11430_vm14 = vmpackc.low %vm17665_vm1, %vm17664_vm10  ;;  %v2401_v3 = vrot.slane %v11382_v22, 1  ;;  %v17669_v54 = vmov 0  ;;  %v3184_v10 = vrot.slane %v11408_v16, 2  ;;  %v2487_v19 = vmax.f32 %v11412_v39, %v2400_v45 }
 0x113   : > { %v1020_v41 = vmax.f32 %v959_v57, 0.0  ;;  %9805 = vmatmul.msk.bf16.gmra.mxu0 %vm17663_vm13, %v10447_v48  ;;  %v17667_v20 = vsel %vm11430_vm14, 4294967295, %v17666_v20  ;;  %v3042_v48 = vsel %vm11388_vm12, 0, %v11256_v59  ;;  %vm11448_vm1 = vmpackc.low %vm11357_vm15, %vm11290_vm4  ;;  %v11454_v57 = vunpack.c.l.bf16 %v11338_v49 }
 0x114   : > { %v17670_v54 = vsel %vm11448_vm1, 4294967295, %v17669_v54  ;;  %v3107_v35 = vunpack.c.l.bf16 %v3042_v48  ;;  %vm17673_vm0 = vcmask 519168   ;;  %v11474_v22 = vunpack.c.l.bf16 %v3041_v61 }
 0x115   : > { %v1477_v60 = vpack.c.bf16 %v1020_v41, %v1020_v41  ;;  %17671 = vst [vmem:[#allocation31_spill] sm:$0xff] %v11454_v57  ;;  %v11466_v41 = vsel %vm11112_vm7, %v11129_v44, %v2751_v12  ;;  %v1874_v45 = vrot.slane %v11334_v21, 4  ;;  %vm11480_vm15 = vcmp.ne.s32.totalorder %v2110_v15, %v11101_v29 }
 0x116   : > { %17674 = vst [vmem:[#allocation33_spill] sm:$0xff] %v11474_v22  ;;  %vm11487_vm4 = vcmp.ne.s32.totalorder %v2111_v31, %v11109_v33  ;;  %vm17679_vm10 = vcmask 1046528   ;;  %v2753_v36 = vrot.slane %v2751_v12, 4  ;;  %vm11507_vm13 = vcmp.ne.s32.totalorder %v2894_v47, %v11109_v33 }
 0x117   : > { %v11459_v9 = vld [vmem:[#allocation4 + $0x2c] sm:$0xf]  ;;  %1510 = vst.msk [vmem:[#allocation4 + $0x30] sm:$0xf] %vm17673_vm0, %v1477_v60  ;;  %v2402_v21 = vsel %vm17679_vm10, %v2399_v53, %v2401_v3  ;;  %vm11500_vm0 = vcmp.ne.s32.totalorder %v2893_v46, %v11101_v29  ;;  %v11517_v31 = vsel %vm11091_vm5, %v1874_v45, %v11095_v26  ;;  %vm11527_vm10 = vmpackc.low %vm11378_vm8, %vm11373_vm6  ;;  %v17360_v45 = vrot.slane %v11474_v22, 2 }
 0x118   : > { %17672 = vst [vmem:[#allocation32_spill] sm:$0xff] %v11459_v9  ;;  %v2261_v16 = vsel %vm11430_vm14, 0, %v11459_v9  ;;  %v3044_v28 = vsel %vm11448_vm1, 0, %v11459_v9  ;;  %v960_v17 = vpop.f32.mrf.mxu0  ;;  %vm11537_vm5 = vmpackc.low %vm11404_vm11, %vm11399_vm3  ;;  %v11542_v7 = vunpack.c.l.bf16 %v11459_v9  ;;  %vm17689_vm6 = vcmask 1046528  }
 0x119   : > { %v11491_v4 = vunpack.c.l.bf16 %v2261_v16  ;;  %v11493_v61 = vunpack.c.l.bf16 %v3044_v28  ;;  %v961_v2 = vadd.f32 %v10992_v11, %v960_v17  ;;  %v3182_v28 = vrot.slane %v3107_v35, 2 }
 0x11a   : > { %v3435_v17 = vsel %vm11234_vm9, 0, %v11338_v49  ;;  %v17684_v35 = vmov 0  ;;  %v2488_v16 = vmax.f32 %v11415_v32, %v2402_v21  ;;  %17688 = vst [vmem:[#allocation34_spill] sm:$0xff] %v11542_v7  ;;  %vm17690_vm8 = vnez %v17631_v8 }
 0x11b   : > { %v2403_v53 = vrot.slane %v11491_v4, 1  ;;  %v3186_v18 = vrot.slane %v11493_v61, 2  ;;  %v1021_v47 = vmax.f32 %v961_v2, 0.0  ;;  %v17685_v35 = vsel %vm11527_vm10, 4294967295, %v17684_v35 }
 0x11c   : > { %v17686_v2 = vmov 0  ;;  %v3436_v4 = vsel %vm17690_vm8, 0, %v11459_v9  ;;  %v11548_v61 = vunpack.c.l.bf16 %v3435_v17  ;;  %v11554_v27 = vsel %vm11112_vm7, %v2753_v36, %v11103_v30 }
 0x11d   : > { %v17687_v2 = vsel %vm11537_vm5, 4294967295, %v17686_v2  ;;  %v2404_v13 = vsel %vm17689_vm6, %v2401_v3, %v2403_v53  ;;  %v1478_v21 = vpack.c.bf16 %v1021_v47, %v1021_v47  ;;  %vm17692_vm3 = vcmask 1045504  }
 0x11e   : > { %17691 = vst [vmem:[#allocation35_spill] sm:$0xff] %v11548_v61  ;;  %v3183_v12 = vsel %vm17692_vm3, %v17360_v45, %v3182_v28  ;;  %v11559_v46 = vld [vmem:[#allocation4 + $0x30] sm:$0xf]  ;;  %v2489_v3 = vmax.f32 %v11454_v57, %v2404_v13  ;;  %vm17693_vm11 = vmmov %vm17692_vm3  ;;  %vm17695_vm8 = vcmask 519168   ;;  %v17703_v30 = vunpack.c.l.b16 %v11396_v24 }
 0x11f   : > { %v3187_v50 = vsel %vm17693_vm11, %v3184_v10, %v3186_v18  ;;  %vm17694_vm6 = vmmov %vm17692_vm3  ;;  %v11564_v47 = vmax.f32 %v2487_v19, %v3183_v12  ;;  %1511 = vst.msk [vmem:[#allocation4 + $0x34] sm:$0xf] %vm17695_vm8, %v1478_v21  ;;  %v2262_v36 = vsel %vm11527_vm10, 0, %v11559_v46  ;;  %v11572_v40 = vunpack.c.l.bf16 %v11559_v46 }
 0x120   : > { %v3185_v17 = vsel %vm17694_vm6, %v3182_v28, %v3184_v10  ;;  %v3045_v13 = vsel %vm11537_vm5, 0, %v11559_v46  ;;  %vm17696_vm3 = vnez %v17635_v5  ;;  %v963_v19 = vpop.f32.mrf.mxu0  ;;  %v17697_v28 = vunpack.c.l.b16 %v11368_v55  ;;  %vm11632_vm5 = vmpackc.low %vm11487_vm4, %vm11480_vm15 }
 0x121   : > { %v3437_v10 = vsel %vm17696_vm3, 0, %v11559_v46  ;;  %v17700_v21 = vunpack.c.h.b16 %v11368_v55  ;;  %v11594_v38 = vunpack.c.l.bf16 %v2262_v36  ;;  %v11596_v39 = vunpack.c.l.bf16 %v3045_v13 }
 0x122   : > { %vm11583_vm8 = vcmp.ne.s32.totalorder %v17697_v28, %v11101_v29  ;;  %v11598_v32 = vmax.f32 %v2489_v3, %v3187_v50  ;;  %v11600_v22 = vunpack.c.l.bf16 %v3437_v10  ;;  %v964_v28 = vadd.f32 %v10992_v11, %v963_v19 }
 0x123   : > { %vm11590_vm11 = vcmp.ne.s32.totalorder %v17700_v21, %v11109_v33  ;;  %vm11607_vm6 = vcmp.ne.s32.totalorder %v17703_v30, %v11101_v29  ;;  %v17706_v36 = vunpack.c.h.b16 %v11396_v24  ;;  %vm17709_vm9 = vnez %v17637_v37 }
 0x124   : > { %v3730_v50 = vsel %vm17709_vm9, 0, %v11559_v46  ;;  %v11621_v3 = vmax.f32 %v2488_v16, %v3185_v17  ;;  %v2405_v19 = vrot.slane %v11594_v38, 1  ;;  %v3188_v21 = vrot.slane %v11596_v39, 2  ;;  %vm11644_vm9 = vmpackc.low %vm11507_vm13, %vm11500_vm0 }
 0x125   : > { %vm11614_vm7 = vcmp.ne.s32.totalorder %v17706_v36, %v11109_v33  ;;  %v1022_v1 = vmax.f32 %v964_v28, 0.0  ;;  %vm17710_vm3 = vcmask 261120   ;;  %v11636_v16 = vunpack.c.l.bf16 %v3730_v50 }
 0x126   : > { %9806 = vmatmul.msk.bf16.gmra.mxu0 %vm17710_vm3, %v10448_v58  ;;  %v3370_v17 = vmax.f32 %v11564_v47, %v11454_v57  ;;  %v3501_v36 = vunpack.c.l.bf16 %v3436_v4  ;;  %vm17715_vm3 = vcmask 1046528   ;;  %v3372_v48 = vmax.f32 %v11598_v32, %v11572_v40  ;;  %v11657_v28 = vld [vmem:[#allocation4 + $0x34] sm:$0xf] }
 0x127   : > { %v2406_v39 = vsel %vm17715_vm3, %v2403_v53, %v2405_v19  ;;  %v3577_v60 = vrot.slane %v11600_v22, 1  ;;  %v3371_v58 = vmax.f32 %v11621_v3, %v11542_v7  ;;  %v1479_v47 = vpack.c.bf16 %v1022_v1, %v1022_v1 }
 0x128   : > { %v2490_v4 = vmax.f32 %v11542_v7, %v2406_v39  ;;  %vm17716_vm15 = vcmask 1045504   ;;  %v3575_v53 = vrot.slane %v3501_v36, 1  ;;  %v3728_v32 = vsel %vm11344_vm2, 0, %v11338_v49  ;;  %v965_v39 = vpop.f32.mrf.mxu0  ;;  %vm11738_vm2 = vmpackc.low %vm11590_vm11, %vm11583_vm8 }
 0x129   : > { %v3189_v15 = vsel %vm17716_vm15, %v3186_v18, %v3188_v21  ;;  %v3729_v22 = vsel %vm11388_vm12, 0, %v11459_v9  ;;  %vm17717_vm13 = vcmask 519168   ;;  %v2263_v1 = vsel %vm11632_vm5, 0, %v11657_v28 }
 0x12a   : > { %1512 = vst.msk [vmem:[#allocation4 + $0x38] sm:$0xf] %vm17717_vm13, %v1479_v47  ;;  %v11671_v18 = vunpack.c.l.bf16 %v11657_v28  ;;  %v3046_v3 = vsel %vm11644_vm9, 0, %v11657_v28  ;;  %v11676_v36 = vmax.f32 %v2490_v4, %v3189_v15  ;;  %v17718_v30 = vunpack.c.l.b16 %v11424_v0 }
 0x12b   : > { %v17721_v47 = vunpack.c.h.b16 %v11424_v0  ;;  %v11692_v56 = vunpack.c.l.bf16 %v2263_v1  ;;  %v11694_v57 = vunpack.c.l.bf16 %v3046_v3  ;;  %v3438_v4 = vsel %vm11430_vm14, 0, %v11657_v28 }
 0x12c   : > { %vm11681_vm4 = vcmp.ne.s32.totalorder %v17718_v30, %v11101_v29  ;;  %v3731_v30 = vsel %vm11448_vm1, 0, %v11657_v28  ;;  %v966_v15 = vadd.f32 %v10992_v11, %v965_v39  ;;  %v17724_v0 = vunpack.c.l.b16 %v11466_v41  ;;  %vm11749_vm1 = vmpackc.low %vm11614_vm7, %vm11607_vm6 }
 0x12d   : > { %vm11688_vm0 = vcmp.ne.s32.totalorder %v17721_v47, %v11109_v33  ;;  %v17727_v1 = vunpack.c.h.b16 %v11466_v41  ;;  %v11717_v7 = vunpack.c.l.bf16 %v3438_v4  ;;  %v11719_v9 = vunpack.c.l.bf16 %v3731_v30 }
 0x12e   : > { %vm11706_vm3 = vcmp.ne.s32.totalorder %v17724_v0, %v11101_v29  ;;  %v11721_v49 = vunpack.c.l.bf16 %v3728_v32  ;;  %v2407_v39 = vrot.slane %v11692_v56, 1  ;;  %v3190_v0 = vrot.slane %v11694_v57, 2 }
 0x12f   : > { %vm11713_vm15 = vcmp.ne.s32.totalorder %v17727_v1, %v11109_v33  ;;  %v17731_v59 = vrot.slane %v11548_v61, 1  ;;  %vm17732_vm13 = vcmask 1046528   ;;  %v17733_v41 = vand.u32 15, %v11141_v63 }
 0x130   : > { %17730 = vst [vmem:[#allocation36_spill] sm:$0xff] %v11721_v49  ;;  %v1023_v4 = vmax.f32 %v966_v15, 0.0  ;;  %v3579_v57 = vrot.slane %v11717_v7, 1  ;;  %v3872_v56 = vrot.slane %v11719_v9, 2  ;;  %v17738_v30 = vmov 0  ;;  %vm17740_vm14 = vmmov %vm17732_vm13 }
 0x131   : > { %v3576_v51 = vsel %vm17732_vm13, %v17731_v59, %v3575_v53  ;;  %vm11730_vm12 = vcmp.ge.s32.totalorder %v17733_v41, 15  ;;  %v3578_v59 = vsel %vm17732_vm13, %v3575_v53, %v3577_v60  ;;  %v17739_v30 = vsel %vm11749_vm1, 4294967295, %v17738_v30  ;;  %vm17742_vm11 = vmmov %vm17732_vm13  ;;  %v1550_v13 = vld [vmem:[#allocation4 + $0x38] sm:$0xf] }
 0x132   : > { %v2408_v45 = vsel %vm17740_vm14, %v2405_v19, %v2407_v39  ;;  %vm17741_vm8 = vcmask 1045504   ;;  %v3373_v15 = vmax.f32 %v11676_v36, %v11671_v18  ;;  %v11757_v7 = vmax.f32 %v3370_v17, %v3576_v51 }
 0x133   : > { %v3191_v12 = vsel %vm17741_vm8, %v3188_v21, %v3190_v0  ;;  %v1480_v9 = vpack.c.bf16 %v1023_v4, %v1023_v4  ;;  %v2491_v53 = vmax.f32 %v11572_v40, %v2408_v45  ;;  %v3580_v55 = vsel %vm17742_vm11, %v3577_v60, %v3579_v57  ;;  %vm17744_vm7 = vmmov %vm17741_vm8 }
 0x134   : > { %v11761_v41 = vunpack.c.l.bf16 %v3729_v22  ;;  %v3665_v61 = vmax.f32 %v3372_v48, %v3580_v55  ;;  %v17743_v34 = vrot.slane %v11636_v16, 2  ;;  %v11766_v44 = vmax.f32 %v3371_v58, %v3578_v59  ;;  %v968_v48 = vpop.f32.mrf.mxu0 }
 0x135   : > { %vm17745_vm14 = vcmask 519168   ;;  %v2264_v51 = vsel %vm11738_vm2, 0, %v1550_v13  ;;  %v11772_v17 = vunpack.c.l.bf16 %v1550_v13  ;;  %v3047_v60 = vsel %vm11749_vm1, 0, %v1550_v13 }
 0x136   : > { %v3873_v19 = vsel %vm17744_vm7, %v17743_v34, %v3872_v56  ;;  %1513 = vst.msk [vmem:[#allocation4 + $0x3c] sm:$0xf] %vm17745_vm14, %v1480_v9  ;;  %v11776_v22 = vmax.f32 %v2491_v53, %v3191_v12  ;;  %v17746_v34 = vunpack.c.l.b16 %v11517_v31  ;;  %v17749_v36 = vunpack.c.h.b16 %v11517_v31  ;;  %vm1670_vm14 = vmpackc.low %vm11730_vm12, %vm11730_vm12 }
 0x137   : > { %v2329_v59 = vunpack.c.l.bf16 %v2264_v51  ;;  %v3112_v45 = vunpack.c.l.bf16 %v3047_v60  ;;  %v3439_v12 = vsel %vm11527_vm10, 0, %v1550_v13  ;;  %vm17752_vm8 = vnez %v17687_v2  ;;  %vm11821_vm10 = vmpackc.low %vm11688_vm0, %vm11681_vm4 }
 0x138   : > { %vm11781_vm6 = vcmp.ne.s32.totalorder %v17746_v34, %v11101_v29  ;;  %vm11788_vm13 = vcmp.ne.s32.totalorder %v17749_v36, %v11109_v33  ;;  %v3732_v9 = vsel %vm17752_vm8, 0, %v1550_v13  ;;  %v969_v53 = vadd.f32 %v10992_v11, %v968_v48  ;;  %vm11831_vm12 = vmpackc.low %vm11713_vm15, %vm11706_vm3 }
 0x139   : > { %v17753_v55 = vunpack.c.l.b16 %v11554_v27  ;;  %v17756_v31 = vunpack.c.h.b16 %v11554_v27  ;;  %v3504_v60 = vunpack.c.l.bf16 %v3439_v12  ;;  %v3797_v36 = vunpack.c.l.bf16 %v3732_v9 }
 0x13a   : > { %v2409_v48 = vrot.slane %v2329_v59, 1  ;;  %vm17759_vm8 = vnez %v17635_v5  ;;  %v1024_v63 = vmax.f32 %v969_v53, 0.0  ;;  %vm17765_vm1 = vcmask 1045504  }
 0x13b   : > { %vm11800_vm11 = vcmp.ne.s32.totalorder %v17753_v55, %v11101_v29  ;;  %vm11807_vm7 = vcmp.ne.s32.totalorder %v17756_v31, %v11109_v33  ;;  %v3192_v55 = vrot.slane %v3112_v45, 2  ;;  %v3958_v29 = vmax.f32 %v3665_v61, %v3873_v19  ;;  %vm17768_vm0 = vmmov %vm17765_vm1 }
 0x13c   : > { %v4123_v6 = vsel %vm17759_vm8, 0, %v1550_v13  ;;  %v3581_v12 = vrot.slane %v3504_v60, 1  ;;  %v3874_v9 = vrot.slane %v3797_v36, 2  ;;  %vm17764_vm8 = vcmask 1046528  }
 0x13d   : > { %v11825_v1 = vunpack.c.l.bf16 %v4123_v6  ;;  %v2410_v61 = vsel %vm17764_vm8, %v2407_v39, %v2409_v48  ;;  %v3193_v10 = vsel %vm17765_vm1, %v3190_v0, %v3192_v55  ;;  %v3374_v50 = vmax.f32 %v11776_v22, %v11772_v17  ;;  %vm17767_vm4 = vmmov %vm17764_vm8  ;;  %v1551_v53 = vld [vmem:[#allocation4 + $0x3c] sm:$0xf] }
 0x13e   : > { %v17766_v19 = vmov 0   ;;  %v1481_v6 = vpack.c.bf16 %v1024_v63, %v1024_v63  ;;  %v2492_v45 = vmax.f32 %v11671_v18, %v2410_v61  ;;  %v3582_v47 = vsel %vm17767_vm4, %v3579_v57, %v3581_v12  ;;  %vm17774_vm8 = vmmov %vm17767_vm4 }
 0x13f   : > { %v11840_v59 = vsel %vm1670_vm14, 65537, %v17766_v19  ;;  %v11845_v3 = vmax.f32 %v3958_v29, %v11772_v17  ;;  %v3666_v31 = vmax.f32 %v3373_v15, %v3582_v47  ;;  %v3875_v39 = vsel %vm17768_vm0, %v3872_v56, %v3874_v9  ;;  %v970_v15 = vpop.f32.mrf.mxu0  ;;  %vm11873_vm14 = vmpackc.low %vm11788_vm13, %vm11781_vm6 }
 0x140   : > { %vm17769_vm1 = vnez %v17637_v37  ;;  %vm17770_vm3 = vcmask 519168   ;;  %v2265_v63 = vsel %vm11821_vm10, 0, %v1551_v53  ;;  %v11854_v60 = vunpack.c.l.bf16 %v1551_v53  ;;  %vm11884_vm4 = vmpackc.low %vm11807_vm7, %vm11800_vm11 }
 0x141   : > { %v4416_v22 = vsel %vm17769_vm1, 0, %v1550_v13  ;;  %1514 = vst.msk [vmem:[#allocation4 + $0x40] sm:$0xf] %vm17770_vm3, %v1481_v6  ;;  %v3048_v29 = vsel %vm11831_vm12, 0, %v1551_v53  ;;  %v11858_v57 = vmax.f32 %v2492_v45, %v3193_v10  ;;  %v2330_v36 = vunpack.c.l.bf16 %v2265_v63  ;;  %vm17779_vm6 = vmmov %vm17768_vm0 }
 0x142   : > { %v3113_v56 = vunpack.c.l.bf16 %v3048_v29  ;;  %v3440_v61 = vsel %vm11632_vm5, 0, %v1551_v53  ;;  %v3733_v37 = vsel %vm11644_vm9, 0, %v1551_v53  ;;  %v971_v13 = vadd.f32 %v10992_v11, %v970_v15  ;;  %vm17780_vm13 = vmmov %vm17774_vm8 }
 0x143   : > { %v3505_v19 = vunpack.c.l.bf16 %v3440_v61  ;;  %v3798_v6 = vunpack.c.l.bf16 %v3733_v37  ;;  %v11865_v47 = vunpack.c.l.bf16 %v4416_v22  ;;  %v2411_v0 = vrot.slane %v2330_v36, 1  ;;  %vm17781_vm11 = vmmov %vm17768_vm0 }
 0x144   : > { %v3194_v21 = vrot.slane %v3113_v56, 2  ;;  %v3959_v33 = vmax.f32 %v3666_v31, %v3875_v39  ;;  %vm17771_vm15 = vnez %v17667_v20  ;;  %v1025_v45 = vmax.f32 %v971_v13, 0.0  ;;  %vm17783_vm1 = vmmov %vm17770_vm3 }
 0x145   : > { %v4124_v10 = vsel %vm17771_vm15, 0, %v1551_v53  ;;  %v3583_v29 = vrot.slane %v3505_v19, 1  ;;  %v3876_v15 = vrot.slane %v3798_v6, 2  ;;  %v2412_v22 = vsel %vm17774_vm8, %v2409_v48, %v2411_v0 }
 0x146   : > { %v11877_v61 = vunpack.c.l.bf16 %v4124_v10  ;;  %v3195_v58 = vsel %vm17768_vm0, %v3192_v55, %v3194_v21  ;;  %v3375_v4 = vmax.f32 %v11858_v57, %v11854_v60  ;;  %v17777_v31 = vrot.slane %v11761_v41, 2 }
 0x147   : > { %v17778_v39 = vrot.slane %v11721_v49, 2  ;;  %v1482_v48 = vpack.c.bf16 %v1025_v45, %v1025_v45  ;;  %v2493_v34 = vmax.f32 %v11772_v17, %v2412_v22  ;;  %v3584_v51 = vsel %vm17780_vm13, %v3581_v12, %v3583_v29  ;;  %v973_v10 = vpop.f32.mrf.mxu0  ;;  %vm17787_vm13 = vmmov %vm17774_vm8 }
 0x148   : > { %v11901_v56 = vmax.f32 %v3959_v33, %v11854_v60  ;;  %v1552_v37 = vld [vmem:[#allocation4 + $0x40] sm:$0xf]  ;;  %v3667_v55 = vmax.f32 %v3374_v50, %v3584_v51  ;;  %v3877_v13 = vsel %vm17781_vm11, %v3874_v9, %v3876_v15  ;;  %v4265_v57 = vrot.slane %v11877_v61, 1  ;;  %vm17788_vm11 = vmmov %vm17779_vm6 }
 0x149   : > { %v11896_v36 = vsel %vm17779_vm6, %v17778_v39, %v17777_v31  ;;  %vm17782_vm7 = vnez %v17670_v54  ;;  %1515 = vst.msk [vmem:[#allocation4 + $0x44] sm:$0xf] %vm17783_vm1, %v1482_v48  ;;  %v2266_v6 = vsel %vm11873_vm14, 0, %v1552_v37  ;;  %v11910_v17 = vunpack.c.l.bf16 %v1552_v37 }
 0x14a   : > { %v4417_v19 = vsel %vm17782_vm7, 0, %v1551_v53  ;;  %v3049_v33 = vsel %vm11884_vm4, 0, %v1552_v37  ;;  %v3276_v12 = vmax.f32 %v2493_v34, %v3195_v58  ;;  %v11914_v50 = vunpack.c.l.bf16 %v2266_v6  ;;  %vm17789_vm7 = vmmov %vm17783_vm1 }
 0x14b   : > { %v11916_v9 = vunpack.c.l.bf16 %v3049_v33  ;;  %v3441_v54 = vsel %vm11738_vm2, 0, %v1552_v37  ;;  %vm17784_vm3 = vnez %v17739_v30  ;;  %v974_v45 = vadd.f32 %v10992_v11, %v973_v10  ;;  %vm17791_vm1 = vmmov %vm17774_vm8 }
 0x14c   : > { %v3734_v53 = vsel %vm17784_vm3, 0, %v1552_v37  ;;  %v3506_v61 = vunpack.c.l.bf16 %v3441_v54  ;;  %v11923_v31 = vunpack.c.l.bf16 %v4417_v19  ;;  %v17405_v39 = vrot.slane %v11914_v50, 1 }
 0x14d   : > { %v3799_v22 = vunpack.c.l.bf16 %v3734_v53  ;;  %v17406_v58 = vrot.slane %v11916_v9, 2  ;;  %vm17785_vm15 = vnez %v17685_v35  ;;  %v1026_v51 = vmax.f32 %v974_v45, 0.0 }
 0x14e   : > { %v4125_v48 = vsel %vm17785_vm15, 0, %v1552_v37  ;;  %v3585_v6 = vrot.slane %v3506_v61, 1  ;;  %v2414_v11 = vsel %vm17774_vm8, %v2411_v0, %v17405_v39  ;;  %v3376_v19 = vmax.f32 %v3276_v12, %v11910_v17  ;;  %vm17793_vm15 = vmmov %vm17791_vm1 }
 0x14f   : > { %v3878_v33 = vrot.slane %v3799_v22, 2  ;;  %v4190_v49 = vunpack.c.l.bf16 %v4125_v48  ;;  %v3960_v10 = vmax.f32 %v3667_v55, %v3877_v13  ;;  %vm17786_vm0 = vnez %v17687_v2  ;;  %vm17794_vm8 = vmmov %vm17779_vm6 }
 0x150   : > { %v4418_v54 = vsel %vm17786_vm0, 0, %v1552_v37  ;;  %v1483_v53 = vpack.c.bf16 %v1026_v51, %v1026_v51  ;;  %v2494_v35 = vmax.f32 %v11854_v60, %v2414_v11  ;;  %v3197_v45 = vsel %vm17779_vm6, %v3194_v21, %v17406_v58  ;;  %v1553_v22 = vld [vmem:[#allocation4 + $0x44] sm:$0xf]  ;;  %v975_v21 = vpop.f32.mrf.mxu0  ;;  %vm17796_vm0 = vmmov %vm17789_vm7 }
 0x151   : > { %v3586_v61 = vsel %vm17787_vm13, %v3583_v29, %v3585_v6  ;;  %v3879_v34 = vsel %vm17788_vm11, %v3876_v15, %v3878_v33  ;;  %v4267_v0 = vrot.slane %v4190_v49, 1  ;;  %v4483_v39 = vunpack.c.l.bf16 %v4418_v54  ;;  %v11954_v49 = vld [vmem:[%s17574_s30] ss:$0 sm:$0xff]  ;;  %vm17801_vm13 = vmmov %vm17791_vm1 }
 0x152   : > { %v3668_v48 = vmax.f32 %v3375_v4, %v3586_v61  ;;  %1516 = vst.msk [vmem:[#allocation4 + $0x48] sm:$0xf] %vm17789_vm7, %v1483_v53  ;;  %v11943_v55 = vunpack.c.l.bf16 %v1553_v22  ;;  %v3277_v2 = vmax.f32 %v2494_v35, %v3197_v45  ;;  %v3442_v60 = vsel %vm11821_vm10, 0, %v1553_v22 }
 0x153   : > { %v3735_v37 = vsel %vm11831_vm12, 0, %v1553_v22  ;;  %v3507_v13 = vunpack.c.l.bf16 %v3442_v60  ;;  %v4126_v15 = vsel %vm11632_vm5, 0, %v1553_v22  ;;  %v976_v4 = vadd.f32 %v11954_v49, %v975_v21  ;;  %vm17792_vm5 = vmmov %vm17791_vm1 }
 0x154   : > { %v3800_v29 = vunpack.c.l.bf16 %v3735_v37  ;;  %v3961_v12 = vmax.f32 %v3668_v48, %v3879_v34  ;;  %v4060_v51 = vmax.f32 %v3960_v10, %v11910_v17  ;;  %v4191_v11 = vunpack.c.l.bf16 %v4126_v15 }
 0x155   : > { %v4419_v54 = vsel %vm11644_vm9, 0, %v1553_v22  ;;  %v3587_v53 = vrot.slane %v3507_v13, 1  ;;  %v17790_v34 = vrot.slane %v11825_v1, 1  ;;  %v1027_v61 = vmax.f32 %v976_v4, 0.0  ;;  %vm17795_vm9 = vmmov %vm17791_vm1 }
 0x156   : > { %v3880_v35 = vrot.slane %v3800_v29, 2  ;;  %v4484_v45 = vunpack.c.l.bf16 %v4419_v54  ;;  %v3377_v48 = vmax.f32 %v3277_v2, %v11943_v55  ;;  %v4269_v60 = vrot.slane %v4191_v11, 1 }
 0x157   : > { %v4266_v24 = vsel %vm17791_vm1, %v17790_v34, %v4265_v57  ;;  %v4268_v37 = vsel %vm17792_vm5, %v4265_v57, %v4267_v0  ;;  %v3588_v21 = vsel %vm17793_vm15, %v3585_v6, %v3587_v53  ;;  %v4061_v38 = vmax.f32 %v3961_v12, %v11943_v55  ;;  %vm17806_vm15 = vmmov %vm17796_vm0 }
 0x158   : > { %v3881_v10 = vsel %vm17794_vm8, %v3878_v33, %v3880_v35  ;;  %v4560_v22 = vrot.slane %v4483_v39, 2  ;;  %v1484_v13 = vpack.c.bf16 %v1027_v61, %v1027_v61  ;;  %v3669_v29 = vmax.f32 %v3376_v19, %v3588_v21 }
 0x159   : > { %v4270_v15 = vsel %vm17795_vm9, %v4267_v0, %v4269_v60  ;;  %v4562_v54 = vrot.slane %v4484_v45, 2  ;;  %v1554_v58 = vld [vmem:[#allocation4 + $0x48] sm:$0xf]  ;;  %v4351_v4 = vmax.f32 %v11845_v3, %v4266_v24  ;;  %v4352_v2 = vmax.f32 %v11901_v56, %v4268_v37  ;;  %v978_v0 = vpop.f32.mrf.mxu0  ;;  %vm17810_vm9 = vmmov %vm17791_vm1 }
 0x15a   : > { %v4353_v34 = vmax.f32 %v4060_v51, %v4270_v15  ;;  %v4558_v57 = vrot.slane %v11923_v31, 2  ;;  %1517 = vst.msk [vmem:[#allocation4 + $0x4c] sm:$0xf] %vm17796_vm0, %v1484_v13  ;;  %v11973_v6 = vunpack.c.l.bf16 %v1554_v58  ;;  %v3443_v39 = vsel %vm11873_vm14, 0, %v1554_v58 }
 0x15b   : > { %v3736_v33 = vsel %vm11884_vm4, 0, %v1554_v58  ;;  %v3962_v19 = vmax.f32 %v3669_v29, %v3881_v10  ;;  %v11979_v12 = vunpack.c.l.bf16 %v3443_v39  ;;  %v4127_v3 = vsel %vm11738_vm2, 0, %v1554_v58  ;;  %vm17799_vm2 = vmmov %vm17779_vm6 }
 0x15c   : > { %v11981_v51 = vunpack.c.l.bf16 %v3736_v33  ;;  %v4420_v56 = vsel %vm17784_vm3, 0, %v1554_v58  ;;  %v979_v31 = vadd.f32 %v11954_v49, %v978_v0  ;;  %v4192_v11 = vunpack.c.l.bf16 %v4127_v3  ;;  %vm17800_vm3 = vmmov %vm17799_vm2 }
 0x15d   : > { %v4485_v45 = vunpack.c.l.bf16 %v4420_v56  ;;  %v4563_v24 = vsel %vm17779_vm6, %v4560_v22, %v4562_v54  ;;  %v17410_v61 = vrot.slane %v11979_v12, 1  ;;  %v11992_v21 = vmax.f32 %v3962_v19, %v11973_v6  ;;  %vm17803_vm11 = vmmov %vm17799_vm2 }
 0x15e   : > { %v17409_v37 = vrot.slane %v11981_v51, 2  ;;  %v17797_v10 = vrot.slane %v11636_v16, 2  ;;  %v17798_v32 = vrot.slane %v11761_v41, 2  ;;  %v1028_v58 = vmax.f32 %v979_v31, 0.0  ;;  %vm17804_vm7 = vmmov %vm17799_vm2 }
 0x15f   : > { %v4271_v13 = vrot.slane %v4192_v11, 1  ;;  %v4564_v29 = vrot.slane %v4485_v45, 2  ;;  %v4561_v15 = vsel %vm17800_vm3, %v4558_v57, %v4560_v22  ;;  %v3590_v39 = vsel %vm17801_vm13, %v3587_v53, %v17410_v61  ;;  %vm17805_vm5 = vmmov %vm17799_vm2 }
 0x160   : > { %v3871_v30 = vsel %vm17799_vm2, %v17798_v32, %v17797_v10  ;;  %v12003_v33 = vmax.f32 %v4353_v34, %v4563_v24  ;;  %v17802_v19 = vrot.slane %v11865_v47, 2  ;;  %v12008_v16 = vmax.f32 %v4352_v2, %v4561_v15  ;;  %vm17812_vm6 = vmmov %vm17799_vm2 }
 0x161   : > { %v1485_v41 = vpack.c.bf16 %v1028_v58, %v1028_v58  ;;  %v3670_v3 = vmax.f32 %v3377_v48, %v3590_v39  ;;  %v3883_v56 = vsel %vm17804_vm7, %v3880_v35, %v17409_v37  ;;  %v4272_v22 = vsel %vm17791_vm1, %v4269_v60, %v4271_v13  ;;  %v1555_v31 = vld [vmem:[#allocation4 + $0x4c] sm:$0xf]  ;;  %v980_v60 = vpop.f32.mrf.mxu0  ;;  %vm17813_vm2 = vmmov %vm17806_vm15 }
 0x162   : > { %v4559_v0 = vsel %vm17803_vm11, %v17802_v19, %v4558_v57  ;;  %v4354_v11 = vmax.f32 %v4061_v38, %v4272_v22  ;;  %v4565_v53 = vsel %vm17805_vm5, %v4562_v54, %v4564_v29  ;;  %v3956_v45 = vmax.f32 %v11757_v7, %v11896_v36  ;;  %vm17814_vm3 = vmmov %vm17791_vm1 }
 0x163   : > { %v12015_v34 = vmax.f32 %v4351_v4, %v4559_v0  ;;  %1518 = vst.msk [vmem:[#allocation4 + $0x50] sm:$0xf] %vm17806_vm15, %v1485_v41  ;;  %v12020_v2 = vunpack.c.l.bf16 %v1555_v31  ;;  %v3963_v48 = vmax.f32 %v3670_v3, %v3883_v56  ;;  %v4128_v57 = vsel %vm11821_vm10, 0, %v1555_v31  ;;  %vm17817_vm13 = vmmov %vm17791_vm1 }
 0x164   : > { %v4421_v35 = vsel %vm11831_vm12, 0, %v1555_v31  ;;  %v4193_v38 = vunpack.c.l.bf16 %v4128_v57  ;;  %v3957_v4 = vmax.f32 %v11766_v44, %v3871_v30  ;;  %v981_v7 = vadd.f32 %v11954_v49, %v980_v60  ;;  %vm17821_vm11 = vmmov %vm17791_vm1 }
 0x165   : > { %v4486_v24 = vunpack.c.l.bf16 %v4421_v35  ;;  %v4671_v54 = vpack.c.bf16 %v12008_v16, %v12015_v34  ;;  %v12030_v36 = vmax.f32 %v4354_v11, %v4565_v53  ;;  %v4056_v10 = vmax.f32 %v3956_v45, %v11572_v40  ;;  %v12212_v34 = vld [vmem:[#allocation4 + $0x20] sm:$0xf] }
 0x166   : > { %vm17807_vm10 = vnez %v17620_v52  ;;  %v4063_v5 = vmax.f32 %v3963_v48, %v12020_v2  ;;  %v4273_v32 = vrot.slane %v4193_v38, 1  ;;  %vm17808_vm12 = vnez %v17631_v8  ;;  %v12075_v38 = vld [vmem:[#allocation4 + $0x18] sm:$0xf] }
 0x167   : > { %v4121_v27 = vsel %vm17807_vm10, 0, %v11559_v46  ;;  %v4566_v58 = vrot.slane %v4486_v24, 2  ;;  %v4122_v15 = vsel %vm17808_vm12, 0, %v11657_v28  ;;  %v1029_v39 = vmax.f32 %v981_v7, 0.0 }
 0x168   : > { %v12040_v44 = vunpack.c.l.bf16 %v4121_v27  ;;  %v4187_v30 = vunpack.c.l.bf16 %v4122_v15  ;;  %vm17809_vm8 = vnez %v17647_v42  ;;  %v4274_v19 = vsel %vm17810_vm9, %v4271_v13, %v4273_v32 }
 0x169   : > { %v4414_v40 = vsel %vm17809_vm8, 0, %v11559_v46  ;;  %v4057_v52 = vmax.f32 %v3957_v4, %v11671_v18  ;;  %vm17811_vm0 = vnez %v17656_v23  ;;  %v1486_v8 = vpack.c.bf16 %v1029_v39, %v1029_v39 }
 0x16a   : > { %v4415_v0 = vsel %vm17811_vm0, 0, %v11657_v28  ;;  %v12050_v41 = vunpack.c.l.bf16 %v4414_v40  ;;  %v4672_v3 = vpack.c.bf16 %v12030_v36, %v12003_v33  ;;  %v4259_v56 = vrot.slane %v12040_v44, 1  ;;  %v1556_v31 = vld [vmem:[#allocation4 + $0x50] sm:$0xf] }
 0x16b   : > { %v4261_v22 = vrot.slane %v4187_v30, 1  ;;  %v4355_v42 = vmax.f32 %v11992_v21, %v4274_v19  ;;  %v4567_v46 = vsel %vm17812_vm6, %v4564_v29, %v4566_v58  ;;  %v4480_v13 = vunpack.c.l.bf16 %v4415_v0  ;;  %1519 = vst.msk [vmem:[#allocation4 + $0x54] sm:$0xf] %vm17813_vm2, %v1486_v8  ;;  %v983_v21 = vpop.f32.mrf.mxu0 }
 0x16c   : > { %v1777_v18 = vshrl.u32 %v11840_v59, 16  ;;  %v4129_v23 = vsel %vm11873_vm14, 0, %v1556_v31  ;;  %v4422_v28 = vsel %vm11884_vm4, 0, %v1556_v31  ;;  %v4552_v53 = vrot.slane %v12050_v41, 2  ;;  %vm17818_vm14 = vmmov %vm17805_vm5 }
 0x16d   : > { %v4262_v11 = vsel %vm17814_vm3, %v4259_v56, %v4261_v22  ;;  %v12067_v45 = vunpack.c.l.bf16 %v4129_v23  ;;  %v12069_v29 = vunpack.c.l.bf16 %v4422_v28  ;;  %v17816_v48 = vrot.slane %v11825_v1, 1  ;;  %vm17820_vm4 = vmmov %vm17805_vm5  ;;  %v17825_v23 = vld [vmem:[#allocation24_spill] sm:$0xff] }
 0x16e   : > { %v4349_v63 = vmax.f32 %v4056_v10, %v4262_v11  ;;  %v984_v35 = vadd.f32 %v11954_v49, %v983_v21  ;;  %v4554_v60 = vrot.slane %v4480_v13, 2  ;;  %v12077_v24 = vrot.slane %v1777_v18, 7  ;;  %vm17823_vm1 = vmmov %vm17820_vm4  ;;  %v17829_v21 = vld [vmem:[#allocation23_spill] sm:$0xff] }
 0x16f   : > { %17815 = vst [vmem:[#allocation37_spill] sm:$0xff] %v12069_v29  ;;  %v4264_v57 = vsel %vm17817_vm13, %v4261_v22, %v17816_v48  ;;  %v17408_v4 = vrot.slane %v12067_v45, 1  ;;  %v17407_v7 = vrot.slane %v12069_v29, 2  ;;  %v4648_v27 = vmax.f32 %v4355_v42, %v4567_v46  ;;  %vm17824_vm5 = vmmov %vm17813_vm2  ;;  %v17830_v48 = vld [vmem:[#allocation22_spill] sm:$0xff] }
 0x170   : > { %v4350_v20 = vmax.f32 %v4057_v52, %v4264_v57  ;;  %v1798_v15 = vshll.u32 %v11054_v62, 16  ;;  %v1030_v39 = vmax.f32 %v984_v35, 0.0  ;;  %v4555_v1 = vsel %vm17818_vm14, %v4552_v53, %v4554_v60  ;;  %v17833_v35 = vld [vmem:[#allocation21_spill] sm:$0xff] }
 0x171   : > { %v17819_v10 = vrot.slane %v11865_v47, 2  ;;  %v1784_v40 = vrot.slane %v12077_v24, 4  ;;  %v4276_v19 = vsel %vm17821_vm11, %v4273_v32, %v17408_v4  ;;  %v12092_v52 = vmax.f32 %v4349_v63, %v4555_v1  ;;  %v17832_v63 = vld [vmem:[#allocation19_spill] sm:$0xff]  ;;  %vm17843_vm11 = vmmov %vm17824_vm5 }
 0x172   : > { %v12097_v62 = vunpack.c.l.bf16 %v12075_v38  ;;  %v1487_v8 = vpack.c.bf16 %v1030_v39, %v1030_v39  ;;  %v4356_v22 = vmax.f32 %v4063_v5, %v4276_v19  ;;  %vm17822_vm7 = vnez %v17591_v25  ;;  %v12122_v1 = vld [vmem:[#allocation4 + $0x1c] sm:$0xf] }
 0x173   : > { %v4557_v30 = vsel %vm17820_vm4, %v4554_v60, %v17819_v10  ;;  %v1792_v47 = vsel %vm17822_vm7, %v1784_v40, %v11095_v26  ;;  %v1800_v31 = vor.u32 %v1798_v15, %v11076_v14  ;;  %v4569_v42 = vsel %vm17823_vm1, %v4566_v58, %v17407_v7  ;;  %v17827_v14 = vld [vmem:[#allocation18_spill] sm:$0xff]  ;;  %v985_v57 = vpop.f32.mrf.mxu0 }
 0x174   : > { %v12094_v0 = vmax.f32 %v4350_v20, %v4557_v30  ;;  %v2061_v46 = vunpack.c.l.b16 %v1792_v47  ;;  %v2062_v13 = vunpack.c.h.b16 %v1792_v47  ;;  %1520 = vst.msk [vmem:[#allocation4 + $0x58] sm:$0xf] %vm17824_vm5, %v1487_v8  ;;  %v4649_v18 = vmax.f32 %v4356_v22, %v4569_v42  ;;  %v12128_v30 = vld [vmem:[#allocation6 + $0x18] sm:$0xff] }
 0x175   : > { %v1801_v5 = vsel %vm17822_vm7, %v11126_v43, %v1800_v31  ;;  %v17826_v28 = vand.u32 15, %v17825_v23  ;;  %v17828_v11 = vrot.slane %v17827_v14, 7  ;;  %vm17831_vm10 = vnez %v17830_v48 }
 0x176   : > { %v4670_v32 = vpack.c.bf16 %v12094_v0, %v12092_v52  ;;  %vm2065_vm12 = vcmp.ne.s32.totalorder %v2061_v46, %v17832_v63  ;;  %vm2066_vm8 = vcmp.ne.s32.totalorder %v2062_v13, %v17833_v35  ;;  %v2068_v20 = vunpack.c.l.b16 %v1801_v5 }
 0x177   : > { %vm2549_vm15 = vcmp.ge.s32.totalorder %v17826_v28, 14  ;;  %v2728_v58 = vsel %vm17831_vm10, %v17829_v21, %v17828_v11  ;;  %v2069_v60 = vunpack.c.h.b16 %v1801_v5  ;;  %v986_v15 = vadd.f32 %v11954_v49, %v985_v57  ;;  %vm12124_vm0 = vmpackc.low %vm2066_vm8, %vm2065_vm12  ;;  %v17839_v28 = vld [vmem:[#allocation26_spill] sm:$0xff] }
 0x178   : > { %vm2645_vm9 = vmpackc.low %vm2549_vm15, %vm2549_vm15  ;;  %v4673_v39 = vpack.c.bf16 %v4649_v18, %v4648_v27  ;;  %v2851_v19 = vunpack.c.l.b16 %v2728_v58  ;;  %vm2072_vm6 = vcmp.ne.s32.totalorder %v2068_v20, %v17832_v63  ;;  %v2256_v27 = vsel %vm12124_vm0, 0, %v12075_v38  ;;  %v17838_v18 = vld [vmem:[#allocation25_spill] sm:$0xff] }
 0x179   : > { %v12131_v40 = vsel %vm2645_vm9, 65537, %v12128_v30  ;;  %vm2073_vm2 = vcmp.ne.s32.totalorder %v2069_v60, %v17833_v35  ;;  %v1031_v22 = vmax.f32 %v986_v15, 0.0  ;;  %v12143_v31 = vunpack.c.l.bf16 %v2256_v27  ;;  %v17840_v60 = vld [vmem:[#allocation20_spill] sm:$0xff] }
 0x17a   : > { %v17412_v8 = vrot.slane %v12131_v40, 7  ;;  %4722 = vmatpush.bf16.msra.mxu1 %v4673_v39  ;;  %vm12139_vm3 = vmpackc.low %vm2073_vm2, %vm2072_vm6  ;;  %v2852_v42 = vunpack.c.h.b16 %v2728_v58  ;;  %vm2855_vm13 = vcmp.ne.s32.totalorder %v2851_v19, %v17832_v63  ;;  %v3433_v5 = vsel %vm12124_vm0, 0, %v17838_v18 }
 0x17b   : > { %v2257_v46 = vsel %vm12139_vm3, 0, %v12122_v1  ;;  %v3434_v14 = vsel %vm12139_vm3, 0, %v17839_v28  ;;  %v1488_v11 = vpack.c.bf16 %v1031_v22, %v1031_v22  ;;  %v12158_v58 = vunpack.c.l.bf16 %v12122_v1  ;;  %v988_v18 = vpop.f32.mrf.mxu0  ;;  %vm17858_vm6 = vmmov %vm17843_vm11 }
 0x17c   : > { %v2723_v13 = vrot.slane %v17412_v8, 4  ;;  %v2322_v57 = vunpack.c.l.bf16 %v2257_v46  ;;  %vm2856_vm14 = vcmp.ne.s32.totalorder %v2852_v42, %v17833_v35  ;;  %v17411_v20 = vrot.slane %v12143_v31, 1 }
 0x17d   : > { %vm12165_vm4 = vmpackc.low %vm2856_vm14, %vm2855_vm13  ;;  %v12169_v19 = vunpack.c.l.bf16 %v3433_v5  ;;  %v3499_v27 = vunpack.c.l.bf16 %v3434_v14  ;;  %1521 = vst.msk [vmem:[#allocation4 + $0x5c] sm:$0xf] %vm17843_vm11, %v1488_v11  ;;  %v17844_v14 = vld [vmem:[#allocation28_spill] sm:$0xff]  ;;  %v989_v33 = vadd.f32 %v11954_v49, %v988_v18  ;;  %vm17845_vm1 = vcmask 1046528  }
 0x17e   : > { %v2725_v15 = vsel %vm17831_vm10, %v2723_v13, %v17840_v60  ;;  %4723 = vmatpush.bf16.msra.mxu1 %v4672_v3  ;;  %v2395_v22 = vrot.slane %v2322_v57, 1  ;;  %v3040_v13 = vsel %vm12165_vm4, 0, %v12122_v1  ;;  %v3727_v5 = vsel %vm12165_vm4, 0, %v17839_v28  ;;  %v17846_v3 = vld [vmem:[#allocation27_spill] sm:$0xff]  ;;  %vm17848_vm5 = vmmov %vm17845_vm1 }
 0x17f   : > { %v2844_v42 = vunpack.c.l.b16 %v2725_v15  ;;  %v2845_v46 = vunpack.c.h.b16 %v2725_v15  ;;  %v3105_v7 = vunpack.c.l.bf16 %v3040_v13  ;;  %v3571_v4 = vrot.slane %v3499_v27, 1  ;;  %vm17853_vm9 = vmmov %vm17845_vm1 }
 0x180   : > { %v4119_v11 = vsel %vm12124_vm0, 0, %v17844_v14  ;;  %v2396_v36 = vsel %vm17845_vm1, %v17411_v20, %v2395_v22  ;;  %v17847_v57 = vrot.slane %v17846_v3, 1  ;;  %v17414_v10 = vrot.slane %v12169_v19, 1  ;;  %vm17860_vm2 = vmmov %vm17845_vm1 }
 0x181   : > { %vm2848_vm15 = vcmp.ne.s32.totalorder %v2844_v42, %v17832_v63  ;;  %vm2849_vm12 = vcmp.ne.s32.totalorder %v2845_v46, %v17833_v35  ;;  %v3178_v28 = vrot.slane %v3105_v7, 2  ;;  %v1032_v13 = vmax.f32 %v989_v33, 0.0  ;;  %v17854_v46 = vld [vmem:[#allocation33_spill] sm:$0xff]  ;;  %vm17871_vm11 = vmmov %vm17845_vm1 }
 0x182   : > { %v2398_v15 = vsel %vm17848_vm5, %v2395_v22, %v17847_v57  ;;  %4724 = vmatpush.bf16.msra.mxu1 %v4671_v54  ;;  %v2485_v18 = vmax.f32 %v12097_v62, %v2396_v36  ;;  %vm12199_vm8 = vmpackc.low %vm2849_vm12, %vm2848_vm15  ;;  %v17851_v22 = vld [vmem:[#allocation35_spill] sm:$0xff]  ;;  %v17855_v33 = vrot.slane %v17854_v46, 2  ;;  %vm17856_vm0 = vcmask 1045504   ;;  %v17857_v36 = vld [vmem:[#allocation32_spill] sm:$0xff] }
 0x183   : > { %v2486_v27 = vmax.f32 %v12158_v58, %v2398_v15  ;;  %v17852_v42 = vrot.slane %v17851_v22, 1  ;;  %v3792_v15 = vunpack.c.l.bf16 %v3727_v5  ;;  %v3039_v7 = vsel %vm12199_vm8, 0, %v12075_v38  ;;  %vm17864_vm13 = vmmov %vm17856_vm0 }
 0x184   : > { %v3181_v16 = vsel %vm17856_vm0, %v3178_v28, %v17855_v33  ;;  %v3726_v54 = vsel %vm12199_vm8, 0, %v12212_v34  ;;  %v4120_v22 = vsel %vm12139_vm3, 0, %v17857_v36  ;;  %v12220_v5 = vunpack.c.l.bf16 %v3039_v7  ;;  %v17861_v7 = vld [vmem:[#allocation36_spill] sm:$0xff]  ;;  %vm17863_vm3 = vmmov %vm17856_vm0 }
 0x185   : > { %v3574_v57 = vsel %vm17853_vm9, %v3571_v4, %v17852_v42  ;;  %v1489_v42 = vpack.c.bf16 %v1032_v13, %v1032_v13  ;;  %v3269_v37 = vmax.f32 %v2486_v27, %v3181_v16  ;;  %v12222_v61 = vunpack.c.l.bf16 %v3726_v54  ;;  %v17859_v13 = vld [vmem:[#allocation30_spill] sm:$0xff]  ;;  %vm17865_vm14 = vmmov %vm17856_vm0 }
 0x186   : > { %v3864_v20 = vrot.slane %v3792_v15, 2  ;;  %v12224_v46 = vunpack.c.l.bf16 %v4119_v11  ;;  %v4185_v33 = vunpack.c.l.bf16 %v4120_v22  ;;  %v4412_v8 = vsel %vm12199_vm8, 0, %v17844_v14  ;;  %4725 = vmatpush.bf16.msra.mxu1 %v4670_v32  ;;  %v990_v15 = vpop.f32.mrf.mxu0  ;;  %vm17873_vm5 = vmmov %vm17858_vm6 }
 0x187   : > { %1522 = vst.msk [vmem:[#allocation4 + $0x60] sm:$0xf] %vm17858_vm6, %v1489_v42  ;;  %v17418_v47 = vrot.slane %v12220_v5, 2  ;;  %v3369_v27 = vmax.f32 %v3269_v37, %v17859_v13  ;;  %v4413_v11 = vsel %vm12165_vm4, 0, %v17857_v36  ;;  %v3572_v3 = vsel %vm17860_vm2, %v17414_v10, %v3571_v4  ;;  %vm17866_vm4 = vmmov %vm17845_vm1  ;;  %v17870_v10 = vld [vmem:[#allocation34_spill] sm:$0xff] }
 0x188   : > { %v17413_v14 = vrot.slane %v12222_v61, 2  ;;  %v17862_v16 = vrot.slane %v17861_v7, 2  ;;  %v12245_v0 = vunpack.c.l.bf16 %v4412_v8  ;;  %v991_v32 = vadd.f32 %v11954_v49, %v990_v15  ;;  %v12255_v7 = vld [vmem:[#allocation4 + $0x10] sm:$0xf]  ;;  %vm17872_vm1 = vmmov %vm17856_vm0 }
 0x189   : > { %v3179_v37 = vsel %vm17864_vm13, %v17418_v47, %v3178_v28  ;;  %v3662_v39 = vmax.f32 %v3369_v27, %v3574_v57  ;;  %v4257_v54 = vrot.slane %v4185_v33, 1  ;;  %v17417_v22 = vrot.slane %v12224_v46, 1  ;;  %v12261_v57 = vld [vmem:[#allocation4 + $0x14] sm:$0xf]  ;;  %vm17874_vm15 = vmmov %vm17856_vm0 }
 0x18a   : > { %v3867_v52 = vsel %vm17863_vm3, %v3864_v20, %v17862_v16  ;;  %v3268_v36 = vmax.f32 %v2485_v18, %v3179_v37  ;;  %v3865_v4 = vsel %vm17865_vm14, %v17413_v14, %v3864_v20  ;;  %v4478_v42 = vunpack.c.l.bf16 %v4413_v11  ;;  %v17867_v18 = vld [vmem:[#allocation29_spill] sm:$0xff]  ;;  %v17868_v37 = vld [vmem:[#allocation16_spill] sm:$0xff] }
 0x18b   : > { %v1033_v8 = vmax.f32 %v991_v32, 0.0  ;;  %v3955_v16 = vmax.f32 %v3662_v39, %v3867_v52  ;;  %v4260_v15 = vsel %vm17866_vm4, %v4257_v54, %v4259_v56  ;;  %v17415_v28 = vrot.slane %v12245_v0, 2 }
 0x18c   : > { %v3368_v33 = vmax.f32 %v3268_v36, %v17867_v18  ;;  %v4550_v27 = vrot.slane %v4478_v42, 2  ;;  %v12265_v20 = vadd.s32 24, %v17868_v37  ;;  %v1780_v11 = vshll.u32 %v11840_v59, 16 }
 0x18d   : > { %v1490_v14 = vpack.c.bf16 %v1033_v8, %v1033_v8  ;;  %v4055_v32 = vmax.f32 %v3955_v16, %v17870_v10  ;;  %v4258_v44 = vsel %vm17871_vm11, %v17417_v22, %v4257_v54  ;;  %v12273_v56 = vunpack.c.l.bf16 %v12255_v7  ;;  %vm17883_vm11 = vmmov %vm17872_vm1 }
 0x18e   : > { %17869 = vst [vmem:[#allocation18_spill] sm:$0xff] %v12265_v20  ;;  %v3661_v52 = vmax.f32 %v3368_v33, %v3572_v3  ;;  %v4551_v39 = vsel %vm17872_vm1, %v17415_v28, %v4550_v27  ;;  %v1106_v36 = vand.u32 15, %v12265_v20  ;;  %v12280_v42 = vunpack.c.l.bf16 %v12261_v57 }
 0x18f   : > { %1523 = vst.msk [vmem:[#allocation4 + $0x64] sm:$0xf] %vm17873_vm5, %v1490_v14  ;;  %v4348_v59 = vmax.f32 %v4055_v32, %v4260_v15  ;;  %v4553_v10 = vsel %vm17874_vm15, %v4550_v27, %v4552_v53  ;;  %v1782_v54 = vor.u32 %v1780_v11, %v12077_v24  ;;  %v17875_v3 = vrot.slane %v12131_v40, 7  ;;  %v17877_v24 = vld [vmem:[#allocation31_spill] sm:$0xff] }
 0x190   : > { %v3954_v16 = vmax.f32 %v3661_v52, %v3865_v4  ;;  %vm1572_vm12 = vcmp.ge.s32.totalorder %v1106_v36, 15  ;;  %vm2547_vm8 = vcmp.ge.s32.totalorder %v1106_v36, 14  ;;  %v12296_v53 = vadd.s32 8, %v17868_v37 }
 0x191   : > { %v2722_v8 = vsel %vm17831_vm10, %v17829_v21, %v17875_v3  ;;  %v4641_v28 = vmax.f32 %v4348_v59, %v4553_v10  ;;  %vm1668_vm9 = vmpackc.low %vm1572_vm12, %vm1572_vm12  ;;  %v1783_v41 = vsel %vm17822_vm7, %v11126_v43, %v1782_v54  ;;  %v17882_v20 = vrot.slane %v12220_v5, 2 }
 0x192   : > { %v2837_v33 = vunpack.c.l.b16 %v2722_v8  ;;  %v2838_v14 = vunpack.c.h.b16 %v2722_v8  ;;  %17876 = vst [vmem:[#allocation23_spill] sm:$0xff] %v12296_v53  ;;  %v4054_v40 = vmax.f32 %v3954_v16, %v17877_v24  ;;  %v12300_v15 = vsel %vm1668_vm9, 65537, %v12128_v30  ;;  %vm2643_vm0 = vmpackc.low %vm2547_vm8, %vm2547_vm8 }
 0x193   : > { %v2054_v27 = vunpack.c.l.b16 %v1783_v41  ;;  %v2055_v4 = vunpack.c.h.b16 %v1783_v41  ;;  %v1759_v11 = vshrl.u32 %v12300_v15, 16  ;;  %v12304_v32 = vsel %vm2643_vm0, 65537, %v12128_v30 }
 0x194   : > { %vm2841_vm6 = vcmp.ne.s32.totalorder %v2837_v33, %v17832_v63  ;;  %vm2842_vm2 = vcmp.ne.s32.totalorder %v2838_v14, %v17833_v35  ;;  %v4347_v52 = vmax.f32 %v4054_v40, %v4258_v44  ;;  %v17416_v36 = vrot.slane %v12304_v32, 7 }
 0x195   : > { %vm2058_vm3 = vcmp.ne.s32.totalorder %v2054_v27, %v17832_v63  ;;  %vm2059_vm13 = vcmp.ne.s32.totalorder %v2055_v4, %v17833_v35  ;;  %vm12311_vm14 = vmpackc.low %vm2842_vm2, %vm2841_vm6  ;;  %v12315_v10 = vrot.slane %v1759_v11, 7  ;;  %vm17885_vm1 = vcmask 1046528  }
 0x196   : > { %vm12317_vm4 = vmpackc.low %vm2059_vm13, %vm2058_vm3  ;;  %v3038_v44 = vsel %vm12311_vm14, 0, %v12261_v57  ;;  %v3725_v3 = vsel %vm12311_vm14, 0, %v12122_v1  ;;  %v4640_v16 = vmax.f32 %v4347_v52, %v4551_v39  ;;  %v2717_v41 = vrot.slane %v17416_v36, 4 }
 0x197   : > { %v2255_v33 = vsel %vm12317_vm4, 0, %v12261_v57  ;;  %v3103_v14 = vunpack.c.l.bf16 %v3038_v44  ;;  %v1766_v24 = vrot.slane %v12315_v10, 4  ;;  %v3432_v27 = vsel %vm12317_vm4, 0, %v12122_v1  ;;  %vm17889_vm6 = vmmov %vm17885_vm1 }
 0x198   : > { %v2320_v40 = vunpack.c.l.bf16 %v2255_v33  ;;  %v3790_v4 = vunpack.c.l.bf16 %v3725_v3  ;;  %v4669_v11 = vpack.c.bf16 %v4641_v28, %v4640_v16  ;;  %v2719_v39 = vsel %vm17831_vm10, %v2717_v41, %v17840_v60  ;;  %v10688_v3 = vld [vmem:[#allocation4 + $0x24] sm:$0xf]  ;;  %vm17891_vm2 = vmmov %vm17883_vm11 }
 0x199   : > { %v3174_v52 = vrot.slane %v3103_v14, 2  ;;  %v3497_v8 = vunpack.c.l.bf16 %v3432_v27  ;;  %v1774_v36 = vsel %vm17822_vm7, %v1766_v24, %v11095_v26  ;;  %v2830_v22 = vunpack.c.l.b16 %v2719_v39  ;;  %vm17892_vm3 = vmmov %vm17885_vm1 }
 0x19a   : > { %v2391_v44 = vrot.slane %v2320_v40, 1  ;;  %v2831_v47 = vunpack.c.h.b16 %v2719_v39  ;;  %4726 = vmatpush.bf16.msra.mxu1 %v4669_v11  ;;  %v2047_v33 = vunpack.c.l.b16 %v1774_v36  ;;  %v2048_v23 = vunpack.c.h.b16 %v1774_v36  ;;  %vm17893_vm13 = vmmov %vm17891_vm2 }
 0x19b   : > { %v3177_v28 = vsel %vm17883_vm11, %v3174_v52, %v17882_v20  ;;  %v4411_v16 = vsel %vm12311_vm14, 0, %v10688_v3  ;;  %v17884_v41 = vrot.slane %v12143_v31, 1  ;;  %vm2834_vm5 = vcmp.ne.s32.totalorder %v2830_v22, %v17832_v63  ;;  %vm17894_vm14 = vmmov %vm17885_vm1 }
 0x19c   : > { %vm2835_vm15 = vcmp.ne.s32.totalorder %v2831_v47, %v17833_v35  ;;  %v3567_v24 = vrot.slane %v3497_v8, 1  ;;  %vm2051_vm12 = vcmp.ne.s32.totalorder %v2047_v33, %v17832_v63  ;;  %vm2052_vm8 = vcmp.ne.s32.totalorder %v2048_v23, %v17833_v35  ;;  %vm17896_vm11 = vmmov %vm17885_vm1 }
 0x19d   : > { %v2394_v14 = vsel %vm17885_vm1, %v2391_v44, %v17884_v41  ;;  %vm12356_vm9 = vmpackc.low %vm2835_vm15, %vm2834_vm5  ;;  %v3860_v36 = vrot.slane %v3790_v4, 2  ;;  %v17888_v22 = vrot.slane %v12169_v19, 1  ;;  %v4118_v59 = vsel %vm12317_vm4, 0, %v10688_v3 }
 0x19e   : > { %v2484_v5 = vmax.f32 %v12280_v42, %v2394_v14  ;;  %vm2053_vm0 = vmpackc.low %vm2052_vm8, %vm2051_vm12  ;;  %v3037_v31 = vsel %vm12356_vm9, 0, %v12255_v7  ;;  %v3724_v23 = vsel %vm12356_vm9, 0, %v12075_v38  ;;  %v17890_v54 = vrot.slane %v12222_v61, 2 }
 0x19f   : > { %v3570_v47 = vsel %vm17889_vm6, %v3567_v24, %v17888_v22  ;;  %v2254_v8 = vsel %vm2053_vm0, 0, %v12255_v7  ;;  %v12372_v40 = vunpack.c.l.bf16 %v3037_v31  ;;  %v3431_v4 = vsel %vm2053_vm0, 0, %v12075_v38  ;;  %vm17895_vm4 = vmmov %vm17891_vm2 }
 0x1a0   : > { %v3267_v27 = vmax.f32 %v2484_v5, %v3177_v28  ;;  %v12375_v11 = vunpack.c.l.bf16 %v2254_v8  ;;  %v12377_v39 = vunpack.c.l.bf16 %v3431_v4  ;;  %v12379_v19 = vunpack.c.l.bf16 %v3724_v23  ;;  %vm17899_vm12 = vmmov %vm17891_vm2 }
 0x1a1   : > { %v4117_v33 = vsel %vm2053_vm0, 0, %v12212_v34  ;;  %v3863_v3 = vsel %vm17891_vm2, %v3860_v36, %v17890_v54  ;;  %v4183_v31 = vunpack.c.l.bf16 %v4118_v59  ;;  %v17421_v5 = vrot.slane %v12372_v40, 2  ;;  %v993_v54 = vpop.f32.mrf.mxu0  ;;  %vm17901_vm8 = vmmov %vm17891_vm2 }
 0x1a2   : > { %v3367_v41 = vmax.f32 %v3267_v27, %v12158_v58  ;;  %v12386_v14 = vunpack.c.l.bf16 %v4117_v33  ;;  %v17420_v28 = vrot.slane %v12375_v11, 1  ;;  %v17422_v22 = vrot.slane %v12377_v39, 1 }
 0x1a3   : > { %v4410_v23 = vsel %vm12356_vm9, 0, %v12212_v34  ;;  %v17425_v27 = vrot.slane %v12379_v19, 2  ;;  %v4253_v4 = vrot.slane %v4183_v31, 1  ;;  %v3175_v33 = vsel %vm17893_vm13, %v17421_v5, %v3174_v52  ;;  %v12416_v52 = vld [vmem:[#allocation4 + $0xc] sm:$0xf] }
 0x1a4   : > { %v3660_v8 = vmax.f32 %v3367_v41, %v3570_v47  ;;  %v17424_v61 = vrot.slane %v12386_v14, 1  ;;  %v2392_v59 = vsel %vm17892_vm3, %v17420_v28, %v2391_v44  ;;  %v3568_v20 = vsel %vm17894_vm14, %v17422_v22, %v3567_v24  ;;  %v12414_v28 = vld [vmem:[#allocation4 + $0x8] sm:$0xf] }
 0x1a5   : > { %v12405_v34 = vunpack.c.l.bf16 %v4410_v23  ;;  %v2483_v47 = vmax.f32 %v12273_v56, %v2392_v59  ;;  %v3861_v41 = vsel %vm17895_vm4, %v17425_v27, %v3860_v36  ;;  %v17897_v5 = vrot.slane %v12224_v46, 1 }
 0x1a6   : > { %v3953_v31 = vmax.f32 %v3660_v8, %v3863_v3  ;;  %v4254_v44 = vsel %vm17896_vm11, %v17424_v61, %v4253_v4  ;;  %v4476_v23 = vunpack.c.l.bf16 %v4411_v16  ;;  %v994_v22 = vadd.f32 %v11954_v49, %v993_v54 }
 0x1a7   : > { %v4256_v24 = vsel %vm17885_vm1, %v4253_v4, %v17897_v5  ;;  %v17428_v59 = vrot.slane %v12405_v34, 2  ;;  %v3266_v29 = vmax.f32 %v2483_v47, %v3175_v33  ;;  %v17898_v3 = vand.u32 15, %v12296_v53 }
 0x1a8   : > { %v4053_v36 = vmax.f32 %v3953_v31, %v17859_v13  ;;  %v1762_v8 = vshll.u32 %v12300_v15, 16  ;;  %v4546_v61 = vrot.slane %v4476_v23, 2  ;;  %v1034_v27 = vmax.f32 %v994_v22, 0.0 }
 0x1a9   : > { %vm1570_vm5 = vcmp.ge.s32.totalorder %v17898_v3, 15  ;;  %v17429_v46 = vunpack.c.l.bf16 %v12414_v28  ;;  %v17427_v5 = vunpack.c.l.bf16 %v12416_v52  ;;  %v3366_v16 = vmax.f32 %v3266_v29, %v12097_v62 }
 0x1aa   : > { %vm1666_vm15 = vmpackc.low %vm1570_vm5, %vm1570_vm5  ;;  %v4346_v4 = vmax.f32 %v4053_v36, %v4256_v24  ;;  %v1764_v13 = vor.u32 %v1762_v8, %v12315_v10  ;;  %v4547_v54 = vsel %vm17899_vm12, %v17428_v59, %v4546_v61  ;;  %v17900_v15 = vrot.slane %v12245_v0, 2 }
 0x1ab   : > { %v12431_v49 = vsel %vm1666_vm15, 65537, %v12128_v30  ;;  %v1491_v33 = vpack.c.bf16 %v1034_v27, %v1034_v27  ;;  %v3659_v31 = vmax.f32 %v3366_v16, %v3568_v20  ;;  %v17902_v24 = vmov %v17898_v3 }
 0x1ac   : > { %v4549_v22 = vsel %vm17901_vm8, %v4546_v61, %v17900_v15  ;;  %v1741_v47 = vshrl.u32 %v12431_v49, 16  ;;  %v1765_v29 = vsel %vm17822_vm7, %v11126_v43, %v1764_v13  ;;  %vm2545_vm9 = vcmp.ge.s32.totalorder %v17902_v24, 14 }
 0x1ad   : > { %v4639_v23 = vmax.f32 %v4346_v4, %v4549_v22  ;;  %vm17903_vm0 = vcmask 519168   ;;  %v2040_v36 = vunpack.c.l.b16 %v1765_v29  ;;  %v2041_v0 = vunpack.c.h.b16 %v1765_v29  ;;  %vm2641_vm6 = vmpackc.low %vm2545_vm9, %vm2545_vm9 }
 0x1ae   : > { %1524 = vst.msk [vmem:[#allocation4 + $0x68] sm:$0xf] %vm17903_vm0, %v1491_v33  ;;  %v12447_v10 = vrot.slane %v1741_v47, 7  ;;  %v17904_v27 = vrot.slane %v12304_v32, 7  ;;  %v3952_v20 = vmax.f32 %v3659_v31, %v3861_v41  ;;  %v12455_v3 = vsel %vm2641_vm6, 65537, %v12128_v30 }
 0x1af   : > { %vm2044_vm2 = vcmp.ne.s32.totalorder %v2040_v36, %v17832_v63  ;;  %vm2045_vm3 = vcmp.ne.s32.totalorder %v2041_v0, %v17833_v35  ;;  %v17426_v13 = vrot.slane %v12455_v3, 7  ;;  %v1744_v41 = vshll.u32 %v12431_v49, 16 }
 0x1b0   : > { %v2716_v61 = vsel %vm17831_vm10, %v17829_v21, %v17904_v27  ;;  %v1748_v4 = vrot.slane %v12447_v10, 4  ;;  %v4052_v32 = vmax.f32 %v3952_v20, %v17867_v18  ;;  %vm12462_vm13 = vmpackc.low %vm2045_vm3, %vm2044_vm2  ;;  %vm17912_vm12 = vcmask 1046528  }
 0x1b1   : > { %v2823_v8 = vunpack.c.l.b16 %v2716_v61  ;;  %v2824_v16 = vunpack.c.h.b16 %v2716_v61  ;;  %v2253_v33 = vsel %vm12462_vm13, 0, %v12416_v52  ;;  %v2711_v18 = vrot.slane %v17426_v13, 4  ;;  %vm17916_vm6 = vmmov %vm17912_vm12 }
 0x1b2   : > { %v1756_v22 = vsel %vm17822_vm7, %v1748_v4, %v11095_v26  ;;  %v3430_v31 = vsel %vm12462_vm13, 0, %v12261_v57  ;;  %v4345_v29 = vmax.f32 %v4052_v32, %v4254_v44  ;;  %v2318_v0 = vunpack.c.l.bf16 %v2253_v33  ;;  %vm17919_vm3 = vmmov %vm17916_vm6 }
 0x1b3   : > { %vm2827_vm14 = vcmp.ne.s32.totalorder %v2823_v8, %v17832_v63  ;;  %vm2828_vm4 = vcmp.ne.s32.totalorder %v2824_v16, %v17833_v35  ;;  %v2033_v24 = vunpack.c.l.b16 %v1756_v22  ;;  %v2034_v36 = vunpack.c.h.b16 %v1756_v22 }
 0x1b4   : > { %vm12477_vm11 = vmpackc.low %vm2828_vm4, %vm2827_vm14  ;;  %v2713_v27 = vsel %vm17831_vm10, %v2711_v18, %v17840_v60  ;;  %v3495_v20 = vunpack.c.l.bf16 %v3430_v31  ;;  %v4638_v16 = vmax.f32 %v4345_v29, %v4547_v54  ;;  %v2387_v44 = vrot.slane %v2318_v0, 1 }
 0x1b5   : > { %v3036_v61 = vsel %vm12477_vm11, 0, %v12416_v52  ;;  %v3723_v8 = vsel %vm12477_vm11, 0, %v12261_v57  ;;  %vm2037_vm1 = vcmp.ne.s32.totalorder %v2033_v24, %v17832_v63  ;;  %vm2038_vm5 = vcmp.ne.s32.totalorder %v2034_v36, %v17833_v35  ;;  %vm17920_vm14 = vmmov %vm17919_vm3 }
 0x1b6   : > { %vm12495_vm15 = vmpackc.low %vm2038_vm5, %vm2037_vm1  ;;  %v2816_v32 = vunpack.c.l.b16 %v2713_v27  ;;  %v2817_v22 = vunpack.c.h.b16 %v2713_v27  ;;  %v3101_v33 = vunpack.c.l.bf16 %v3036_v61  ;;  %v3563_v18 = vrot.slane %v3495_v20, 1 }
 0x1b7   : > { %v4668_v13 = vpack.c.bf16 %v4639_v23, %v4638_v16  ;;  %v2252_v31 = vsel %vm12495_vm15, 0, %v12414_v28  ;;  %v17911_v54 = vrot.slane %v12375_v11, 1  ;;  %v3429_v24 = vsel %vm12495_vm15, 0, %v12255_v7  ;;  %vm17927_vm5 = vmmov %vm17919_vm3 }
 0x1b8   : > { %v12508_v36 = vunpack.c.l.bf16 %v2252_v31  ;;  %vm2820_vm8 = vcmp.ne.s32.totalorder %v2816_v32, %v17832_v63  ;;  %vm2821_vm9 = vcmp.ne.s32.totalorder %v2817_v22, %v17833_v35  ;;  %v3170_v11 = vrot.slane %v3101_v33, 2 }
 0x1b9   : > { %v2390_v29 = vsel %vm17912_vm12, %v2387_v44, %v17911_v54  ;;  %4727 = vmatpush.bf16.msra.mxu1 %v4668_v13  ;;  %vm12514_vm0 = vmpackc.low %vm2821_vm9, %vm2820_vm8  ;;  %v12518_v27 = vunpack.c.l.bf16 %v3429_v24  ;;  %v17915_v61 = vrot.slane %v12377_v39, 1  ;;  %v3788_v16 = vunpack.c.l.bf16 %v3723_v8 }
 0x1ba   : > { %v2482_v0 = vmax.f32 %v17427_v5, %v2390_v29  ;;  %v2385_v31 = vrot.slane %v12508_v36, 1  ;;  %v3035_v32 = vsel %vm12514_vm0, 0, %v12414_v28  ;;  %v3722_v13 = vsel %vm12514_vm0, 0, %v12255_v7 }
 0x1bb   : > { %v3566_v20 = vsel %vm17916_vm6, %v3563_v18, %v17915_v61  ;;  %v4115_v22 = vsel %vm12495_vm15, 0, %v12075_v38  ;;  %v12533_v33 = vunpack.c.l.bf16 %v3035_v32  ;;  %v17917_v39 = vrot.slane %v12372_v40, 2 }
 0x1bc   : > { %vm17918_vm2 = vcmask 1045504   ;;  %v3561_v54 = vrot.slane %v12518_v27, 1  ;;  %v12539_v29 = vunpack.c.l.bf16 %v3722_v13  ;;  %v2388_v24 = vsel %vm17919_vm3, %v2385_v31, %v2387_v44 }
 0x1bd   : > { %v3173_v8 = vsel %vm17918_vm2, %v3170_v11, %v17917_v39  ;;  %v3856_v5 = vrot.slane %v3788_v16, 2  ;;  %v4116_v4 = vsel %vm12462_vm13, 0, %v12122_v1  ;;  %v2481_v32 = vmax.f32 %v17429_v46, %v2388_v24  ;;  %vm17922_vm4 = vmmov %vm17918_vm2 }
 0x1be   : > { %v3265_v61 = vmax.f32 %v2482_v0, %v3173_v8  ;;  %v3168_v40 = vrot.slane %v12533_v33, 2  ;;  %v3564_v13 = vsel %vm17920_vm14, %v3561_v54, %v3563_v18  ;;  %v17430_v39 = vrot.slane %v12539_v29, 2  ;;  %vm17923_vm13 = vmmov %vm17918_vm2 }
 0x1bf   : > { %v17921_v44 = vrot.slane %v12379_v19, 2  ;;  %v12558_v16 = vunpack.c.l.bf16 %v4115_v22  ;;  %v4181_v15 = vunpack.c.l.bf16 %v4116_v4  ;;  %vm17924_vm1 = vmmov %vm17918_vm2  ;;  %v4408_v18 = vsel %vm12514_vm0, 0, %v12075_v38 }
 0x1c0   : > { %v3365_v59 = vmax.f32 %v3265_v61, %v12280_v42  ;;  %v3171_v8 = vsel %vm17923_vm13, %v3168_v40, %v3170_v11  ;;  %v3857_v24 = vsel %vm17924_vm1, %v17430_v39, %v3856_v5  ;;  %v4409_v19 = vsel %vm12477_vm11, 0, %v12122_v1  ;;  %vm17925_vm11 = vmmov %vm17919_vm3 }
 0x1c1   : > { %v3859_v0 = vsel %vm17922_vm4, %v3856_v5, %v17921_v44  ;;  %v3264_v61 = vmax.f32 %v2481_v32, %v3171_v8  ;;  %v4247_v4 = vrot.slane %v12558_v16, 1  ;;  %v4249_v44 = vrot.slane %v4181_v15, 1  ;;  %v1536_v15 = vld [vmem:[#allocation4] sm:$0xf]  ;;  %v1537_v8 = vld [vmem:[#allocation4 + $0x4] sm:$0xf]  ;;  %vm17928_vm12 = vmmov %vm17924_vm1 }
 0x1c2   : > { %v3658_v22 = vmax.f32 %v3365_v59, %v3566_v20  ;;  %v12573_v46 = vunpack.c.l.bf16 %v4408_v18  ;;  %v4474_v11 = vunpack.c.l.bf16 %v4409_v19  ;;  %v1746_v5 = vor.u32 %v1744_v41, %v12447_v10  ;;  %vm17930_vm8 = vmmov %vm17924_vm1 }
 0x1c3   : > { %v2019_v39 = vunpack.c.l.b16 %v11095_v26  ;;  %v3364_v38 = vmax.f32 %v3264_v61, %v12273_v56  ;;  %v4250_v1 = vsel %vm17925_vm11, %v4247_v4, %v4249_v44  ;;  %v17926_v59 = vrot.slane %v12386_v14, 1  ;;  %v12593_v14 = vpop.f32.mrf.mxu0 }
 0x1c4   : > { %v3951_v23 = vmax.f32 %v3658_v22, %v3859_v0  ;;  %v17431_v20 = vrot.slane %v12573_v46, 2  ;;  %v4542_v32 = vrot.slane %v4474_v11, 2  ;;  %v1747_v49 = vsel %vm17822_vm7, %v11126_v43, %v1746_v5 }
 0x1c5   : > { %v4252_v47 = vsel %vm17927_vm5, %v4249_v44, %v17926_v59  ;;  %v2020_v10 = vunpack.c.h.b16 %v11095_v26  ;;  %v3657_v41 = vmax.f32 %v3364_v38, %v3564_v13  ;;  %vm2023_vm15 = vcmp.ne.s32.totalorder %v2019_v39, %v17832_v63 }
 0x1c6   : > { %v4051_v0 = vmax.f32 %v3951_v23, %v12158_v58  ;;  %v2026_v18 = vunpack.c.l.b16 %v1747_v49  ;;  %v4543_v19 = vsel %vm17928_vm12, %v17431_v20, %v4542_v32  ;;  %v17929_v61 = vrot.slane %v12405_v34, 2 }
 0x1c7   : > { %vm2024_vm9 = vcmp.ne.s32.totalorder %v2020_v10, %v17833_v35  ;;  %v2027_v44 = vunpack.c.h.b16 %v1747_v49  ;;  %v3950_v13 = vmax.f32 %v3657_v41, %v3857_v24  ;;  %v2283_v39 = vunpack.c.l.bf16 %v1536_v15 }
 0x1c8   : > { %v4545_v22 = vsel %vm17930_vm8, %v4542_v32, %v17929_v61  ;;  %v4344_v11 = vmax.f32 %v4051_v0, %v4252_v47  ;;  %vm12602_vm0 = vmpackc.low %vm2024_vm9, %vm2023_vm15  ;;  %vm2030_vm6 = vcmp.ne.s32.totalorder %v2026_v18, %v17832_v63  ;;  %v2284_v34 = vunpack.c.l.bf16 %v1537_v8 }
 0x1c9   : > { %vm2031_vm2 = vcmp.ne.s32.totalorder %v2027_v44, %v17833_v35  ;;  %v2250_v5 = vsel %vm12602_vm0, 0, %v1536_v15  ;;  %v17933_v38 = vrot.slane %v12455_v3, 7  ;;  %v4050_v23 = vmax.f32 %v3950_v13, %v12097_v62  ;;  %v2543_v44 = vld [vmem:[#allocation4] sm:$0xe]  ;;  %v3719_v62 = vld [vmem:[#allocation4 + $0x8] sm:$0xe] }
 0x1ca   : > { %v4637_v59 = vmax.f32 %v4344_v11, %v4545_v22  ;;  %vm12616_vm3 = vmpackc.low %vm2031_vm2, %vm2030_vm6  ;;  %v2315_v32 = vunpack.c.l.bf16 %v2250_v5  ;;  %v2802_v49 = vunpack.c.l.b16 %v17840_v60  ;;  %v2803_v10 = vunpack.c.h.b16 %v17840_v60 }
 0x1cb   : > { %v2710_v24 = vsel %vm17831_vm10, %v17829_v21, %v17933_v38  ;;  %v2251_v15 = vsel %vm12616_vm3, 0, %v1537_v8  ;;  %v4343_v0 = vmax.f32 %v4050_v23, %v4250_v1  ;;  %v3427_v22 = vsel %vm12602_vm0, 0, %v12414_v28 }
 0x1cc   : > { %v2809_v3 = vunpack.c.l.b16 %v2710_v24  ;;  %v2810_v41 = vunpack.c.h.b16 %v2710_v24  ;;  %v2316_v18 = vunpack.c.l.bf16 %v2251_v15  ;;  %v2382_v61 = vrot.slane %v2315_v32, 1  ;;  %v998_v24 = vpop.f32.mrf.mxu0 }
 0x1cd   : > { %vm2806_vm14 = vcmp.ne.s32.totalorder %v2802_v49, %v17832_v63  ;;  %vm2807_vm4 = vcmp.ne.s32.totalorder %v2803_v10, %v17833_v35  ;;  %v4636_v13 = vmax.f32 %v4343_v0, %v4543_v19  ;;  %v3428_v5 = vsel %vm12616_vm3, 0, %v12416_v52 }
 0x1ce   : > { %vm2813_vm13 = vcmp.ne.s32.totalorder %v2809_v3, %v17832_v63  ;;  %vm2814_vm1 = vcmp.ne.s32.totalorder %v2810_v41, %v17833_v35  ;;  %v2383_v11 = vrot.slane %v2316_v18, 1  ;;  %vm12631_vm11 = vmpackc.low %vm2807_vm4, %vm2806_vm14  ;;  %v3492_v38 = vunpack.c.l.bf16 %v3427_v22 }
 0x1cf   : > { %vm12638_vm5 = vmpackc.low %vm2814_vm1, %vm2813_vm13  ;;  %v3033_v32 = vsel %vm12631_vm11, 0, %v2543_v44  ;;  %v3493_v49 = vunpack.c.l.bf16 %v3428_v5  ;;  %v3720_v19 = vsel %vm12631_vm11, 0, %v3719_v62  ;;  %v4113_v15 = vsel %vm12602_vm0, 0, %v12255_v7 }
 0x1d0   : > { %v4667_v10 = vpack.c.bf16 %v4637_v59, %v4636_v13  ;;  %vm17940_vm15 = vcmask 1046528   ;;  %v3034_v0 = vsel %vm12638_vm5, 0, %v1537_v8  ;;  %v3098_v22 = vunpack.c.l.bf16 %v3033_v32  ;;  %v4405_v8 = vld [vmem:[#allocation4 + $0x10] sm:$0xe] }
 0x1d1   : > { %v2384_v3 = vsel %vm17940_vm15, %v2382_v61, %v2383_v11  ;;  %vm17941_vm12 = vmmov %vm17940_vm15  ;;  %v3099_v5 = vunpack.c.l.bf16 %v3034_v0  ;;  %v3558_v62 = vrot.slane %v3492_v38, 1  ;;  %v3559_v20 = vrot.slane %v3493_v49, 1 }
 0x1d2   : > { %v2386_v41 = vsel %vm17941_vm12, %v2383_v11, %v2385_v31  ;;  %v2479_v18 = vmax.f32 %v2283_v39, %v2384_v3  ;;  %4728 = vmatpush.bf16.msra.mxu1 %v4667_v10  ;;  %v3721_v7 = vsel %vm12638_vm5, 0, %v12416_v52  ;;  %v3785_v58 = vunpack.c.l.bf16 %v3720_v19  ;;  %vm17942_vm8 = vmmov %vm17941_vm12 }
 0x1d3   : > { %v2480_v44 = vmax.f32 %v2284_v34, %v2386_v41  ;;  %v3165_v59 = vrot.slane %v3098_v22, 2  ;;  %v3166_v61 = vrot.slane %v3099_v5, 2  ;;  %v3786_v36 = vunpack.c.l.bf16 %v3721_v7  ;;  %vm17945_vm6 = vmmov %vm17942_vm8 }
 0x1d4   : > { %v4114_v31 = vsel %vm12616_vm3, 0, %v12261_v57  ;;  %v3560_v39 = vsel %vm17942_vm8, %v3558_v62, %v3559_v20  ;;  %v4178_v34 = vunpack.c.l.bf16 %v4113_v15  ;;  %vm17943_vm9 = vcmask 1045504   ;;  %v1000_v3 = vpop.f32.mrf.mxu0  ;;  %v12685_v62 = vld [vmem:[%s17574_s30] ss:$0 sm:$0xff]  ;;  %vm17951_vm14 = vmmov %vm17945_vm6  ;;  %s18169_s30 = sld [smem:[#allocation45_spill]] }
 0x1d5   : > { %v3167_v13 = vsel %vm17943_vm9, %v3165_v59, %v3166_v61  ;;  %vm17944_vm0 = vmmov %vm17943_vm9  ;;  %v3852_v38 = vrot.slane %v3786_v36, 2  ;;  %v4179_v32 = vunpack.c.l.bf16 %v4114_v31  ;;  %v3562_v10 = vsel %vm17945_vm6, %v3559_v20, %v3561_v54 }
 0x1d6   : > { %v3169_v11 = vsel %vm17944_vm0, %v3166_v61, %v3168_v40  ;;  %v3262_v49 = vmax.f32 %v2479_v18, %v3167_v13  ;;  %v4406_v47 = vsel %vm12631_vm11, 0, %v4405_v8  ;;  %v3851_v41 = vrot.slane %v3785_v58, 2  ;;  %vm17948_vm2 = vmmov %vm17944_vm0 }
 0x1d7   : > { %v3263_v19 = vmax.f32 %v2480_v44, %v3169_v11  ;;  %v4244_v15 = vrot.slane %v4178_v34, 1  ;;  %v4245_v0 = vrot.slane %v4179_v32, 1  ;;  %v4407_v33 = vsel %vm12638_vm5, 0, %v12261_v57  ;;  %vm17950_vm3 = vmmov %vm17944_vm0 }
 0x1d8   : > { %v17946_v40 = vunpack.c.l.bf16 %v12414_v28  ;;  %v17947_v18 = vunpack.c.l.bf16 %v12416_v52  ;;  %v4471_v27 = vunpack.c.l.bf16 %v4406_v47  ;;  %v4472_v5 = vunpack.c.l.bf16 %v4407_v33  ;;  %vm17952_vm4 = vmmov %vm17945_vm6  ;;  %v4013_v33 = vld [vmem:[#allocation4 + $0x8c] sm:$0xf] }
 0x1d9   : > { %v3853_v54 = vsel %vm17948_vm2, %v3851_v41, %v3852_v38  ;;  %v17949_v20 = vrot.slane %v12539_v29, 2  ;;  %v996_v57 = vadd.f32 %v12685_v62, %v12593_v14  ;;  %v999_v28 = vadd.f32 %v12685_v62, %v998_v24  ;;  %vm17953_vm13 = vmmov %vm17944_vm0 }
 0x1da   : > { %v3362_v22 = vmax.f32 %v3262_v49, %v17946_v40  ;;  %v3363_v44 = vmax.f32 %v3263_v19, %v17947_v18  ;;  %v4246_v7 = vsel %vm17951_vm14, %v4244_v15, %v4245_v0  ;;  %v4538_v58 = vrot.slane %v4472_v5, 2  ;;  %vm17959_vm8 = vmmov %vm17944_vm0 }
 0x1db   : > { %v3855_v1 = vsel %vm17950_vm3, %v3852_v38, %v17949_v20  ;;  %v1035_v59 = vmax.f32 %v996_v57, 0.0  ;;  %v1036_v61 = vmax.f32 %v999_v28, 0.0  ;;  %v1001_v29 = vadd.f32 %v12685_v62, %v1000_v3  ;;  %v12730_v57 = vld [vmem:[#allocation4 + $0x80] sm:$0xf] }
 0x1dc   : > { %v3655_v52 = vmax.f32 %v3362_v22, %v3560_v39  ;;  %v3656_v23 = vmax.f32 %v3363_v44, %v3562_v10  ;;  %v1078_v36 = vadd.s32 232, %v17868_v37  ;;  %v4248_v34 = vsel %vm17952_vm4, %v4245_v0, %v4247_v4  ;;  %v1003_v19 = vpop.f32.mrf.mxu0 }
 0x1dd   : > { %v4537_v14 = vrot.slane %v4471_v27, 2  ;;  %v1492_v13 = vpack.c.bf16 %v1035_v59, %v1035_v59  ;;  %v1493_v24 = vpack.c.bf16 %v1036_v61, %v1036_v61  ;;  %v1037_v39 = vmax.f32 %v1001_v29, 0.0  ;;  %v12737_v61 = vld [vmem:[#allocation4 + $0x84] sm:$0xf] }
 0x1de   : > { %v3948_v31 = vmax.f32 %v3655_v52, %v3853_v54  ;;  %v3949_v8 = vmax.f32 %v3656_v23, %v3855_v1  ;;  %v1080_v11 = vadd.s32 248, %v17868_v37  ;;  %v1288_v10 = vand.u32 15, %v1078_v36 }
 0x1df   : > { %v4539_v49 = vsel %vm17953_vm13, %v4537_v14, %v4538_v58  ;;  %vm17954_vm1 = vcmask 519168   ;;  %v1494_v47 = vpack.c.bf16 %v1037_v39, %v1037_v39  ;;  %v1004_v16 = vadd.f32 %v12685_v62, %v1003_v19 }
 0x1e0   : > { %v4048_v38 = vmax.f32 %v3948_v31, %v12273_v56  ;;  %v4049_v32 = vmax.f32 %v3949_v8, %v12280_v42  ;;  %1525 = vst.msk [vmem:[#allocation4 + $0x6c] sm:$0xf] %vm17954_vm1, %v1492_v13  ;;  %v1302_v4 = vand.u32 15, %v1080_v11  ;;  %vm1534_vm11 = vcmask 516096   ;;  %vm17955_vm5 = vmmov %vm17954_vm1 }
 0x1e1   : > { %1526 = vst.msk [vmem:[#allocation4 + $0x70] sm:$0xf] %vm17955_vm5, %v1493_v24  ;;  %vm1598_vm15 = vcmp.ge.s32.totalorder %v1288_v10, 15  ;;  %vm12703_vm12 = vcmp.ge.s32.totalorder %v1288_v10, 14  ;;  %v17958_v42 = vrot.slane %v12573_v46, 2  ;;  %vm17960_vm9 = vmmov %vm17954_vm1  ;;  %v1038_v0 = vmax.f32 %v1004_v16, 0.0 }
 0x1e2   : > { %v4341_v3 = vmax.f32 %v4048_v38, %v4246_v7  ;;  %v4342_v41 = vmax.f32 %v4049_v32, %v4248_v34  ;;  %1527 = vst.msk [vmem:[#allocation4 + $0x74] sm:$0xf] %vm17960_vm9, %v1494_v47  ;;  %vm1600_vm0 = vcmp.ge.s32.totalorder %v1302_v4, 15  ;;  %vm1694_vm6 = vmpackc.low %vm1598_vm15, %vm1598_vm15  ;;  %vm12711_vm2 = vcmp.ge.s32.totalorder %v1302_v4, 14 }
 0x1e3   : > { %v4541_v15 = vsel %vm17959_vm8, %v4538_v58, %v17958_v42  ;;  %1535 = vst.msk [vmem:[#allocation4 + $0x90] sm:$0x1] %vm1534_vm11, %v12128_v30  ;;  %vm1696_vm3 = vmpackc.low %vm1600_vm0, %vm1600_vm0  ;;  %v12717_v18 = vsel %vm1694_vm6, 65537, %v12128_v30  ;;  %v1495_v46 = vpack.c.bf16 %v1038_v0, %v1038_v0  ;;  %v17435_v29 = vunpack.c.l.bf16 %v12730_v57  ;;  %v12762_v42 = vld [vmem:[#allocation4 + $0x88] sm:$0xf] }
 0x1e4   : > { %v4634_v40 = vmax.f32 %v4341_v3, %v4539_v49  ;;  %v4635_v22 = vmax.f32 %v4342_v41, %v4541_v15  ;;  %v1728_v44 = vsel %vm1696_vm3, 65537, %v12128_v30  ;;  %v1993_v27 = vshrl.u32 %v12717_v18, 16  ;;  %vm2669_vm14 = vmpackc.low %vm12703_vm12, %vm12703_vm12  ;;  %v1005_v7 = vpop.f32.mrf.mxu0  ;;  %v1568_v15 = vld [vmem:[#allocation4 + $0x80] sm:$0x1] }
 0x1e5   : > { %v2011_v54 = vshrl.u32 %v1728_v44, 16  ;;  %v2014_v20 = vshll.u32 %v1728_v44, 16  ;;  %vm2671_vm4 = vmpackc.low %vm12711_vm2, %vm12711_vm2  ;;  %v12728_v1 = vsel %vm2669_vm14, 65537, %v12128_v30  ;;  %v1006_v36 = vadd.f32 %v12685_v62, %v1005_v7 }
 0x1e6   : > { %v4666_v5 = vpack.c.bf16 %v4635_v22, %v4634_v40  ;;  %vm17963_vm13 = vmmov %vm17954_vm1  ;;  %v12733_v28 = vrot.slane %v1993_v27, 7  ;;  %v2703_v52 = vsel %vm2671_vm4, 65537, %v12128_v30  ;;  %v17432_v23 = vrot.slane %v12728_v1, 7 }
 0x1e7   : > { %1528 = vst.msk [vmem:[#allocation4 + $0x78] sm:$0xf] %vm17963_vm13, %v1495_v46  ;;  %v2013_v58 = vrot.slane %v2011_v54, 7  ;;  %v2799_v59 = vrot.slane %v2703_v52, 7  ;;  %v17437_v34 = vunpack.c.l.bf16 %v12737_v61  ;;  %v1039_v39 = vmax.f32 %v1006_v36, 0.0  ;;  %vm17964_vm15 = vmmov %vm17960_vm9 }
 0x1e8   : > { %4729 = vmatpush.bf16.msra.mxu1 %v4666_v5  ;;  %v2000_v31 = vrot.slane %v12733_v28, 4  ;;  %v2795_v8 = vrot.slane %v17432_v23, 4  ;;  %v3426_v52 = vld [vmem:[#allocation4 + $0x88] sm:$0x1] }
 0x1e9   : > { %v2016_v30 = vor.u32 %v2014_v20, %v2013_v58  ;;  %v2018_v14 = vrot.slane %v2013_v58, 4  ;;  %v2800_v13 = vsel %vm17831_vm10, %v17829_v21, %v2799_v59  ;;  %v2801_v24 = vrot.slane %v2799_v59, 4 }
 0x1ea   : > { %v2008_v11 = vsel %vm17822_vm7, %v2000_v31, %v11095_v26  ;;  %v2797_v62 = vsel %vm17831_vm10, %v2795_v8, %v17840_v60  ;;  %v3019_v38 = vunpack.c.l.b16 %v2800_v13  ;;  %v1496_v47 = vpack.c.bf16 %v1039_v39, %v1039_v39 }
 0x1eb   : > { %v2017_v32 = vsel %vm17822_vm7, %v11126_v43, %v2016_v30  ;;  %v2229_v49 = vunpack.c.l.b16 %v2008_v11  ;;  %v2230_v19 = vunpack.c.h.b16 %v2008_v11  ;;  %v2243_v10 = vunpack.c.l.b16 %v2018_v14 }
 0x1ec   : > { %v2236_v16 = vunpack.c.l.b16 %v2017_v32  ;;  %v2237_v4 = vunpack.c.h.b16 %v2017_v32  ;;  %v2244_v3 = vunpack.c.h.b16 %v2018_v14  ;;  %v3012_v56 = vunpack.c.l.b16 %v2797_v62  ;;  %1529 = vst.msk [vmem:[#allocation4 + $0x7c] sm:$0xf] %vm17964_vm15, %v1496_v47 }
 0x1ed   : > { %vm2233_vm1 = vcmp.ne.s32.totalorder %v2229_v49, %v17832_v63  ;;  %vm2234_vm11 = vcmp.ne.s32.totalorder %v2230_v19, %v17833_v35  ;;  %vm2247_vm5 = vcmp.ne.s32.totalorder %v2243_v10, %v17832_v63  ;;  %v3013_v22 = vunpack.c.h.b16 %v2797_v62 }
 0x1ee   : > { %v12757_v41 = vld [vmem:[#allocation4 + $0x78] sm:$0xf]  ;;  %vm12765_vm12 = vmpackc.low %vm2234_vm11, %vm2233_vm1  ;;  %vm2240_vm8 = vcmp.ne.s32.totalorder %v2236_v16, %v17832_v63  ;;  %vm2241_vm9 = vcmp.ne.s32.totalorder %v2237_v4, %v17833_v35  ;;  %vm2248_vm0 = vcmp.ne.s32.totalorder %v2244_v3, %v17833_v35  ;;  %vm12777_vm6 = vcmp.ne.s32.totalorder %v3012_v56, %v17832_v63 }
 0x1ef   : > { %v2280_v40 = vsel %vm12765_vm12, 0, %v12757_v41  ;;  %v3020_v44 = vunpack.c.h.b16 %v2800_v13  ;;  %vm12781_vm2 = vmpackc.low %vm2248_vm0, %vm2247_vm5  ;;  %vm3023_vm3 = vcmp.ne.s32.totalorder %v3019_v38, %v17832_v63  ;;  %v3026_v54 = vunpack.c.l.b16 %v2801_v24 }
 0x1f0   : > { %v12785_v5 = vunpack.c.l.bf16 %v2280_v40  ;;  %v3027_v20 = vunpack.c.h.b16 %v2801_v24  ;;  %vm12788_vm14 = vmpackc.low %vm2241_vm9, %vm2240_vm8  ;;  %v2282_v58 = vsel %vm12781_vm2, 0, %v1568_v15  ;;  %vm3017_vm4 = vcmp.ne.s32.totalorder %v3013_v22, %v17833_v35 }
 0x1f1   : > { %vm3024_vm13 = vcmp.ne.s32.totalorder %v3020_v44, %v17833_v35  ;;  %v3457_v59 = vsel %vm12765_vm12, 0, %v12730_v57  ;;  %v12800_v36 = vunpack.c.l.bf16 %v12757_v41  ;;  %v2347_v31 = vunpack.c.l.bf16 %v2282_v58  ;;  %vm12804_vm1 = vmpackc.low %vm3017_vm4, %vm12777_vm6 }
 0x1f2   : > { %vm3030_vm11 = vcmp.ne.s32.totalorder %v3026_v54, %v17832_v63  ;;  %vm3031_vm5 = vcmp.ne.s32.totalorder %v3027_v20, %v17833_v35  ;;  %vm12810_vm15 = vmpackc.low %vm3024_vm13, %vm3023_vm3  ;;  %v3063_v14 = vsel %vm12804_vm1, 0, %v12757_v41  ;;  %v3458_v13 = vsel %vm12788_vm14, 0, %v12737_v61 }
 0x1f3   : > { %v3459_v24 = vsel %vm12781_vm2, 0, %v3426_v52  ;;  %v12822_v39 = vunpack.c.l.bf16 %v3457_v59  ;;  %v2441_v11 = vrot.slane %v12785_v5, 1  ;;  %vm12825_vm8 = vmpackc.low %vm3031_vm5, %vm3030_vm11  ;;  %v12829_v38 = vunpack.c.l.bf16 %v3063_v14  ;;  %v12831_v19 = vld [vmem:[#allocation4 + $0x7c] sm:$0xf] }
 0x1f4   : > { %v3523_v32 = vunpack.c.l.bf16 %v3458_v13  ;;  %v3524_v49 = vunpack.c.l.bf16 %v3459_v24  ;;  %v2445_v10 = vrot.slane %v2347_v31, 1  ;;  %v3065_v47 = vsel %vm12825_vm8, 0, %v1568_v15 }
 0x1f5   : > { %v17433_v16 = vrot.slane %v12822_v39, 1  ;;  %v3750_v4 = vsel %vm12804_vm1, 0, %v12730_v57  ;;  %v2281_v3 = vsel %vm12788_vm14, 0, %v12831_v19  ;;  %v3064_v56 = vsel %vm12810_vm15, 0, %v12831_v19 }
 0x1f6   : > { %v3130_v40 = vunpack.c.l.bf16 %v3065_v47  ;;  %v3751_v22 = vsel %vm12810_vm15, 0, %v12737_v61  ;;  %v12849_v15 = vunpack.c.l.bf16 %v12831_v19  ;;  %v2346_v46 = vunpack.c.l.bf16 %v2281_v3 }
 0x1f7   : > { %v3129_v44 = vunpack.c.l.bf16 %v3064_v56  ;;  %v3619_v54 = vrot.slane %v3523_v32, 1  ;;  %v17434_v20 = vrot.slane %v12829_v38, 2  ;;  %v3621_v58 = vrot.slane %v3524_v49, 1  ;;  %v4112_v49 = vld [vmem:[#allocation4 + $0x90] sm:$0x1] }
 0x1f8   : > { %v3752_v59 = vsel %vm12825_vm8, 0, %v3426_v52  ;;  %v12854_v31 = vunpack.c.l.bf16 %v3750_v4  ;;  %v2443_v14 = vrot.slane %v2346_v46, 1  ;;  %v3228_v24 = vrot.slane %v3130_v40, 2 }
 0x1f9   : > { %v3226_v13 = vrot.slane %v3129_v44, 2  ;;  %v3816_v47 = vunpack.c.l.bf16 %v3751_v22  ;;  %vm17979_vm9 = vcmask 1046528   ;;  %v3817_v56 = vunpack.c.l.bf16 %v3752_v59 }
 0x1fa   : > { %v3620_v23 = vsel %vm17979_vm9, %v17433_v16, %v3619_v54  ;;  %vm17980_vm0 = vmmov %vm17979_vm9  ;;  %v17436_v32 = vrot.slane %v12854_v31, 2  ;;  %vm17983_vm4 = vcmask 1045504   ;;  %v4143_v22 = vsel %vm12765_vm12, 0, %v12762_v42 }
 0x1fb   : > { %v3622_v3 = vsel %vm17980_vm0, %v3619_v54, %v3621_v58  ;;  %vm17981_vm6 = vmmov %vm17980_vm0  ;;  %v3227_v40 = vsel %vm17983_vm4, %v17434_v20, %v3226_v13  ;;  %v3912_v54 = vrot.slane %v3816_v47, 2  ;;  %v3914_v58 = vrot.slane %v3817_v56, 2 }
 0x1fc   : > { %v2444_v52 = vsel %vm17981_vm6, %v2441_v11, %v2443_v14  ;;  %vm17982_vm3 = vmmov %vm17980_vm0  ;;  %v4144_v16 = vsel %vm12788_vm14, 0, %v4013_v33  ;;  %v12884_v47 = vunpack.c.l.bf16 %v4143_v22  ;;  %v4437_v27 = vsel %vm12810_vm15, 0, %v4013_v33 }
 0x1fd   : > { %v2446_v4 = vsel %vm17982_vm3, %v2443_v14, %v2445_v10  ;;  %v2509_v46 = vmax.f32 %v12800_v36, %v2444_v52  ;;  %vm17984_vm13 = vmmov %vm17983_vm4  ;;  %v4145_v10 = vsel %vm12781_vm2, 0, %v4112_v49  ;;  %v4436_v14 = vsel %vm12804_vm1, 0, %v12762_v42 }
 0x1fe   : > { %v2510_v44 = vmax.f32 %v12849_v15, %v2446_v4  ;;  %v3229_v59 = vsel %vm17984_vm13, %v3226_v13, %v3228_v24  ;;  %vm17985_vm12 = vmmov %vm17983_vm4  ;;  %v4209_v24 = vunpack.c.l.bf16 %v4144_v16  ;;  %v4210_v7 = vunpack.c.l.bf16 %v4145_v10 }
 0x1ff   : > { %v3292_v0 = vmax.f32 %v2509_v46, %v3227_v40  ;;  %v3913_v52 = vsel %vm17985_vm12, %v17436_v32, %v3912_v54  ;;  %vm17986_vm11 = vmmov %vm17983_vm4  ;;  %v4438_v4 = vsel %vm12825_vm8, 0, %v4112_v49  ;;  %v12895_v40 = vunpack.c.l.bf16 %v4436_v14 }
 0x200   : > { %v3293_v20 = vmax.f32 %v2510_v44, %v3229_v59  ;;  %v3915_v13 = vsel %vm17986_vm11, %v3912_v54, %v3914_v58  ;;  %v4305_v22 = vrot.slane %v4209_v24, 1  ;;  %v4307_v46 = vrot.slane %v4210_v7, 1  ;;  %vm17987_vm2 = vmmov %vm17980_vm0 }
 0x201   : > { %v3392_v56 = vmax.f32 %v3292_v0, %v17435_v29  ;;  %v4502_v44 = vunpack.c.l.bf16 %v4437_v27  ;;  %v4503_v54 = vunpack.c.l.bf16 %v4438_v4  ;;  %v4047_v59 = vunpack.c.l.bf16 %v4013_v33  ;;  %vm17988_vm14 = vmmov %vm17980_vm0 }
 0x202   : > { %v3393_v8 = vmax.f32 %v3293_v20, %v17437_v34  ;;  %v1076_v30 = vadd.s32 216, %v17868_v37  ;;  %v4303_v10 = vrot.slane %v12884_v47, 1  ;;  %v1996_v62 = vshll.u32 %v12717_v18, 16  ;;  %vm17990_vm5 = vmmov %vm17983_vm4 }
 0x203   : > { %v3685_v16 = vmax.f32 %v3392_v56, %v3620_v23  ;;  %v4598_v0 = vrot.slane %v4502_v44, 2  ;;  %v4600_v29 = vrot.slane %v4503_v54, 2  ;;  %v4308_v14 = vsel %vm17988_vm14, %v4305_v22, %v4307_v46  ;;  %vm17991_vm15 = vmmov %vm17983_vm4  ;;  %v12917_v56 = vld [vmem:[#allocation6 + $0x18] sm:$0xff]  ;;  %v12929_v44 = vld [vmem:[#allocation4 + $0x74] sm:$0xf] }
 0x204   : > { %v3686_v58 = vmax.f32 %v3393_v8, %v3622_v3  ;;  %v1274_v34 = vand.u32 15, %v1076_v30  ;;  %v4306_v49 = vsel %vm17987_vm2, %v4303_v10, %v4305_v22  ;;  %v17438_v23 = vrot.slane %v12895_v40, 2 }
 0x205   : > { %v3978_v32 = vmax.f32 %v3685_v16, %v3913_v52  ;;  %v17989_v33 = vunpack.c.l.bf16 %v12762_v42  ;;  %v1998_v7 = vor.u32 %v1996_v62, %v12733_v28  ;;  %v4601_v18 = vsel %vm17991_vm15, %v4598_v0, %v4600_v29 }
 0x206   : > { %v3979_v20 = vmax.f32 %v3686_v58, %v3915_v13  ;;  %vm1596_vm1 = vcmp.ge.s32.totalorder %v1274_v34, 15  ;;  %v4599_v52 = vsel %vm17990_vm5, %v17438_v23, %v4598_v0  ;;  %vm2571_vm9 = vcmp.ge.s32.totalorder %v1274_v34, 14 }
 0x207   : > { %v4078_v3 = vmax.f32 %v3978_v32, %v17989_v33  ;;  %vm1692_vm8 = vmpackc.low %vm1596_vm1, %vm1596_vm1  ;;  %v17992_v13 = vrot.slane %v12728_v1, 7  ;;  %v1999_v8 = vsel %vm17822_vm7, %v11126_v43, %v1998_v7  ;;  %v12952_v33 = vunpack.c.l.bf16 %v12929_v44 }
 0x208   : > { %v4079_v24 = vmax.f32 %v3979_v20, %v4047_v59  ;;  %v12920_v28 = vsel %vm1692_vm8, 65537, %v12917_v56  ;;  %vm2667_vm0 = vmpackc.low %vm2571_vm9, %vm2571_vm9  ;;  %v2222_v34 = vunpack.c.l.b16 %v1999_v8  ;;  %v2223_v1 = vunpack.c.h.b16 %v1999_v8 }
 0x209   : > { %v2794_v27 = vsel %vm17831_vm10, %v17829_v21, %v17992_v13  ;;  %v4371_v42 = vmax.f32 %v4078_v3, %v4306_v49  ;;  %v1975_v29 = vshrl.u32 %v12920_v28, 16  ;;  %v12927_v4 = vsel %vm2667_vm0, 65537, %v12917_v56 }
 0x20a   : > { %v4372_v32 = vmax.f32 %v4079_v24, %v4308_v14  ;;  %v17439_v54 = vrot.slane %v12927_v4, 7  ;;  %v3005_v16 = vunpack.c.l.b16 %v2794_v27  ;;  %vm2226_vm6 = vcmp.ne.s32.totalorder %v2222_v34, %v17832_v63 }
 0x20b   : > { %v4664_v22 = vmax.f32 %v4371_v42, %v4599_v52  ;;  %v12932_v58 = vrot.slane %v1975_v29, 7  ;;  %vm2227_vm3 = vcmp.ne.s32.totalorder %v2223_v1, %v17833_v35  ;;  %v3006_v59 = vunpack.c.h.b16 %v2794_v27 }
 0x20c   : > { %v4665_v46 = vmax.f32 %v4372_v32, %v4601_v18  ;;  %vm12936_vm4 = vmpackc.low %vm2227_vm3, %vm2226_vm6  ;;  %v2789_v20 = vrot.slane %v17439_v54, 4  ;;  %vm3009_vm13 = vcmp.ne.s32.totalorder %v3005_v16, %v17832_v63  ;;  %v12967_v32 = vld [vmem:[#allocation4 + $0x70] sm:$0xf]  ;;  %vm17997_vm15 = vcmask 1046528  }
 0x20d   : > { %v1982_v62 = vrot.slane %v12932_v58, 4  ;;  %v2279_v49 = vsel %vm12936_vm4, 0, %v12929_v44  ;;  %vm3010_vm12 = vcmp.ne.s32.totalorder %v3006_v59, %v17833_v35  ;;  %v3456_v14 = vsel %vm12936_vm4, 0, %v12831_v19  ;;  %vm18005_vm6 = vmmov %vm17997_vm15 }
 0x20e   : > { %v4681_v30 = vpack.c.bf16 %v4665_v46, %v4664_v22  ;;  %v2344_v3 = vunpack.c.l.bf16 %v2279_v49  ;;  %v2791_v24 = vsel %vm17831_vm10, %v2789_v20, %v17840_v60  ;;  %vm12957_vm11 = vmpackc.low %vm3010_vm12, %vm3009_vm13  ;;  %v3521_v52 = vunpack.c.l.bf16 %v3456_v14 }
 0x20f   : > { %v1990_v18 = vsel %vm17822_vm7, %v1982_v62, %v11095_v26  ;;  %v2998_v13 = vunpack.c.l.b16 %v2791_v24  ;;  %v2999_v27 = vunpack.c.h.b16 %v2791_v24  ;;  %v3062_v42 = vsel %vm12957_vm11, 0, %v12929_v44  ;;  %vm18006_vm3 = vmmov %vm18005_vm6 }
 0x210   : > { %4751 = vmatpush.bf16.msra.mxu2 %v4681_v30  ;;  %v2215_v8 = vunpack.c.l.b16 %v1990_v18  ;;  %v2216_v29 = vunpack.c.h.b16 %v1990_v18  ;;  %v2439_v34 = vrot.slane %v2344_v3, 1  ;;  %v3127_v1 = vunpack.c.l.bf16 %v3062_v42  ;;  %vm18010_vm12 = vmmov %vm18006_vm3 }
 0x211   : > { %vm3002_vm2 = vcmp.ne.s32.totalorder %v2998_v13, %v17832_v63  ;;  %vm3003_vm14 = vcmp.ne.s32.totalorder %v2999_v27, %v17833_v35  ;;  %v3615_v22 = vrot.slane %v3521_v52, 1  ;;  %v4142_v46 = vsel %vm12936_vm4, 0, %v12737_v61 }
 0x212   : > { %vm2219_vm1 = vcmp.ne.s32.totalorder %v2215_v8, %v17832_v63  ;;  %vm2220_vm5 = vcmp.ne.s32.totalorder %v2216_v29, %v17833_v35  ;;  %v2442_v16 = vsel %vm17997_vm15, %v2439_v34, %v2441_v11  ;;  %vm12979_vm8 = vmpackc.low %vm3003_vm14, %vm3002_vm2  ;;  %v3222_v30 = vrot.slane %v3127_v1, 2 }
 0x213   : > { %vm12983_vm9 = vmpackc.low %vm2220_vm5, %vm2219_vm1  ;;  %v2508_v0 = vmax.f32 %v12952_v33, %v2442_v16  ;;  %v3061_v62 = vsel %vm12979_vm8, 0, %v12967_v32  ;;  %v3748_v5 = vsel %vm12979_vm8, 0, %v12757_v41  ;;  %v3749_v11 = vsel %vm12957_vm11, 0, %v12831_v19 }
 0x214   : > { %v2278_v49 = vsel %vm12983_vm9, 0, %v12967_v32  ;;  %v13000_v14 = vunpack.c.l.bf16 %v3061_v62  ;;  %v18002_v3 = vrot.slane %v12829_v38, 2  ;;  %vm18003_vm0 = vcmask 1045504   ;;  %vm18013_vm14 = vmmov %vm18006_vm3 }
 0x215   : > { %v3455_v52 = vsel %vm12983_vm9, 0, %v12757_v41  ;;  %v13008_v18 = vunpack.c.l.bf16 %v2278_v49  ;;  %v18004_v42 = vrot.slane %v12822_v39, 1  ;;  %v13015_v29 = vunpack.c.l.bf16 %v3748_v5  ;;  %vm18007_vm4 = vmmov %vm18003_vm0 }
 0x216   : > { %v3225_v24 = vsel %vm18003_vm0, %v3222_v30, %v18002_v3  ;;  %v13010_v27 = vunpack.c.l.bf16 %v3455_v52  ;;  %v3814_v1 = vunpack.c.l.bf16 %v3749_v11  ;;  %v4141_v38 = vsel %vm12983_vm9, 0, %v12730_v57  ;;  %vm18009_vm13 = vmmov %vm18003_vm0 }
 0x217   : > { %v3291_v13 = vmax.f32 %v2508_v0, %v3225_v24  ;;  %v3618_v8 = vsel %vm18005_vm6, %v3615_v22, %v18004_v42  ;;  %v4207_v16 = vunpack.c.l.bf16 %v4142_v46  ;;  %v13021_v62 = vunpack.c.l.bf16 %v12967_v32  ;;  %vm18011_vm2 = vmmov %vm18003_vm0 }
 0x218   : > { %v17441_v49 = vrot.slane %v13008_v18, 1  ;;  %v1074_v3 = vadd.s32 200, %v17868_v37  ;;  %v17440_v39 = vrot.slane %v13000_v14, 2  ;;  %v3613_v5 = vrot.slane %v13010_v27, 1  ;;  %vm18017_vm9 = vmmov %vm18003_vm0 }
 0x219   : > { %v3391_v0 = vmax.f32 %v3291_v13, %v12849_v15  ;;  %v3908_v24 = vrot.slane %v3814_v1, 2  ;;  %v13028_v11 = vunpack.c.l.bf16 %v4141_v38  ;;  %v4301_v52 = vrot.slane %v4207_v16, 1 }
 0x21a   : > { %v2440_v46 = vsel %vm18006_vm3, %v17441_v49, %v2439_v34  ;;  %v4434_v42 = vsel %vm12979_vm8, 0, %v12730_v57  ;;  %v3223_v23 = vsel %vm18007_vm4, %v17440_v39, %v3222_v30  ;;  %v17445_v1 = vrot.slane %v13015_v29, 2  ;;  %v13053_v49 = vld [vmem:[#allocation4 + $0x6c] sm:$0xf] }
 0x21b   : > { %v3684_v20 = vmax.f32 %v3391_v0, %v3618_v8  ;;  %v2507_v13 = vmax.f32 %v13021_v62, %v2440_v46  ;;  %v18008_v38 = vrot.slane %v12854_v31, 2  ;;  %v3616_v34 = vsel %vm18010_vm12, %v3613_v5, %v3615_v22 }
 0x21c   : > { %v4435_v59 = vsel %vm12957_vm11, 0, %v12737_v61  ;;  %v13050_v16 = vunpack.c.l.bf16 %v4434_v42  ;;  %v17444_v30 = vrot.slane %v13028_v11, 1  ;;  %v1260_v39 = vand.u32 15, %v1074_v3  ;;  %vm18014_vm11 = vmmov %vm18006_vm3 }
 0x21d   : > { %v3911_v54 = vsel %vm18009_vm13, %v3908_v24, %v18008_v38  ;;  %v3290_v0 = vmax.f32 %v2507_v13, %v3223_v23  ;;  %v4500_v46 = vunpack.c.l.bf16 %v4435_v59  ;;  %v3909_v31 = vsel %vm18011_vm2, %v17445_v1, %v3908_v24 }
 0x21e   : > { %v3977_v8 = vmax.f32 %v3684_v20, %v3911_v54  ;;  %v18012_v22 = vunpack.c.l.bf16 %v12737_v61  ;;  %v4304_v7 = vsel %vm18013_vm14, %v4301_v52, %v4303_v10  ;;  %v1978_v20 = vshll.u32 %v12920_v28, 16 }
 0x21f   : > { %v3390_v23 = vmax.f32 %v3290_v0, %v12800_v36  ;;  %v4302_v3 = vsel %vm18014_vm11, %v17444_v30, %v4301_v52  ;;  %v4594_v42 = vrot.slane %v4500_v46, 2  ;;  %vm1594_vm1 = vcmp.ge.s32.totalorder %v1260_v39, 15 }
 0x220   : > { %v4077_v54 = vmax.f32 %v3977_v8, %v18012_v22  ;;  %v17443_v13 = vrot.slane %v13050_v16, 2  ;;  %vm1690_vm5 = vmpackc.low %vm1594_vm1, %vm1594_vm1  ;;  %v1980_v61 = vor.u32 %v1978_v20, %v12932_v58  ;;  %v13071_v24 = vunpack.c.l.bf16 %v13053_v49 }
 0x221   : > { %vm2569_vm15 = vcmp.ge.s32.totalorder %v1260_v39, 14  ;;  %v3683_v47 = vmax.f32 %v3390_v23, %v3616_v34  ;;  %v13074_v28 = vsel %vm1690_vm5, 65537, %v12917_v56  ;;  %v18015_v38 = vrot.slane %v12927_v4, 7 }
 0x222   : > { %v4370_v10 = vmax.f32 %v4077_v54, %v4304_v7  ;;  %vm2665_vm8 = vmpackc.low %vm2569_vm15, %vm2569_vm15  ;;  %v18016_v8 = vrot.slane %v12895_v40, 2  ;;  %v1957_v59 = vshrl.u32 %v13074_v28, 16  ;;  %v1981_v39 = vsel %vm17822_vm7, %v11126_v43, %v1980_v61 }
 0x223   : > { %v2788_v52 = vsel %vm17831_vm10, %v17829_v21, %v18015_v38  ;;  %v13089_v34 = vsel %vm2665_vm8, 65537, %v12917_v56  ;;  %v3976_v0 = vmax.f32 %v3683_v47, %v3909_v31  ;;  %v2208_v46 = vunpack.c.l.b16 %v1981_v39 }
 0x224   : > { %v4597_v58 = vsel %vm18017_vm9, %v4594_v42, %v18016_v8  ;;  %v2209_v4 = vunpack.c.h.b16 %v1981_v39  ;;  %v17442_v22 = vrot.slane %v13089_v34, 7  ;;  %v4595_v40 = vsel %vm18003_vm0, %v17443_v13, %v4594_v42 }
 0x225   : > { %v13095_v54 = vrot.slane %v1957_v59, 7  ;;  %v2991_v7 = vunpack.c.l.b16 %v2788_v52  ;;  %v2992_v20 = vunpack.c.h.b16 %v2788_v52  ;;  %v18018_v23 = vunpack.c.l.bf16 %v12730_v57 }
 0x226   : > { %vm2212_vm6 = vcmp.ne.s32.totalorder %v2208_v46, %v17832_v63  ;;  %vm2213_vm3 = vcmp.ne.s32.totalorder %v2209_v4, %v17833_v35  ;;  %v2783_v31 = vrot.slane %v17442_v22, 4  ;;  %v4663_v61 = vmax.f32 %v4370_v10, %v4597_v58  ;;  %v13126_v4 = vld [vmem:[#allocation4 + $0x68] sm:$0xf] }
 0x227   : > { %v4076_v38 = vmax.f32 %v3976_v0, %v18018_v23  ;;  %v1964_v47 = vrot.slane %v13095_v54, 4  ;;  %vm13104_vm4 = vmpackc.low %vm2213_vm3, %vm2212_vm6  ;;  %vm2995_vm13 = vcmp.ne.s32.totalorder %v2991_v7, %v17832_v63  ;;  %vm2996_vm12 = vcmp.ne.s32.totalorder %v2992_v20, %v17833_v35 }
 0x228   : > { %v2277_v42 = vsel %vm13104_vm4, 0, %v13053_v49  ;;  %v2785_v52 = vsel %vm17831_vm10, %v2783_v31, %v17840_v60  ;;  %vm13116_vm2 = vmpackc.low %vm2996_vm12, %vm2995_vm13  ;;  %v3454_v58 = vsel %vm13104_vm4, 0, %v12929_v44  ;;  %vm18028_vm9 = vcmask 1046528  }
 0x229   : > { %v4369_v57 = vmax.f32 %v4076_v38, %v4302_v3  ;;  %v1972_v3 = vsel %vm17822_vm7, %v1964_v47, %v11095_v26  ;;  %v2342_v59 = vunpack.c.l.bf16 %v2277_v42  ;;  %v2984_v39 = vunpack.c.l.b16 %v2785_v52  ;;  %vm18030_vm6 = vmmov %vm18028_vm9 }
 0x22a   : > { %v2985_v0 = vunpack.c.h.b16 %v2785_v52  ;;  %v2201_v7 = vunpack.c.l.b16 %v1972_v3  ;;  %v2202_v20 = vunpack.c.h.b16 %v1972_v3  ;;  %v3060_v23 = vsel %vm13116_vm2, 0, %v13053_v49  ;;  %vm18031_vm3 = vmmov %vm18030_vm6 }
 0x22b   : > { %v4662_v46 = vmax.f32 %v4369_v57, %v4595_v40  ;;  %v2435_v38 = vrot.slane %v2342_v59, 1  ;;  %vm2988_vm14 = vcmp.ne.s32.totalorder %v2984_v39, %v17832_v63  ;;  %v3125_v31 = vunpack.c.l.bf16 %v3060_v23  ;;  %vm18032_vm13 = vmmov %vm18003_vm0 }
 0x22c   : > { %vm2989_vm11 = vcmp.ne.s32.totalorder %v2985_v0, %v17833_v35  ;;  %vm2205_vm1 = vcmp.ne.s32.totalorder %v2201_v7, %v17832_v63  ;;  %vm2206_vm5 = vcmp.ne.s32.totalorder %v2202_v20, %v17833_v35  ;;  %v3519_v47 = vunpack.c.l.bf16 %v3454_v58  ;;  %vm18034_vm12 = vmmov %vm18003_vm0 }
 0x22d   : > { %v4680_v22 = vpack.c.bf16 %v4663_v61, %v4662_v46  ;;  %vm13135_vm15 = vmpackc.low %vm2989_vm11, %vm2988_vm14  ;;  %v18027_v42 = vrot.slane %v13008_v18, 1  ;;  %v3218_v3 = vrot.slane %v3125_v31, 2  ;;  %v18029_v7 = vrot.slane %v13000_v14, 2 }
 0x22e   : > { %vm13139_vm8 = vmpackc.low %vm2206_vm5, %vm2205_vm1  ;;  %v3059_v61 = vsel %vm13135_vm15, 0, %v13126_v4  ;;  %v3746_v59 = vsel %vm13135_vm15, 0, %v12967_v32  ;;  %v13169_v31 = vunpack.c.l.bf16 %v13126_v4  ;;  %v18033_v53 = vrot.slane %v13015_v29, 2 }
 0x22f   : > { %v2438_v52 = vsel %vm18028_vm9, %v2435_v38, %v18027_v42  ;;  %4752 = vmatpush.bf16.msra.mxu2 %v4680_v22  ;;  %v2276_v58 = vsel %vm13139_vm8, 0, %v13126_v4  ;;  %v13156_v0 = vunpack.c.l.bf16 %v3059_v61  ;;  %v3453_v18 = vsel %vm13139_vm8, 0, %v12967_v32  ;;  %vm18039_vm14 = vmmov %vm18003_vm0 }
 0x230   : > { %v2506_v39 = vmax.f32 %v13071_v24, %v2438_v52  ;;  %v13161_v46 = vunpack.c.l.bf16 %v2276_v58  ;;  %v3221_v20 = vsel %vm18003_vm0, %v3218_v3, %v18029_v7  ;;  %v13166_v23 = vunpack.c.l.bf16 %v3453_v18 }
 0x231   : > { %v3611_v22 = vrot.slane %v3519_v47, 1  ;;  %v17448_v42 = vrot.slane %v13156_v0, 2  ;;  %v3747_v61 = vsel %vm13116_vm2, 0, %v12929_v44  ;;  %v13179_v7 = vunpack.c.l.bf16 %v3746_v59 }
 0x232   : > { %v3289_v52 = vmax.f32 %v2506_v39, %v3221_v20  ;;  %v2433_v58 = vrot.slane %v13161_v46, 1  ;;  %v3812_v18 = vunpack.c.l.bf16 %v3747_v61  ;;  %v4139_v39 = vsel %vm13139_vm8, 0, %v12757_v41 }
 0x233   : > { %v3614_v14 = vsel %vm18030_vm6, %v3611_v22, %v3613_v5  ;;  %v1072_v20 = vadd.s32 184, %v17868_v37  ;;  %v3219_v27 = vsel %vm18032_vm13, %v17448_v42, %v3218_v3  ;;  %v4140_v59 = vsel %vm13104_vm4, 0, %v12831_v19  ;;  %vm18036_vm4 = vmmov %vm18031_vm3 }
 0x234   : > { %v3389_v47 = vmax.f32 %v3289_v52, %v12952_v33  ;;  %v2436_v30 = vsel %vm18031_vm3, %v2433_v58, %v2435_v38  ;;  %v3904_v5 = vrot.slane %v3812_v18, 2  ;;  %v13197_v57 = vunpack.c.l.bf16 %v4139_v39  ;;  %vm18044_vm6 = vmmov %vm18034_vm12 }
 0x235   : > { %v2505_v52 = vmax.f32 %v13169_v31, %v2436_v30  ;;  %v4205_v13 = vunpack.c.l.bf16 %v4140_v59  ;;  %v3902_v1 = vrot.slane %v13179_v7, 2  ;;  %v4432_v3 = vsel %vm13135_vm15, 0, %v12757_v41  ;;  %vm18042_vm15 = vmmov %vm18003_vm0 }
 0x236   : > { %v3682_v61 = vmax.f32 %v3389_v47, %v3614_v14  ;;  %v3907_v38 = vsel %vm18034_vm12, %v3904_v5, %v18033_v53  ;;  %v4433_v8 = vsel %vm13116_vm2, 0, %v12831_v19  ;;  %v18035_v30 = vrot.slane %v13166_v23, 1  ;;  %vm18038_vm2 = vmmov %vm18031_vm3 }
 0x237   : > { %v3288_v18 = vmax.f32 %v2505_v52, %v3219_v27  ;;  %v4297_v39 = vrot.slane %v4205_v13, 1  ;;  %v13212_v59 = vunpack.c.l.bf16 %v4432_v3  ;;  %v4498_v29 = vunpack.c.l.bf16 %v4433_v8  ;;  %v13221_v52 = vld [vmem:[#allocation4 + $0x60] sm:$0xf]  ;;  %vm18040_vm1 = vmmov %vm18038_vm2 }
 0x238   : > { %v3612_v14 = vsel %vm18036_vm4, %v18035_v30, %v3611_v22  ;;  %v3975_v47 = vmax.f32 %v3682_v61, %v3907_v38  ;;  %v1246_v42 = vand.u32 15, %v1072_v20  ;;  %v1960_v53 = vshll.u32 %v13074_v28, 16  ;;  %v13231_v38 = vld [vmem:[#allocation4 + $0x64] sm:$0xf] }
 0x239   : > { %v3388_v40 = vmax.f32 %v3288_v18, %v13021_v62  ;;  %v17451_v10 = vrot.slane %v13197_v57, 1  ;;  %v18037_v19 = vrot.slane %v13028_v11, 1  ;;  %v3905_v13 = vsel %vm18039_vm14, %v3902_v1, %v3904_v5 }
 0x23a   : > { %v4075_v41 = vmax.f32 %v3975_v47, %v12849_v15  ;;  %v4590_v22 = vrot.slane %v4498_v29, 2  ;;  %vm1592_vm11 = vcmp.ge.s32.totalorder %v1246_v42, 15  ;;  %v1962_v28 = vor.u32 %v1960_v53, %v13095_v54 }
 0x23b   : > { %v4300_v27 = vsel %vm18038_vm2, %v4297_v39, %v18037_v19  ;;  %v3681_v20 = vmax.f32 %v3388_v40, %v3612_v14  ;;  %v4298_v15 = vsel %vm18040_vm1, %v17451_v10, %v4297_v39  ;;  %v17449_v11 = vrot.slane %v13212_v59, 2  ;;  %vm1688_vm5 = vmpackc.low %vm1592_vm11, %vm1592_vm11 }
 0x23c   : > { %v4368_v61 = vmax.f32 %v4075_v41, %v4300_v27  ;;  %v18041_v3 = vrot.slane %v13050_v16, 2  ;;  %v13237_v5 = vsel %vm1688_vm5, 65537, %v12917_v56  ;;  %v1963_v54 = vsel %vm17822_vm7, %v11126_v43, %v1962_v28 }
 0x23d   : > { %v13243_v18 = vunpack.c.l.bf16 %v13221_v52  ;;  %v3974_v30 = vmax.f32 %v3681_v20, %v3905_v13  ;;  %v1939_v47 = vshrl.u32 %v13237_v5, 16  ;;  %v2194_v39 = vunpack.c.l.b16 %v1963_v54 }
 0x23e   : > { %v4593_v8 = vsel %vm18042_vm15, %v4590_v22, %v18041_v3  ;;  %v2195_v29 = vunpack.c.h.b16 %v1963_v54  ;;  %v13247_v16 = vunpack.c.l.bf16 %v13231_v38  ;;  %vm2567_vm8 = vcmp.ge.s32.totalorder %v1246_v42, 14 }
 0x23f   : > { %v4661_v14 = vmax.f32 %v4368_v61, %v4593_v8  ;;  %v18043_v53 = vrot.slane %v13089_v34, 7  ;;  %v4074_v41 = vmax.f32 %v3974_v30, %v12800_v36  ;;  %v13255_v19 = vrot.slane %v1939_v47, 7  ;;  %vm2663_vm0 = vmpackc.low %vm2567_vm8, %vm2567_vm8 }
 0x240   : > { %vm2198_vm9 = vcmp.ne.s32.totalorder %v2194_v39, %v17832_v63  ;;  %v4591_v13 = vsel %vm18044_vm6, %v17449_v11, %v4590_v22  ;;  %vm2199_vm3 = vcmp.ne.s32.totalorder %v2195_v29, %v17833_v35  ;;  %v13263_v34 = vsel %vm2663_vm0, 65537, %v12917_v56  ;;  %vm18055_vm0 = vmmov %vm18044_vm6  ;;  %v13391_v39 = vld [vmem:[#allocation4 + $0x5c] sm:$0xf] }
 0x241   : > { %v2782_v40 = vsel %vm17831_vm10, %v17829_v21, %v18043_v53  ;;  %v4367_v28 = vmax.f32 %v4074_v41, %v4298_v15  ;;  %v1946_v20 = vrot.slane %v13255_v19, 4  ;;  %vm13266_vm13 = vmpackc.low %vm2199_vm3, %vm2198_vm9  ;;  %v17450_v61 = vrot.slane %v13263_v34, 7 }
 0x242   : > { %v2977_v27 = vunpack.c.l.b16 %v2782_v40  ;;  %v2978_v42 = vunpack.c.h.b16 %v2782_v40  ;;  %v2275_v22 = vsel %vm13266_vm13, 0, %v13231_v38  ;;  %v3452_v15 = vsel %vm13266_vm13, 0, %v13053_v49 }
 0x243   : > { %v4138_v3 = vsel %vm13266_vm13, 0, %v12929_v44  ;;  %v4660_v8 = vmax.f32 %v4367_v28, %v4591_v13  ;;  %v1954_v54 = vsel %vm17822_vm7, %v1946_v20, %v11095_v26  ;;  %v2340_v30 = vunpack.c.l.bf16 %v2275_v22  ;;  %vm18059_vm13 = vmmov %vm18055_vm0 }
 0x244   : > { %vm2981_vm12 = vcmp.ne.s32.totalorder %v2977_v27, %v17832_v63  ;;  %vm2982_vm4 = vcmp.ne.s32.totalorder %v2978_v42, %v17833_v35  ;;  %v2777_v47 = vrot.slane %v17450_v61, 4  ;;  %v2187_v29 = vunpack.c.l.b16 %v1954_v54 }
 0x245   : > { %vm13287_vm2 = vmpackc.low %vm2982_vm4, %vm2981_vm12  ;;  %v2188_v53 = vunpack.c.h.b16 %v1954_v54  ;;  %v3517_v41 = vunpack.c.l.bf16 %v3452_v15  ;;  %v4679_v27 = vpack.c.bf16 %v4661_v14, %v4660_v8  ;;  %v2431_v13 = vrot.slane %v2340_v30, 1 }
 0x246   : > { %v3058_v40 = vsel %vm13287_vm2, 0, %v13231_v38  ;;  %v2779_v42 = vsel %vm17831_vm10, %v2777_v47, %v17840_v60  ;;  %vm2191_vm14 = vcmp.ne.s32.totalorder %v2187_v29, %v17832_v63  ;;  %vm18051_vm5 = vcmask 1046528   ;;  %vm18061_vm4 = vmmov %vm18055_vm0 }
 0x247   : > { %v3123_v28 = vunpack.c.l.bf16 %v3058_v40  ;;  %vm2192_vm11 = vcmp.ne.s32.totalorder %v2188_v53, %v17833_v35  ;;  %v2970_v20 = vunpack.c.l.b16 %v2779_v42  ;;  %v2971_v36 = vunpack.c.h.b16 %v2779_v42  ;;  %4753 = vmatpush.bf16.msra.mxu2 %v4679_v27  ;;  %vm18057_vm6 = vmmov %vm18051_vm5 }
 0x248   : > { %vm13299_vm1 = vmpackc.low %vm2192_vm11, %vm2191_vm14  ;;  %v2434_v14 = vsel %vm18051_vm5, %v2431_v13, %v2433_v58  ;;  %v3607_v8 = vrot.slane %v3517_v41, 1  ;;  %v3745_v54 = vsel %vm13287_vm2, 0, %v13053_v49  ;;  %v18054_v58 = vrot.slane %v13156_v0, 2 }
 0x249   : > { %v3214_v15 = vrot.slane %v3123_v28, 2  ;;  %v2274_v30 = vsel %vm13299_vm1, 0, %v13221_v52  ;;  %v2504_v47 = vmax.f32 %v13247_v16, %v2434_v14  ;;  %vm2974_vm15 = vcmp.ne.s32.totalorder %v2970_v20, %v17832_v63  ;;  %vm18058_vm3 = vmmov %vm18051_vm5 }
 0x24a   : > { %vm2975_vm8 = vcmp.ne.s32.totalorder %v2971_v36, %v17833_v35  ;;  %v13315_v29 = vunpack.c.l.bf16 %v2274_v30  ;;  %v3451_v40 = vsel %vm13299_vm1, 0, %v13126_v4  ;;  %v18056_v41 = vrot.slane %v13166_v23, 1  ;;  %vm18060_vm12 = vmmov %vm18058_vm3 }
 0x24b   : > { %vm13317_vm9 = vmpackc.low %vm2975_vm8, %vm2974_vm15  ;;  %v3217_v53 = vsel %vm18055_vm0, %v3214_v15, %v18054_v58  ;;  %v13333_v20 = vunpack.c.l.bf16 %v3451_v40  ;;  %v3810_v23 = vunpack.c.l.bf16 %v3745_v54  ;;  %v1942_v46 = vshll.u32 %v13237_v5, 16 }
 0x24c   : > { %v3610_v27 = vsel %vm18057_vm6, %v3607_v8, %v18056_v41  ;;  %v3057_v42 = vsel %vm13317_vm9, 0, %v13221_v52  ;;  %v3287_v28 = vmax.f32 %v2504_v47, %v3217_v53  ;;  %v3744_v0 = vsel %vm13317_vm9, 0, %v13126_v4  ;;  %vm18063_vm14 = vmmov %vm18058_vm3 }
 0x24d   : > { %v17452_v36 = vrot.slane %v13315_v29, 1  ;;  %v13339_v14 = vunpack.c.l.bf16 %v3057_v42  ;;  %v13341_v30 = vunpack.c.l.bf16 %v3744_v0  ;;  %v4137_v41 = vsel %vm13299_vm1, 0, %v12967_v32  ;;  %vm18064_vm11 = vmmov %vm18055_vm0 }
 0x24e   : > { %v3387_v58 = vmax.f32 %v3287_v28, %v13071_v24  ;;  %v4203_v47 = vunpack.c.l.bf16 %v4138_v3  ;;  %v1070_v53 = vadd.s32 168, %v17868_v37  ;;  %v3605_v42 = vrot.slane %v13333_v20, 1  ;;  %vm18065_vm1 = vmmov %vm18058_vm3 }
 0x24f   : > { %v2432_v40 = vsel %vm18058_vm3, %v17452_v36, %v2431_v13  ;;  %v3212_v11 = vrot.slane %v13339_v14, 2  ;;  %v3900_v0 = vrot.slane %v3810_v23, 2  ;;  %v17457_v28 = vrot.slane %v13341_v30, 2 }
 0x250   : > { %v2503_v54 = vmax.f32 %v13243_v18, %v2432_v40  ;;  %v3680_v61 = vmax.f32 %v3387_v58, %v3610_v27  ;;  %v13355_v10 = vunpack.c.l.bf16 %v4137_v41  ;;  %v3608_v13 = vsel %vm18060_vm12, %v3605_v42, %v3607_v8 }
 0x251   : > { %v3215_v3 = vsel %vm18059_vm13, %v3212_v11, %v3214_v15  ;;  %v3903_v22 = vsel %vm18061_vm4, %v3900_v0, %v3902_v1  ;;  %v4293_v23 = vrot.slane %v4203_v47, 1  ;;  %v4430_v58 = vsel %vm13317_vm9, 0, %v12967_v32  ;;  %vm18068_vm9 = vmmov %vm18055_vm0 }
 0x252   : > { %v3286_v36 = vmax.f32 %v2503_v54, %v3215_v3  ;;  %v3973_v40 = vmax.f32 %v3680_v61, %v3903_v22  ;;  %v17453_v27 = vrot.slane %v13355_v10, 1  ;;  %v18062_v41 = vrot.slane %v13197_v57, 1  ;;  %vm18069_vm13 = vmmov %vm18061_vm4 }
 0x253   : > { %v4431_v8 = vsel %vm13287_vm2, 0, %v12929_v44  ;;  %v13376_v7 = vunpack.c.l.bf16 %v4430_v58  ;;  %v1232_v1 = vand.u32 15, %v1070_v53  ;;  %v13381_v3 = vadd.s32 152, %v17868_v37  ;;  %v13389_v44 = vld [vmem:[#allocation4 + $0x58] sm:$0xf] }
 0x254   : > { %v4296_v15 = vsel %vm18063_vm14, %v4293_v23, %v18062_v41  ;;  %v3386_v47 = vmax.f32 %v3286_v36, %v13169_v31  ;;  %v4073_v61 = vmax.f32 %v3973_v40, %v12952_v33  ;;  %v4496_v54 = vunpack.c.l.bf16 %v4431_v8 }
 0x255   : > { %v3901_v32 = vsel %vm18064_vm11, %v17457_v28, %v3900_v0  ;;  %v4294_v57 = vsel %vm18065_vm1, %v17453_v27, %v4293_v23  ;;  %vm1590_vm2 = vcmp.ge.s32.totalorder %v1232_v1, 15  ;;  %v17455_v53 = vrot.slane %v13376_v7, 2 }
 0x256   : > { %v3679_v33 = vmax.f32 %v3386_v47, %v3608_v13  ;;  %v4366_v36 = vmax.f32 %v4073_v61, %v4296_v15  ;;  %v4586_v22 = vrot.slane %v4496_v54, 2  ;;  %vm1686_vm5 = vmpackc.low %vm1590_vm2, %vm1590_vm2  ;;  %v1944_v0 = vor.u32 %v1942_v46, %v13255_v19 }
 0x257   : > { %v13396_v40 = vsel %vm1686_vm5, 65537, %v12917_v56  ;;  %vm2565_vm15 = vcmp.ge.s32.totalorder %v1232_v1, 14  ;;  %v18066_v23 = vrot.slane %v13263_v34, 7  ;;  %v13406_v13 = vunpack.c.l.bf16 %v13389_v44 }
 0x258   : > { %v3972_v41 = vmax.f32 %v3679_v33, %v3901_v32  ;;  %v1921_v5 = vshrl.u32 %v13396_v40, 16  ;;  %v13409_v15 = vunpack.c.l.bf16 %v13391_v39  ;;  %vm2661_vm8 = vmpackc.low %vm2565_vm15, %vm2565_vm15  ;;  %v18067_v8 = vrot.slane %v13212_v59, 2 }
 0x259   : > { %v2776_v58 = vsel %vm17831_vm10, %v17829_v21, %v18066_v23  ;;  %v1945_v34 = vsel %vm17822_vm7, %v11126_v43, %v1944_v0  ;;  %v13418_v1 = vsel %vm2661_vm8, 65537, %v12917_v56  ;;  %vm18077_vm8 = vcmask 1046528  }
 0x25a   : > { %v4589_v19 = vsel %vm18068_vm9, %v4586_v22, %v18067_v8  ;;  %v2963_v47 = vunpack.c.l.b16 %v2776_v58  ;;  %v4072_v61 = vmax.f32 %v3972_v41, %v13021_v62  ;;  %v13421_v54 = vrot.slane %v1921_v5, 7 }
 0x25b   : > { %v2180_v32 = vunpack.c.l.b16 %v1945_v34  ;;  %v2181_v46 = vunpack.c.h.b16 %v1945_v34  ;;  %v4659_v33 = vmax.f32 %v4366_v36, %v4589_v19  ;;  %v17454_v23 = vrot.slane %v13418_v1, 7 }
 0x25c   : > { %v2964_v59 = vunpack.c.h.b16 %v2776_v58  ;;  %vm2967_vm0 = vcmp.ne.s32.totalorder %v2963_v47, %v17832_v63  ;;  %v4365_v8 = vmax.f32 %v4072_v61, %v4294_v57  ;;  %v1928_v27 = vrot.slane %v13421_v54, 4 }
 0x25d   : > { %vm2184_vm6 = vcmp.ne.s32.totalorder %v2180_v32, %v17832_v63  ;;  %vm2185_vm3 = vcmp.ne.s32.totalorder %v2181_v46, %v17833_v35  ;;  %v4587_v62 = vsel %vm18069_vm13, %v17455_v53, %v4586_v22  ;;  %v2771_v36 = vrot.slane %v17454_v23, 4 }
 0x25e   : > { %vm13431_vm12 = vmpackc.low %vm2185_vm3, %vm2184_vm6  ;;  %vm2968_vm4 = vcmp.ne.s32.totalorder %v2964_v59, %v17833_v35  ;;  %v17456_v57 = vand.u32 15, %v13381_v3  ;;  %v4658_v58 = vmax.f32 %v4365_v8, %v4587_v62  ;;  %v1936_v41 = vsel %vm17822_vm7, %v1928_v27, %v11095_v26 }
 0x25f   : > { %v2273_v22 = vsel %vm13431_vm12, 0, %v13391_v39  ;;  %vm13445_vm14 = vmpackc.low %vm2968_vm4, %vm2967_vm0  ;;  %v3450_v19 = vsel %vm13431_vm12, 0, %v13231_v38  ;;  %v2173_v34 = vunpack.c.l.b16 %v1936_v41  ;;  %v2174_v47 = vunpack.c.h.b16 %v1936_v41 }
 0x260   : > { %v2338_v61 = vunpack.c.l.bf16 %v2273_v22  ;;  %v2773_v32 = vsel %vm17831_vm10, %v2771_v36, %v17840_v60  ;;  %v4678_v27 = vpack.c.bf16 %v4659_v33, %v4658_v58  ;;  %v3056_v8 = vsel %vm13445_vm14, 0, %v13391_v39  ;;  %vm18080_vm0 = vmmov %vm18069_vm13 }
 0x261   : > { %v2956_v46 = vunpack.c.l.b16 %v2773_v32  ;;  %v2957_v59 = vunpack.c.h.b16 %v2773_v32  ;;  %vm2177_vm11 = vcmp.ne.s32.totalorder %v2173_v34, %v17832_v63  ;;  %vm2178_vm1 = vcmp.ne.s32.totalorder %v2174_v47, %v17833_v35  ;;  %vm18083_vm3 = vmmov %vm18077_vm8 }
 0x262   : > { %v2427_v62 = vrot.slane %v2338_v61, 1  ;;  %v3121_v23 = vunpack.c.l.bf16 %v3056_v8  ;;  %4754 = vmatpush.bf16.msra.mxu2 %v4678_v27  ;;  %vm13460_vm2 = vmpackc.low %vm2178_vm1, %vm2177_vm11  ;;  %v3515_v33 = vunpack.c.l.bf16 %v3450_v19  ;;  %v3743_v36 = vsel %vm13445_vm14, 0, %v13231_v38 }
 0x263   : > { %vm2960_vm5 = vcmp.ne.s32.totalorder %v2956_v46, %v17832_v63  ;;  %vm2961_vm15 = vcmp.ne.s32.totalorder %v2957_v59, %v17833_v35  ;;  %v2272_v58 = vsel %vm13460_vm2, 0, %v13389_v44  ;;  %v18076_v22 = vrot.slane %v13315_v29, 1  ;;  %vm18084_vm13 = vmmov %vm18083_vm3 }
 0x264   : > { %vm13475_vm9 = vmpackc.low %vm2961_vm15, %vm2960_vm5  ;;  %v3210_v61 = vrot.slane %v3121_v23, 2  ;;  %v3449_v19 = vsel %vm13460_vm2, 0, %v13221_v52  ;;  %v13482_v32 = vunpack.c.l.bf16 %v2272_v58  ;;  %v3603_v8 = vrot.slane %v3515_v33, 1 }
 0x265   : > { %v2430_v34 = vsel %vm18077_vm8, %v2427_v62, %v18076_v22  ;;  %v3055_v46 = vsel %vm13475_vm9, 0, %v13389_v44  ;;  %v13488_v29 = vunpack.c.l.bf16 %v3449_v19  ;;  %v3742_v58 = vsel %vm13475_vm9, 0, %v13221_v52  ;;  %vm18085_vm4 = vmmov %vm18083_vm3 }
 0x266   : > { %v2502_v27 = vmax.f32 %v13409_v15, %v2430_v34  ;;  %v13490_v59 = vunpack.c.l.bf16 %v3055_v46  ;;  %v3213_v23 = vsel %vm18080_vm0, %v3210_v61, %v3212_v11  ;;  %v2425_v22 = vrot.slane %v13482_v32, 1  ;;  %vm18086_vm11 = vmmov %vm18080_vm0 }
 0x267   : > { %vm13501_vm6 = vcmp.ge.s32.totalorder %v17456_v57, 15  ;;  %v1924_v19 = vshll.u32 %v13396_v40, 16  ;;  %v3601_v14 = vrot.slane %v13488_v29, 1  ;;  %v3606_v11 = vsel %vm18083_vm3, %v3603_v8, %v3605_v42  ;;  %vm18092_vm5 = vmmov %vm18080_vm0 }
 0x268   : > { %v3285_v34 = vmax.f32 %v2502_v27, %v3213_v23  ;;  %v13510_v33 = vunpack.c.l.bf16 %v3742_v58  ;;  %v3808_v46 = vunpack.c.l.bf16 %v3743_v36  ;;  %v2428_v27 = vsel %vm18084_vm13, %v2425_v22, %v2427_v62  ;;  %vm1684_vm1 = vmpackc.low %vm13501_vm6, %vm13501_vm6 }
 0x269   : > { %v3208_v23 = vrot.slane %v13490_v59, 2  ;;  %v4135_v40 = vsel %vm13460_vm2, 0, %v13126_v4  ;;  %v2501_v28 = vmax.f32 %v13406_v13, %v2428_v27  ;;  %v3604_v20 = vsel %vm18085_vm4, %v3601_v14, %v3603_v8  ;;  %vm18089_vm2 = vmmov %vm18080_vm0 }
 0x26a   : > { %v3385_v57 = vmax.f32 %v3285_v34, %v13247_v16  ;;  %v3896_v42 = vrot.slane %v3808_v46, 2  ;;  %v4136_v36 = vsel %vm13431_vm12, 0, %v13053_v49  ;;  %v4428_v41 = vsel %vm13475_vm9, 0, %v13126_v4  ;;  %vm18088_vm12 = vmmov %vm18080_vm0 }
 0x26b   : > { %v3211_v62 = vsel %vm18086_vm11, %v3208_v23, %v3210_v61  ;;  %v4201_v34 = vunpack.c.l.bf16 %v4136_v36  ;;  %v3894_v46 = vrot.slane %v13510_v33, 2  ;;  %v18087_v0 = vrot.slane %v13341_v30, 2  ;;  %vm18094_vm15 = vmmov %vm18080_vm0 }
 0x26c   : > { %v3678_v58 = vmax.f32 %v3385_v57, %v3606_v11  ;;  %v3284_v8 = vmax.f32 %v2501_v28, %v3211_v62  ;;  %v4429_v57 = vsel %vm13445_vm14, 0, %v13053_v49  ;;  %v13543_v11 = vunpack.c.l.bf16 %v4135_v40  ;;  %vm18091_vm14 = vmmov %vm18083_vm3 }
 0x26d   : > { %v3899_v27 = vsel %vm18088_vm12, %v3896_v42, %v18087_v0  ;;  %v4289_v47 = vrot.slane %v4201_v34, 1  ;;  %v13545_v4 = vunpack.c.l.bf16 %v4428_v41  ;;  %v4494_v36 = vunpack.c.l.bf16 %v4429_v57  ;;  %vm18095_vm8 = vmmov %vm18083_vm3 }
 0x26e   : > { %v3971_v61 = vmax.f32 %v3678_v58, %v3899_v27  ;;  %v3384_v53 = vmax.f32 %v3284_v8, %v13243_v18  ;;  %v13549_v28 = vsel %vm1684_vm1, 65537, %v12917_v56  ;;  %v1926_v30 = vor.u32 %v1924_v19, %v13421_v54 }
 0x26f   : > { %v3897_v62 = vsel %vm18089_vm2, %v3894_v46, %v3896_v42  ;;  %v18090_v5 = vrot.slane %v13355_v10, 1  ;;  %v17459_v58 = vrot.slane %v13545_v4, 2  ;;  %v4582_v41 = vrot.slane %v4494_v36, 2 }
 0x270   : > { %v4071_v49 = vmax.f32 %v3971_v61, %v13071_v24  ;;  %v3677_v34 = vmax.f32 %v3384_v53, %v3604_v20  ;;  %v1903_v8 = vshrl.u32 %v13549_v28, 16  ;;  %v1927_v54 = vsel %vm17822_vm7, %v11126_v43, %v1926_v30  ;;  %v13571_v61 = vld [vmem:[#allocation4 + $0x54] sm:$0xf] }
 0x271   : > { %v4292_v40 = vsel %vm18091_vm14, %v4289_v47, %v18090_v5  ;;  %v4287_v19 = vrot.slane %v13543_v11, 1  ;;  %v2166_v42 = vunpack.c.l.b16 %v1927_v54  ;;  %v2167_v27 = vunpack.c.h.b16 %v1927_v54 }
 0x272   : > { %v4364_v0 = vmax.f32 %v4071_v49, %v4292_v40  ;;  %v3970_v24 = vmax.f32 %v3677_v34, %v3897_v62  ;;  %v4583_v10 = vsel %vm18092_vm5, %v17459_v58, %v4582_v41  ;;  %v18093_v57 = vrot.slane %v13376_v7, 2  ;;  %vm18104_vm5 = vmmov %vm18095_vm8 }
 0x273   : > { %v13573_v53 = vrot.slane %v1903_v8, 7  ;;  %v4290_v36 = vsel %vm18095_vm8, %v4287_v19, %v4289_v47  ;;  %vm2170_vm9 = vcmp.ne.s32.totalorder %v2166_v42, %v17832_v63  ;;  %vm2171_vm0 = vcmp.ne.s32.totalorder %v2167_v27, %v17833_v35 }
 0x274   : > { %v4585_v20 = vsel %vm18094_vm15, %v4582_v41, %v18093_v57  ;;  %v4070_v62 = vmax.f32 %v3970_v24, %v13169_v31  ;;  %vm13582_vm6 = vmpackc.low %vm2171_vm0, %vm2170_vm9  ;;  %v18098_v5 = vand.u32 15, %v13381_v3  ;;  %v18099_v40 = vrot.slane %v13418_v1, 7 }
 0x275   : > { %v4657_v30 = vmax.f32 %v4364_v0, %v4585_v20  ;;  %v1910_v49 = vrot.slane %v13573_v53, 4  ;;  %v2271_v34 = vsel %vm13582_vm6, 0, %v13571_v61  ;;  %v3448_v8 = vsel %vm13582_vm6, 0, %v13391_v39 }
 0x276   : > { %vm2563_vm3 = vcmp.ge.s32.totalorder %v18098_v5, 14  ;;  %v2770_v47 = vsel %vm17831_vm10, %v17829_v21, %v18099_v40  ;;  %v4363_v54 = vmax.f32 %v4070_v62, %v4290_v36  ;;  %v2336_v1 = vunpack.c.l.bf16 %v2271_v34 }
 0x277   : > { %vm2659_vm13 = vmpackc.low %vm2563_vm3, %vm2563_vm3  ;;  %v2949_v31 = vunpack.c.l.b16 %v2770_v47  ;;  %v2950_v41 = vunpack.c.h.b16 %v2770_v47  ;;  %v1918_v3 = vsel %vm17822_vm7, %v1910_v49, %v11095_v26  ;;  %v13608_v20 = vunpack.c.l.bf16 %v13571_v61 }
 0x278   : > { %v13603_v0 = vsel %vm2659_vm13, 65537, %v12917_v56  ;;  %v2159_v42 = vunpack.c.l.b16 %v1918_v3  ;;  %v2160_v27 = vunpack.c.h.b16 %v1918_v3  ;;  %v4656_v57 = vmax.f32 %v4363_v54, %v4583_v10  ;;  %vm18109_vm3 = vmmov %vm18104_vm5 }
 0x279   : > { %v2763_v24 = vrot.slane %v13603_v0, 7  ;;  %vm2953_vm4 = vcmp.ne.s32.totalorder %v2949_v31, %v17832_v63  ;;  %v2423_v5 = vrot.slane %v2336_v1, 1  ;;  %vm2954_vm11 = vcmp.ne.s32.totalorder %v2950_v41, %v17833_v35  ;;  %v13632_v31 = vld [vmem:[#allocation4 + $0x50] sm:$0xf]  ;;  %vm18110_vm13 = vmmov %vm18109_vm3 }
 0x27a   : > { %vm2163_vm1 = vcmp.ne.s32.totalorder %v2159_v42, %v17832_v63  ;;  %vm2164_vm12 = vcmp.ne.s32.totalorder %v2160_v27, %v17833_v35  ;;  %vm13615_vm2 = vmpackc.low %vm2954_vm11, %vm2953_vm4  ;;  %v3513_v62 = vunpack.c.l.bf16 %v3448_v8  ;;  %v4677_v49 = vpack.c.bf16 %v4657_v30, %v4656_v57 }
 0x27b   : > { %v2765_v56 = vrot.slane %v2763_v24, 4  ;;  %vm13619_vm14 = vmpackc.low %vm2164_vm12, %vm2163_vm1  ;;  %v2426_v40 = vsel %vm18104_vm5, %v2423_v5, %v2425_v22  ;;  %v3054_v47 = vsel %vm13615_vm2, 0, %v13571_v61  ;;  %v4134_v34 = vsel %vm13582_vm6, 0, %v13231_v38 }
 0x27c   : > { %v2270_v30 = vsel %vm13619_vm14, 0, %v13632_v31  ;;  %v2500_v41 = vmax.f32 %v13608_v20, %v2426_v40  ;;  %v3119_v22 = vunpack.c.l.bf16 %v3054_v47  ;;  %4755 = vmatpush.bf16.msra.mxu2 %v4677_v49  ;;  %v3447_v7 = vsel %vm13619_vm14, 0, %v13389_v44  ;;  %vm18108_vm6 = vmmov %vm18104_vm5 }
 0x27d   : > { %v2767_v32 = vsel %vm17831_vm10, %v2765_v56, %v17840_v60  ;;  %v13641_v8 = vunpack.c.l.bf16 %v2270_v30  ;;  %v13647_v1 = vunpack.c.l.bf16 %v13632_v31  ;;  %v3599_v27 = vrot.slane %v3513_v62, 1  ;;  %vm18113_vm1 = vmmov %vm18109_vm3 }
 0x27e   : > { %v2942_v54 = vunpack.c.l.b16 %v2767_v32  ;;  %v2943_v3 = vunpack.c.h.b16 %v2767_v32  ;;  %v3206_v42 = vrot.slane %v3119_v22, 2  ;;  %v3741_v57 = vsel %vm13615_vm2, 0, %v13391_v39 }
 0x27f   : > { %v17458_v56 = vrot.slane %v13641_v8, 1  ;;  %v13655_v49 = vunpack.c.l.bf16 %v3447_v7  ;;  %vm18107_vm0 = vcmask 1045504   ;;  %v3806_v47 = vunpack.c.l.bf16 %v3741_v57 }
 0x280   : > { %vm2946_vm15 = vcmp.ne.s32.totalorder %v2942_v54, %v17832_v63  ;;  %vm2947_vm8 = vcmp.ne.s32.totalorder %v2943_v3, %v17833_v35  ;;  %v3209_v62 = vsel %vm18107_vm0, %v3206_v42, %v3208_v23  ;;  %v4133_v30 = vsel %vm13619_vm14, 0, %v13221_v52  ;;  %vm18111_vm4 = vmmov %vm18107_vm0 }
 0x281   : > { %vm13657_vm9 = vmpackc.low %vm2947_vm8, %vm2946_vm15  ;;  %v4199_v32 = vunpack.c.l.bf16 %v4134_v34  ;;  %v2424_v22 = vsel %vm18108_vm6, %v17458_v56, %v2423_v5  ;;  %v3283_v3 = vmax.f32 %v2500_v41, %v3209_v62  ;;  %v3602_v10 = vsel %vm18109_vm3, %v3599_v27, %v3601_v14 }
 0x282   : > { %v3053_v54 = vsel %vm13657_vm9, 0, %v13632_v31  ;;  %v3740_v59 = vsel %vm13657_vm9, 0, %v13389_v44  ;;  %v2499_v7 = vmax.f32 %v13647_v1, %v2424_v22  ;;  %v3597_v57 = vrot.slane %v13655_v49, 1  ;;  %vm18112_vm11 = vmmov %vm18107_vm0 }
 0x283   : > { %v13676_v23 = vunpack.c.l.bf16 %v3053_v54  ;;  %v13681_v34 = vunpack.c.l.bf16 %v3740_v59  ;;  %v3383_v5 = vmax.f32 %v3283_v3, %v13409_v15  ;;  %v13686_v56 = vunpack.c.l.bf16 %v4133_v30  ;;  %vm18114_vm12 = vmmov %vm18107_vm0 }
 0x284   : > { %v3892_v62 = vrot.slane %v3806_v47, 2  ;;  %v3600_v54 = vsel %vm18110_vm13, %v3597_v57, %v3599_v27  ;;  %v4285_v58 = vrot.slane %v4199_v32, 1  ;;  %v4427_v14 = vsel %vm13615_vm2, 0, %v13231_v38  ;;  %vm18115_vm2 = vmmov %vm18113_vm1 }
 0x285   : > { %v3204_v41 = vrot.slane %v13676_v23, 2  ;;  %v3676_v29 = vmax.f32 %v3383_v5, %v3602_v10  ;;  %v3890_v30 = vrot.slane %v13681_v34, 2  ;;  %v4426_v27 = vsel %vm13657_vm9, 0, %v13221_v52  ;;  %vm18121_vm13 = vmmov %vm18111_vm4  ;;  %v9809_v34 = vld [vmem:[%s18135_s7] sm:$0xf] }
 0x286   : > { %v3895_v47 = vsel %vm18112_vm11, %v3892_v62, %v3894_v46  ;;  %v4283_v59 = vrot.slane %v13686_v56, 1  ;;  %v1066_v38 = vadd.s32 136, %v17868_v37  ;;  %v4288_v36 = vsel %vm18113_vm1, %v4285_v58, %v4287_v19 }
 0x287   : > { %v3207_v22 = vsel %vm18111_vm4, %v3204_v41, %v3206_v42  ;;  %v3969_v32 = vmax.f32 %v3676_v29, %v3895_v47  ;;  %v4492_v42 = vunpack.c.l.bf16 %v4427_v14  ;;  %v1906_v10 = vshll.u32 %v13549_v28, 16 }
 0x288   : > { %v3282_v3 = vmax.f32 %v2499_v7, %v3207_v22  ;;  %v2764_v33 = vsel %vm17831_vm10, %v17829_v21, %v2763_v24  ;;  %v3893_v46 = vsel %vm18114_vm12, %v3890_v30, %v3892_v62  ;;  %v1204_v40 = vand.u32 15, %v1066_v38 }
 0x289   : > { %v2935_v7 = vunpack.c.l.b16 %v2764_v33  ;;  %v4286_v11 = vsel %vm18115_vm2, %v4283_v59, %v4285_v58  ;;  %v13723_v19 = vunpack.c.l.bf16 %v4426_v27  ;;  %v1908_v28 = vor.u32 %v1906_v10, %v13573_v53  ;;  %v13756_v10 = vld [vmem:[#allocation4 + $0x4c] sm:$0xf] }
 0x28a   : > { %v3382_v52 = vmax.f32 %v3282_v3, %v13406_v13  ;;  %v2936_v0 = vunpack.c.h.b16 %v2764_v33  ;;  %v4069_v24 = vmax.f32 %v3969_v32, %v13247_v16  ;;  %vm1586_vm14 = vcmp.ge.s32.totalorder %v1204_v40, 15 }
 0x28b   : > { %vm13727_vm5 = vcmp.ge.s32.totalorder %v1204_v40, 14  ;;  %v4578_v62 = vrot.slane %v4492_v42, 2  ;;  %vm1682_vm15 = vmpackc.low %vm1586_vm14, %vm1586_vm14  ;;  %v1909_v14 = vsel %vm17822_vm7, %v11126_v43, %v1908_v28  ;;  %vm2939_vm8 = vcmp.ne.s32.totalorder %v2935_v7, %v17832_v63 }
 0x28c   : > { %v3675_v5 = vmax.f32 %v3382_v52, %v3600_v54  ;;  %vm2940_vm9 = vcmp.ne.s32.totalorder %v2936_v0, %v17833_v35  ;;  %v4362_v53 = vmax.f32 %v4069_v24, %v4288_v36  ;;  %v13736_v54 = vld [vmem:[#allocation6 + $0x18] sm:$0xff]  ;;  %v2152_v22 = vunpack.c.l.b16 %v1909_v14  ;;  %vm2657_vm0 = vmpackc.low %vm13727_vm5, %vm13727_vm5 }
 0x28d   : > { %v13739_v16 = vsel %vm1682_vm15, 65537, %v13736_v54  ;;  %v4576_v47 = vrot.slane %v13723_v19, 2  ;;  %v2153_v3 = vunpack.c.h.b16 %v1909_v14  ;;  %v13747_v32 = vsel %vm2657_vm0, 65537, %v13736_v54  ;;  %vm13749_vm6 = vmpackc.low %vm2940_vm9, %vm2939_vm8 }
 0x28e   : > { %v3968_v58 = vmax.f32 %v3675_v5, %v3893_v46  ;;  %v1885_v27 = vshrl.u32 %v13739_v16, 16  ;;  %vm2156_vm3 = vcmp.ne.s32.totalorder %v2152_v22, %v17832_v63  ;;  %v2757_v42 = vrot.slane %v13747_v32, 7  ;;  %vm18130_vm0 = vmmov %vm18112_vm11 }
 0x28f   : > { %v3052_v33 = vsel %vm13749_vm6, 0, %v13756_v10  ;;  %v18120_v52 = vrot.slane %v13545_v4, 2  ;;  %vm2157_vm4 = vcmp.ne.s32.totalorder %v2153_v3, %v17833_v35  ;;  %vm18125_vm15 = vcmask 1046528  }
 0x290   : > { %v4068_v36 = vmax.f32 %v3968_v58, %v13243_v18  ;;  %v13764_v40 = vrot.slane %v1885_v27, 7  ;;  %v4579_v18 = vsel %vm18112_vm11, %v4576_v47, %v4578_v62  ;;  %vm13770_vm1 = vmpackc.low %vm2157_vm4, %vm2156_vm3  ;;  %v2759_v5 = vrot.slane %v2757_v42, 4 }
 0x291   : > { %v4581_v46 = vsel %vm18121_vm13, %v4578_v62, %v18120_v52  ;;  %v2269_v24 = vsel %vm13770_vm1, 0, %v13756_v10  ;;  %v3117_v29 = vunpack.c.l.bf16 %v3052_v33  ;;  %vm18131_vm3 = vmmov %vm18125_vm15 }
 0x292   : > { %v4361_v7 = vmax.f32 %v4068_v36, %v4286_v11  ;;  %v4655_v28 = vmax.f32 %v4362_v53, %v4581_v46  ;;  %v1892_v4 = vrot.slane %v13764_v40, 4  ;;  %v3446_v11 = vsel %vm13770_vm1, 0, %v13571_v61  ;;  %vm18132_vm13 = vmmov %vm18131_vm3 }
 0x293   : > { %v2334_v14 = vunpack.c.l.bf16 %v2269_v24  ;;  %v2761_v58 = vsel %vm17831_vm10, %v2759_v5, %v17840_v60  ;;  %v3739_v53 = vsel %vm13749_vm6, 0, %v13571_v61  ;;  %v3511_v36 = vunpack.c.l.bf16 %v3446_v11  ;;  %v10694_v24 = vld [vmem:[#allocation4 + $0x48] sm:$0xf]  ;;  %vm18133_vm4 = vmmov %vm18130_vm0 }
 0x294   : > { %v4654_v62 = vmax.f32 %v4361_v7, %v4579_v18  ;;  %v1900_v22 = vsel %vm17822_vm7, %v1892_v4, %v11095_v26  ;;  %v2928_v27 = vunpack.c.l.b16 %v2761_v58  ;;  %v2929_v3 = vunpack.c.h.b16 %v2761_v58  ;;  %vm18134_vm11 = vmmov %vm18130_vm0 }
 0x295   : > { %v2145_v52 = vunpack.c.l.b16 %v1900_v22  ;;  %v2146_v46 = vunpack.c.h.b16 %v1900_v22  ;;  %v2419_v7 = vrot.slane %v2334_v14, 1  ;;  %v18124_v60 = vrot.slane %v13641_v8, 1 }
 0x296   : > { %v4676_v33 = vpack.c.bf16 %v4655_v28, %v4654_v62  ;;  %vm2932_vm12 = vcmp.ne.s32.totalorder %v2928_v27, %v17832_v63  ;;  %vm2933_vm2 = vcmp.ne.s32.totalorder %v2929_v3, %v17833_v35  ;;  %v3202_v28 = vrot.slane %v3117_v29, 2 }
 0x297   : > { %vm2149_vm14 = vcmp.ne.s32.totalorder %v2145_v52, %v17832_v63  ;;  %vm2150_vm5 = vcmp.ne.s32.totalorder %v2146_v46, %v17833_v35  ;;  %v2422_v26 = vsel %vm18125_vm15, %v2419_v7, %v18124_v60  ;;  %vm13799_vm8 = vmpackc.low %vm2933_vm2, %vm2932_vm12  ;;  %v3804_v62 = vunpack.c.l.bf16 %v3739_v53 }
 0x298   : > { %4756 = vmatpush.bf16.msra.mxu2 %v4676_v33  ;;  %vm13803_vm9 = vmpackc.low %vm2150_vm5, %vm2149_vm14  ;;  %v2498_v4 = vmax.f32 %v12020_v2, %v2422_v26  ;;  %v3051_v11 = vsel %vm13799_vm8, 0, %v10694_v24  ;;  %v3738_v8 = vsel %vm13799_vm8, 0, %v13632_v31  ;;  %v3205_v29 = vsel %vm18130_vm0, %v3202_v28, %v3204_v41 }
 0x299   : > { %v2268_v14 = vsel %vm13803_vm9, 0, %v10694_v24  ;;  %v3445_v58 = vsel %vm13803_vm9, 0, %v13632_v31  ;;  %v3595_v22 = vrot.slane %v3511_v36, 1  ;;  %v13823_v3 = vunpack.c.l.bf16 %v3051_v11  ;;  %vm18138_vm14 = vmmov %vm18130_vm0 }
 0x29a   : > { %v13821_v27 = vunpack.c.l.bf16 %v2268_v14  ;;  %v3281_v33 = vmax.f32 %v2498_v4, %v3205_v29  ;;  %v4132_v53 = vsel %vm13770_vm1, 0, %v13391_v39  ;;  %v13828_v52 = vunpack.c.l.bf16 %v3445_v58  ;;  %vm18137_vm1 = vmmov %vm18131_vm3 }
 0x29b   : > { %v3598_v23 = vsel %vm18131_vm3, %v3595_v22, %v3597_v57  ;;  %v13833_v41 = vunpack.c.l.bf16 %v3738_v8  ;;  %v1888_v46 = vshll.u32 %v13739_v16, 16  ;;  %v3888_v60 = vrot.slane %v3804_v62, 2  ;;  %vm18143_vm0 = vmmov %vm18137_vm1 }
 0x29c   : > { %v2417_v31 = vrot.slane %v13821_v27, 1  ;;  %v3381_v36 = vmax.f32 %v3281_v33, %v13608_v20  ;;  %v4131_v0 = vsel %vm13803_vm9, 0, %v13389_v44  ;;  %v4197_v26 = vunpack.c.l.bf16 %v4132_v53 }
 0x29d   : > { %v3200_v57 = vrot.slane %v13823_v3, 2  ;;  %v4425_v24 = vsel %vm13749_vm6, 0, %v13391_v39  ;;  %v3593_v16 = vrot.slane %v13828_v52, 1  ;;  %v3886_v8 = vrot.slane %v13833_v41, 2  ;;  %vm18136_vm6 = vmmov %vm18131_vm3 }
 0x29e   : > { %v2420_v49 = vsel %vm18132_vm13, %v2417_v31, %v2419_v7  ;;  %v3674_v4 = vmax.f32 %v3381_v36, %v3598_v23  ;;  %v3891_v5 = vsel %vm18133_vm4, %v3888_v60, %v3890_v30  ;;  %v13857_v62 = vunpack.c.l.bf16 %v4131_v0  ;;  %v10452_v30 = vld [vmem:[%s18135_s7 + $0x4] sm:$0xf0]  ;;  %vm18144_vm3 = vmmov %vm18133_vm4 }
 0x29f   : > { %v2497_v11 = vmax.f32 %v11973_v6, %v2420_v49  ;;  %v3203_v7 = vsel %vm18134_vm11, %v3200_v57, %v3202_v28  ;;  %v1890_v14 = vor.u32 %v1888_v46, %v13764_v40  ;;  %v2758_v39 = vsel %vm17831_vm10, %v17829_v21, %v2757_v42  ;;  %vm18145_vm13 = vmmov %vm18144_vm3 }
 0x2a0   : > { %v3967_v28 = vmax.f32 %v3674_v4, %v3891_v5  ;;  %v4281_v29 = vrot.slane %v4197_v26, 1  ;;  %v2921_v58 = vunpack.c.l.b16 %v2758_v39  ;;  %v3596_v32 = vsel %vm18136_vm6, %v3593_v16, %v3595_v22  ;;  %v10695_v26 = vld [vmem:[#allocation4 + $0x44] sm:$0xf]  ;;  %vm18147_vm4 = vmmov %vm18143_vm0 }
 0x2a1   : > { %v3280_v38 = vmax.f32 %v2497_v11, %v3203_v7  ;;  %v1891_v21 = vsel %vm17822_vm7, %v11126_v43, %v1890_v14  ;;  %v2922_v42 = vunpack.c.h.b16 %v2758_v39  ;;  %v9810_v40 = vor.u32 %v10452_v30, %v9809_v34  ;;  %vm18148_vm11 = vmmov %vm18143_vm0 }
 0x2a2   : > { %v4284_v53 = vsel %vm18137_vm1, %v4281_v29, %v4283_v59  ;;  %v4424_v23 = vsel %vm13799_vm8, 0, %v13389_v44  ;;  %v2138_v36 = vunpack.c.l.b16 %v1891_v21  ;;  %v4490_v46 = vunpack.c.l.bf16 %v4425_v24  ;;  %vm18150_vm6 = vmmov %vm18144_vm3 }
 0x2a3   : > { %v3380_v33 = vmax.f32 %v3280_v38, %v13647_v1  ;;  %v2139_v0 = vunpack.c.h.b16 %v1891_v21  ;;  %vm2925_vm12 = vcmp.ne.s32.totalorder %v2921_v58, %v17832_v63  ;;  %vm2926_vm2 = vcmp.ne.s32.totalorder %v2922_v42, %v17833_v35  ;;  %4730 = vmatmul.bf16.vlgmr.msra.gmra.mxu1 %v9810_v40  ;;  %vm18151_vm1 = vmmov %vm18144_vm3 }
 0x2a4   : > { %v3889_v22 = vsel %vm18138_vm14, %v3886_v8, %v3888_v60  ;;  %v4067_v56 = vmax.f32 %v3967_v28, %v13409_v15  ;;  %vm2142_vm5 = vcmp.ne.s32.totalorder %v2138_v36, %v17832_v63  ;;  %vm13891_vm15 = vmpackc.low %vm2926_vm2, %vm2925_vm12  ;;  %v4279_v44 = vrot.slane %v13857_v62, 1  ;;  %v10454_v36 = vld [vmem:[%s18135_s7 + $0x14] sm:$0xf0] }
 0x2a5   : > { %v3673_v43 = vmax.f32 %v3380_v33, %v3596_v32  ;;  %v13896_v18 = vunpack.c.l.bf16 %v4424_v23  ;;  %vm2143_vm8 = vcmp.ne.s32.totalorder %v2139_v0, %v17833_v35  ;;  %v3050_v49 = vsel %vm13891_vm15, 0, %v10695_v26  ;;  %v9817_v23 = vld [vmem:[%s18135_s7 + $0x10] sm:$0xf]  ;;  %vm18153_vm12 = vmmov %vm18143_vm0 }
 0x2a6   : > { %v4360_v60 = vmax.f32 %v4067_v56, %v4284_v53  ;;  %vm13901_vm9 = vmpackc.low %vm2143_vm8, %vm2142_vm5  ;;  %v3115_v24 = vunpack.c.l.bf16 %v3050_v49  ;;  %v4282_v11 = vsel %vm18143_vm0, %v4279_v44, %v4281_v29  ;;  %v4574_v5 = vrot.slane %v4490_v46, 2 }
 0x2a7   : > { %v3966_v4 = vmax.f32 %v3673_v43, %v3889_v22  ;;  %v2267_v7 = vsel %vm13901_vm9, 0, %v10695_v26  ;;  %v3444_v62 = vsel %vm13901_vm9, 0, %v13756_v10  ;;  %v3737_v30 = vsel %vm13891_vm15, 0, %v13756_v10  ;;  %vm18154_vm2 = vmmov %vm18143_vm0 }
 0x2a8   : > { %v2332_v39 = vunpack.c.l.bf16 %v2267_v7  ;;  %v3509_v34 = vunpack.c.l.bf16 %v3444_v62  ;;  %v4572_v38 = vrot.slane %v13896_v18, 2  ;;  %v4577_v28 = vsel %vm18144_vm3, %v4574_v5, %v4576_v47  ;;  %vm18156_vm14 = vmmov %vm18151_vm1 }
 0x2a9   : > { %v4066_v14 = vmax.f32 %v3966_v4, %v13406_v13  ;;  %v4653_v58 = vmax.f32 %v4360_v60, %v4577_v28  ;;  %v3198_v21 = vrot.slane %v3115_v24, 2  ;;  %v3802_v40 = vunpack.c.l.bf16 %v3737_v30  ;;  %vm18157_vm5 = vmmov %vm18151_vm1 }
 0x2aa   : > { %v2415_v32 = vrot.slane %v2332_v39, 1  ;;  %v4575_v42 = vsel %vm18145_vm13, %v4572_v38, %v4574_v5  ;;  %v4130_v13 = vsel %vm13901_vm9, 0, %v13571_v61  ;;  %v18146_v10 = vrot.slane %v11914_v50, 1  ;;  %vm18160_vm8 = vmmov %vm18143_vm0 }
 0x2ab   : > { %v4359_v29 = vmax.f32 %v4066_v14, %v4282_v11  ;;  %v3591_v47 = vrot.slane %v3509_v34, 1  ;;  %v18149_v43 = vrot.slane %v11916_v9, 2  ;;  %v4195_v22 = vunpack.c.l.bf16 %v4130_v13  ;;  %v18161_v34 = vld [vmem:[#allocation37_spill] sm:$0xff]  ;;  %vm18163_vm9 = vmmov %vm18151_vm1  ;;  %v9833_v13 = vld [vmem:[%s18135_s7 + $0x30] sm:$0xf] }
 0x2ac   : > { %v2416_v53 = vsel %vm18147_vm4, %v18146_v10, %v2415_v32  ;;  %v2418_v19 = vsel %vm18148_vm11, %v2415_v32, %v2417_v31  ;;  %v3201_v31 = vsel %vm18151_vm1, %v3198_v21, %v3200_v57  ;;  %v4423_v26 = vsel %vm13891_vm15, 0, %v13571_v61  ;;  %vm18159_vm15 = vmmov %vm18143_vm0 }
 0x2ad   : > { %v4652_v33 = vmax.f32 %v4359_v29, %v4575_v42  ;;  %v2495_v46 = vmax.f32 %v11910_v17, %v2416_v53  ;;  %v2496_v0 = vmax.f32 %v11943_v55, %v2418_v19  ;;  %v3199_v27 = vsel %vm18150_vm6, %v18149_v43, %v3198_v21  ;;  %vm18164_vm0 = vmmov %vm18151_vm1  ;;  %v10453_v21 = vld [vmem:[%s18135_s7 + $0x14] sm:$0xf]  ;;  %v9819_v42 = vld [vmem:[%s18135_s7 + $0x18] sm:$0xf0] }
 0x2ae   : > { %v9818_v49 = vor.u32 %v10454_v36, %v9817_v23  ;;  %v18152_v17 = vrot.slane %v11979_v12, 1  ;;  %v3594_v9 = vsel %vm18154_vm2, %v3591_v47, %v3593_v16  ;;  %v3884_v3 = vrot.slane %v3802_v40, 2  ;;  %v10455_v53 = vld [vmem:[%s18135_s7 + $0x24] sm:$0xf]  ;;  %v9827_v19 = vld [vmem:[%s18135_s7 + $0x28] sm:$0xf0] }
 0x2af   : > { %v4675_v50 = vpack.c.bf16 %v4653_v58, %v4652_v33  ;;  %v3278_v56 = vmax.f32 %v2495_v46, %v3199_v27  ;;  %v3279_v18 = vmax.f32 %v2496_v0, %v3201_v31  ;;  %v4277_v60 = vrot.slane %v4195_v22, 1  ;;  %v9825_v58 = vld [vmem:[%s18135_s7 + $0x20] sm:$0xf]  ;;  %v10458_v33 = vld [vmem:[%s18135_s7 + $0x34] sm:$0xf0]  ;;  %v10460_v43 = vld [vmem:[%s18165_s8 + $0x8] sm:$0xff] }
 0x2b0   : > { %v3592_v55 = vsel %vm18153_vm12, %v18152_v17, %v3591_v47  ;;  %v4488_v15 = vunpack.c.l.bf16 %v4423_v26  ;;  %v18155_v61 = vrot.slane %v11981_v51, 2  ;;  %v3887_v52 = vsel %vm18157_vm5, %v3884_v3, %v3886_v8  ;;  %v10457_v23 = vld [vmem:[%s18135_s7 + $0x34] sm:$0xf]  ;;  %v9835_v36 = vld [vmem:[%s18135_s7 + $0x38] sm:$0xf0]  ;;  %v10459_v27 = vld [vmem:[%s18165_s8] sm:$0xff] }
 0x2b1   : > { %4757 = vmatpush.bf16.msra.mxu2 %v4675_v50  ;;  %v3378_v57 = vmax.f32 %v3278_v56, %v11973_v6  ;;  %v3379_v4 = vmax.f32 %v3279_v18, %v12020_v2  ;;  %v18158_v5 = vrot.slane %v12067_v45, 1  ;;  %v4280_v2 = vsel %vm18160_vm8, %v4277_v60, %v4279_v44  ;;  %v10451_v45 = vld [vmem:[%s18135_s7 + $0x4] sm:$0xf]  ;;  %v10462_v0 = vld [vmem:[%s18165_s8 + $0x18] sm:$0xff]  ;;  %v10461_v50 = vld [vmem:[%s18165_s8 + $0x10] sm:$0xff]  ;;  %s18603_s8 = sld [smem:[#allocation43_spill]] }
 0x2b2   : > { %v3885_v12 = vsel %vm18156_vm14, %v18155_v61, %v3884_v3  ;;  %v4570_v7 = vrot.slane %v4488_v15, 2  ;;  %v18162_v30 = vrot.slane %v18161_v34, 2  ;;  %v9822_v40 = vor.u32 %v10453_v21, %v9819_v42  ;;  %4837 = vmatpush.bf16.msra.mxu3 %v10462_v0 }
 0x2b3   : > { %v3671_v24 = vmax.f32 %v3378_v57, %v3592_v55  ;;  %v3672_v59 = vmax.f32 %v3379_v4, %v3594_v9  ;;  %4735 = vmatmul.bf16.gmra.mxu1 %v9818_v49  ;;  %v4278_v6 = vsel %vm18159_vm15, %v18158_v5, %v4277_v60  ;;  %v9834_v10 = vor.u32 %v10458_v33, %v9833_v13 }
 0x2b4   : > { %v4571_v41 = vsel %vm18163_vm9, %v18162_v30, %v4570_v7  ;;  %v4573_v8 = vsel %vm18164_vm0, %v4570_v7, %v4572_v38  ;;  %v10456_v38 = vld [vmem:[%s18135_s7 + $0x24] sm:$0xf0]  ;;  %v9830_v47 = vor.u32 %v10455_v53, %v9827_v19  ;;  %v9838_v46 = vor.u32 %v10457_v23, %v9835_v36 }
 0x2b5   : > { %v3964_v11 = vmax.f32 %v3671_v24, %v3885_v12  ;;  %v3965_v16 = vmax.f32 %v3672_v59, %v3887_v52  ;;  %v9826_v32 = vor.u32 %v10456_v38, %v9825_v58  ;;  %vm17463_vm3 = vcmask 523264  }
 0x2b6   : > { %4838 = vmatpush.bf16.msra.mxu3 %v10461_v50  ;;  %vm17466_vm13 = vcmask 125952   ;;  %vm17464_vm4 = vcmask 122880   ;;  %vm18166_vm11 = vsmask.f32 256  ;;  %v18167_v34 = vmov 0 }
 0x2b7   : > { %v4064_v62 = vmax.f32 %v3964_v11, %v13647_v1  ;;  %v4065_v14 = vmax.f32 %v3965_v16, %v13608_v20  ;;  %v9811_v1 = vld [vmem:[%s18135_s7 + $0x8] sm:$0xf0]  ;;  %vm14024_vm6 = vmand %vm17464_vm4, %vm18166_vm11  ;;  %4879 = vst.msk [vmem:[#allocation2] sm:$0xf] %vm17466_vm13, %v13736_v54  ;;  %vm4966_vm1 = vsmask.f32 7938 }
 0x2b8   : > { %v9814_v20 = vor.u32 %v10451_v45, %v9811_v1  ;;  %v18168_v34 = vsel %vm14024_vm6, 4294967295, %v18167_v34  ;;  %4985 = vst.msk [vmem:[#allocation2 + $0x28] sm:$0x1] %vm17464_vm4, %v13736_v54  ;;  %vm14042_vm12 = vmand %vm17466_vm13, %vm4966_vm1  ;;  %v14049_v53 = vand.u32 7, %v17868_v37 }
 0x2b9   : > { %v4357_v51 = vmax.f32 %v4064_v62, %v4278_v6  ;;  %v4358_v39 = vmax.f32 %v4065_v14, %v4280_v2 }
 0x2ba   : > { %4839 = vmatpush.bf16.msra.mxu3 %v10460_v43  ;;  %18172 = vst [vmem:[#allocation19_spill] sm:$0xff] %v14049_v53  ;;  %vm5082_vm2 = vcmp.eq.s32.totalorder %v14049_v53, 0  ;;  %v18173_v43 = vld [vmem:[#allocation23_spill] sm:$0xff]  ;;  %vm5090_vm5 = vcmp.eq.s32.totalorder %v14049_v53, 7 }
 0x2bb   : > { %v4650_v28 = vmax.f32 %v4357_v51, %v4571_v41  ;;  %v4651_v29 = vmax.f32 %v4358_v39, %v4573_v8  ;;  %v4882_v39 = vld [vmem:[#allocation2 + $0x4] sm:$0x1]  ;;  %v14037_v41 = vld [vmem:[%s18169_s30] ss:$0 sm:$0xff]  ;;  %vm14059_vm14 = vmpackc.low %vm5082_vm2, %vm5082_vm2  ;;  %s17499_s30 = smov 64  }
 0x2bc   : > { %v4883_v30 = vsel %vm14024_vm6, 0, %v4882_v39  ;;  %vm5156_vm9 = vmpackc.low %vm5090_vm5, %vm5090_vm5 }
 0x2bd   : > { %v4674_v44 = vpack.c.bf16 %v4651_v29, %v4650_v28  ;;  %4884 = vst [vmem:[#allocation2 + $0x4] sm:$0x1] %v4883_v30 }
 0x2be   : > { %4840 = vmatpush.bf16.msra.mxu3 %v10459_v27  ;;  %v14054_v27 = vand.u32 7, %v18173_v43 }
 0x2bf   : > { %4758 = vmatpush.bf16.msra.mxu2 %v4674_v44  ;;  %v14469_v43 = vld [vmem:[#allocation2 + $0x28] sm:$0x1] }
 0x2c0   : > { %18174 = vst [vmem:[#allocation21_spill] sm:$0xff] %v14054_v27  ;;  %vm5083_vm15 = vcmp.eq.s32.totalorder %v14054_v27, 0  ;;  %vm5091_vm8 = vcmp.eq.s32.totalorder %v14054_v27, 7 }
 0x2c1   : > { %vm5157_vm11 = vmpackc.low %vm5091_vm8, %vm5091_vm8 }
 0x2c2   : > { %4759 = vmatmul.bf16.vlgmr.msra.gmra.mxu2 %v9814_v20  ;;  %vm14103_vm8 = vmpackc.low %vm5083_vm15, %vm5083_vm15 }
 0x2c3   : > { %4740 = vmatmul.bf16.gmra.mxu1 %v9826_v32 }
 0x2c4   : > { %v4968_v21 = vld [vmem:[#allocation2 + $0x4] sm:$0xf] }
 0x2d2   : > { %4764 = vmatmul.bf16.gmra.mxu2 %v9822_v40 }
 0x2d3   : > { %4745 = vmatmul.bf16.gmra.mxu1 %v9834_v10 }
 0x2e2   : > { %4769 = vmatmul.bf16.gmra.mxu2 %v9830_v47 }
 0x2f2   : > { %4774 = vmatmul.bf16.gmra.mxu2 %v9838_v46 }
 0x320   : > { %v4731_v31 = vpop.f32.mrf.mxu1 }
 0x328   : > { %v4733_v22 = vpop.f32.mrf.mxu1 }
 0x330   : > { %v4736_v18 = vpop.f32.mrf.mxu1 }
 0x338   : > { %v4738_v9 = vpop.f32.mrf.mxu1 }
 0x340   : > { %v4741_v4 = vpop.f32.mrf.mxu1 }
 0x345   : > { %v4760_v56 = vpop.f32.mrf.mxu2 }
 0x346   : > { %v4761_v49 = vadd.f32 %v4760_v56, %v4731_v31  ;;  %v18175_v31 = vld [vmem:[#allocation18_spill] sm:$0xff] }
 0x348   : > { %v4743_v61 = vpop.f32.mrf.mxu1 }
 0x34d   : > { %v4762_v26 = vpop.f32.mrf.mxu2 }
 0x34e   : > { %v4763_v17 = vadd.f32 %v4762_v26, %v4733_v22  ;;  %v14057_v22 = vand.u32 7, %v18175_v31 }
 0x350   : > { %v4780_v55 = vpack.c.bf16 %v4763_v17, %v4761_v49  ;;  %v4746_v5 = vpop.f32.mrf.mxu1  ;;  %18176 = vst [vmem:[#allocation25_spill] sm:$0xff] %v14057_v22  ;;  %vm5093_vm0 = vcmp.eq.s32.totalorder %v14057_v22, 7 }
 0x351   : > { %vm14084_vm1 = vmpackc.low %vm5093_vm0, %vm5093_vm0 }
 0x352   : > { %9855 = vmatmul.msk.bf16.vlgmr.msra.gmra.mxu3 %vm17463_vm3, %v4780_v55 }
 0x355   : > { %v4765_v3 = vpop.f32.mrf.mxu2 }
 0x356   : > { %v4766_v60 = vadd.f32 %v4765_v3, %v4736_v18 }
 0x358   : > { %v4748_v2 = vpop.f32.mrf.mxu1 }
 0x35d   : > { %v4767_v57 = vpop.f32.mrf.mxu2 }
 0x35e   : > { %v4768_v15 = vadd.f32 %v4767_v57, %v4738_v9  ;;  %v1051_v9 = vadd.s32 16, %v17868_v37 }
 0x360   : > { %v4781_v24 = vpack.c.bf16 %v4768_v15, %v4766_v60  ;;  %v14077_v15 = vand.u32 7, %v1051_v9 }
 0x362   : > { %9856 = vmatmul.msk.bf16.gmra.mxu3 %vm17463_vm3, %v4781_v24  ;;  %18179 = vst [vmem:[#allocation26_spill] sm:$0xff] %v14077_v15  ;;  %v5164_v24 = vsel %vm5156_vm9, 65537, %v13736_v54  ;;  %vm5092_vm2 = vcmp.eq.s32.totalorder %v14077_v15, 7 }
 0x363   : > { %vm5158_vm5 = vmpackc.low %vm5092_vm2, %vm5092_vm2 }
 0x364   : > { %v5166_v39 = vsel %vm5158_vm5, 65537, %v13736_v54 }
 0x365   : > { %v4770_v59 = vpop.f32.mrf.mxu2 }
 0x366   : > { %v4771_v12 = vadd.f32 %v4770_v59, %v4741_v4 }
 0x36d   : > { %v4772_v52 = vpop.f32.mrf.mxu2 }
 0x36e   : > { %v4773_v11 = vadd.f32 %v4772_v52, %v4743_v61  ;;  %v5165_v52 = vsel %vm5157_vm11, 65537, %v13736_v54 }
 0x370   : > { %v4782_v16 = vpack.c.bf16 %v4773_v11, %v4771_v12  ;;  %v5172_v11 = vrot.slane %v5164_v24, 7 }
 0x372   : > { %9857 = vmatmul.msk.bf16.gmra.mxu3 %vm17463_vm3, %v4782_v16 }
 0x375   : > { %v4775_v6 = vpop.f32.mrf.mxu2 }
 0x376   : > { %v4776_v7 = vadd.f32 %v4775_v6, %v4746_v5  ;;  %v5174_v6 = vrot.slane %v5165_v52, 7 }
 0x378   : > { %v5176_v30 = vrot.slane %v5174_v6, 4 }
 0x37d   : > { %v4777_v62 = vpop.f32.mrf.mxu2 }
 0x37e   : > { %v4778_v14 = vadd.f32 %v4777_v62, %v4748_v2  ;;  %v5167_v62 = vsel %vm14084_vm1, 65537, %v13736_v54 }
 0x380   : > { %v4783_v51 = vpack.c.bf16 %v4778_v14, %v4776_v7  ;;  %v5173_v14 = vrot.slane %v5172_v11, 4 }
 0x382   : > { %9858 = vmatmul.msk.bf16.gmra.mxu3 %vm17463_vm3, %v4783_v51  ;;  %vm5085_vm3 = vcmp.eq.s32.totalorder %v14057_v22, 0 }
 0x3d5   : > { %v4842_v8 = vpop.f32.mrf.mxu3 }
 0x3d6   : > { %v4843_v28 = vadd.f32 %v14037_v41, %v4842_v8  ;;  %v5195_v8 = vunpack.c.l.b16 %v5172_v11 }
 0x3d8   : > { %v4862_v29 = vmax.f32 %v4843_v28, 0.0  ;;  %vm5199_vm15 = vcmp.ne.s32.totalorder %v5195_v8, %v17832_v63 }
 0x3da   : > { %v4870_v45 = vpack.c.bf16 %v4862_v29, %v4862_v29 }
 0x3dc   : > { %v4886_v1 = vshrl.u32 %v4870_v45, 16  ;;  %v4889_v58 = vshll.u32 %v4870_v45, 16 }
 0x3dd   : > { %v4844_v44 = vpop.f32.mrf.mxu3 }
 0x3de   : > { %v4888_v20 = vrot.slane %v4886_v1, 7  ;;  %v4845_v38 = vadd.f32 %v14037_v41, %v4844_v44  ;;  %v18182_v1 = vmov 0  ;;  %v5175_v44 = vsel %vm17831_vm10, %v5173_v14, %v5174_v6 }
 0x3df   : > { %v18183_v1 = vsel %vm14103_vm8, 4294967295, %v18182_v1 }
 0x3e0   : > { %v4891_v42 = vor.u32 %v4889_v58, %v4888_v20  ;;  %v4863_v40 = vmax.f32 %v4845_v38, 0.0  ;;  %v4892_v46 = vrot.slane %v4888_v20, 4  ;;  %v5177_v20 = vrot.slane %v5166_v39, 7 }
 0x3e1   : > { %v18190_v39 = vmov 0 }
 0x3e2   : > { %v4969_v13 = vsel %vm14042_vm12, %v4891_v42, %v4968_v21  ;;  %v4871_v33 = vpack.c.bf16 %v4863_v40, %v4863_v40  ;;  %v14116_v21 = vrot.slane %v5167_v62, 7  ;;  %v5196_v42 = vunpack.c.h.b16 %v5172_v11 }
 0x3e3   : > { %4970 = vst [vmem:[#allocation2 + $0x4] sm:$0xf] %v4969_v13  ;;  %v18188_v11 = vmov 0 }
 0x3e4   : > { %v4894_v10 = vshrl.u32 %v4871_v33, 16  ;;  %v4897_v23 = vshll.u32 %v4871_v33, 16  ;;  %vm5200_vm9 = vcmp.ne.s32.totalorder %v5196_v42, %v17833_v35 }
 0x3e5   : > { %v4847_v19 = vpop.f32.mrf.mxu3  ;;  %vm14130_vm0 = vmpackc.low %vm5200_vm9, %vm5199_vm15 }
 0x3e6   : > { %v4896_v47 = vrot.slane %v4894_v10, 7  ;;  %v4848_v36 = vadd.f32 %v14037_v41, %v4847_v19  ;;  %v5139_v10 = vld [vmem:[#allocation2] sm:$0xe] }
 0x3e7   : > { %v14119_v19 = vld [vmem:[#allocation2] sm:$0xf] }
 0x3e8   : > { %v4899_v0 = vor.u32 %v4897_v23, %v4896_v47  ;;  %v4864_v50 = vmax.f32 %v4848_v36, 0.0  ;;  %v4901_v16 = vrot.slane %v4896_v47, 4  ;;  %v5178_v23 = vsel %vm17831_vm10, %v5176_v30, %v5177_v20  ;;  %5984 = vst.msk [vmem:[#allocation2] sm:$0xf] %vm17466_vm13, %v13736_v54 }
 0x3e9   : > { %v5179_v36 = vrot.slane %v5177_v20, 4  ;;  %v5210_v9 = vunpack.c.h.b16 %v5178_v23 }
 0x3ea   : > { %v5985_v18 = vld [vmem:[#allocation2 + $0x4] sm:$0x1]  ;;  %v4900_v26 = vsel %vm17822_vm7, %v4892_v46, %v4899_v0  ;;  %v4872_v49 = vpack.c.bf16 %v4864_v50, %v4864_v50  ;;  %v5202_v46 = vunpack.c.l.b16 %v5175_v44  ;;  %v5277_v6 = vld [vmem:[#allocation2 + $0x4] sm:$0xe] }
 0x3eb   : > { %v14065_v17 = vld [vmem:[#allocation2 + $0x4] sm:$0xf]  ;;  %v5986_v55 = vsel %vm14024_vm6, 0, %v5985_v18  ;;  %4971 = vst.msk [vmem:[#allocation2 + $0x8] sm:$0xf] %vm17466_vm13, %v4900_v26  ;;  %v5203_v18 = vunpack.c.h.b16 %v5175_v44  ;;  %v5181_v26 = vsel %vm17831_vm10, %v5179_v36, %v14116_v21  ;;  %vm5214_vm15 = vcmp.ne.s32.totalorder %v5210_v9, %v17833_v35 }
 0x3ec   : > { %v4903_v3 = vshrl.u32 %v4872_v49, 16  ;;  %v5268_v57 = vsel %vm14059_vm14, 0, %v14065_v17  ;;  %5987 = vst [vmem:[#allocation2 + $0x4] sm:$0x1] %v5986_v55  ;;  %v4906_v4 = vshll.u32 %v4872_v49, 16  ;;  %v18184_v49 = vmov 0 }
 0x3ed   : > { %v4849_v60 = vpop.f32.mrf.mxu3  ;;  %v5444_v5 = vunpack.c.l.b16 %v5268_v57  ;;  %v18185_v49 = vsel %vm14130_vm0, 4294967295, %v18184_v49  ;;  %vm5206_vm11 = vcmp.ne.s32.totalorder %v5202_v46, %v17832_v63  ;;  %v5209_v55 = vunpack.c.l.b16 %v5178_v23 }
 0x3ee   : > { %v14081_v59 = vrot.slane %v4903_v3, 7  ;;  %v4850_v61 = vadd.f32 %v14037_v41, %v4849_v60  ;;  %vm5207_vm1 = vcmp.ne.s32.totalorder %v5203_v18, %v17833_v35  ;;  %v5216_v24 = vunpack.c.l.b16 %v5181_v26 }
 0x3ef   : > { %vm14137_vm2 = vmpackc.low %vm5207_vm1, %vm5206_vm11  ;;  %vm5213_vm5 = vcmp.ne.s32.totalorder %v5209_v55, %v17832_v63  ;;  %v5278_v20 = vsel %vm14130_vm0, 0, %v5277_v6 }
 0x3f0   : > { %v4908_v2 = vor.u32 %v4906_v4, %v14081_v59  ;;  %v4865_v7 = vmax.f32 %v4850_v61, 0.0  ;;  %v4910_v51 = vrot.slane %v14081_v59, 4  ;;  %v5217_v59 = vunpack.c.h.b16 %v5181_v26  ;;  %vm14147_vm9 = vmpackc.low %vm5214_vm15, %vm5213_vm5 }
 0x3f1   : > { %v18189_v11 = vsel %vm14147_vm9, 4294967295, %v18188_v11  ;;  %vm5220_vm11 = vcmp.ne.s32.totalorder %v5216_v24, %v17832_v63  ;;  %vm18192_vm15 = vcmask 1046528  }
 0x3f2   : > { %v4909_v28 = vsel %vm17822_vm7, %v4901_v16, %v4908_v2  ;;  %v4873_v29 = vpack.c.bf16 %v4865_v7, %v4865_v7  ;;  %v14098_v45 = vld [vmem:[#allocation2 + $0x8] sm:$0xf]  ;;  %v5258_v16 = vsel %vm14130_vm0, 0, %v5139_v10  ;;  %vm5221_vm1 = vcmp.ne.s32.totalorder %v5217_v59, %v17833_v35 }
 0x3f3   : > { %4972 = vst.msk [vmem:[#allocation2 + $0xc] sm:$0xf] %vm17466_vm13, %v4909_v28  ;;  %v5269_v58 = vsel %vm14103_vm8, 0, %v14098_v45  ;;  %v5288_v38 = vsel %vm14059_vm14, 0, %v14098_v45  ;;  %v5260_v7 = vsel %vm14147_vm9, 0, %v14098_v45  ;;  %vm14165_vm5 = vmpackc.low %vm5221_vm1, %vm5220_vm11  ;;  %v5404_v30 = vunpack.c.l.b16 %v5258_v16 }
 0x3f4   : > { %v4912_v40 = vshrl.u32 %v4873_v29, 16  ;;  %v4915_v13 = vshll.u32 %v4873_v29, 16  ;;  %v5445_v33 = vunpack.c.l.b16 %v5269_v58  ;;  %v5565_v4 = vunpack.c.l.b16 %v5288_v38  ;;  %vm18195_vm1 = vmmov %vm18192_vm15 }
 0x3f5   : > { %v4852_v47 = vpop.f32.mrf.mxu3  ;;  %v18191_v39 = vsel %vm14165_vm5, 4294967295, %v18190_v39  ;;  %v5406_v44 = vunpack.c.l.b16 %v5260_v7  ;;  %v5279_v10 = vsel %vm14137_vm2, 0, %v14098_v45  ;;  %vm17465_vm11 = vsmask.f32 7424 }
 0x3f6   : > { %v4914_v0 = vrot.slane %v4912_v40, 7  ;;  %v4853_v50 = vadd.f32 %v14037_v41, %v4852_v47  ;;  %v5452_v31 = vpack.c.b16 %v5445_v33, %v5444_v5  ;;  %v5259_v5 = vsel %vm14137_vm2, 0, %v14065_v17 }
 0x3f7   : > { %v5405_v29 = vunpack.c.l.b16 %v5259_v5  ;;  %v5527_v26 = vunpack.c.l.b16 %v5279_v10 }
 0x3f8   : > { %v4917_v3 = vor.u32 %v4915_v13, %v4914_v0  ;;  %v4866_v57 = vmax.f32 %v4853_v50, 0.0  ;;  %5456 = vrot.lane.b32.xlu1 %v5452_v31, %s17495_s5  ;;  %v4919_v13 = vrot.slane %v4914_v0, 4  ;;  %v5526_v50 = vunpack.c.l.b16 %v5278_v20 }
 0x3f9   : > { %v5413_v33 = vpack.c.b16 %v5405_v29, %v5404_v30  ;;  %v5336_v0 = vunpack.c.l.b16 %v14119_v19 }
 0x3fa   : > { %v4918_v61 = vsel %vm17822_vm7, %v4910_v51, %v4917_v3  ;;  %v4874_v12 = vpack.c.bf16 %v4866_v57, %v4866_v57  ;;  %v14145_v52 = vld [vmem:[#allocation2 + $0xc] sm:$0xf]  ;;  %v5535_v59 = vpack.c.b16 %v5527_v26, %v5526_v50  ;;  %v5297_v50 = vld [vmem:[#allocation2 + $0x8] sm:$0xe] }
 0x3fb   : > { %4973 = vst.msk [vmem:[#allocation2 + $0x10] sm:$0xf] %vm17466_vm13, %v4918_v61  ;;  %v5289_v2 = vsel %vm14103_vm8, 0, %v14145_v52  ;;  %v5261_v28 = vsel %vm14165_vm5, 0, %v14145_v52  ;;  %v5280_v47 = vsel %vm14147_vm9, 0, %v14145_v52  ;;  %v5419_v18 = vrot.slane %v5413_v33, 1 }
 0x3fc   : > { %v4921_v62 = vshrl.u32 %v4874_v12, 16  ;;  %v4924_v14 = vshll.u32 %v4874_v12, 16  ;;  %v5566_v51 = vunpack.c.l.b16 %v5289_v2  ;;  %v5407_v40 = vunpack.c.l.b16 %v5261_v28 }
 0x3fd   : > { %v4854_v8 = vpop.f32.mrf.mxu3  ;;  %v5338_v61 = vunpack.c.l.b16 %v14098_v45  ;;  %v5339_v12 = vunpack.c.l.b16 %v14145_v52  ;;  %v5528_v6 = vunpack.c.l.b16 %v5280_v47 }
 0x3fe   : > { %v4923_v58 = vrot.slane %v4921_v62, 7  ;;  %v4855_v38 = vadd.f32 %v14037_v41, %v4854_v8  ;;  %v5573_v42 = vpack.c.b16 %v5566_v51, %v5565_v4  ;;  %v5414_v46 = vpack.c.b16 %v5407_v40, %v5406_v44  ;;  %v10471_v8 = vld [vmem:[%s18193_s27 + $0x40] sm:$0xff]  ;;  %s18272_s27 = smov 80  }
 0x3ff   : > { %v5337_v4 = vunpack.c.l.b16 %v14065_v17  ;;  %v14199_v30 = vpack.c.b16 %v5339_v12, %v5338_v61  ;;  %5837 = vmatpush.bf16.msrb.mxu1 %v10471_v8 }
 0x400   : > { %v4926_v23 = vor.u32 %v4924_v14, %v4923_v58  ;;  %v4867_v36 = vmax.f32 %v4855_v38, 0.0  ;;  %5577 = vrot.lane.b32.xlu2 %v5573_v42, %s17517_s25  ;;  %v4928_v31 = vrot.slane %v4923_v58, 4  ;;  %v14185_v3 = vrot.slane %v5414_v46, 1 }
 0x401   : > { %v5540_v14 = vrot.slane %v5535_v59, 1  ;;  %v5345_v51 = vpack.c.b16 %v5337_v4, %v5336_v0  ;;  %v5359_v38 = vshll.u32 %v14199_v30, 16  ;;  %v5468_v42 = vpack.c.b16 %v5338_v61, %v5337_v4 }
 0x402   : > { %v4927_v55 = vsel %vm17822_vm7, %v4919_v13, %v4926_v23  ;;  %v4875_v9 = vpack.c.bf16 %v4867_v36, %v4867_v36  ;;  %v14187_v57 = vld [vmem:[#allocation2 + $0x10] sm:$0xf]  ;;  %v5421_v5 = vsel %vm18192_vm15, %v5419_v18, %v14185_v3  ;;  %vm5084_vm15 = vcmp.eq.s32.totalorder %v14077_v15, 0 }
 0x403   : > { %4974 = vst.msk [vmem:[#allocation2 + $0x14] sm:$0xf] %vm17466_vm13, %v4927_v55  ;;  %v5281_v24 = vsel %vm14165_vm5, 0, %v14187_v57  ;;  %5428 = vrot.lane.b32.xlu0 %v5421_v5, %s17505_s4  ;;  %v5340_v20 = vunpack.c.l.b16 %v14187_v57  ;;  %v5354_v58 = vshll.u32 %v5345_v51, 16  ;;  %v5352_v10 = vshrl.u32 %v5345_v51, 16  ;;  %vm14227_vm4 = vmpackc.low %vm5084_vm15, %vm5084_vm15 }
 0x404   : > { %v4930_v16 = vshrl.u32 %v4875_v9, 16  ;;  %v5529_v2 = vunpack.c.l.b16 %v5281_v24  ;;  %v4933_v7 = vshll.u32 %v4875_v9, 16  ;;  %v14212_v23 = vrot.slane %v5359_v38, 1 }
 0x405   : > { %v4857_v62 = vpop.f32.mrf.mxu3  ;;  %v5356_v47 = vrot.slane %v5354_v58, 1  ;;  %v14216_v36 = vpack.c.b16 %v5340_v20, %v5339_v12  ;;  %v5474_v46 = vshrl.u32 %v5468_v42, 16  ;;  %v5476_v55 = vshll.u32 %v5468_v42, 16  ;;  %v18200_v58 = vld [vmem:[#allocation24_spill] sm:$0xff] }
 0x406   : > { %v14204_v28 = vrot.slane %v4930_v16, 7  ;;  %v4858_v29 = vadd.f32 %v14037_v41, %v4857_v62  ;;  %v5536_v44 = vpack.c.b16 %v5529_v2, %v5528_v6  ;;  %v18196_v61 = vmov 0 }
 0x407   : > { %v5357_v9 = vor.u32 %v5356_v47, %v5352_v10  ;;  %v5481_v4 = vshll.u32 %v14216_v36, 16  ;;  %v18197_v61 = vsel %vm14227_vm4, 4294967295, %v18196_v61  ;;  %v5298_v16 = vsel %vm14130_vm0, 0, %v5297_v50 }
 0x408   : > { %v4935_v40 = vor.u32 %v4933_v7, %v14204_v28  ;;  %v4868_v13 = vmax.f32 %v4858_v29, 0.0  ;;  %v14210_v33 = vrot.slane %v5536_v44, 1  ;;  %v18198_v7 = vmov 0 }
 0x409   : > { %v5362_v5 = vsel %vm17465_vm11, %v5357_v9, %v14212_v23  ;;  %v14237_v6 = vrot.slane %v5481_v4, 1  ;;  %v5270_v62 = vsel %vm14227_vm4, 0, %v14145_v52  ;;  %v14255_v38 = vand.u32 7, %v18200_v58 }
 0x40a   : > { %v4936_v18 = vsel %vm17822_vm7, %v4928_v31, %v4935_v40  ;;  %v4876_v26 = vpack.c.bf16 %v4868_v13, %v4868_v13  ;;  %v5542_v0 = vsel %vm18195_vm1, %v5540_v14, %v14210_v33  ;;  %v5478_v31 = vrot.slane %v5476_v55, 1  ;;  %v14231_v12 = vld [vmem:[#allocation2 + $0x14] sm:$0xf]  ;;  %vm14239_vm1 = vmpackc.low %vm5085_vm3, %vm5085_vm3 }
 0x40b   : > { %4975 = vst.msk [vmem:[#allocation2 + $0x18] sm:$0xf] %vm17466_vm13, %v4936_v18  ;;  %5549 = vrot.lane.b32.xlu2 %v5542_v0, %s17501_s28  ;;  %v18199_v7 = vsel %vm14239_vm1, 4294967295, %v18198_v7  ;;  %v5299_v14 = vsel %vm14137_vm2, 0, %v14145_v52  ;;  %5387 = vrot.lane.b32.xlu0 %v5362_v5, %s17503_s1  ;;  %v5271_v44 = vsel %vm14239_vm1, 0, %v14187_v57  ;;  %v5300_v40 = vsel %vm14147_vm9, 0, %v14187_v57 }
 0x40c   : > { %v4939_v24 = vshrl.u32 %v4876_v26, 16  ;;  %v4942_v59 = vshll.u32 %v4876_v26, 16  ;;  %v5479_v8 = vor.u32 %v5478_v31, %v5474_v46  ;;  %v5447_v42 = vunpack.c.l.b16 %v5271_v44 }
 0x40d   : > { %v4859_v2 = vpop.f32.mrf.mxu3  ;;  %v5301_v13 = vsel %vm14165_vm5, 0, %v14231_v12  ;;  %v4937_v10 = vrot.slane %v14204_v28, 4  ;;  %v5446_v18 = vunpack.c.l.b16 %v5270_v62  ;;  %v5621_v26 = vunpack.c.l.b16 %v5298_v16 }
 0x40e   : > { %v4941_v51 = vrot.slane %v4939_v24, 7  ;;  %v4860_v29 = vadd.f32 %v14037_v41, %v4859_v2  ;;  %v5484_v41 = vsel %vm17465_vm11, %v5479_v8, %v14237_v6  ;;  %v5622_v0 = vunpack.c.l.b16 %v5299_v14 }
 0x40f   : > { %5509 = vrot.lane.b32.xlu1 %v5484_v41, %s17499_s30  ;;  %v5623_v4 = vunpack.c.l.b16 %v5300_v40  ;;  %v5624_v24 = vunpack.c.l.b16 %v5301_v13  ;;  %v5453_v28 = vpack.c.b16 %v5447_v42, %v5446_v18  ;;  %v1053_v31 = vadd.s32 32, %v17868_v37  ;;  %v4978_v13 = vld [vmem:[#allocation2 + $0x24] sm:$0x1] }
 0x410   : > { %v4944_v47 = vor.u32 %v4942_v59, %v4941_v51  ;;  %v4869_v46 = vmax.f32 %v4860_v29, 0.0  ;;  %v4946_v50 = vrot.slane %v4941_v51, 4  ;;  %v5630_v59 = vpack.c.b16 %v5622_v0, %v5621_v26 }
 0x411   : > { %vm5095_vm3 = vcmp.eq.s32.totalorder %v14255_v38, 7  ;;  %v5631_v2 = vpack.c.b16 %v5624_v24, %v5623_v4  ;;  %vm17467_vm15 = vcmask 130048   ;;  %v5341_v16 = vunpack.c.l.b16 %v14231_v12 }
 0x412   : > { %v4945_v55 = vsel %vm17822_vm7, %v4937_v10, %v4944_v47  ;;  %v4877_v9 = vpack.c.bf16 %v4869_v46, %v4869_v46  ;;  %vm5161_vm11 = vmpackc.low %vm5095_vm3, %vm5095_vm3  ;;  %v14273_v62 = vld [vmem:[#allocation2 + $0x18] sm:$0xf]  ;;  %v14275_v51 = vand.u32 7, %v1053_v31  ;;  %v5182_v29 = vrot.slane %v14116_v21, 4 }
 0x413   : > { %4976 = vst.msk [vmem:[#allocation2 + $0x1c] sm:$0xf] %vm17466_vm13, %v4945_v55  ;;  %v5169_v8 = vsel %vm5161_vm11, 65537, %v13736_v54  ;;  %5458 = vrot.lane.b32.xlu0 %v5453_v28, %s17495_s5  ;;  %v5635_v58 = vrot.slane %v5630_v59, 1  ;;  %v14280_v42 = vrot.slane %v5631_v2, 1  ;;  %v14284_v40 = vpack.c.b16 %v5341_v16, %v5340_v20  ;;  %v14295_v20 = vld [vmem:[#allocation6 + $0x18] sm:$0xff] }
 0x414   : > { %v4948_v5 = vshrl.u32 %v4877_v9, 16  ;;  %v4951_v14 = vshll.u32 %v4877_v9, 16  ;;  %18201 = vst [vmem:[#allocation20_spill] sm:$0xff] %v14275_v51  ;;  %vm5094_vm3 = vcmp.eq.s32.totalorder %v14275_v51, 7  ;;  %v14287_v10 = vrot.slane %v5169_v8, 7 }
 0x415   : > { %v5363_v47 = vshrl.u32 %v14199_v30, 16  ;;  %v5342_v54 = vunpack.c.l.b16 %v14273_v62  ;;  %vm18202_vm11 = vcmask 1046528   ;;  %vm5160_vm13 = vmpackc.low %vm5094_vm3, %vm5094_vm3  ;;  %v5367_v18 = vshll.u32 %v14284_v40, 16 }
 0x416   : > { %v4950_v44 = vrot.slane %v4948_v5, 7  ;;  %v5637_v46 = vsel %vm18202_vm11, %v5635_v58, %v14280_v42  ;;  %v5168_v26 = vsel %vm5160_vm13, 65537, %v14295_v20  ;;  %v5485_v30 = vshrl.u32 %v14216_v36, 16 }
 0x417   : > { %9895 = vmatmul.msk.bf16.vlgmr.msrb.gmra.mxu1 %vm17467_vm15, %v5637_v46  ;;  %v5365_v0 = vor.u32 %v5363_v47, %v14212_v23  ;;  %v14299_v55 = vpack.c.b16 %v5342_v54, %v5341_v16  ;;  %v5183_v24 = vrot.slane %v5168_v26, 7  ;;  %v14306_v28 = vrot.slane %v5367_v18, 1  ;;  %v18205_v18 = vld [vmem:[#allocation17_spill] sm:$0xff] }
 0x418   : > { %v4953_v21 = vor.u32 %v4951_v14, %v4950_v44  ;;  %v4955_v41 = vrot.slane %v4950_v44, 4  ;;  %vm18203_vm3 = vcmask 125952   ;;  %v5290_v23 = vsel %vm14227_vm4, 0, %v14187_v57 }
 0x419   : > { %v5489_v31 = vshll.u32 %v14299_v55, 16  ;;  %v5291_v36 = vsel %vm14239_vm1, 0, %v14231_v12  ;;  %v5184_v5 = vsel %vm17831_vm10, %v5182_v29, %v5183_v24  ;;  %v5185_v2 = vrot.slane %v5183_v24, 4 }
 0x41a   : > { %v4954_v9 = vsel %vm17822_vm7, %v4946_v50, %v4953_v21  ;;  %v4979_v4 = vsel %vm14024_vm6, %v4955_v41, %v4978_v13  ;;  %v14308_v59 = vld [vmem:[#allocation2 + $0x1c] sm:$0xf]  ;;  %vm18204_vm13 = vsmask.f32 7424  ;;  %v5568_v14 = vunpack.c.l.b16 %v5291_v36 }
 0x41b   : > { %4977 = vst.msk [vmem:[#allocation2 + $0x20] sm:$0xf] %vm18203_vm3, %v4954_v9  ;;  %v5343_v50 = vunpack.c.l.b16 %v14308_v59  ;;  %v5370_v16 = vsel %vm18204_vm13, %v5365_v0, %v14306_v28  ;;  %v5223_v8 = vunpack.c.l.b16 %v5184_v5  ;;  %v5224_v44 = vunpack.c.h.b16 %v5184_v5 }
 0x41c   : > { %4980 = vst [vmem:[#allocation2 + $0x24] sm:$0x1] %v4979_v4  ;;  %5389 = vrot.lane.b32.xlu1 %v5370_v16, %s17503_s1  ;;  %v5487_v58 = vor.u32 %v5485_v30, %v14237_v6  ;;  %v14325_v13 = vrot.slane %v5489_v31, 1  ;;  %v5187_v47 = vsel %vm17831_vm10, %v5185_v2, %v14287_v10  ;;  %5604 = vrot.lane.b32.xlu0 %v5370_v16, %s17515_s2  ;;  %v5567_v29 = vunpack.c.l.b16 %v5290_v23 }
 0x41d   : > { %v14333_v21 = vpack.c.b16 %v5343_v50, %v5342_v54  ;;  %v1055_v41 = vadd.s32 48, %v17868_v37  ;;  %vm5227_vm11 = vcmp.ne.s32.totalorder %v5223_v8, %v17832_v63  ;;  %vm5228_vm3 = vcmp.ne.s32.totalorder %v5224_v44, %v17833_v35 }
 0x41e   : > { %v5230_v6 = vunpack.c.l.b16 %v5187_v47  ;;  %v5231_v46 = vunpack.c.h.b16 %v5187_v47  ;;  %v14339_v26 = vand.u32 7, %v18205_v18  ;;  %vm14341_vm13 = vmpackc.low %vm5228_vm3, %vm5227_vm11  ;;  %v18206_v0 = vmov 0 }
 0x41f   : > { %v18207_v0 = vsel %vm14341_vm13, 4294967295, %v18206_v0  ;;  %vm18208_vm15 = vsmask.f32 7424  ;;  %v5574_v54 = vpack.c.b16 %v5568_v14, %v5567_v29  ;;  %v5262_v9 = vsel %vm14341_vm13, 0, %v14187_v57 }
 0x420   : > { %v5492_v30 = vsel %vm18208_vm15, %v5487_v58, %v14325_v13  ;;  %vm5234_vm6 = vcmp.ne.s32.totalorder %v5230_v6, %v17832_v63  ;;  %vm5235_vm5 = vcmp.ne.s32.totalorder %v5231_v46, %v17833_v35  ;;  %v14352_v4 = vand.u32 7, %v1055_v41 }
 0x421   : > { %vm14354_vm9 = vmpackc.low %vm5235_vm5, %vm5234_vm6  ;;  %v18209_v24 = vmov 0  ;;  %v5408_v31 = vunpack.c.l.b16 %v5262_v9  ;;  %v5282_v23 = vsel %vm14341_vm13, 0, %v14231_v12  ;;  %v5302_v36 = vsel %vm14341_vm13, 0, %v14273_v62 }
 0x422   : > { %v18210_v24 = vsel %vm14354_vm9, 4294967295, %v18209_v24  ;;  %v5375_v5 = vshll.u32 %v14333_v21, 16  ;;  %v5263_v16 = vsel %vm14354_vm9, 0, %v14231_v12  ;;  %v5283_v14 = vsel %vm14354_vm9, 0, %v14273_v62 }
 0x423   : > { %v4981_v2 = vld [vmem:[#allocation2 + $0x24] sm:$0xf]  ;;  %v5303_v8 = vsel %vm14354_vm9, 0, %v14308_v59  ;;  %v5625_v44 = vunpack.c.l.b16 %v5302_v36  ;;  %v5409_v47 = vunpack.c.l.b16 %v5263_v16  ;;  %v5531_v29 = vunpack.c.l.b16 %v5283_v14 }
 0x424   : > { %v4982_v58 = vsel %vm14042_vm12, 0, %v4981_v2  ;;  %v5626_v41 = vunpack.c.l.b16 %v5303_v8  ;;  %v5530_v6 = vunpack.c.l.b16 %v5282_v23  ;;  %5511 = vrot.lane.b32.xlu1 %v5492_v30, %s17499_s30  ;;  %vm5096_vm6 = vcmp.eq.s32.totalorder %v14352_v4, 7  ;;  %5579 = vrot.lane.b32.xlu0 %v5574_v54, %s17517_s25 }
 0x425   : > { %4983 = vst [vmem:[#allocation2 + $0x24] sm:$0xf] %v4982_v58  ;;  %vm5097_vm5 = vcmp.eq.s32.totalorder %v14339_v26, 7  ;;  %v5415_v46 = vpack.c.b16 %v5409_v47, %v5408_v31  ;;  %v5371_v9 = vshrl.u32 %v14284_v40, 16  ;;  %v14381_v36 = vrot.slane %v5375_v5, 1  ;;  %vm5162_vm15 = vmpackc.low %vm5096_vm6, %vm5096_vm6 }
 0x426   : > { %v5632_v18 = vpack.c.b16 %v5626_v41, %v5625_v44  ;;  %v5537_v2 = vpack.c.b16 %v5531_v29, %v5530_v6  ;;  %vm5163_vm11 = vmpackc.low %vm5097_vm5, %vm5097_vm5  ;;  %v5170_v16 = vsel %vm5162_vm15, 65537, %v14295_v20  ;;  %v5188_v23 = vrot.slane %v14287_v10, 4  ;;  %v14403_v58 = vld [vmem:[#allocation2 + $0x20] sm:$0xf] }
 0x427   : > { %vm5087_vm3 = vcmp.eq.s32.totalorder %v14255_v38, 0  ;;  %v14386_v30 = vrot.slane %v5415_v46, 1  ;;  %v5373_v54 = vor.u32 %v5371_v9, %v14306_v28  ;;  %v5171_v31 = vsel %vm5163_vm11, 65537, %v14295_v20 }
 0x428   : > { %v14388_v14 = vrot.slane %v5632_v18, 1  ;;  %v5189_v40 = vrot.slane %v5170_v16, 7  ;;  %v5192_v5 = vrot.slane %v5171_v31, 7  ;;  %vm5086_vm6 = vcmp.eq.s32.totalorder %v14275_v51, 0  ;;  %vm14405_vm13 = vmpackc.low %vm5087_vm3, %vm5087_vm3 }
 0x429   : > { %vm18211_vm5 = vcmask 1046528   ;;  %vm18213_vm9 = vsmask.f32 7424  ;;  %v14410_v47 = vrot.slane %v5537_v2, 1  ;;  %vm18216_vm11 = vcmask 130048  }
 0x42a   : > { %v5423_v8 = vsel %vm18211_vm5, %v14185_v3, %v14386_v30  ;;  %vm18212_vm15 = vmmov %vm18211_vm5  ;;  %v14401_v44 = vsel %vm18213_vm9, %v5373_v54, %v14381_v36  ;;  %v5190_v3 = vsel %vm17831_vm10, %v5188_v23, %v5189_v40  ;;  %v5273_v29 = vsel %vm14405_vm13, 0, %v14273_v62 }
 0x42b   : > { %v5639_v10 = vsel %vm18212_vm15, %v14280_v42, %v14388_v14  ;;  %5430 = vrot.lane.b32.xlu2 %v5423_v8, %s17505_s4  ;;  %v5191_v42 = vrot.slane %v5189_v40, 4  ;;  %v5237_v41 = vunpack.c.l.b16 %v5190_v3  ;;  %v5238_v6 = vunpack.c.h.b16 %v5190_v3  ;;  %vm14418_vm9 = vmpackc.low %vm5086_vm6, %vm5086_vm6 }
 0x42c   : > { %9896 = vmatmul.msk.bf16.gmra.mxu1 %vm18216_vm11, %v5639_v10  ;;  %5606 = vrot.lane.b32.xlu1 %v14401_v44, %s17515_s2  ;;  %v17480_v9 = vunpack.c.l.b16 %v14403_v58  ;;  %v5272_v2 = vsel %vm14418_vm9, 0, %v14231_v12  ;;  %v5449_v16 = vunpack.c.l.b16 %v5273_v29  ;;  %v5544_v31 = vsel %vm18211_vm5, %v14210_v33, %v14410_v47  ;;  %v14439_v8 = vld [vmem:[#allocation2 + $0x24] sm:$0xf] }
 0x42d   : > { %v5193_v18 = vsel %vm17831_vm10, %v5191_v42, %v5192_v5  ;;  %vm5241_vm3 = vcmp.ne.s32.totalorder %v5237_v41, %v17832_v63  ;;  %vm5242_vm6 = vcmp.ne.s32.totalorder %v5238_v6, %v17833_v35  ;;  %v18219_v40 = vmov 0 }
 0x42e   : > { %v5244_v23 = vunpack.c.l.b16 %v5193_v18  ;;  %v5245_v54 = vunpack.c.h.b16 %v5193_v18  ;;  %vm14435_vm15 = vmpackc.low %vm5242_vm6, %vm5241_vm3  ;;  %v5448_v3 = vunpack.c.l.b16 %v5272_v2  ;;  %v18221_v42 = vmov 0 }
 0x42f   : > { %v18220_v40 = vsel %vm14435_vm15, 4294967295, %v18219_v40  ;;  %v5264_v10 = vsel %vm14435_vm15, 0, %v14273_v62  ;;  %v14454_v33 = vpack.c.b16 %v17480_v9, %v5343_v50  ;;  %v5304_v29 = vsel %vm14435_vm15, 0, %v14403_v58 }
 0x430   : > { %vm5248_vm11 = vcmp.ne.s32.totalorder %v5244_v23, %v17832_v63  ;;  %vm5249_vm10 = vcmp.ne.s32.totalorder %v5245_v54, %v17833_v35  ;;  %v5454_v6 = vpack.c.b16 %v5449_v16, %v5448_v3  ;;  %v5410_v50 = vunpack.c.l.b16 %v5264_v10 }
 0x431   : > { %vm14446_vm0 = vmpackc.low %vm5249_vm10, %vm5248_vm11  ;;  %v5627_v54 = vunpack.c.l.b16 %v5304_v29  ;;  %v5284_v16 = vsel %vm14435_vm15, 0, %v14308_v59  ;;  %v5293_v3 = vsel %vm14405_vm13, 0, %v14308_v59  ;;  %v5194_v37 = vrot.slane %v5192_v5, 4 }
 0x432   : > { %v18222_v42 = vsel %vm14446_vm0, 4294967295, %v18221_v42  ;;  %v5265_v41 = vsel %vm14446_vm0, 0, %v14308_v59  ;;  %v5285_v18 = vsel %vm14446_vm0, 0, %v14403_v58  ;;  %v5305_v2 = vsel %vm14446_vm0, 0, %v14439_v8  ;;  %vm18224_vm11 = vmmov %vm18211_vm5 }
 0x433   : > { %5551 = vrot.lane.b32.xlu2 %v5544_v31, %s17501_s28  ;;  %v5411_v23 = vunpack.c.l.b16 %v5265_v41  ;;  %v5628_v9 = vunpack.c.l.b16 %v5305_v2  ;;  %vm18223_vm10 = vcmask 122880   ;;  %v5533_v31 = vunpack.c.l.b16 %v5285_v18  ;;  %v5138_v2 = vld [vmem:[#allocation2 + $0x20] sm:$0x1] }
 0x434   : > { %6084 = vst.msk [vmem:[#allocation2 + $0x28] sm:$0x1] %vm18223_vm10, %v14295_v20  ;;  %5460 = vrot.lane.b32.xlu1 %v5454_v6, %s17495_s5  ;;  %v5292_v29 = vsel %vm14418_vm9, 0, %v14273_v62  ;;  %v5497_v41 = vshll.u32 %v14454_v33, 16  ;;  %v5251_v15 = vunpack.c.l.b16 %v5194_v37  ;;  %v5252_v27 = vunpack.c.h.b16 %v5194_v37  ;;  %s18270_s5 = smov 16  }
 0x435   : > { %v5416_v53 = vpack.c.b16 %v5411_v23, %v5410_v50  ;;  %v5633_v10 = vpack.c.b16 %v5628_v9, %v5627_v54  ;;  %v5532_v22 = vunpack.c.l.b16 %v5284_v16  ;;  %v5570_v48 = vunpack.c.l.b16 %v5293_v3 }
 0x436   : > { %v5569_v20 = vunpack.c.l.b16 %v5292_v29  ;;  %v5587_v50 = vunpack.c.l.b16 %v14439_v8  ;;  %vm5255_vm3 = vcmp.ne.s32.totalorder %v5251_v15, %v17832_v63  ;;  %vm5256_vm6 = vcmp.ne.s32.totalorder %v5252_v27, %v17833_v35  ;;  %v10469_v29 = vld [vmem:[%s18194_s29 + $0x30] sm:$0xff] }
 0x437   : > { %v5424_v51 = vrot.slane %v5416_v53, 1  ;;  %v14484_v5 = vrot.slane %v5633_v10, 1  ;;  %v5538_v6 = vpack.c.b16 %v5533_v31, %v5532_v22  ;;  %v5344_v53 = vunpack.c.l.b16 %v5138_v2  ;;  %vm14494_vm10 = vmpackc.low %vm5256_vm6, %vm5255_vm3 }
 0x438   : > { %v18225_v18 = vmov 0  ;;  %v5266_v15 = vsel %vm14494_vm10, 0, %v5138_v2  ;;  %vm18227_vm0 = vcmask 130048   ;;  %v5575_v27 = vpack.c.b16 %v5570_v48, %v5569_v20  ;;  %vm18230_vm3 = vmmov %vm18211_vm5 }
 0x439   : > { %v5425_v9 = vsel %vm18211_vm5, %v14386_v30, %v5424_v51  ;;  %v5641_v37 = vsel %vm18224_vm11, %v14388_v14, %v14484_v5  ;;  %v18226_v18 = vsel %vm14494_vm10, 4294967295, %v18225_v18  ;;  %v5412_v22 = vunpack.c.l.b16 %v5266_v15  ;;  %v5276_v30 = vld [vmem:[#allocation2 + $0x24] sm:$0x1]  ;;  %v10470_v14 = vld [vmem:[%s18194_s29 + $0x38] sm:$0xff]  ;;  %vm18231_vm6 = vmmov %vm18230_vm3 }
 0x43a   : > { %5432 = vrot.lane.b32.xlu0 %v5425_v9, %s17505_s4  ;;  %v5493_v23 = vshrl.u32 %v14299_v55, 16  ;;  %v5499_v54 = vrot.slane %v5497_v41, 1  ;;  %v18228_v16 = vunpack.c.l.b16 %v14403_v58  ;;  %v5545_v31 = vrot.slane %v5538_v6, 1  ;;  %5801 = vmatpush.bf16.msrb.mxu3 %v10470_v14 }
 0x43b   : > { %5391 = vrot.lane.b32.xlu2 %v14401_v44, %s17503_s1  ;;  %v5306_v44 = vsel %vm14494_vm10, 0, %v14469_v43  ;;  %v5349_v48 = vpack.c.b16 %v5344_v53, %v5344_v53  ;;  %v5417_v10 = vpack.c.b16 %v5412_v22, %v5412_v22  ;;  %v5286_v2 = vsel %vm14494_vm10, 0, %v5276_v30 }
 0x43c   : > { %9897 = vmatmul.msk.bf16.gmra.mxu1 %vm18227_vm0, %v5641_v37  ;;  %v14510_v3 = vpack.c.b16 %v5587_v50, %v18228_v16  ;;  %5581 = vrot.lane.b32.xlu1 %v5575_v27, %s17517_s25  ;;  %v5495_v55 = vor.u32 %v5493_v23, %v14325_v13  ;;  %v5629_v41 = vunpack.c.l.b16 %v5306_v44  ;;  %vm18229_vm0 = vsmask.f32 7424 }
 0x43d   : > { %v5426_v9 = vrot.slane %v5417_v10, 1  ;;  %v5534_v6 = vunpack.c.l.b16 %v5286_v2  ;;  %v5546_v37 = vsel %vm18230_vm3, %v14410_v47, %v5545_v31  ;;  %v5383_v53 = vshll.u32 %v5349_v48, 16  ;;  %vm18232_vm11 = vmmov %vm18229_vm0  ;;  %v10468_v2 = vld [vmem:[%s18194_s29 + $0x28] sm:$0xff] }
 0x43e   : > { %v5500_v20 = vsel %vm18229_vm0, %v5495_v55, %v5499_v54  ;;  %v5592_v50 = vshll.u32 %v14510_v3, 16  ;;  %v5467_v15 = vunpack.c.l.b16 %v5276_v30  ;;  %5802 = vmatpush.bf16.msrb.mxu3 %v10469_v29  ;;  %v5634_v27 = vpack.c.b16 %v5629_v41, %v5629_v41  ;;  %vm18233_vm3 = vmmov %vm18232_vm11 }
 0x43f   : > { %v5379_v13 = vshrl.u32 %v14333_v21, 16  ;;  %v5427_v14 = vsel %vm18231_vm6, %v5424_v51, %v5426_v9  ;;  %v5539_v23 = vpack.c.b16 %v5534_v6, %v5534_v6  ;;  %v5385_v16 = vrot.slane %v5383_v53, 1 }
 0x440   : > { %v5594_v22 = vrot.slane %v5592_v50, 1  ;;  %v5472_v44 = vpack.c.b16 %v5467_v15, %v5467_v15  ;;  %vm5089_vm5 = vcmp.eq.s32.totalorder %v14339_v26, 0  ;;  %v5642_v30 = vrot.slane %v5634_v27, 1 }
 0x441   : > { %v5381_v47 = vor.u32 %v5379_v13, %v14381_v36  ;;  %vm5088_vm0 = vcmp.eq.s32.totalorder %v14352_v4, 0  ;;  %v5547_v10 = vrot.slane %v5539_v23, 1  ;;  %vm14536_vm10 = vmpackc.low %vm5089_vm5, %vm5089_vm5  ;;  %v5588_v55 = vunpack.c.l.b16 %v14469_v43 }
 0x442   : > { %5553 = vrot.lane.b32.xlu0 %v5546_v37, %s17501_s28  ;;  %v5505_v51 = vshll.u32 %v5472_v44, 16  ;;  %v5275_v36 = vsel %vm14536_vm10, 0, %v14403_v58  ;;  %v5643_v41 = vsel %vm18231_vm6, %v14484_v5, %v5642_v30  ;;  %vm14551_vm5 = vmpackc.low %vm5088_vm0, %vm5088_vm0  ;;  %5803 = vmatpush.bf16.msrb.mxu3 %v10468_v2  ;;  %v5501_v9 = vshrl.u32 %v14454_v33, 16  ;;  %v10464_v2 = vld [vmem:[%s18194_s29 + $0x8] sm:$0xff] }
 0x443   : > { %5513 = vrot.lane.b32.xlu2 %v5500_v20, %s17499_s30  ;;  %v5595_v48 = vsel %vm18232_vm11, %v5381_v47, %v5594_v22  ;;  %v5386_v21 = vsel %vm18233_vm3, %v5381_v47, %v5385_v16  ;;  %vm18238_vm11 = vcmask 130048   ;;  %v5274_v43 = vsel %vm14551_vm5, 0, %v14308_v59  ;;  %vm18239_vm3 = vmmov %vm18231_vm6 }
 0x444   : > { %5434 = vrot.lane.b32.xlu1 %v5427_v14, %s17505_s4  ;;  %v5548_v50 = vsel %vm18239_vm3, %v5545_v31, %v5547_v10  ;;  %v5451_v5 = vunpack.c.l.b16 %v5275_v36  ;;  %v5507_v6 = vrot.slane %v5505_v51, 1  ;;  %v5590_v37 = vpack.c.b16 %v5588_v55, %v5588_v55  ;;  %s18264_s4 = smov 96  }
 0x445   : > { %v5450_v53 = vunpack.c.l.b16 %v5274_v43  ;;  %v5503_v15 = vor.u32 %v5501_v9, %v5499_v54  ;;  %vm18240_vm0 = vsmask.f32 7424  ;;  %v5295_v31 = vsel %vm14536_vm10, 0, %v14439_v8  ;;  %v10467_v8 = vld [vmem:[%s18194_s29 + $0x20] sm:$0xff] }
 0x446   : > { %v5600_v14 = vshll.u32 %v5590_v37, 16  ;;  %v5596_v33 = vshrl.u32 %v14510_v3, 16  ;;  %v5294_v23 = vsel %vm14551_vm5, 0, %v14403_v58  ;;  %v5572_v16 = vunpack.c.l.b16 %v5295_v31  ;;  %vm18242_vm6 = vmmov %vm18240_vm0  ;;  %5804 = vmatpush.bf16.msrb.mxu3 %v10467_v8  ;;  %v10466_v58 = vld [vmem:[%s18194_s29 + $0x18] sm:$0xff]  ;;  %v10465_v3 = vld [vmem:[%s18194_s29 + $0x10] sm:$0xff] }
 0x447   : > { %v5455_v27 = vpack.c.b16 %v5451_v5, %v5450_v53  ;;  %v5508_v13 = vsel %vm18240_vm0, %v5503_v15, %v5507_v6  ;;  %v5571_v47 = vunpack.c.l.b16 %v5294_v23  ;;  %v5130_v10 = vsel %vm14059_vm14, 0, %v14119_v19 }
 0x448   : > { %v5598_v54 = vor.u32 %v5596_v33, %v5594_v22  ;;  %v5602_v44 = vrot.slane %v5600_v14, 1  ;;  %v5315_v51 = vunpack.c.l.b16 %v5130_v10  ;;  %vm18243_vm3 = vcmask 261120  }
 0x449   : > { %v5576_v30 = vpack.c.b16 %v5572_v16, %v5571_v47  ;;  %vm17509_vm0 = vcmask 392192   ;;  %vm18244_vm15 = vcmask 523264  }
 0x44a   : > { %5393 = vrot.lane.b32.xlu0 %v5386_v21, %s17503_s1  ;;  %5805 = vmatpush.bf16.msrb.mxu3 %v10466_v58  ;;  %v5131_v21 = vsel %vm14103_vm8, 0, %v14065_v17  ;;  %s18267_s1 = smov 32  }
 0x44b   : > { %5608 = vrot.lane.b32.xlu2 %v5595_v48, %s17515_s2  ;;  %v5603_v48 = vsel %vm18242_vm6, %v5598_v54, %v5602_v44  ;;  %v5316_v55 = vunpack.c.l.b16 %v5131_v21  ;;  %vm17510_vm6 = vcmask 654336  }
 0x44c   : > { %9898 = vmatmul.msk.bf16.gmra.mxu1 %vm18238_vm11, %v5643_v41  ;;  %5555 = vrot.lane.b32.xlu1 %v5548_v50, %s17501_s28  ;;  %v10463_v50 = vld [vmem:[%s18194_s29] sm:$0xff] }
 0x44d   : > { %v5323_v43 = vpack.c.b16 %v5316_v55, %v5315_v51 }
 0x44e   : > { %5806 = vmatpush.bf16.msrb.mxu3 %v10465_v3 }
 0x452   : > { %5515 = vrot.lane.b32.xlu0 %v5508_v13, %s17499_s30  ;;  %5807 = vmatpush.bf16.msrb.mxu3 %v10464_v2  ;;  %v5132_v13 = vsel %vm14227_vm4, 0, %v14098_v45  ;;  %vm18249_vm4 = vcmask 654336   ;;  %v5134_v2 = vsel %vm14418_vm9, 0, %v14187_v57  ;;  %v10478_v57 = vld [vmem:[%s18252_s10 + $0x30] sm:$0xff] }
 0x453   : > { %5462 = vrot.lane.b32.xlu2 %v5455_v27, %s18241_s0  ;;  %v5133_v27 = vsel %vm14239_vm1, 0, %v14145_v52  ;;  %v5317_v23 = vunpack.c.l.b16 %v5132_v13  ;;  %vm18248_vm1 = vcmask 523264  }
 0x454   : > { %v5318_v31 = vunpack.c.l.b16 %v5133_v27 }
 0x456   : > { %5808 = vmatpush.bf16.msrb.mxu3 %v10463_v50  ;;  %v5324_v47 = vpack.c.b16 %v5318_v31, %v5317_v23  ;;  %v5137_v23 = vsel %vm14536_vm10, 0, %v14308_v59 }
 0x45a   : > { %5610 = vrot.lane.b32.xlu0 %v5603_v48, %s17515_s2  ;;  %v5578_v36 = vpop.permute.xlu2 %5577  ;;  %s18286_s2 = smov 112  }
 0x45b   : > { %5583 = vrot.lane.b32.xlu2 %v5576_v30, %s17517_s25  ;;  %s18281_s25 = smov 64  }
 0x465   : > { %v5550_v17 = vpop.permute.xlu2 %5549 }
 0x46a   : > { %v5457_v41 = vpop.permute.xlu1 %5456 }
 0x475   : > { %v5429_v22 = vpop.permute.xlu0 %5428 }
 0x47d   : > { %v5388_v19 = vpop.permute.xlu0 %5387 }
 0x47e   : > { %v5647_v5 = vsel %vm18238_vm11, %v5323_v43, %v5388_v19  ;;  %vm17520_vm11 = vcmask 785408   ;;  %v5319_v19 = vunpack.c.l.b16 %v5134_v2 }
 0x47f   : > { %v5658_v9 = vsel %vm18243_vm3, %v5647_v5, %v5429_v22  ;;  %vm17519_vm3 = vcmask 916480  }
 0x480   : > { %v5667_v37 = vsel %vm17509_vm0, %v5658_v9, %v5457_v41  ;;  %vm18246_vm0 = vcmask 261120   ;;  %v5135_v41 = vsel %vm14405_vm13, 0, %v14231_v12 }
 0x481   : > { %v5510_v6 = vpop.permute.xlu1 %5509  ;;  %v5320_v43 = vunpack.c.l.b16 %v5135_v41 }
 0x482   : > { %v5675_v15 = vsel %vm18244_vm15, %v5667_v37, %v5510_v6  ;;  %vm18245_vm15 = vcmask 130048  }
 0x483   : > { %v5684_v14 = vsel %vm17510_vm6, %v5675_v15, %v5550_v17  ;;  %vm18247_vm6 = vcmask 392192   ;;  %v5325_v5 = vpack.c.b16 %v5320_v43, %v5319_v19  ;;  %v10473_v19 = vld [vmem:[%s18252_s10 + $0x8] sm:$0xff] }
 0x484   : > { %v5693_v44 = vsel %vm17520_vm11, %v5684_v14, %v5578_v36 }
 0x485   : > { %v5459_v53 = vpop.permute.xlu0 %5458  ;;  %v5431_v33 = vpop.permute.xlu2 %5430 }
 0x48d   : > { %v5552_v8 = vpop.permute.xlu2 %5551 }
 0x48e   : > { %v5390_v16 = vpop.permute.xlu1 %5389  ;;  %v5605_v54 = vpop.permute.xlu0 %5604 }
 0x48f   : > { %v5702_v30 = vsel %vm17519_vm3, %v5693_v44, %v5605_v54  ;;  %v5650_v52 = vsel %vm18245_vm15, %v5324_v47, %v5390_v16  ;;  %v10477_v16 = vld [vmem:[%s18252_s10 + $0x28] sm:$0xff]  ;;  %v5136_v44 = vsel %vm14551_vm5, 0, %v14273_v62  ;;  %v5322_v47 = vunpack.c.l.b16 %v5137_v23 }
 0x490   : > { %5809 = vmatmul.bf16.vlgmr.msrb.gmra.mxu3 %v5702_v30  ;;  %v5660_v48 = vsel %vm18246_vm0, %v5650_v52, %v5431_v33  ;;  %v10476_v30 = vld [vmem:[%s18252_s10 + $0x20] sm:$0xff]  ;;  %v5321_v52 = vunpack.c.l.b16 %v5136_v44 }
 0x491   : > { %v5669_v58 = vsel %vm18247_vm6, %v5660_v48, %v5459_v53  ;;  %v10479_v53 = vld [vmem:[%s18252_s10 + $0x38] sm:$0xff] }
 0x492   : > { %5939 = vmatpush.bf16.msrb.mxu2 %v10479_v53 }
 0x495   : > { %v5392_v36 = vpop.permute.xlu2 %5391 }
 0x496   : > { %v5512_v45 = vpop.permute.xlu1 %5511  ;;  %v5580_v22 = vpop.permute.xlu0 %5579  ;;  %5940 = vmatpush.bf16.msrb.mxu2 %v10478_v57 }
 0x497   : > { %v5677_v3 = vsel %vm18248_vm1, %v5669_v58, %v5512_v45  ;;  %vm18251_vm1 = vmmov %vm18246_vm0  ;;  %v5326_v45 = vpack.c.b16 %v5322_v47, %v5321_v52 }
 0x498   : > { %v5686_v10 = vsel %vm18249_vm4, %v5677_v3, %v5552_v8  ;;  %vm18250_vm4 = vmmov %vm18245_vm15  ;;  %vm18255_vm15 = vcmask 654336   ;;  %v10475_v8 = vld [vmem:[%s18252_s10 + $0x18] sm:$0xff] }
 0x499   : > { %v5695_v21 = vsel %vm17520_vm11, %v5686_v10, %v5580_v22  ;;  %v5653_v6 = vsel %vm18250_vm4, %v5325_v5, %v5392_v36  ;;  %vm18253_vm0 = vmmov %vm18247_vm6  ;;  %vm18254_vm6 = vcmask 523264   ;;  %v10472_v5 = vld [vmem:[%s18252_s10] sm:$0xff] }
 0x49a   : > { %5941 = vmatpush.bf16.msrb.mxu2 %v10477_v16 }
 0x49d   : > { %v5514_v17 = vpop.permute.xlu2 %5513 }
 0x49e   : > { %v5607_v51 = vpop.permute.xlu1 %5606  ;;  %5942 = vmatpush.bf16.msrb.mxu2 %v10476_v30 }
 0x49f   : > { %v5705_v55 = vsel %vm17519_vm3, %v5695_v21, %v5607_v51 }
 0x4a0   : > { %5814 = vmatmul.bf16.gmra.mxu3 %v5705_v55 }
 0x4a2   : > { %5943 = vmatpush.bf16.msrb.mxu2 %v10475_v8 }
 0x4a5   : > { %v5609_v31 = vpop.permute.xlu2 %5608 }
 0x4a6   : > { %v5461_v50 = vpop.permute.xlu1 %5460 }
 0x4ac   : > { %v5433_v9 = vpop.permute.xlu0 %5432 }
 0x4ad   : > { %v5662_v37 = vsel %vm18251_vm1, %v5653_v6, %v5433_v9  ;;  %v5463_v3 = vpop.permute.xlu2 %5462  ;;  %v10677_v6 = vld [vmem:[%s18256_s9] ss:$0 sm:$0xff]  ;;  %s9654_s9 = scalar_lea.hbm %s17334_s24, %s10920_s6 }
 0x4ae   : > { %v5671_v12 = vsel %vm18253_vm0, %v5662_v37, %v5461_v50  ;;  %v5582_v15 = vpop.permute.xlu1 %5581  ;;  %v10474_v50 = vld [vmem:[%s18252_s10 + $0x10] sm:$0xff] }
 0x4af   : > { %v5679_v27 = vsel %vm18254_vm6, %v5671_v12, %v5514_v17  ;;  %5944 = vmatpush.bf16.msrb.mxu2 %v10474_v50  ;;  %v5839_v17 = vpop.f32.mrf.mxu1 }
 0x4b3   : > { %5945 = vmatpush.bf16.msrb.mxu2 %v10473_v19 }
 0x4b4   : > { %v5554_v13 = vpop.permute.xlu0 %5553 }
 0x4b5   : > { %v5688_v14 = vsel %vm18255_vm15, %v5679_v27, %v5554_v13  ;;  %v5584_v36 = vpop.permute.xlu2 %5583 }
 0x4b6   : > { %v5697_v33 = vsel %vm17520_vm11, %v5688_v14, %v5582_v15  ;;  %v5435_v48 = vpop.permute.xlu1 %5434 }
 0x4b7   : > { %v5708_v54 = vsel %vm17519_vm3, %v5697_v33, %v5609_v31  ;;  %5946 = vmatpush.bf16.msrb.mxu2 %v10472_v5  ;;  %v5841_v53 = vpop.f32.mrf.mxu1 }
 0x4b8   : > { %5819 = vmatmul.bf16.gmra.mxu3 %v5708_v54 }
 0x4bc   : > { %v5394_v59 = vpop.permute.xlu0 %5393 }
 0x4bd   : > { %v5656_v58 = vsel %vm18250_vm4, %v5326_v45, %v5394_v59  ;;  %vm18258_vm4 = vcmask 125952  }
 0x4be   : > { %v5664_v62 = vsel %vm18251_vm1, %v5656_v58, %v5435_v48  ;;  %v5556_v51 = vpop.permute.xlu1 %5555  ;;  %vm18259_vm1 = vmmov %vm18258_vm4 }
 0x4bf   : > { %v5673_v10 = vsel %vm18253_vm0, %v5664_v62, %v5463_v3  ;;  %v5844_v33 = vpop.f32.mrf.mxu1  ;;  %vm18260_vm0 = vnez %v18185_v49 }
 0x4c4   : > { %v5516_v22 = vpop.permute.xlu0 %5515 }
 0x4c5   : > { %v5681_v21 = vsel %vm18254_vm6, %v5673_v10, %v5516_v22  ;;  %vm18261_vm6 = vnez %v18189_v11 }
 0x4c6   : > { %v5690_v55 = vsel %vm18255_vm15, %v5681_v21, %v5556_v51  ;;  %vm18262_vm15 = vmmov %vm18259_vm1 }
 0x4c7   : > { %v5699_v2 = vsel %vm17520_vm11, %v5690_v55, %v5584_v36  ;;  %v5846_v30 = vpop.f32.mrf.mxu1  ;;  %vm18269_vm11 = vnez %v18199_v7 }
 0x4cc   : > { %v5611_v41 = vpop.permute.xlu0 %5610 }
 0x4cd   : > { %v5711_v43 = vsel %vm17519_vm3, %v5699_v2, %v5611_v41  ;;  %vm18268_vm3 = vsmask.f32 7424 }
 0x4ce   : > { %5824 = vmatmul.bf16.gmra.mxu3 %v5711_v43 }
 0x4cf   : > { %v5849_v8 = vpop.f32.mrf.mxu1 }
 0x4d7   : > { %v5851_v21 = vpop.f32.mrf.mxu1 }
 0x4df   : > { %v5854_v2 = vpop.f32.mrf.mxu1 }
 0x513   : > { %v5810_v9 = vpop.f32.mrf.mxu3 }
 0x514   : > { %v5811_v37 = vadd.f32 %v10677_v6, %v5810_v9  ;;  %v5856_v9 = vpop.f32.mrf.mxu1 }
 0x516   : > { %v5840_v15 = vadd.f32 %v5839_v17, %v5811_v37 }
 0x518   : > { %v5859_v13 = vmax.f32 %v5840_v15, 0.0 }
 0x51b   : > { %v5812_v12 = vpop.f32.mrf.mxu3 }
 0x51c   : > { %v5813_v57 = vadd.f32 %v10677_v6, %v5812_v12 }
 0x51e   : > { %v5842_v27 = vadd.f32 %v5841_v53, %v5813_v57  ;;  %v14672_v57 = vld [vmem:[%s18257_s11] ss:$0 sm:$0xff]  ;;  %s9658_s11 = sshll.u32 %s9654_s9, 4  ;;  %s9659_s11 = int_to_ptr.hbm [resolvable:$true] %s9658_s11 }
 0x51f   : > { %s10714_s30 = sshra.s32 %s9659_s11, 4  ;;  %s10715_s30 = int_to_ptr.hbm [resolvable:$true] %s10714_s30 }
 0x520   : > { %v5860_v14 = vmax.f32 %v5842_v27, 0.0  ;;  %p10721_p0 = scmp.lt.s32.totalorder %s10715_s30, %s17334_s24 }
 0x522   : > { %v5867_v31 = vpack.c.bf16 %v5860_v14, %v5859_v13 }
 0x523   : > { %v5815_v23 = vpop.f32.mrf.mxu3 }
 0x524   : > { %5947 = vmatmul.bf16.vlgmr.msrb.gmra.mxu2 %v5867_v31  ;;  %v5816_v16 = vadd.f32 %v10677_v6, %v5815_v23 }
 0x526   : > { %v5845_v44 = vadd.f32 %v5844_v33, %v5816_v16 }
 0x528   : > { %v5861_v59 = vmax.f32 %v5845_v44, 0.0 }
 0x52b   : > { %v5817_v54 = vpop.f32.mrf.mxu3 }
 0x52c   : > { %v5818_v47 = vadd.f32 %v10677_v6, %v5817_v54 }
 0x52e   : > { %v5847_v52 = vadd.f32 %v5846_v30, %v5818_v47  ;;  %v6068_v30 = vld [vmem:[#allocation2 + $0x4] sm:$0xf] }
 0x530   : > { %v5862_v48 = vmax.f32 %v5847_v52, 0.0 }
 0x532   : > { %v5868_v45 = vpack.c.bf16 %v5862_v48, %v5861_v59 }
 0x534   : > { %5952 = vmatmul.bf16.gmra.mxu2 %v5868_v45 }
 0x53b   : > { %v5820_v58 = vpop.f32.mrf.mxu3 }
 0x53c   : > { %v5821_v3 = vadd.f32 %v10677_v6, %v5820_v58 }
 0x53e   : > { %v5850_v22 = vadd.f32 %v5849_v8, %v5821_v3 }
 0x540   : > { %v5863_v55 = vmax.f32 %v5850_v22, 0.0 }
 0x543   : > { %v5822_v62 = vpop.f32.mrf.mxu3 }
 0x544   : > { %v5823_v10 = vadd.f32 %v10677_v6, %v5822_v62 }
 0x546   : > { %v5852_v51 = vadd.f32 %v5851_v21, %v5823_v10 }
 0x548   : > { %v5864_v36 = vmax.f32 %v5852_v51, 0.0 }
 0x54a   : > { %v5869_v41 = vpack.c.bf16 %v5864_v36, %v5863_v55 }
 0x54c   : > { %5957 = vmatmul.bf16.gmra.mxu2 %v5869_v41 }
 0x551   : > { %v5825_v43 = vpop.f32.mrf.mxu3 }
 0x552   : > { %v5826_v50 = vadd.f32 %v10677_v6, %v5825_v43 }
 0x554   : > { %v5855_v5 = vadd.f32 %v5854_v2, %v5826_v50 }
 0x556   : > { %v5865_v53 = vmax.f32 %v5855_v5, 0.0 }
 0x559   : > { %v5827_v19 = vpop.f32.mrf.mxu3 }
 0x55a   : > { %v5828_v17 = vadd.f32 %v10677_v6, %v5827_v19 }
 0x55c   : > { %v5857_v37 = vadd.f32 %v5856_v9, %v5828_v17 }
 0x55e   : > { %v5866_v12 = vmax.f32 %v5857_v37, 0.0  ;;  %v6102_v37 = vld [vmem:[#allocation2] sm:$0xe] }
 0x560   : > { %v5870_v15 = vpack.c.bf16 %v5866_v12, %v5865_v53 }
 0x562   : > { %5962 = vmatmul.bf16.gmra.mxu2 %v5870_v15 }
 0x5a7   : > { %v5948_v27 = vpop.f32.mrf.mxu2 }
 0x5a8   : > { %v5949_v13 = vadd.f32 %v14672_v57, %v5948_v27 }
 0x5aa   : > { %v5968_v14 = vmax.f32 %v5949_v13, 0.0  ;;  %v14695_v13 = vld [vmem:[#allocation2] sm:$0xf] }
 0x5ac   : > { %v5976_v31 = vpack.c.bf16 %v5968_v14, %v5968_v14 }
 0x5ae   : > { %v5989_v33 = vshrl.u32 %v5976_v31, 16  ;;  %v5992_v6 = vshll.u32 %v5976_v31, 16  ;;  %v6103_v31 = vsel %vm18260_vm0, 0, %v6102_v37 }
 0x5af   : > { %v5950_v23 = vpop.f32.mrf.mxu2 }
 0x5b0   : > { %v5991_v16 = vrot.slane %v5989_v33, 7  ;;  %v5951_v54 = vadd.f32 %v14672_v57, %v5950_v23 }
 0x5b2   : > { %v5994_v44 = vor.u32 %v5992_v6, %v5991_v16  ;;  %v5969_v47 = vmax.f32 %v5951_v54, 0.0  ;;  %v5995_v62 = vrot.slane %v5991_v16, 4 }
 0x5b4   : > { %v6069_v52 = vsel %vm14042_vm12, %v5994_v44, %v6068_v30  ;;  %v5977_v59 = vpack.c.bf16 %v5969_v47, %v5969_v47  ;;  %v6181_v44 = vunpack.c.l.b16 %v14695_v13 }
 0x5b5   : > { %6070 = vst [vmem:[#allocation2 + $0x4] sm:$0xf] %v6069_v52 }
 0x5b6   : > { %v5997_v48 = vshrl.u32 %v5977_v59, 16  ;;  %v6000_v58 = vshll.u32 %v5977_v59, 16  ;;  %v6248_v59 = vunpack.c.l.b16 %v6103_v31 }
 0x5b7   : > { %v5953_v45 = vpop.f32.mrf.mxu2 }
 0x5b8   : > { %v5999_v8 = vrot.slane %v5997_v48, 7  ;;  %v5954_v3 = vadd.f32 %v14672_v57, %v5953_v45 }
 0x5ba   : > { %v6002_v22 = vor.u32 %v6000_v58, %v5999_v8  ;;  %v5970_v10 = vmax.f32 %v5954_v3, 0.0  ;;  %v6004_v19 = vrot.slane %v5999_v8, 4 }
 0x5bc   : > { %v6003_v21 = vsel %vm17822_vm7, %v5995_v62, %v6002_v22  ;;  %v5978_v51 = vpack.c.bf16 %v5970_v10, %v5970_v10  ;;  %v14683_v50 = vld [vmem:[#allocation2 + $0x4] sm:$0xf] }
 0x5bd   : > { %6071 = vst.msk [vmem:[#allocation2 + $0x8] sm:$0xf] %vm18258_vm4, %v6003_v21  ;;  %v6113_v9 = vsel %vm14059_vm14, 0, %v14683_v50  ;;  %v6104_v27 = vsel %vm14137_vm2, 0, %v14683_v50  ;;  %v6182_v33 = vunpack.c.l.b16 %v14683_v50  ;;  %vm18263_vm4 = vnez %v18191_v39 }
 0x5be   : > { %v6006_v55 = vshrl.u32 %v5978_v51, 16  ;;  %v6009_v2 = vshll.u32 %v5978_v51, 16  ;;  %v6287_v16 = vunpack.c.l.b16 %v6113_v9  ;;  %v6249_v54 = vunpack.c.l.b16 %v6104_v27 }
 0x5bf   : > { %v5955_v36 = vpop.f32.mrf.mxu2  ;;  %v6190_v45 = vpack.c.b16 %v6182_v33, %v6181_v44 }
 0x5c0   : > { %v6008_v41 = vrot.slane %v6006_v55, 7  ;;  %v5956_v43 = vadd.f32 %v14672_v57, %v5955_v36  ;;  %v6257_v51 = vpack.c.b16 %v6249_v54, %v6248_v59 }
 0x5c1   : > { %v6198_v62 = vshll.u32 %v6190_v45, 16 }
 0x5c2   : > { %v6011_v5 = vor.u32 %v6009_v2, %v6008_v41  ;;  %v5971_v17 = vmax.f32 %v5956_v43, 0.0  ;;  %v6013_v8 = vrot.slane %v6008_v41, 4  ;;  %v6262_v31 = vrot.slane %v6257_v51, 1 }
 0x5c4   : > { %v6012_v53 = vsel %vm17822_vm7, %v6004_v19, %v6011_v5  ;;  %v5979_v12 = vpack.c.bf16 %v5971_v17, %v5971_v17  ;;  %v14690_v15 = vld [vmem:[#allocation2 + $0x8] sm:$0xf] }
 0x5c5   : > { %6072 = vst.msk [vmem:[#allocation2 + $0xc] sm:$0xf] %vm18259_vm1, %v6012_v53  ;;  %v6114_v14 = vsel %vm14103_vm8, 0, %v14690_v15  ;;  %v6133_v48 = vsel %vm14059_vm14, 0, %v14690_v15  ;;  %v6105_v3 = vsel %vm18261_vm6, 0, %v14690_v15  ;;  %v6183_v2 = vunpack.c.l.b16 %v14690_v15 }
 0x5c6   : > { %v6015_v23 = vshrl.u32 %v5979_v12, 16  ;;  %v6288_v6 = vunpack.c.l.b16 %v6114_v14  ;;  %v6018_v30 = vshll.u32 %v5979_v12, 16  ;;  %v6408_v21 = vunpack.c.l.b16 %v6133_v48 }
 0x5c7   : > { %v6250_v17 = vunpack.c.l.b16 %v6105_v3  ;;  %v6200_v53 = vrot.slane %v6198_v62, 1  ;;  %v6124_v54 = vsel %vm14137_vm2, 0, %v14690_v15  ;;  %vm18265_vm1 = vnez %v18197_v61 }
 0x5c8   : > { %v14705_v47 = vrot.slane %v6015_v23, 7  ;;  %v6295_v52 = vpack.c.b16 %v6288_v6, %v6287_v16  ;;  %v6196_v23 = vshrl.u32 %v6190_v45, 16  ;;  %v6122_v6 = vld [vmem:[#allocation2 + $0x4] sm:$0xe]  ;;  %v6370_v48 = vunpack.c.l.b16 %v6124_v54 }
 0x5c9   : > { %v6123_v59 = vsel %vm18260_vm0, 0, %v6122_v6 }
 0x5ca   : > { %v6020_v58 = vor.u32 %v6018_v30, %v14705_v47  ;;  %6299 = vrot.lane.b32.xlu0 %v6295_v52, %s18241_s0  ;;  %v6201_v45 = vor.u32 %v6200_v53, %v6196_v23 }
 0x5cc   : > { %v6021_v22 = vsel %vm17822_vm7, %v6013_v8, %v6020_v58  ;;  %v14719_v10 = vld [vmem:[#allocation2 + $0xc] sm:$0xf] }
 0x5cd   : > { %6073 = vst.msk [vmem:[#allocation2 + $0x10] sm:$0xf] %vm18262_vm15, %v6021_v22  ;;  %v6134_v36 = vsel %vm14103_vm8, 0, %v14719_v10  ;;  %v6106_v41 = vsel %vm18263_vm4, 0, %v14719_v10  ;;  %v6184_v43 = vunpack.c.l.b16 %v14719_v10  ;;  %v6125_v44 = vsel %vm18261_vm6, 0, %v14719_v10 }
 0x5ce   : > { %v6409_v5 = vunpack.c.l.b16 %v6134_v36  ;;  %v6251_v9 = vunpack.c.l.b16 %v6106_v41  ;;  %v6115_v58 = vsel %vm18265_vm1, 0, %v14719_v10  ;;  %vm18266_vm15 = vcmask 1046528  }
 0x5cf   : > { %v5958_v55 = vpop.f32.mrf.mxu2  ;;  %v14735_v37 = vpack.c.b16 %v6184_v43, %v6183_v2  ;;  %v6371_v51 = vunpack.c.l.b16 %v6125_v44  ;;  %v6289_v6 = vunpack.c.l.b16 %v6115_v58 }
 0x5d0   : > { %v5959_v19 = vadd.f32 %v14672_v57, %v5958_v55  ;;  %v6416_v27 = vpack.c.b16 %v6409_v5, %v6408_v21  ;;  %v6258_v14 = vpack.c.b16 %v6251_v9, %v6250_v17  ;;  %v6369_v21 = vunpack.c.l.b16 %v6123_v59 }
 0x5d1   : > { %v6203_v16 = vshll.u32 %v14735_v37, 16 }
 0x5d2   : > { %v5972_v12 = vmax.f32 %v5959_v19, 0.0  ;;  %6420 = vrot.lane.b32.xlu0 %v6416_v27, %s18264_s4  ;;  %v14745_v52 = vrot.slane %v6258_v14, 1  ;;  %v6022_v27 = vrot.slane %v14705_v47, 4 }
 0x5d3   : > { %v14749_v8 = vrot.slane %v6203_v16, 1 }
 0x5d4   : > { %v5980_v30 = vpack.c.bf16 %v5972_v12, %v5972_v12  ;;  %v6264_v62 = vsel %vm18266_vm15, %v6262_v31, %v14745_v52  ;;  %v14756_v22 = vld [vmem:[#allocation2 + $0x10] sm:$0xf]  ;;  %v6378_v12 = vpack.c.b16 %v6370_v48, %v6369_v21 }
 0x5d5   : > { %6271 = vrot.lane.b32.xlu2 %v6264_v62, %s18267_s1  ;;  %v6206_v41 = vsel %vm18268_vm3, %v6201_v45, %v14749_v8  ;;  %v6126_v19 = vsel %vm18263_vm4, 0, %v14756_v22  ;;  %v6116_v5 = vsel %vm18269_vm11, 0, %v14756_v22  ;;  %vm18271_vm3 = vcmask 125952  }
 0x5d6   : > { %v6024_v3 = vshrl.u32 %v5980_v30, 16  ;;  %v6027_v55 = vshll.u32 %v5980_v30, 16  ;;  %6231 = vrot.lane.b32.xlu1 %v6206_v41, %s18270_s5  ;;  %v6372_v53 = vunpack.c.l.b16 %v6126_v19  ;;  %v6290_v16 = vunpack.c.l.b16 %v6116_v5  ;;  %vm18273_vm8 = vmmov %vm18271_vm3 }
 0x5d7   : > { %v5960_v36 = vpop.f32.mrf.mxu2  ;;  %v6383_v30 = vrot.slane %v6378_v12, 1  ;;  %v6144_v19 = vsel %vm14137_vm2, 0, %v14719_v10  ;;  %v6185_v5 = vunpack.c.l.b16 %v14756_v22  ;;  %v6145_v12 = vsel %vm18261_vm6, 0, %v14756_v22 }
 0x5d8   : > { %v6026_v17 = vrot.slane %v6024_v3, 7  ;;  %v5961_v9 = vadd.f32 %v14672_v57, %v5960_v36  ;;  %v6379_v23 = vpack.c.b16 %v6372_v53, %v6371_v51  ;;  %v6296_v3 = vpack.c.b16 %v6290_v16, %v6289_v6  ;;  %v10488_v36 = vld [vmem:[%s18274_s12 + $0x40] sm:$0xff]  ;;  %v6142_v53 = vld [vmem:[#allocation2 + $0x8] sm:$0xe] }
 0x5d9   : > { %v6465_v60 = vunpack.c.l.b16 %v6144_v19  ;;  %6675 = vmatpush.bf16.msra.mxu1 %v10488_v36  ;;  %10625 = vmatpush.bf16.msra.mxu2 %v10488_v36  ;;  %vm18276_vm2 = vnez %v18210_v24  ;;  %v6312_v49 = vpack.c.b16 %v6185_v5, %v6184_v43  ;;  %v6207_v19 = vshrl.u32 %v14735_v37, 16 }
 0x5da   : > { %v6029_v14 = vor.u32 %v6027_v55, %v6026_v17  ;;  %v5973_v31 = vmax.f32 %v5961_v9, 0.0  ;;  %v14772_v59 = vrot.slane %v6379_v23, 1  ;;  %v6031_v58 = vrot.slane %v6026_v17, 4 }
 0x5db   : > { %v6311_v17 = vpack.c.b16 %v6183_v2, %v6182_v33  ;;  %vm18278_vm6 = vcmask 130048  }
 0x5dc   : > { %v6030_v54 = vsel %vm17822_vm7, %v6022_v27, %v6029_v14  ;;  %v5981_v44 = vpack.c.bf16 %v5973_v31, %v5973_v31  ;;  %v6385_v48 = vsel %vm18266_vm15, %v6383_v30, %v14772_v59  ;;  %v6143_v14 = vsel %vm18260_vm0, 0, %v6142_v53  ;;  %vm18277_vm0 = vmmov %vm18266_vm15 }
 0x5dd   : > { %6074 = vst.msk [vmem:[#allocation2 + $0x14] sm:$0xf] %vm18271_vm3, %v6030_v54  ;;  %6392 = vrot.lane.b32.xlu2 %v6385_v48, %s18272_s27  ;;  %v6466_v31 = vunpack.c.l.b16 %v6145_v12  ;;  %v6464_v16 = vunpack.c.l.b16 %v6143_v14  ;;  %v6319_v48 = vshll.u32 %v6311_v17, 16  ;;  %vm18280_vm3 = vsmask.f32 7424 }
 0x5de   : > { %v6033_v45 = vshrl.u32 %v5981_v44, 16  ;;  %v6036_v62 = vshll.u32 %v5981_v44, 16  ;;  %6301 = vrot.lane.b32.xlu1 %v6296_v3, %s18241_s0  ;;  %vm18282_vm15 = vcmask 125952  }
 0x5df   : > { %v6321_v36 = vrot.slane %v6319_v48, 1 }
 0x5e0   : > { %v14778_v47 = vrot.slane %v6033_v45, 7  ;;  %v6473_v45 = vpack.c.b16 %v6465_v60, %v6464_v16 }
 0x5e2   : > { %v6038_v21 = vor.u32 %v6036_v62, %v14778_v47  ;;  %v6040_v2 = vrot.slane %v14778_v47, 4 }
 0x5e4   : > { %v6039_v51 = vsel %vm17822_vm7, %v6031_v58, %v6038_v21  ;;  %v14788_v41 = vld [vmem:[#allocation2 + $0x14] sm:$0xf]  ;;  %v6317_v58 = vshrl.u32 %v6311_v17, 16  ;;  %v6324_v21 = vshll.u32 %v6312_v49, 16 }
 0x5e5   : > { %6075 = vst.msk [vmem:[#allocation2 + $0x18] sm:$0xf] %vm18273_vm8, %v6039_v51  ;;  %v5963_v55 = vpop.f32.mrf.mxu2  ;;  %v6146_v27 = vsel %vm18263_vm4, 0, %v14788_v41  ;;  %vm18275_vm8 = vnez %v18207_v0  ;;  %v6108_v39 = vsel %vm18276_vm2, 0, %v14788_v41  ;;  %v6186_v3 = vunpack.c.l.b16 %v14788_v41  ;;  %vm18279_vm4 = vmmov %vm18277_vm0 }
 0x5e6   : > { %v5964_v9 = vadd.f32 %v14672_v57, %v5963_v55  ;;  %v6467_v23 = vunpack.c.l.b16 %v6146_v27  ;;  %v6107_v33 = vsel %vm18275_vm8, 0, %v14756_v22  ;;  %v6253_v44 = vunpack.c.l.b16 %v6108_v39 }
 0x5e7   : > { %v6252_v54 = vunpack.c.l.b16 %v6107_v33  ;;  %v6478_v55 = vrot.slane %v6473_v45, 1  ;;  %v6326_v27 = vrot.slane %v6324_v21, 1  ;;  %v14824_v60 = vpack.c.b16 %v6186_v3, %v6185_v5 }
 0x5e8   : > { %v5974_v11 = vmax.f32 %v5964_v9, 0.0  ;;  %v6474_v6 = vpack.c.b16 %v6467_v23, %v6466_v31  ;;  %v6322_v23 = vor.u32 %v6321_v36, %v6317_v58  ;;  %v6127_v5 = vsel %vm18275_vm8, 0, %v14788_v41 }
 0x5e9   : > { %v6259_v47 = vpack.c.b16 %v6253_v44, %v6252_v54  ;;  %v6211_v33 = vshll.u32 %v14824_v60, 16  ;;  %v6373_v54 = vunpack.c.l.b16 %v6127_v5  ;;  %v6098_v61 = vsel %vm14405_vm13, 0, %v14788_v41 }
 0x5ea   : > { %v5982_v30 = vpack.c.bf16 %v5974_v11, %v5974_v11  ;;  %v14817_v62 = vrot.slane %v6474_v6, 1  ;;  %v6327_v39 = vsel %vm18280_vm3, %v6322_v23, %v6326_v27  ;;  %v6209_v6 = vor.u32 %v6207_v19, %v14749_v8 }
 0x5eb   : > { %v14822_v43 = vrot.slane %v6259_v47, 1  ;;  %6352 = vrot.lane.b32.xlu1 %v6327_v39, %s18281_s25 }
 0x5ec   : > { %v6042_v51 = vshrl.u32 %v5982_v30, 16  ;;  %v14820_v9 = vld [vmem:[#allocation2 + $0x18] sm:$0xf]  ;;  %v6045_v53 = vshll.u32 %v5982_v30, 16  ;;  %v6480_v17 = vsel %vm18277_vm0, %v6478_v55, %v14817_v62  ;;  %vm18283_vm0 = vmmov %vm18280_vm3  ;;  %v6328_v55 = vshrl.u32 %v6312_v49, 16 }
 0x5ed   : > { %v5965_v12 = vpop.f32.mrf.mxu2  ;;  %9967 = vmatmul.msk.bf16.vlgmr.msra.gmra.mxu1 %vm18278_vm6, %v6480_v17  ;;  %v6266_v37 = vsel %vm18279_vm4, %v14745_v52, %v14822_v43  ;;  %v6213_v52 = vrot.slane %v6211_v33, 1  ;;  %v6187_v30 = vunpack.c.l.b16 %v14820_v9  ;;  %vm18284_vm6 = vmmov %vm18279_vm4  ;;  %v6078_v49 = vld [vmem:[#allocation2 + $0x24] sm:$0x1]  ;;  %vm18287_vm3 = vnez %v18168_v34 }
 0x5ee   : > { %v6044_v14 = vrot.slane %v6042_v51, 7  ;;  %v5966_v31 = vadd.f32 %v14672_v57, %v5965_v12  ;;  %v6128_v57 = vsel %vm18276_vm2, 0, %v14820_v9  ;;  %6273 = vrot.lane.b32.xlu0 %v6266_v37, %s18267_s1  ;;  %v6330_v12 = vor.u32 %v6328_v55, %v6326_v27  ;;  %vm18285_vm4 = vmmov %vm18283_vm0 }
 0x5ef   : > { %v6374_v44 = vunpack.c.l.b16 %v6128_v57  ;;  %v6214_v47 = vsel %vm18283_vm0, %v6209_v6, %v6213_v52  ;;  %v14849_v21 = vpack.c.b16 %v6187_v30, %v6186_v3  ;;  %v6136_v3 = vsel %vm18269_vm11, 0, %v14788_v41 }
 0x5f0   : > { %v6047_v11 = vor.u32 %v6045_v53, %v6044_v14  ;;  %v5975_v16 = vmax.f32 %v5966_v31, 0.0  ;;  %6233 = vrot.lane.b32.xlu2 %v6214_v47, %s18270_s5  ;;  %v6049_v17 = vrot.slane %v6044_v14, 4  ;;  %v6135_v57 = vsel %vm18265_vm1, 0, %v14756_v22 }
 0x5f1   : > { %v6380_v58 = vpack.c.b16 %v6374_v44, %v6373_v54  ;;  %v6332_v36 = vshll.u32 %v14849_v21, 16  ;;  %vm18289_vm0 = vnez %v18222_v42 }
 0x5f2   : > { %v6048_v45 = vsel %vm17822_vm7, %v6040_v2, %v6047_v11  ;;  %v5983_v48 = vpack.c.bf16 %v5975_v16, %v5975_v16  ;;  %v6411_v11 = vunpack.c.l.b16 %v6136_v3  ;;  %v14908_v3 = vld [vmem:[#allocation2 + $0x28] sm:$0x1] }
 0x5f3   : > { %6076 = vst.msk [vmem:[#allocation2 + $0x1c] sm:$0xf] %vm18282_vm15, %v6048_v45  ;;  %v14852_v8 = vrot.slane %v6380_v58, 1  ;;  %v14858_v31 = vrot.slane %v6332_v36, 1  ;;  %6447 = vrot.lane.b32.xlu1 %v6214_v47, %s18286_s2  ;;  %v6410_v45 = vunpack.c.l.b16 %v6135_v57  ;;  %v6117_v57 = vsel %vm14418_vm9, 0, %v14788_v41 }
 0x5f4   : > { %v6051_v51 = vshrl.u32 %v5983_v48, 16  ;;  %v6054_v53 = vshll.u32 %v5983_v48, 16 }
 0x5f5   : > { %v6387_v2 = vsel %vm18284_vm6, %v14772_v59, %v14852_v8  ;;  %v6335_v33 = vsel %vm18285_vm4, %v6330_v12, %v14858_v31  ;;  %v6147_v59 = vsel %vm18275_vm8, 0, %v14820_v9  ;;  %vm18288_vm8 = vnez %v18220_v40 }
 0x5f6   : > { %v6053_v19 = vrot.slane %v6051_v51, 7  ;;  %6394 = vrot.lane.b32.xlu0 %v6387_v2, %s18272_s27  ;;  %v6109_v34 = vsel %vm18288_vm8, 0, %v14820_v9  ;;  %v6468_v6 = vunpack.c.l.b16 %v6147_v59  ;;  %v6417_v58 = vpack.c.b16 %v6411_v11, %v6410_v45 }
 0x5f7   : > { %v6254_v47 = vunpack.c.l.b16 %v6109_v34  ;;  %v6215_v51 = vshrl.u32 %v14824_v60, 16  ;;  %v6118_v60 = vsel %vm14405_vm13, 0, %v14820_v9  ;;  %v6336_v34 = vshrl.u32 %v14849_v21, 16  ;;  %v10487_v21 = vld [vmem:[%s18274_s12 + $0x38] sm:$0xff] }
 0x5f8   : > { %v6056_v23 = vor.u32 %v6054_v53, %v6053_v19  ;;  %v6058_v37 = vrot.slane %v6053_v19, 4  ;;  %6354 = vrot.lane.b32.xlu2 %v6335_v33, %s18281_s25  ;;  %v6292_v11 = vunpack.c.l.b16 %v6118_v60  ;;  %6639 = vmatpush.bf16.msra.mxu3 %v10487_v21 }
 0x5f9   : > { %v6217_v53 = vor.u32 %v6215_v51, %v6213_v52 }
 0x5fa   : > { %v6057_v27 = vsel %vm17822_vm7, %v6049_v17, %v6056_v23  ;;  %v6079_v14 = vsel %vm18287_vm3, %v6058_v37, %v6078_v49  ;;  %v14874_v5 = vld [vmem:[#allocation2 + $0x1c] sm:$0xf]  ;;  %vm18292_vm3 = vnez %v18226_v18 }
 0x5fb   : > { %6077 = vst.msk [vmem:[#allocation2 + $0x20] sm:$0xf] %vm18282_vm15, %v6057_v27  ;;  %v6148_v0 = vsel %vm18276_vm2, 0, %v14874_v5  ;;  %v6188_v16 = vunpack.c.l.b16 %v14874_v5  ;;  %v6110_v39 = vsel %vm18289_vm0, 0, %v14874_v5  ;;  %6422 = vrot.lane.b32.xlu1 %v6417_v58, %s18264_s4  ;;  %vm18290_vm2 = vmmov %vm18284_vm6  ;;  %vm18291_vm6 = vcmask 130048  }
 0x5fc   : > { %6080 = vst [vmem:[#allocation2 + $0x24] sm:$0x1] %v6079_v14  ;;  %v6469_v54 = vunpack.c.l.b16 %v6148_v0  ;;  %v6255_v44 = vunpack.c.l.b16 %v6110_v39  ;;  %v6151_v32 = vsel %vm18292_vm3, 0, %v14908_v3  ;;  %vm18294_vm15 = vmmov %vm18285_vm4 }
 0x5fd   : > { %v14891_v48 = vpack.c.b16 %v6188_v16, %v6187_v30 }
 0x5fe   : > { %v6475_v24 = vpack.c.b16 %v6469_v54, %v6468_v6  ;;  %v6260_v19 = vpack.c.b16 %v6255_v44, %v6254_v47  ;;  %v6291_v54 = vunpack.c.l.b16 %v6117_v57  ;;  %v6472_v44 = vunpack.c.l.b16 %v6151_v32 }
 0x5ff   : > { %v6219_v55 = vshll.u32 %v14891_v48, 16  ;;  %v6223_v42 = vshrl.u32 %v14891_v48, 16 }
 0x600   : > { %v14895_v36 = vrot.slane %v6475_v24, 1  ;;  %v14924_v33 = vrot.slane %v6260_v19, 1  ;;  %v6338_v24 = vor.u32 %v6336_v34, %v14858_v31  ;;  %v6297_v58 = vpack.c.b16 %v6292_v11, %v6291_v54 }
 0x601   : > { %v14898_v2 = vrot.slane %v6219_v55, 1  ;;  %v6138_v31 = vsel %vm14405_vm13, 0, %v14874_v5 }
 0x602   : > { %v6482_v30 = vsel %vm18290_vm2, %v14817_v62, %v14895_v36  ;;  %v14903_v12 = vld [vmem:[#allocation2 + $0x20] sm:$0xf]  ;;  %v6129_v62 = vsel %vm18288_vm8, 0, %v14874_v5 }
 0x603   : > { %v6081_v17 = vld [vmem:[#allocation2 + $0x24] sm:$0xf]  ;;  %9968 = vmatmul.msk.bf16.gmra.mxu1 %vm18291_vm6, %v6482_v30  ;;  %v6222_v52 = vsel %vm18285_vm4, %v6217_v53, %v14898_v2  ;;  %v6309_v23 = vunpack.c.l.b16 %v14903_v12  ;;  %v6130_v37 = vsel %vm18289_vm0, 0, %v14903_v12  ;;  %v6101_v27 = vld [vmem:[#allocation2 + $0x20] sm:$0x1]  ;;  %v6375_v0 = vunpack.c.l.b16 %v6129_v62  ;;  %vm18298_vm4 = vmmov %vm18291_vm6 }
 0x604   : > { %v6082_v49 = vsel %vm14042_vm12, 0, %v6081_v17  ;;  %6235 = vrot.lane.b32.xlu0 %v6222_v52, %s18270_s5  ;;  %6449 = vrot.lane.b32.xlu2 %v6222_v52, %s18286_s2  ;;  %v6376_v59 = vunpack.c.l.b16 %v6130_v37  ;;  %v6189_v6 = vunpack.c.l.b16 %v6101_v27  ;;  %vm18293_vm12 = vmmov %vm18290_vm2  ;;  %v6477_v53 = vpack.c.b16 %v6472_v44, %v6472_v44 }
 0x605   : > { %6083 = vst [vmem:[#allocation2 + $0x24] sm:$0xf] %v6082_v49  ;;  %v14926_v14 = vpack.c.b16 %v6309_v23, %v6188_v16  ;;  %v6268_v16 = vsel %vm18293_vm12, %v14822_v43, %v14924_v33  ;;  %v6149_v43 = vsel %vm18288_vm8, 0, %v14903_v12  ;;  %v6137_v30 = vsel %vm14418_vm9, 0, %v14820_v9  ;;  %vm18295_vm8 = vmmov %vm18290_vm2 }
 0x606   : > { %v6381_v45 = vpack.c.b16 %v6376_v59, %v6375_v0  ;;  %6275 = vrot.lane.b32.xlu1 %v6268_v16, %s18267_s1  ;;  %v6194_v55 = vpack.c.b16 %v6189_v6, %v6189_v6  ;;  %v6111_v40 = vsel %vm18292_vm3, 0, %v6101_v27  ;;  %v6470_v37 = vunpack.c.l.b16 %v6149_v43  ;;  %v10486_v16 = vld [vmem:[%s18274_s12 + $0x30] sm:$0xff]  ;;  %vm18299_vm12 = vmmov %vm18294_vm15 }
 0x607   : > { %v6340_v39 = vshll.u32 %v14926_v14, 16  ;;  %v6413_v59 = vunpack.c.l.b16 %v6138_v31  ;;  %v6412_v57 = vunpack.c.l.b16 %v6137_v30  ;;  %v6256_v11 = vunpack.c.l.b16 %v6111_v40  ;;  %6640 = vmatpush.bf16.msra.mxu3 %v10486_v16 }
 0x608   : > { %v14961_v60 = vrot.slane %v6381_v45, 1  ;;  %v6227_v0 = vshll.u32 %v6194_v55, 16  ;;  %v6225_v45 = vor.u32 %v6223_v42, %v14898_v2  ;;  %v6120_v31 = vsel %vm14536_vm10, 0, %v14903_v12 }
 0x609   : > { %v14940_v47 = vrot.slane %v6340_v39, 1  ;;  %v6485_v39 = vrot.slane %v6477_v53, 1  ;;  %v6261_v21 = vpack.c.b16 %v6256_v11, %v6256_v11  ;;  %v6119_v55 = vsel %vm14551_vm5, 0, %v14874_v5 }
 0x60a   : > { %v6389_v27 = vsel %vm18295_vm8, %v14852_v8, %v14961_v60  ;;  %v6294_v30 = vunpack.c.l.b16 %v6120_v31 }
 0x60b   : > { %v6343_v51 = vsel %vm18294_vm15, %v6338_v24, %v14940_v47 }
 0x60c   : > { %6356 = vrot.lane.b32.xlu0 %v6343_v51, %s18281_s25  ;;  %6303 = vrot.lane.b32.xlu2 %v6297_v58, %s18241_s0  ;;  %v14956_v19 = vld [vmem:[#allocation2 + $0x24] sm:$0xf]  ;;  %v6229_v58 = vrot.slane %v6227_v0, 1 }
 0x60d   : > { %v6150_v17 = vsel %vm18289_vm0, 0, %v14956_v19  ;;  %v6430_v52 = vunpack.c.l.b16 %v14956_v19  ;;  %v6121_v62 = vld [vmem:[#allocation2 + $0x24] sm:$0x1]  ;;  %vm18296_vm0 = vmmov %vm18290_vm2  ;;  %v6140_v0 = vsel %vm14536_vm10, 0, %v14956_v19 }
 0x60e   : > { %v6471_v49 = vunpack.c.l.b16 %v6150_v17  ;;  %v6310_v6 = vunpack.c.l.b16 %v6121_v62  ;;  %6396 = vrot.lane.b32.xlu1 %v6389_v27, %s18272_s27  ;;  %vm18297_vm2 = vmmov %vm18296_vm0  ;;  %v6131_v48 = vsel %vm18292_vm3, 0, %v6121_v62  ;;  %v6431_v17 = vunpack.c.l.b16 %v14908_v3 }
 0x60f   : > { %v6432_v32 = vpack.c.b16 %v6430_v52, %v6309_v23  ;;  %v6418_v23 = vpack.c.b16 %v6413_v59, %v6412_v57  ;;  %v6377_v18 = vunpack.c.l.b16 %v6131_v48  ;;  %vm18300_vm3 = vmmov %vm18299_vm12  ;;  %v6293_v52 = vunpack.c.l.b16 %v6119_v55 }
 0x610   : > { %v6476_v34 = vpack.c.b16 %v6471_v49, %v6470_v37  ;;  %v6315_v43 = vpack.c.b16 %v6310_v6, %v6310_v6  ;;  %v6230_v53 = vsel %vm18300_vm3, %v6225_v45, %v6229_v58  ;;  %vm18301_vm15 = vmmov %vm18296_vm0  ;;  %v6344_v59 = vshrl.u32 %v14926_v14, 16 }
 0x611   : > { %v6435_v54 = vshll.u32 %v6432_v32, 16  ;;  %v6382_v37 = vpack.c.b16 %v6377_v18, %v6377_v18  ;;  %v6298_v49 = vpack.c.b16 %v6294_v30, %v6293_v52  ;;  %v6433_v11 = vpack.c.b16 %v6431_v17, %v6431_v17  ;;  %vm18302_vm8 = vmmov %vm18300_vm3 }
 0x612   : > { %v6483_v44 = vrot.slane %v6476_v34, 1  ;;  %v6348_v40 = vshll.u32 %v6315_v43, 16  ;;  %v6346_v3 = vor.u32 %v6344_v59, %v14940_v47  ;;  %v6415_v27 = vunpack.c.l.b16 %v6140_v0 }
 0x613   : > { %v6437_v24 = vrot.slane %v6435_v54, 1  ;;  %v6390_v34 = vrot.slane %v6382_v37, 1  ;;  %v6443_v6 = vshll.u32 %v6433_v11, 16  ;;  %v6439_v42 = vshrl.u32 %v6432_v32, 16  ;;  %v10482_v32 = vld [vmem:[%s18274_s12 + $0x10] sm:$0xff] }
 0x614   : > { %v6484_v8 = vsel %vm18296_vm0, %v14895_v36, %v6483_v44  ;;  %v6486_v51 = vsel %vm18297_vm2, %v6483_v44, %v6485_v39  ;;  %6424 = vrot.lane.b32.xlu2 %v6418_v23, %s18264_s4  ;;  %v6269_v36 = vrot.slane %v6261_v21, 1  ;;  %v6350_v57 = vrot.slane %v6348_v40, 1  ;;  %vm18303_vm2 = vmmov %vm18300_vm3  ;;  %v10484_v23 = vld [vmem:[%s18274_s12 + $0x20] sm:$0xff] }
 0x615   : > { %9969 = vmatmul.msk.bf16.gmra.mxu1 %vm18291_vm6, %v6484_v8  ;;  %9970 = vmatmul.msk.bf16.vlgmr.msra.gmra.mxu2 %vm18298_vm4, %v6486_v51  ;;  %v6438_v2 = vsel %vm18299_vm12, %v6225_v45, %v6437_v24  ;;  %v6139_v39 = vsel %vm14551_vm5, 0, %v14903_v12  ;;  %v6391_v47 = vsel %vm18296_vm0, %v14961_v60, %v6390_v34  ;;  %v6441_v16 = vor.u32 %v6439_v42, %v6437_v24  ;;  %v10483_v60 = vld [vmem:[%s18274_s12 + $0x18] sm:$0xff]  ;;  %v10481_v45 = vld [vmem:[%s18274_s12 + $0x8] sm:$0xff]  ;;  %v10480_v21 = vld [vmem:[%s18274_s12] sm:$0xff] }
 0x616   : > { %6451 = vrot.lane.b32.xlu0 %v6438_v2, %s18286_s2  ;;  %6237 = vrot.lane.b32.xlu1 %v6230_v53, %s18270_s5  ;;  %v6270_v62 = vsel %vm18301_vm15, %v14924_v33, %v6269_v36  ;;  %v10485_v33 = vld [vmem:[%s18274_s12 + $0x28] sm:$0xff]  ;;  %v6351_v14 = vsel %vm18302_vm8, %v6346_v3, %v6350_v57  ;;  %v6414_v19 = vunpack.c.l.b16 %v6139_v39  ;;  %v6445_v44 = vrot.slane %v6443_v6, 1 }
 0x617   : > { %6641 = vmatpush.bf16.msra.mxu3 %v10485_v33  ;;  %v6093_v48 = vsel %vm14059_vm14, 0, %v14695_v13  ;;  %vm18304_vm6 = vnez %v18183_v1  ;;  %vm18305_vm12 = vcmask 261120   ;;  %vm18306_vm3 = vcmask 392192  }
 0x618   : > { %v6419_v54 = vpack.c.b16 %v6415_v27, %v6414_v19  ;;  %v6446_v12 = vsel %vm18303_vm2, %v6441_v16, %v6445_v44  ;;  %v6094_v43 = vsel %vm18304_vm6, 0, %v14683_v50  ;;  %v6160_v2 = vunpack.c.l.b16 %v6093_v48  ;;  %vm18311_vm2 = vmmov %vm18298_vm4 }
 0x619   : > { %v6161_v31 = vunpack.c.l.b16 %v6094_v43  ;;  %vm18307_vm14 = vcmask 523264   ;;  %v6096_v1 = vsel %vm18269_vm11, 0, %v14719_v10  ;;  %vm18308_vm15 = vcmask 654336   ;;  %vm18312_vm11 = vmmov %vm18305_vm12 }
 0x61a   : > { %v6095_v37 = vsel %vm18265_vm1, 0, %v14690_v15  ;;  %vm18309_vm8 = vcmask 785408   ;;  %vm18310_vm0 = vcmask 916480   ;;  %vm18313_vm6 = vmmov %vm18306_vm3  ;;  %v6097_v6 = vsel %vm14418_vm9, 0, %v14756_v22 }
 0x61b   : > { %6642 = vmatpush.bf16.msra.mxu3 %v10484_v23  ;;  %v6168_v53 = vpack.c.b16 %v6161_v31, %v6160_v2  ;;  %v6162_v11 = vunpack.c.l.b16 %v6095_v37  ;;  %vm18314_vm1 = vmmov %vm18307_vm14  ;;  %v6165_v42 = vunpack.c.l.b16 %v6098_v61  ;;  %v6164_v16 = vunpack.c.l.b16 %v6097_v6 }
 0x61c   : > { %6277 = vrot.lane.b32.xlu2 %v6270_v62, %s18267_s1  ;;  %vm18318_vm13 = vmmov %vm18311_vm2 }
 0x61d   : > { %vm18321_vm9 = vmmov %vm18314_vm1 }
 0x61e   : > { %6305 = vrot.lane.b32.xlu0 %v6298_v49, %s18241_s0  ;;  %6358 = vrot.lane.b32.xlu1 %v6351_v14, %s18281_s25  ;;  %v6163_v49 = vunpack.c.l.b16 %v6096_v1 }
 0x61f   : > { %6643 = vmatpush.bf16.msra.mxu3 %v10483_v60 }
 0x620   : > { %v6169_v33 = vpack.c.b16 %v6163_v49, %v6162_v11 }
 0x623   : > { %6644 = vmatpush.bf16.msra.mxu3 %v10482_v32 }
 0x624   : > { %6398 = vrot.lane.b32.xlu2 %v6391_v47, %s18272_s27  ;;  %s18441_s27 = sld [smem:[#allocation42_spill]] }
 0x626   : > { %6426 = vrot.lane.b32.xlu0 %v6419_v54, %s18264_s4  ;;  %6453 = vrot.lane.b32.xlu1 %v6446_v12, %s18286_s2  ;;  %v6170_v12 = vpack.c.b16 %v6165_v42, %v6164_v16  ;;  %s728_s2 = sand.u32 1, %s10754_s26  }
 0x627   : > { %6645 = vmatpush.bf16.msra.mxu3 %v10481_v45  ;;  %s729_s7 = scalar_lea.vmem [#allocation7], %s728_s2 }
 0x628   : > { %s9656_s10 = sshll.u32 %s729_s7, 4  ;;  %s9657_s10 = int_to_ptr.vmem [resolvable:$true] %s9656_s10 }
 0x62b   : > { %6646 = vmatpush.bf16.msra.mxu3 %v10480_v21 }
 0x62f   : > { %v6272_v24 = vpop.permute.xlu2 %6271 }
 0x637   : > { %v6393_v51 = vpop.permute.xlu2 %6392 }
 0x63c   : > { %v6300_v8 = vpop.permute.xlu0 %6299 }
 0x644   : > { %v6421_v55 = vpop.permute.xlu0 %6420 }
 0x648   : > { %v6232_v58 = vpop.permute.xlu1 %6231 }
 0x649   : > { %v6489_v30 = vsel %vm18298_vm4, %v6168_v53, %v6232_v58  ;;  %vm18315_vm4 = vmmov %vm18308_vm15  ;;  %v6099_v58 = vsel %vm14551_vm5, 0, %v14820_v9 }
 0x64a   : > { %v6234_v18 = vpop.permute.xlu2 %6233  ;;  %v6500_v40 = vsel %vm18305_vm12, %v6489_v30, %v6272_v24  ;;  %vm18316_vm12 = vmmov %vm18309_vm8  ;;  %v6100_v24 = vsel %vm14536_vm10, 0, %v14874_v5  ;;  %v6166_v43 = vunpack.c.l.b16 %v6099_v58 }
 0x64b   : > { %v6508_v62 = vsel %vm18306_vm3, %v6500_v40, %v6300_v8  ;;  %v6492_v7 = vsel %vm18311_vm2, %v6169_v33, %v6234_v18  ;;  %vm18317_vm3 = vmmov %vm18310_vm0 }
 0x64c   : > { %vm18324_vm2 = vmmov %vm18317_vm3 }
 0x64d   : > { %vm18327_vm5 = vmmov %vm18314_vm1 }
 0x650   : > { %v6302_v36 = vpop.permute.xlu1 %6301 }
 0x652   : > { %v6355_v56 = vpop.permute.xlu2 %6354 }
 0x65d   : > { %v6353_v52 = vpop.permute.xlu1 %6352 }
 0x65e   : > { %v6516_v13 = vsel %vm18307_vm14, %v6508_v62, %v6353_v52  ;;  %v6450_v34 = vpop.permute.xlu2 %6449  ;;  %vm18319_vm14 = vmmov %vm18312_vm11 }
 0x65f   : > { %v6524_v50 = vsel %vm18308_vm15, %v6516_v13, %v6393_v51  ;;  %vm18320_vm15 = vmmov %vm18313_vm6  ;;  %v6167_v51 = vunpack.c.l.b16 %v6100_v24 }
 0x660   : > { %v6274_v17 = vpop.permute.xlu0 %6273  ;;  %v6532_v57 = vsel %vm18309_vm8, %v6524_v50, %v6421_v55  ;;  %vm18322_vm8 = vmmov %vm18315_vm4  ;;  %v15090_v50 = vld [vmem:[%s17323_s13] ss:$0 sm:$0xff] }
 0x661   : > { %v6502_v10 = vsel %vm18312_vm11, %v6492_v7, %v6274_v17  ;;  %v6171_v31 = vpack.c.b16 %v6167_v51, %v6166_v43  ;;  %vm18325_vm11 = vmmov %vm18318_vm13 }
 0x662   : > { %v6510_v14 = vsel %vm18313_vm6, %v6502_v10, %v6302_v36  ;;  %vm18326_vm10 = vmmov %vm18319_vm14 }
 0x663   : > { %v6518_v27 = vsel %vm18314_vm1, %v6510_v14, %v6355_v56  ;;  %vm18328_vm1 = vmmov %vm18315_vm4 }
 0x665   : > { %v6448_v59 = vpop.permute.xlu1 %6447 }
 0x666   : > { %v6540_v3 = vsel %vm18310_vm0, %v6532_v57, %v6448_v59  ;;  %v6304_v47 = vpop.permute.xlu2 %6303  ;;  %vm18323_vm0 = vmmov %vm18316_vm12 }
 0x667   : > { %6647 = vmatmul.bf16.vlgmr.msra.gmra.mxu3 %v6540_v3 }
 0x668   : > { %v6395_v0 = vpop.permute.xlu0 %6394 }
 0x669   : > { %v6526_v19 = vsel %vm18315_vm4, %v6518_v27, %v6395_v0  ;;  %vm18329_vm4 = vmmov %vm18323_vm0 }
 0x66a   : > { %v6677_v13 = vpop.f32.mrf.mxu1 }
 0x66d   : > { %v6423_v39 = vpop.permute.xlu1 %6422 }
 0x66e   : > { %v6534_v54 = vsel %vm18316_vm12, %v6526_v19, %v6423_v39  ;;  %v6425_v22 = vpop.permute.xlu2 %6424  ;;  %vm18330_vm12 = vmmov %vm18324_vm2 }
 0x66f   : > { %v6543_v23 = vsel %vm18317_vm3, %v6534_v54, %v6450_v34  ;;  %vm6740_vm3 = vcmp.ge.s32.totalorder %v14255_v38, 7 }
 0x672   : > { %v6679_v37 = vpop.f32.mrf.mxu1 }
 0x676   : > { %v6236_v15 = vpop.permute.xlu0 %6235  ;;  %v6278_v55 = vpop.permute.xlu2 %6277 }
 0x677   : > { %6652 = vmatmul.bf16.gmra.mxu3 %v6543_v23  ;;  %v6495_v28 = vsel %vm18318_vm13, %v6170_v12, %v6236_v15  ;;  %vm6741_vm13 = vcmp.ge.s32.totalorder %v14352_v4, 7 }
 0x678   : > { %v6276_v44 = vpop.permute.xlu1 %6275 }
 0x679   : > { %v6504_v60 = vsel %vm18319_vm14, %v6495_v28, %v6276_v44  ;;  %vm6742_vm14 = vcmp.ge.s32.totalorder %v14339_v26, 7 }
 0x67a   : > { %v6512_v46 = vsel %vm18320_vm15, %v6504_v60, %v6304_v47  ;;  %vm6764_vm15 = vmpackc.low %vm6740_vm3, %vm6740_vm3  ;;  %v15101_v60 = vld [vmem:[#allocation6 + $0x18] sm:$0xff] }
 0x67e   : > { %v6357_v41 = vpop.permute.xlu0 %6356  ;;  %v6399_v30 = vpop.permute.xlu2 %6398 }
 0x67f   : > { %v6520_v45 = vsel %vm18321_vm9, %v6512_v46, %v6357_v41  ;;  %vm6765_vm9 = vmpackc.low %vm6741_vm13, %vm6741_vm13  ;;  %v15104_v46 = vsel %vm6764_vm15, 65537, %v15101_v60 }
 0x680   : > { %v6397_v32 = vpop.permute.xlu1 %6396  ;;  %v6682_v3 = vpop.f32.mrf.mxu1 }
 0x681   : > { %v6528_v21 = vsel %vm18322_vm8, %v6520_v45, %v6397_v32  ;;  %vm6766_vm8 = vmpackc.low %vm6742_vm14, %vm6742_vm14  ;;  %v6773_v32 = vsel %vm6765_vm9, 65537, %v15101_v60  ;;  %v6820_v45 = vshrl.u32 %v15104_v46, 16 }
 0x682   : > { %v6536_v48 = vsel %vm18323_vm0, %v6528_v21, %v6425_v22  ;;  %v6774_v21 = vsel %vm6766_vm8, 65537, %v15101_v60  ;;  %v6829_v58 = vshrl.u32 %v6773_v32, 16  ;;  %vm6991_vm0 = vcmp.ge.s32.totalorder %v14255_v38, 6 }
 0x683   : > { %v6838_v43 = vshrl.u32 %v6774_v21, 16 }
 0x688   : > { %v6452_v8 = vpop.permute.xlu0 %6451  ;;  %v6238_v2 = vpop.permute.xlu1 %6237 }
 0x689   : > { %v6546_v36 = vsel %vm18324_vm2, %v6536_v48, %v6452_v8  ;;  %v6498_v29 = vsel %vm18325_vm11, %v6171_v31, %v6238_v2  ;;  %v6684_v14 = vpop.f32.mrf.mxu1  ;;  %v6832_v8 = vshll.u32 %v6773_v32, 16  ;;  %v15109_v48 = vrot.slane %v6820_v45, 7 }
 0x68a   : > { %6657 = vmatmul.bf16.gmra.mxu3 %v6546_v36  ;;  %v6506_v18 = vsel %vm18326_vm10, %v6498_v29, %v6278_v55  ;;  %v6841_v2 = vshll.u32 %v6774_v21, 16  ;;  %v6831_v31 = vrot.slane %v6829_v58, 7  ;;  %v6840_v29 = vrot.slane %v6838_v43, 7  ;;  %vm15115_vm10 = vmpackc.low %vm6991_vm0, %vm6991_vm0 }
 0x68b   : > { %v6827_v55 = vrot.slane %v15109_v48, 4  ;;  %vm6992_vm2 = vcmp.ge.s32.totalorder %v14352_v4, 6  ;;  %vm6993_vm11 = vcmp.ge.s32.totalorder %v14339_v26, 6  ;;  %v7023_v26 = vsel %vm15115_vm10, 65537, %v15101_v60 }
 0x690   : > { %v6306_v5 = vpop.permute.xlu0 %6305  ;;  %v6359_v53 = vpop.permute.xlu1 %6358 }
 0x691   : > { %v6514_v20 = vsel %vm18313_vm6, %v6506_v18, %v6306_v5  ;;  %vm15120_vm6 = vmpackc.low %vm6992_vm2, %vm6992_vm2 }
 0x692   : > { %v6522_v9 = vsel %vm18327_vm5, %v6514_v20, %v6359_v53  ;;  %v6687_v54 = vpop.f32.mrf.mxu1  ;;  %v6834_v53 = vor.u32 %v6832_v8, %v6831_v31  ;;  %v6836_v20 = vrot.slane %v6831_v31, 4  ;;  %vm15126_vm5 = vmpackc.low %vm6993_vm11, %vm6993_vm11  ;;  %v18364_v8 = vld [vmem:[#allocation20_spill] sm:$0xff] }
 0x693   : > { %v6530_v17 = vsel %vm18328_vm1, %v6522_v9, %v6399_v30 }
 0x694   : > { %v6835_v38 = vsel %vm17822_vm7, %v6827_v55, %v6834_v53 }
 0x698   : > { %v6427_v40 = vpop.permute.xlu0 %6426  ;;  %v6454_v62 = vpop.permute.xlu1 %6453 }
 0x699   : > { %v6538_v52 = vsel %vm18329_vm4, %v6530_v17, %v6427_v40  ;;  %v6692_v5 = vpop.f32.mrf.mxu2  ;;  %v6843_v40 = vor.u32 %v6841_v2, %v6840_v29  ;;  %v6845_v17 = vrot.slane %v6840_v29, 4  ;;  %v15201_v29 = vld [vmem:[#allocation5 + $0x24] sm:$0xf] }
 0x69a   : > { %v6549_v56 = vsel %vm18330_vm12, %v6538_v52, %v6454_v62  ;;  %v6689_v41 = vpop.f32.mrf.mxu1 }
 0x69b   : > { %6662 = vmatmul.bf16.gmra.mxu3 %v6549_v56  ;;  %v6844_v62 = vsel %vm17822_vm7, %v6836_v20, %v6843_v40  ;;  %v6888_v56 = vunpack.c.l.b16 %v6835_v38 }
 0x69d   : > { %vm15153_vm13 = vcmp.ne.s32.totalorder %v6888_v56, %v17832_v63 }
 0x6ea   : > { %v6648_v1 = vpop.f32.mrf.mxu3 }
 0x6eb   : > { %v6649_v49 = vadd.f32 %v15090_v50, %v6648_v1  ;;  %v7024_v1 = vsel %vm15120_vm6, 65537, %v15101_v60 }
 0x6ed   : > { %v6678_v57 = vadd.f32 %v6677_v13, %v6649_v49  ;;  %v6889_v13 = vunpack.c.h.b16 %v6835_v38  ;;  %v6896_v49 = vunpack.c.h.b16 %v6844_v62 }
 0x6ef   : > { %v6697_v33 = vmax.f32 %v6678_v57, 0.0  ;;  %v6903_v57 = vunpack.c.h.b16 %v6845_v17  ;;  %vm6900_vm4 = vcmp.ne.s32.totalorder %v6896_v49, %v17833_v35  ;;  %vm15158_vm14 = vcmp.ne.s32.totalorder %v6889_v13, %v17833_v35 }
 0x6f0   : > { %vm15182_vm0 = vmpackc.low %vm15158_vm14, %vm15153_vm13  ;;  %vm18359_vm13 = vcmask 1046528  }
 0x6f1   : > { %vm6907_vm3 = vcmp.ne.s32.totalorder %v6903_v57, %v17833_v35  ;;  %vm18360_vm14 = vmmov %vm18359_vm13 }
 0x6f2   : > { %v6650_v59 = vpop.f32.mrf.mxu3 }
 0x6f3   : > { %v6651_v11 = vadd.f32 %v15090_v50, %v6650_v59  ;;  %v6902_v59 = vunpack.c.l.b16 %v6845_v17 }
 0x6f5   : > { %v6680_v0 = vadd.f32 %v6679_v37, %v6651_v11  ;;  %v6895_v37 = vunpack.c.l.b16 %v6844_v62  ;;  %vm6906_vm12 = vcmp.ne.s32.totalorder %v6902_v59, %v17832_v63 }
 0x6f6   : > { %vm15162_vm15 = vmpackc.low %vm6907_vm3, %vm6906_vm12 }
 0x6f7   : > { %v6698_v34 = vmax.f32 %v6680_v0, 0.0  ;;  %v7025_v0 = vsel %vm15126_vm5, 65537, %v15101_v60  ;;  %vm15144_vm1 = vcmp.ne.s32.totalorder %v6895_v37, %v17832_v63 }
 0x6f8   : > { %vm15171_vm9 = vmpackc.low %vm6900_vm4, %vm15144_vm1 }
 0x6f9   : > { %v10605_v7 = vpack.c.bf16 %v6698_v34, %v6697_v33  ;;  %v6734_v34 = vld [vmem:[#allocation5 + $0x20] sm:$0x1]  ;;  %v7402_v38 = vsel %vm15171_vm9, 0, %v15201_v29  ;;  %v7377_v33 = vunpack.c.l.bf16 %v15201_v29 }
 0x6fa   : > { %v6653_v10 = vpop.f32.mrf.mxu3  ;;  %v7419_v13 = vunpack.c.l.bf16 %v7402_v38 }
 0x6fb   : > { %10606 = vst [vmem:[#allocation5] sm:$0xff] %v10605_v7   ;;  %v6654_v39 = vadd.f32 %v15090_v50, %v6653_v10  ;;  %v7043_v10 = vrot.slane %v7024_v1, 7 }
 0x6fd   : > { %v6683_v15 = vadd.f32 %v6682_v3, %v6654_v39  ;;  %v15141_v3 = vrot.slane %v7023_v26, 7  ;;  %v7046_v39 = vrot.slane %v7025_v0, 7 }
 0x6ff   : > { %v6699_v19 = vmax.f32 %v6683_v15, 0.0  ;;  %v7042_v7 = vrot.slane %v15141_v3, 4 }
 0x702   : > { %v6655_v61 = vpop.f32.mrf.mxu3 }
 0x703   : > { %v6656_v27 = vadd.f32 %v15090_v50, %v6655_v61 }
 0x705   : > { %v6685_v6 = vadd.f32 %v6684_v14, %v6656_v27 }
 0x707   : > { %v6700_v42 = vmax.f32 %v6685_v6, 0.0  ;;  %v15166_v6 = vld [vmem:[#allocation5 + $0x20] sm:$0xf] }
 0x708   : > { %v7222_v43 = vsel %vm15171_vm9, 0, %v15166_v6  ;;  %v7401_v20 = vsel %vm15182_vm0, 0, %v15166_v6 }
 0x709   : > { %v10610_v47 = vpack.c.bf16 %v6700_v42, %v6699_v19  ;;  %v7214_v19 = vld [vmem:[#allocation5 + $0x24] sm:$0x1]  ;;  %v15222_v17 = vunpack.c.l.bf16 %v7222_v43  ;;  %v15236_v56 = vunpack.c.l.bf16 %v7401_v20 }
 0x70a   : > { %v7223_v58 = vsel %vm15162_vm15, 0, %v7214_v19 }
 0x70b   : > { %10622 = vst [vmem:[#allocation5 + $0x8] sm:$0xff] %v10610_v47   ;;  %v7240_v53 = vunpack.c.l.bf16 %v7223_v58  ;;  %v7441_v27 = vrot.slane %v15236_v56, 1 }
 0x70d   : > { %v6658_v16 = vpop.f32.mrf.mxu3  ;;  %v7265_v52 = vrot.slane %v7240_v53, 1 }
 0x70e   : > { %v6659_v44 = vadd.f32 %v15090_v50, %v6658_v16 }
 0x710   : > { %v6688_v12 = vadd.f32 %v6687_v54, %v6659_v44  ;;  %v18347_v54 = vld [vmem:[#allocation22_spill] sm:$0xff]  ;;  %v7045_v44 = vrot.slane %v7043_v10, 4 }
 0x711   : > { %vm18348_vm8 = vnez %v18347_v54 }
 0x712   : > { %v6701_v24 = vmax.f32 %v6688_v12, 0.0  ;;  %v7044_v16 = vsel %vm18348_vm8, %v7042_v7, %v7043_v10  ;;  %v7197_v12 = vunpack.c.l.bf16 %v15166_v6  ;;  %v7047_v21 = vsel %vm18348_vm8, %v7045_v44, %v7046_v39 }
 0x713   : > { %v7092_v32 = vunpack.c.h.b16 %v7044_v16  ;;  %v7099_v31 = vunpack.c.h.b16 %v7047_v21  ;;  %v7443_v7 = vrot.slane %v7419_v13, 1  ;;  %v7263_v10 = vrot.slane %v15222_v17, 1 }
 0x715   : > { %v6660_v23 = vpop.f32.mrf.mxu3  ;;  %vm7096_vm11 = vcmp.ne.s32.totalorder %v7092_v32, %v17833_v35  ;;  %vm7103_vm5 = vcmp.ne.s32.totalorder %v7099_v31, %v17833_v35  ;;  %v18361_v32 = vld [vmem:[#allocation25_spill] sm:$0xff] }
 0x716   : > { %v6661_v28 = vadd.f32 %v15090_v50, %v6660_v23  ;;  %v6694_v23 = vpop.f32.mrf.mxu2 }
 0x718   : > { %v6690_v22 = vadd.f32 %v6689_v41, %v6661_v28  ;;  %v7048_v41 = vrot.slane %v7046_v39, 4 }
 0x71a   : > { %v6702_v51 = vmax.f32 %v6690_v22, 0.0  ;;  %v7091_v22 = vunpack.c.l.b16 %v7044_v16  ;;  %v7106_v55 = vunpack.c.h.b16 %v7048_v41 }
 0x71c   : > { %v10615_v36 = vpack.c.bf16 %v6702_v51, %v6701_v24  ;;  %v6917_v24 = vsel %vm15162_vm15, 0, %v6734_v34  ;;  %vm15193_vm2 = vcmp.ne.s32.totalorder %v7091_v22, %v17832_v63  ;;  %v7098_v51 = vunpack.c.l.b16 %v7047_v21 }
 0x71d   : > { %vm15211_vm6 = vmpackc.low %vm7096_vm11, %vm15193_vm2  ;;  %vm7110_vm4 = vcmp.ne.s32.totalorder %v7106_v55, %v17833_v35  ;;  %vm18362_vm2 = vcmask 1045504  }
 0x71e   : > { %v6663_v18 = vpop.f32.mrf.mxu3  ;;  %10623 = vst [vmem:[#allocation5 + $0x10] sm:$0xff] %v10615_v36   ;;  %v7105_v36 = vunpack.c.l.b16 %v7048_v41  ;;  %vm7102_vm10 = vcmp.ne.s32.totalorder %v7098_v51, %v17832_v63  ;;  %v7478_v57 = vsel %vm15211_vm6, 0, %v15166_v6  ;;  %v15271_v41 = vsel %vm18360_vm14, %v7441_v27, %v7443_v7  ;;  %vm18363_vm11 = vmmov %vm18359_vm13 }
 0x71f   : > { %v6664_v30 = vadd.f32 %v15090_v50, %v6663_v18  ;;  %v15203_v18 = vunpack.c.l.bf16 %v6917_v24  ;;  %vm15218_vm12 = vmpackc.low %vm7103_vm5, %vm7102_vm10  ;;  %vm6739_vm10 = vcmp.ge.s32.totalorder %v18364_v8, 7  ;;  %v6823_v51 = vshll.u32 %v15104_v46, 16 }
 0x720   : > { %vm7109_vm1 = vcmp.ne.s32.totalorder %v7105_v36, %v17832_v63  ;;  %v7299_v62 = vsel %vm15218_vm12, 0, %v15166_v6 }
 0x721   : > { %v6693_v11 = vadd.f32 %v6692_v5, %v6664_v30  ;;  %v7394_v5 = vld [vmem:[#allocation5 + $0x28] sm:$0x1]  ;;  %vm15229_vm3 = vmpackc.low %vm7110_vm4, %vm7109_vm1  ;;  %v15242_v59 = vunpack.c.l.bf16 %v7299_v62  ;;  %v6959_v61 = vrot.slane %v15203_v18, 1 }
 0x722   : > { %v7403_v4 = vsel %vm15162_vm15, 0, %v7394_v5  ;;  %v7120_v37 = vsel %vm15229_vm3, 0, %v6734_v34  ;;  %v7300_v49 = vsel %vm15229_vm3, 0, %v7214_v19  ;;  %v7479_v34 = vsel %vm15218_vm12, 0, %v15201_v29  ;;  %vm18369_vm1 = vmmov %vm18362_vm2 }
 0x723   : > { %v6703_v28 = vmax.f32 %v6693_v11, 0.0  ;;  %v7420_v1 = vunpack.c.l.bf16 %v7403_v4  ;;  %v7137_v11 = vunpack.c.l.bf16 %v7120_v37  ;;  %v7317_v0 = vunpack.c.l.bf16 %v7300_v49  ;;  %vm18370_vm4 = vmmov %vm18369_vm1 }
 0x724   : > { %v15256_v19 = vunpack.c.l.bf16 %v7478_v57  ;;  %v7340_v16 = vrot.slane %v15242_v59, 2  ;;  %v15264_v44 = vunpack.c.l.bf16 %v7479_v34  ;;  %vm6738_vm15 = vcmp.ge.s32.totalorder %v18361_v32, 7 }
 0x725   : > { %v7445_v39 = vrot.slane %v7420_v1, 1  ;;  %v7342_v15 = vrot.slane %v7317_v0, 2  ;;  %v15297_v55 = vld [vmem:[#allocation5 + $0x10] sm:$0xf]  ;;  %v15315_v38 = vld [vmem:[#allocation5 + $0x14] sm:$0xf] }
 0x726   : > { %v6665_v14 = vpop.f32.mrf.mxu3  ;;  %v7518_v22 = vrot.slane %v15256_v19, 2  ;;  %v7520_v31 = vrot.slane %v15264_v44, 2  ;;  %v15347_v0 = vunpack.c.l.bf16 %v15315_v38 }
 0x727   : > { %v6666_v42 = vadd.f32 %v15090_v50, %v6665_v14  ;;  %v7480_v14 = vsel %vm15229_vm3, 0, %v7394_v5  ;;  %v15282_v21 = vsel %vm18362_vm2, %v7340_v16, %v7342_v15  ;;  %v15285_v58 = vsel %vm18363_vm11, %v7443_v7, %v7445_v39  ;;  %vm18373_vm2 = vmmov %vm18369_vm1 }
 0x728   : > { %v15328_v50 = vunpack.c.l.bf16 %v15297_v55  ;;  %vm6989_vm3 = vcmp.ge.s32.totalorder %v18361_v32, 6  ;;  %v6825_v32 = vor.u32 %v6823_v51, %v15109_v48 }
 0x729   : > { %v6695_v45 = vadd.f32 %v6694_v23, %v6666_v42  ;;  %v15261_v42 = vsel %vm18359_vm13, %v7263_v10, %v7265_v52  ;;  %v15266_v23 = vunpack.c.l.bf16 %v7480_v14  ;;  %v7521_v14 = vsel %vm18369_vm1, %v7518_v22, %v7520_v31  ;;  %vm7013_vm14 = vmpackc.low %vm6989_vm3, %vm6989_vm3 }
 0x72a   : > { %vm6990_vm13 = vcmp.ge.s32.totalorder %v18364_v8, 6  ;;  %v7021_v8 = vsel %vm7013_vm14, 65537, %v15101_v60 }
 0x72b   : > { %v6704_v2 = vmax.f32 %v6695_v45, 0.0  ;;  %v7522_v36 = vrot.slane %v15266_v23, 2 }
 0x72d   : > { %v10620_v9 = vpack.c.bf16 %v6704_v2, %v6703_v28  ;;  %v7162_v28 = vrot.slane %v7137_v11, 2 }
 0x72f   : > { %10624 = vst [vmem:[#allocation5 + $0x18] sm:$0xff] %v10620_v9  }
 0x736   : > { %v15275_v45 = vld [vmem:[#allocation5 + $0x18] sm:$0xf]  ;;  %v15277_v24 = vld [vmem:[#allocation5 + $0x1c] sm:$0xf] }
 0x737   : > { %v6915_v43 = vsel %vm15182_vm0, 0, %v15275_v45  ;;  %v6916_v2 = vsel %vm15171_vm9, 0, %v15277_v24  ;;  %v7118_v46 = vsel %vm15211_vm6, 0, %v15275_v45  ;;  %v7119_v53 = vsel %vm15218_vm12, 0, %v15277_v24  ;;  %vm15323_vm9 = vmpackc.low %vm6738_vm15, %vm6738_vm15 }
 0x738   : > { %v15299_v5 = vunpack.c.l.bf16 %v6915_v43  ;;  %v6933_v18 = vunpack.c.l.bf16 %v6916_v2  ;;  %v15307_v20 = vunpack.c.l.bf16 %v7118_v46  ;;  %v7136_v47 = vunpack.c.l.bf16 %v7119_v53  ;;  %vm18371_vm12 = vmmov %vm18369_vm1 }
 0x739   : > { %v7221_v9 = vsel %vm15182_vm0, 0, %v15277_v24  ;;  %v7298_v52 = vsel %vm15211_vm6, 0, %v15277_v24  ;;  %v15331_v30 = vunpack.c.l.bf16 %v15275_v45  ;;  %v15334_v13 = vunpack.c.l.bf16 %v15277_v24  ;;  %vm6763_vm0 = vmpackc.low %vm6739_vm10, %vm6739_vm10 }
 0x73a   : > { %v6955_v4 = vrot.slane %v15299_v5, 1  ;;  %v6957_v26 = vrot.slane %v6933_v18, 1  ;;  %v15318_v62 = vunpack.c.l.bf16 %v7221_v9  ;;  %v7158_v1 = vrot.slane %v15307_v20, 2  ;;  %vm18367_vm6 = vmmov %vm18363_vm11 }
 0x73b   : > { %v7160_v37 = vrot.slane %v7136_v47, 2  ;;  %vm18368_vm5 = vmmov %vm18367_vm6  ;;  %v15344_v11 = vunpack.c.l.bf16 %v7298_v52  ;;  %v15362_v44 = vsel %vm15323_vm9, 65537, %v15101_v60  ;;  %v6771_v23 = vsel %vm6763_vm0, 65537, %v15101_v60 }
 0x73c   : > { %v6958_v49 = vsel %vm18367_vm6, %v6955_v4, %v6957_v26  ;;  %v6960_v57 = vsel %vm18368_vm5, %v6957_v26, %v6959_v61  ;;  %v7261_v34 = vrot.slane %v15318_v62, 1  ;;  %v6802_v18 = vshrl.u32 %v15362_v44, 16  ;;  %vm18372_vm15 = vmmov %vm18368_vm5 }
 0x73d   : > { %v6975_v7 = vmax.f32 %v15331_v30, %v6958_v49  ;;  %v6976_v39 = vmax.f32 %v15334_v13, %v6960_v57  ;;  %v7161_v15 = vsel %vm18370_vm4, %v7158_v1, %v7160_v37  ;;  %v7163_v61 = vsel %vm18371_vm12, %v7160_v37, %v7162_v28  ;;  %vm7014_vm11 = vmpackc.low %vm6990_vm13, %vm6990_vm13 }
 0x73e   : > { %v6811_v46 = vshrl.u32 %v6771_v23, 16  ;;  %v7338_v53 = vrot.slane %v15344_v11, 2  ;;  %v6814_v47 = vshll.u32 %v6771_v23, 16  ;;  %v15372_v52 = vrot.slane %v6802_v18, 7  ;;  %vm18374_vm10 = vmmov %vm18369_vm1 }
 0x73f   : > { %v7178_v43 = vmax.f32 %v6975_v7, %v7161_v15  ;;  %v7179_v2 = vmax.f32 %v6976_v39, %v7163_v61  ;;  %v7264_v40 = vsel %vm18372_vm15, %v7261_v34, %v7263_v10  ;;  %v7523_v37 = vsel %vm18373_vm2, %v7520_v31, %v7522_v36 }
 0x740   : > { %v6813_v26 = vrot.slane %v6811_v46, 7  ;;  %v6809_v7 = vrot.slane %v15372_v52, 4  ;;  %v7341_v17 = vsel %vm18374_vm10, %v7338_v53, %v7340_v16  ;;  %v7022_v31 = vsel %vm7014_vm11, 65537, %v15101_v60 }
 0x741   : > { %v7204_v28 = vmax.f32 %v7178_v43, %v15334_v13  ;;  %v7205_v9 = vmax.f32 %v7179_v2, %v7197_v12  ;;  %v15390_v36 = vrot.slane %v7021_v8, 7  ;;  %v7037_v15 = vrot.slane %v7022_v31, 7 }
 0x742   : > { %v6816_v39 = vor.u32 %v6814_v47, %v6813_v26  ;;  %v6818_v10 = vrot.slane %v6813_v26, 4  ;;  %vm18382_vm11 = vcmask 1046528  }
 0x743   : > { %v7281_v49 = vmax.f32 %v7204_v28, %v7264_v40  ;;  %v7282_v57 = vmax.f32 %v7205_v9, %v15261_v42  ;;  %v7036_v43 = vrot.slane %v15390_v36, 4  ;;  %v7039_v47 = vrot.slane %v7037_v15, 4  ;;  %vm18383_vm10 = vmmov %vm18382_vm11 }
 0x744   : > { %v6817_v42 = vsel %vm17822_vm7, %v6809_v7, %v6816_v39  ;;  %v6826_v61 = vsel %vm17822_vm7, %v6818_v10, %v6825_v32 }
 0x745   : > { %v7358_v48 = vmax.f32 %v7281_v49, %v7341_v17  ;;  %v7359_v51 = vmax.f32 %v7282_v57, %v15282_v21  ;;  %v6874_v59 = vunpack.c.l.b16 %v6817_v42  ;;  %v6875_v23 = vunpack.c.h.b16 %v6817_v42 }
 0x746   : > { %v6881_v18 = vunpack.c.l.b16 %v6826_v61  ;;  %v6882_v46 = vunpack.c.h.b16 %v6826_v61  ;;  %v7038_v21 = vsel %vm18348_vm8, %v7036_v43, %v7037_v15  ;;  %v18381_v15 = vld [vmem:[#allocation21_spill] sm:$0xff] }
 0x747   : > { %v7384_v16 = vmax.f32 %v7358_v48, %v7197_v12  ;;  %v7385_v2 = vmax.f32 %v7359_v51, %v7377_v33  ;;  %vm6878_vm9 = vcmp.ne.s32.totalorder %v6874_v59, %v17832_v63  ;;  %vm6879_vm0 = vcmp.ne.s32.totalorder %v6875_v23, %v17833_v35 }
 0x748   : > { %vm15408_vm6 = vmpackc.low %vm6879_vm0, %vm6878_vm9  ;;  %vm6885_vm5 = vcmp.ne.s32.totalorder %v6881_v18, %v17832_v63  ;;  %vm6886_vm1 = vcmp.ne.s32.totalorder %v6882_v46, %v17833_v35  ;;  %v7041_v33 = vsel %vm18348_vm8, %v7039_v47, %v15141_v3  ;;  %vm6736_vm2 = vcmp.ge.s32.totalorder %v18381_v15, 7 }
 0x749   : > { %v7461_v28 = vmax.f32 %v7384_v16, %v15271_v41  ;;  %v7462_v9 = vmax.f32 %v7385_v2, %v15285_v58  ;;  %vm15414_vm4 = vmpackc.low %vm6886_vm1, %vm6885_vm5  ;;  %v6913_v29 = vsel %vm15408_vm6, 0, %v15297_v55  ;;  %v7077_v41 = vunpack.c.l.b16 %v7038_v21 }
 0x74a   : > { %v7078_v58 = vunpack.c.h.b16 %v7038_v21  ;;  %v6914_v32 = vsel %vm15414_vm4, 0, %v15315_v38  ;;  %v15427_v8 = vunpack.c.l.bf16 %v6913_v29  ;;  %v7084_v57 = vunpack.c.l.b16 %v7041_v33  ;;  %vm18386_vm0 = vmmov %vm18383_vm10 }
 0x74b   : > { %v7538_v26 = vmax.f32 %v7461_v28, %v7521_v14  ;;  %v7539_v40 = vmax.f32 %v7462_v9, %v7523_v37  ;;  %v6931_v49 = vunpack.c.l.bf16 %v6914_v32  ;;  %vm7081_vm12 = vcmp.ne.s32.totalorder %v7077_v41, %v17832_v63 }
 0x74c   : > { %vm7082_vm3 = vcmp.ne.s32.totalorder %v7078_v58, %v17833_v35  ;;  %v6951_v39 = vrot.slane %v15427_v8, 1  ;;  %v7085_v14 = vunpack.c.h.b16 %v7041_v33  ;;  %v7219_v37 = vsel %vm15408_vm6, 0, %v15315_v38 }
 0x74d   : > { %v7543_v7 = vpack.c.bf16 %v7539_v40, %v7538_v26  ;;  %vm15432_vm13 = vmpackc.low %vm7082_vm3, %vm7081_vm12  ;;  %v6953_v17 = vrot.slane %v6931_v49, 1  ;;  %vm7088_vm14 = vcmp.ne.s32.totalorder %v7084_v57, %v17832_v63  ;;  %v7220_v31 = vsel %vm15414_vm4, 0, %v15275_v45 }
 0x74e   : > { %v7116_v10 = vsel %vm15432_vm13, 0, %v15297_v55  ;;  %vm7089_vm15 = vcmp.ne.s32.totalorder %v7085_v14, %v17833_v35  ;;  %v15449_v51 = vunpack.c.l.bf16 %v7219_v37  ;;  %v7237_v42 = vunpack.c.l.bf16 %v7220_v31 }
 0x74f   : > { %7556 = vmatpush.bf16.msrb.mxu2 %v7543_v7  ;;  %v15447_v48 = vunpack.c.l.bf16 %v7116_v10  ;;  %v6954_v61 = vsel %vm18382_vm11, %v6951_v39, %v6953_v17  ;;  %v6956_v59 = vsel %vm18383_vm10, %v6953_v17, %v6955_v4  ;;  %vm15458_vm9 = vmpackc.low %vm7089_vm15, %vm7088_vm14  ;;  %v7399_v43 = vsel %vm15408_vm6, 0, %v15275_v45 }
 0x750   : > { %v6973_v16 = vmax.f32 %v15328_v50, %v6954_v61  ;;  %v6974_v2 = vmax.f32 %v15347_v0, %v6956_v59  ;;  %v7117_v18 = vsel %vm15458_vm9, 0, %v15315_v38  ;;  %v7296_v5 = vsel %vm15432_vm13, 0, %v15315_v38  ;;  %vm15494_vm6 = vmpackc.low %vm6736_vm2, %vm6736_vm2  ;;  %v18392_v61 = vld [vmem:[#allocation26_spill] sm:$0xff] }
 0x751   : > { %v7134_v4 = vunpack.c.l.bf16 %v7117_v18  ;;  %v7154_v46 = vrot.slane %v15447_v48, 2  ;;  %v7259_v21 = vrot.slane %v7237_v42, 1  ;;  %v7297_v47 = vsel %vm15458_vm9, 0, %v15275_v45  ;;  %vm18395_vm15 = vmmov %vm18386_vm0 }
 0x752   : > { %v7257_v28 = vrot.slane %v15449_v51, 1  ;;  %v7314_v9 = vunpack.c.l.bf16 %v7297_v47  ;;  %v7400_v6 = vsel %vm15414_vm4, 0, %v15277_v24  ;;  %v15481_v29 = vunpack.c.l.bf16 %v7399_v43  ;;  %vm18391_vm4 = vmmov %vm18386_vm0 }
 0x753   : > { %v7156_v33 = vrot.slane %v7134_v4, 2  ;;  %v15483_v41 = vunpack.c.l.bf16 %v7296_v5  ;;  %v7417_v58 = vunpack.c.l.bf16 %v7400_v6  ;;  %v7476_v40 = vsel %vm15432_vm13, 0, %v15275_v45  ;;  %vm18396_vm2 = vmmov %vm18386_vm0 }
 0x754   : > { %v7260_v26 = vsel %vm18386_vm0, %v7257_v28, %v7259_v21  ;;  %vm18389_vm5 = vcmask 1045504   ;;  %v7336_v57 = vrot.slane %v7314_v9, 2  ;;  %v7477_v45 = vsel %vm15458_vm9, 0, %v15277_v24 }
 0x755   : > { %v7157_v32 = vsel %vm18389_vm5, %v7154_v46, %v7156_v33  ;;  %vm18390_vm1 = vmmov %vm18389_vm5  ;;  %v7437_v14 = vrot.slane %v15481_v29, 1  ;;  %v7439_v37 = vrot.slane %v7417_v58, 1  ;;  %v7262_v17 = vsel %vm18391_vm4, %v7259_v21, %v7261_v34  ;;  %v15535_v21 = vld [vmem:[#allocation5 + $0x8] sm:$0xf] }
 0x756   : > { %v7159_v49 = vsel %vm18390_vm1, %v7156_v33, %v7158_v1  ;;  %v7176_v7 = vmax.f32 %v6973_v16, %v7157_v32  ;;  %v7334_v10 = vrot.slane %v15483_v41, 2  ;;  %v15512_v31 = vunpack.c.l.bf16 %v7476_v40  ;;  %vm18393_vm3 = vmmov %vm18390_vm1 }
 0x757   : > { %v7177_v3 = vmax.f32 %v6974_v2, %v7159_v49  ;;  %v7494_v20 = vunpack.c.l.bf16 %v7477_v45  ;;  %vm6737_vm12 = vcmp.ge.s32.totalorder %v18392_v61, 7  ;;  %v15520_v24 = vsel %vm15494_vm6, 65537, %v15101_v60  ;;  %vm18394_vm13 = vmmov %vm18390_vm1 }
 0x758   : > { %v7202_v1 = vmax.f32 %v7176_v7, %v15347_v0  ;;  %v7337_v62 = vsel %vm18393_vm3, %v7334_v10, %v7336_v57  ;;  %v7339_v34 = vsel %vm18394_vm13, %v7336_v57, %v7338_v53  ;;  %vm6761_vm14 = vmpackc.low %vm6737_vm12, %vm6737_vm12  ;;  %v6784_v59 = vshrl.u32 %v15520_v24, 16 }
 0x759   : > { %v7203_v42 = vmax.f32 %v7177_v3, %v15331_v30  ;;  %v6805_v23 = vshll.u32 %v15362_v44, 16  ;;  %v7440_v2 = vsel %vm18395_vm15, %v7437_v14, %v7439_v37  ;;  %v6769_v18 = vsel %vm6761_vm14, 65537, %v15101_v60  ;;  %vm18397_vm0 = vmmov %vm18390_vm1 }
 0x75a   : > { %v7279_v43 = vmax.f32 %v7202_v1, %v7260_v26  ;;  %v7514_v5 = vrot.slane %v15512_v31, 2  ;;  %v7516_v4 = vrot.slane %v7494_v20, 2  ;;  %v15537_v11 = vrot.slane %v6784_v59, 7  ;;  %vm18398_vm5 = vmmov %vm18397_vm0  ;;  %v15566_v59 = vld [vmem:[#allocation5 + $0xc] sm:$0xf] }
 0x75b   : > { %v7280_v16 = vmax.f32 %v7203_v42, %v7262_v17  ;;  %v6793_v53 = vshrl.u32 %v6769_v18, 16  ;;  %v7442_v44 = vsel %vm18396_vm2, %v7439_v37, %v7441_v27  ;;  %v6796_v6 = vshll.u32 %v6769_v18, 16 }
 0x75c   : > { %v7356_v47 = vmax.f32 %v7279_v43, %v7337_v62  ;;  %v6791_v33 = vrot.slane %v15537_v11, 4  ;;  %v6807_v26 = vor.u32 %v6805_v23, %v15372_v52  ;;  %vm6987_vm11 = vcmp.ge.s32.totalorder %v18381_v15, 6  ;;  %v18399_v23 = vld [vmem:[#allocation19_spill] sm:$0xff] }
 0x75d   : > { %v7357_v9 = vmax.f32 %v7280_v16, %v7339_v34  ;;  %v6795_v58 = vrot.slane %v6793_v53, 7  ;;  %v15548_v32 = vunpack.c.l.bf16 %v15535_v21  ;;  %vm6988_vm10 = vcmp.ge.s32.totalorder %v18392_v61, 6  ;;  %vm7011_vm9 = vmpackc.low %vm6987_vm11, %vm6987_vm11 }
 0x75e   : > { %v7382_v40 = vmax.f32 %v7356_v47, %v15331_v30  ;;  %v7517_v56 = vsel %vm18397_vm0, %v7514_v5, %v7516_v4  ;;  %vm7012_vm6 = vmpackc.low %vm6988_vm10, %vm6988_vm10  ;;  %v7019_v52 = vsel %vm7011_vm9, 65537, %v15101_v60  ;;  %v7519_v30 = vsel %vm18398_vm5, %v7516_v4, %v7518_v22 }
 0x75f   : > { %v7383_v12 = vmax.f32 %v7357_v9, %v15334_v13  ;;  %v6798_v27 = vor.u32 %v6796_v6, %v6795_v58  ;;  %v6800_v49 = vrot.slane %v6795_v58, 4  ;;  %v7020_v13 = vsel %vm7012_vm6, 65537, %v15101_v60 }
 0x760   : > { %v7459_v15 = vmax.f32 %v7382_v40, %v7440_v2  ;;  %v15563_v3 = vrot.slane %v7019_v52, 7  ;;  %v7031_v37 = vrot.slane %v7020_v13, 7  ;;  %vm6735_vm12 = vcmp.ge.s32.totalorder %v18399_v23, 7 }
 0x761   : > { %v7460_v57 = vmax.f32 %v7383_v12, %v7442_v44  ;;  %v6799_v45 = vsel %vm17822_vm7, %v6791_v33, %v6798_v27  ;;  %v6808_v7 = vsel %vm17822_vm7, %v6800_v49, %v6807_v26  ;;  %vm6759_vm2 = vmpackc.low %vm6735_vm12, %vm6735_vm12  ;;  %v15604_v26 = vunpack.c.l.bf16 %v15566_v59 }
 0x762   : > { %v7536_v17 = vmax.f32 %v7459_v15, %v7517_v56  ;;  %v6860_v1 = vunpack.c.l.b16 %v6799_v45  ;;  %v6861_v42 = vunpack.c.h.b16 %v6799_v45  ;;  %v6867_v61 = vunpack.c.l.b16 %v6808_v7 }
 0x763   : > { %v7537_v20 = vmax.f32 %v7460_v57, %v7519_v30  ;;  %v6868_v62 = vunpack.c.h.b16 %v6808_v7  ;;  %v7030_v19 = vrot.slane %v15563_v3, 4  ;;  %v7033_v22 = vrot.slane %v7031_v37, 4 }
 0x764   : > { %vm6864_vm1 = vcmp.ne.s32.totalorder %v6860_v1, %v17832_v63  ;;  %vm6865_vm4 = vcmp.ne.s32.totalorder %v6861_v42, %v17833_v35  ;;  %vm6871_vm13 = vcmp.ne.s32.totalorder %v6867_v61, %v17832_v63  ;;  %v6767_v57 = vsel %vm6759_vm2, 65537, %v15101_v60 }
 0x765   : > { %v7542_v34 = vpack.c.bf16 %v7537_v20, %v7536_v17  ;;  %vm15571_vm3 = vmpackc.low %vm6865_vm4, %vm6864_vm1  ;;  %vm6872_vm14 = vcmp.ne.s32.totalorder %v6868_v62, %v17833_v35  ;;  %v7032_v16 = vsel %vm18348_vm8, %v7030_v19, %v7031_v37  ;;  %v7035_v2 = vsel %vm18348_vm8, %v7033_v22, %v15390_v36 }
 0x766   : > { %vm15582_vm15 = vmpackc.low %vm6872_vm14, %vm6871_vm13  ;;  %v6911_v4 = vsel %vm15571_vm3, 0, %v15535_v21  ;;  %v7063_v53 = vunpack.c.l.b16 %v7032_v16  ;;  %v7064_v47 = vunpack.c.h.b16 %v7032_v16  ;;  %v7070_v9 = vunpack.c.l.b16 %v7035_v2 }
 0x767   : > { %7557 = vmatpush.bf16.msrb.mxu2 %v7542_v34  ;;  %v6912_v44 = vsel %vm15582_vm15, 0, %v15566_v59  ;;  %v15592_v6 = vunpack.c.l.bf16 %v6911_v4  ;;  %v7071_v33 = vunpack.c.h.b16 %v7035_v2  ;;  %v7217_v36 = vsel %vm15571_vm3, 0, %v15566_v59 }
 0x768   : > { %v6929_v58 = vunpack.c.l.bf16 %v6912_v44  ;;  %vm7067_vm11 = vcmp.ne.s32.totalorder %v7063_v53, %v17832_v63  ;;  %vm7068_vm10 = vcmp.ne.s32.totalorder %v7064_v47, %v17833_v35  ;;  %vm7074_vm9 = vcmp.ne.s32.totalorder %v7070_v9, %v17832_v63 }
 0x769   : > { %v6947_v40 = vrot.slane %v15592_v6, 1  ;;  %vm15607_vm0 = vmpackc.low %vm7068_vm10, %vm7067_vm11  ;;  %vm7075_vm6 = vcmp.ne.s32.totalorder %v7071_v33, %v17833_v35  ;;  %v7218_v56 = vsel %vm15582_vm15, 0, %v15297_v55  ;;  %v15628_v45 = vunpack.c.l.bf16 %v7217_v36 }
 0x76a   : > { %v6949_v27 = vrot.slane %v6929_v58, 1  ;;  %vm15615_vm5 = vmpackc.low %vm7075_vm6, %vm7074_vm9  ;;  %v7114_v52 = vsel %vm15607_vm0, 0, %v15535_v21  ;;  %v7235_v15 = vunpack.c.l.bf16 %v7218_v56  ;;  %vm18408_vm1 = vcmask 1046528  }
 0x76b   : > { %v7115_v30 = vsel %vm15615_vm5, 0, %v15566_v59  ;;  %v15626_v13 = vunpack.c.l.bf16 %v7114_v52  ;;  %v7295_v7 = vsel %vm15615_vm5, 0, %v15297_v55  ;;  %vm18409_vm4 = vmmov %vm18408_vm1  ;;  %v7294_v1 = vsel %vm15607_vm0, 0, %v15566_v59 }
 0x76c   : > { %v6950_v37 = vsel %vm18408_vm1, %v6947_v40, %v6949_v27  ;;  %v6952_v17 = vsel %vm18409_vm4, %v6949_v27, %v6951_v39  ;;  %v7132_v20 = vunpack.c.l.bf16 %v7115_v30  ;;  %v7255_v22 = vrot.slane %v7235_v15, 1  ;;  %vm18413_vm14 = vmmov %vm18408_vm1 }
 0x76d   : > { %v6971_v42 = vmax.f32 %v15548_v32, %v6950_v37  ;;  %v6972_v61 = vmax.f32 %v15604_v26, %v6952_v17  ;;  %v7150_v62 = vrot.slane %v15626_v13, 2  ;;  %v7312_v34 = vunpack.c.l.bf16 %v7295_v7  ;;  %vm18416_vm10 = vmmov %vm18408_vm1 }
 0x76e   : > { %v7152_v19 = vrot.slane %v7132_v20, 2  ;;  %v6787_v16 = vshll.u32 %v15520_v24, 16  ;;  %v15646_v2 = vunpack.c.l.bf16 %v7294_v1  ;;  %v7397_v8 = vsel %vm15571_vm3, 0, %v15297_v55  ;;  %vm18412_vm3 = vmmov %vm18408_vm1 }
 0x76f   : > { %v7398_v39 = vsel %vm15582_vm15, 0, %v15315_v38  ;;  %v6776_v4 = vshrl.u32 %v6767_v57, 16  ;;  %vm18410_vm12 = vcmask 1045504   ;;  %v7253_v24 = vrot.slane %v15628_v45, 1 }
 0x770   : > { %v7153_v53 = vsel %vm18410_vm12, %v7150_v62, %v7152_v19  ;;  %vm18411_vm13 = vmmov %vm18410_vm12  ;;  %v7474_v43 = vsel %vm15607_vm0, 0, %v15297_v55  ;;  %v7332_v33 = vrot.slane %v7312_v34, 2  ;;  %v7475_v18 = vsel %vm15615_vm5, 0, %v15315_v38 }
 0x771   : > { %v7155_v47 = vsel %vm18411_vm13, %v7152_v19, %v7154_v46  ;;  %v7174_v9 = vmax.f32 %v6971_v42, %v7153_v53  ;;  %v7256_v36 = vsel %vm18412_vm3, %v7253_v24, %v7255_v22  ;;  %v7258_v48 = vsel %vm18413_vm14, %v7255_v22, %v7257_v28  ;;  %vm18414_vm15 = vmmov %vm18410_vm12 }
 0x772   : > { %v7175_v44 = vmax.f32 %v6972_v61, %v7155_v47  ;;  %v15673_v46 = vunpack.c.l.bf16 %v7397_v8  ;;  %v7415_v58 = vunpack.c.l.bf16 %v7398_v39  ;;  %v7330_v56 = vrot.slane %v15646_v2, 2  ;;  %vm18415_vm2 = vmmov %vm18410_vm12 }
 0x773   : > { %v7200_v55 = vmax.f32 %v7174_v9, %v15604_v26  ;;  %v15678_v27 = vunpack.c.l.bf16 %v7474_v43  ;;  %v7492_v38 = vunpack.c.l.bf16 %v7475_v18  ;;  %v6778_v49 = vrot.slane %v6776_v4, 7  ;;  %vm18419_vm0 = vmmov %vm18408_vm1  ;;  %v15708_v43 = vld [vmem:[#allocation5 + $0x4] sm:$0xf] }
 0x774   : > { %v7201_v12 = vmax.f32 %v7175_v44, %v15328_v50  ;;  %v6779_v52 = vshll.u32 %v6767_v57, 16  ;;  %v6789_v15 = vor.u32 %v6787_v16, %v15537_v11  ;;  %v7333_v28 = vsel %vm18414_vm15, %v7330_v56, %v7332_v33  ;;  %vm18420_vm4 = vmmov %vm18415_vm2 }
 0x775   : > { %v7277_v30 = vmax.f32 %v7200_v55, %v7256_v36  ;;  %v7335_v7 = vsel %vm18415_vm2, %v7332_v33, %v7334_v10  ;;  %v7433_v37 = vrot.slane %v15673_v46, 1  ;;  %v7435_v17 = vrot.slane %v7415_v58, 1  ;;  %vm18421_vm12 = vmmov %vm18415_vm2 }
 0x776   : > { %v7278_v51 = vmax.f32 %v7201_v12, %v7258_v48  ;;  %v6781_v20 = vor.u32 %v6779_v52, %v6778_v49  ;;  %v6782_v1 = vrot.slane %v6778_v49, 4  ;;  %v7510_v57 = vrot.slane %v15678_v27, 2  ;;  %v10495_v27 = vld [vmem:[%s17324_s14 + $0x28] sm:$0xff] }
 0x777   : > { %v7354_v42 = vmax.f32 %v7277_v30, %v7333_v28  ;;  %vm6986_vm11 = vcmp.ge.s32.totalorder %v18399_v23, 6  ;;  %v7438_v11 = vsel %vm18416_vm10, %v7435_v17, %v7437_v14  ;;  %v7512_v19 = vrot.slane %v7492_v38, 2  ;;  %v6726_v14 = vld [vmem:[#allocation5] sm:$0xf] }
 0x778   : > { %v7355_v61 = vmax.f32 %v7278_v51, %v7335_v7  ;;  %v6790_v41 = vsel %vm17822_vm7, %v6782_v1, %v6789_v15  ;;  %v6846_v10 = vunpack.c.l.b16 %v6781_v20  ;;  %vm15695_vm9 = vmpackc.low %vm6986_vm11, %vm6986_vm11  ;;  %v6847_v8 = vunpack.c.h.b16 %v6781_v20  ;;  %v6985_v51 = vld [vmem:[#allocation5] sm:$0xe] }
 0x779   : > { %v7380_v34 = vmax.f32 %v7354_v42, %v15328_v50  ;;  %v6853_v39 = vunpack.c.l.b16 %v6790_v41  ;;  %v7436_v29 = vsel %vm18419_vm0, %v7433_v37, %v7435_v17  ;;  %v6854_v23 = vunpack.c.h.b16 %v6790_v41  ;;  %v7291_v41 = vld [vmem:[#allocation5 + $0x4] sm:$0xe] }
 0x77a   : > { %v7381_v16 = vmax.f32 %v7355_v61, %v15347_v0  ;;  %vm6850_vm6 = vcmp.ne.s32.totalorder %v6846_v10, %v17832_v63  ;;  %v7018_v4 = vsel %vm15695_vm9, 65537, %v15101_v60  ;;  %vm6851_vm5 = vcmp.ne.s32.totalorder %v6847_v8, %v17833_v35 }
 0x77b   : > { %v7457_v53 = vmax.f32 %v7380_v34, %v7436_v29  ;;  %vm6857_vm1 = vcmp.ne.s32.totalorder %v6853_v39, %v17832_v63  ;;  %v7513_v50 = vsel %vm18420_vm4, %v7510_v57, %v7512_v19  ;;  %v7515_v0 = vsel %vm18421_vm12, %v7512_v19, %v7514_v5  ;;  %vm15718_vm13 = vmpackc.low %vm6851_vm5, %vm6850_vm6 }
 0x77c   : > { %v7458_v47 = vmax.f32 %v7381_v16, %v7438_v11  ;;  %vm6858_vm3 = vcmp.ne.s32.totalorder %v6854_v23, %v17833_v35  ;;  %v7026_v60 = vrot.slane %v7018_v4, 7  ;;  %v6909_v36 = vsel %vm15718_vm13, 0, %v6726_v14  ;;  %vm18428_vm6 = vmmov %vm18419_vm0 }
 0x77d   : > { %v7534_v44 = vmax.f32 %v7457_v53, %v7513_v50  ;;  %vm15723_vm14 = vmpackc.low %vm6858_vm3, %vm6857_vm1  ;;  %v6926_v5 = vunpack.c.l.bf16 %v6909_v36  ;;  %v6918_v20 = vunpack.c.l.bf16 %v6726_v14  ;;  %v6919_v10 = vunpack.c.l.bf16 %v15708_v43 }
 0x77e   : > { %v7535_v33 = vmax.f32 %v7458_v47, %v7515_v0  ;;  %v6910_v31 = vsel %vm15723_vm14, 0, %v15708_v43  ;;  %v7027_v48 = vrot.slane %v7026_v60, 4  ;;  %v7049_v58 = vunpack.c.l.b16 %v7026_v60  ;;  %v7471_v47 = vld [vmem:[#allocation5 + $0x8] sm:$0xe]  ;;  %vm18431_vm1 = vmmov %vm18420_vm4 }
 0x77f   : > { %v6927_v12 = vunpack.c.l.bf16 %v6910_v31  ;;  %v7050_v38 = vunpack.c.h.b16 %v7026_v60  ;;  %v6944_v49 = vrot.slane %v6926_v5, 1  ;;  %v7216_v15 = vsel %vm15723_vm14, 0, %v15535_v21  ;;  %vm18432_vm4 = vmmov %vm18431_vm1 }
 0x780   : > { %v7541_v55 = vpack.c.bf16 %v7535_v33, %v7534_v44  ;;  %v7029_v52 = vsel %vm18348_vm8, %v7027_v48, %v15563_v3  ;;  %vm7053_vm15 = vcmp.ne.s32.totalorder %v7049_v58, %v17832_v63  ;;  %v7215_v3 = vsel %vm15718_vm13, 0, %v15708_v43  ;;  %vm18433_vm12 = vmmov %vm18419_vm0 }
 0x781   : > { %v6945_v30 = vrot.slane %v6927_v12, 1  ;;  %vm7054_vm2 = vcmp.ne.s32.totalorder %v7050_v38, %v17833_v35  ;;  %v7056_v28 = vunpack.c.l.b16 %v7029_v52  ;;  %v7057_v7 = vunpack.c.h.b16 %v7029_v52  ;;  %vm18435_vm3 = vmmov %vm18431_vm1 }
 0x782   : > { %7558 = vmatpush.bf16.msrb.mxu2 %v7541_v55  ;;  %vm15740_vm11 = vmpackc.low %vm7054_vm2, %vm7053_vm15  ;;  %v7233_v19 = vunpack.c.l.bf16 %v7216_v15  ;;  %v7232_v16 = vunpack.c.l.bf16 %v7215_v3  ;;  %v7396_v50 = vsel %vm15723_vm14, 0, %v15566_v59 }
 0x783   : > { %vm7060_vm10 = vcmp.ne.s32.totalorder %v7056_v28, %v17832_v63  ;;  %vm7061_vm9 = vcmp.ne.s32.totalorder %v7057_v7, %v17833_v35  ;;  %v6946_v1 = vsel %vm18419_vm0, %v6944_v49, %v6945_v30  ;;  %v6948_v42 = vsel %vm18428_vm6, %v6945_v30, %v6947_v40  ;;  %vm18436_vm14 = vmmov %vm18431_vm1 }
 0x784   : > { %vm15753_vm5 = vmpackc.low %vm7061_vm9, %vm7060_vm10  ;;  %v7112_v11 = vsel %vm15740_vm11, 0, %v6985_v51  ;;  %v6969_v8 = vmax.f32 %v6918_v20, %v6946_v1  ;;  %v6970_v39 = vmax.f32 %v6919_v10, %v6948_v42  ;;  %v7292_v14 = vsel %vm15740_vm11, 0, %v7291_v41 }
 0x785   : > { %v7113_v22 = vsel %vm15753_vm5, 0, %v15708_v43  ;;  %v7129_v34 = vunpack.c.l.bf16 %v7112_v11  ;;  %v7293_v6 = vsel %vm15753_vm5, 0, %v15535_v21  ;;  %v7251_v4 = vrot.slane %v7233_v19, 1  ;;  %vm18437_vm15 = vmmov %vm18419_vm0 }
 0x786   : > { %v7130_v40 = vunpack.c.l.bf16 %v7113_v22  ;;  %v7310_v53 = vunpack.c.l.bf16 %v7293_v6  ;;  %v7395_v43 = vsel %vm15718_vm13, 0, %v15535_v21  ;;  %v7250_v44 = vrot.slane %v7232_v16, 1  ;;  %vm18434_vm13 = vmmov %vm18419_vm0  ;;  %v10492_v22 = vld [vmem:[%s17324_s14 + $0x10] sm:$0xff]  ;;  %v10490_v6 = vld [vmem:[%s17324_s14] sm:$0xff] }
 0x787   : > { %v7147_v29 = vrot.slane %v7129_v34, 2  ;;  %v7309_v33 = vunpack.c.l.bf16 %v7292_v14  ;;  %v7472_v5 = vsel %vm15740_vm11, 0, %v7471_v47  ;;  %v7473_v21 = vsel %vm15753_vm5, 0, %v15566_v59  ;;  %vm18438_vm2 = vmmov %vm18419_vm0  ;;  %v10491_v34 = vld [vmem:[%s17324_s14 + $0x8] sm:$0xff]  ;;  %v18445_v47 = vld [vmem:[#allocation16_spill] sm:$0xff] }
 0x788   : > { %v7148_v23 = vrot.slane %v7130_v40, 2  ;;  %v7252_v9 = vsel %vm18433_vm12, %v7250_v44, %v7251_v4  ;;  %v7328_v18 = vrot.slane %v7310_v53, 2  ;;  %v7412_v48 = vunpack.c.l.bf16 %v7395_v43  ;;  %vm18439_vm11 = vmmov %vm18431_vm1 }
 0x789   : > { %v7413_v58 = vunpack.c.l.bf16 %v7396_v50  ;;  %v7327_v12 = vrot.slane %v7309_v33, 2  ;;  %v7489_v38 = vunpack.c.l.bf16 %v7472_v5  ;;  %v7490_v49 = vunpack.c.l.bf16 %v7473_v21  ;;  %vm18440_vm10 = vmmov %vm18431_vm1  ;;  %v18446_v50 = vld [vmem:[#allocation23_spill] sm:$0xff] }
 0x78a   : > { %v7149_v0 = vsel %vm18431_vm1, %v7147_v29, %v7148_v23  ;;  %v7151_v60 = vsel %vm18432_vm4, %v7148_v23, %v7150_v62  ;;  %v7254_v62 = vsel %vm18434_vm13, %v7251_v4, %v7253_v24  ;;  %v7331_v59 = vsel %vm18436_vm14, %v7328_v18, %v7330_v56  ;;  %v10680_v23 = vld [vmem:[%s17325_s15] ss:$0 sm:$0xff]  ;;  %v15850_v33 = vld [vmem:[#allocation6 + $0x18] sm:$0xff] }
 0x78b   : > { %v7172_v36 = vmax.f32 %v6969_v8, %v7149_v0  ;;  %v7173_v31 = vmax.f32 %v6970_v39, %v7151_v60  ;;  %v7329_v30 = vsel %vm18435_vm3, %v7327_v12, %v7328_v18  ;;  %v7430_v51 = vrot.slane %v7412_v48, 1  ;;  %v7656_v39 = vld [vmem:[#allocation3] sm:$0x7] }
 0x78c   : > { %v7431_v28 = vrot.slane %v7413_v58, 1  ;;  %v7507_v24 = vrot.slane %v7489_v38, 2  ;;  %v7508_v20 = vrot.slane %v7490_v49, 2  ;;  %vm18442_vm9 = vcmask 523264  }
 0x78d   : > { %v7198_v55 = vmax.f32 %v7172_v36, %v6919_v10  ;;  %v7199_v13 = vmax.f32 %v7173_v31, %v15548_v32  ;;  %v10493_v10 = vld [vmem:[%s17324_s14 + $0x18] sm:$0xff]  ;;  %vm7653_vm0 = vcmask 256000   ;;  %vm7654_vm6 = vsmask.f32 2304 }
 0x78e   : > { %v7434_v45 = vsel %vm18437_vm15, %v7431_v28, %v7433_v37  ;;  %v7432_v42 = vsel %vm18438_vm2, %v7430_v51, %v7431_v28  ;;  %v7509_v56 = vsel %vm18439_vm11, %v7507_v24, %v7508_v20  ;;  %v7511_v11 = vsel %vm18440_vm10, %v7508_v20, %v7510_v57  ;;  %v10497_v37 = vld [vmem:[%s17324_s14 + $0x38] sm:$0xff]  ;;  %v10494_v57 = vld [vmem:[%s17324_s14 + $0x20] sm:$0xff]  ;;  %vm15831_vm5 = vmand %vm7653_vm0, %vm7654_vm6 }
 0x78f   : > { %v7275_v52 = vmax.f32 %v7198_v55, %v7252_v9  ;;  %v7276_v15 = vmax.f32 %v7199_v13, %v7254_v62  ;;  %v7657_v14 = vsel %vm15831_vm5, 0, %v7656_v39  ;;  %v15841_v43 = vand.u32 3, %v18445_v47  ;;  %v10138_v47 = vld [vmem:[%s17326_s16 + $0x100] sm:$0xf] }
 0x790   : > { %7658 = vst [vmem:[#allocation3] sm:$0x7] %v7657_v14  ;;  %v15844_v0 = vand.u32 3, %v18446_v50  ;;  %vm7683_vm13 = vcmask 257026   ;;  %vm7684_vm15 = vsmask.f32 7946 }
 0x791   : > { %v7352_v7 = vmax.f32 %v7275_v52, %v7329_v30  ;;  %v7353_v17 = vmax.f32 %v7276_v15, %v7331_v59  ;;  %vm9008_vm1 = vcmp.ge.s32.totalorder %v15841_v43, 3  ;;  %vm7723_vm12 = vcmp.eq.s32.totalorder %v15841_v43, 0  ;;  %v10531_v50 = vld [vmem:[%s17326_s16 + $0x104] sm:$0xf0]  ;;  %v10268_v51 = vld [vmem:[%s17330_s20 + $0x60] sm:$0xf] }
 0x792   : > { %vm9009_vm4 = vcmp.ge.s32.totalorder %v15844_v0, 3  ;;  %vm9014_vm3 = vmpackc.low %vm9008_vm1, %vm9008_vm1  ;;  %vm7724_vm14 = vcmp.eq.s32.totalorder %v15844_v0, 0  ;;  %vm7659_vm2 = vsmask.f32 6416  ;;  %vm7781_vm1 = vcmask 1045508  }
 0x793   : > { %v7378_v3 = vmax.f32 %v7352_v7, %v15548_v32  ;;  %v7379_v1 = vmax.f32 %v7353_v17, %v15604_v26  ;;  %v10489_v32 = vld [vmem:[%s18441_s27] sm:$0xff]  ;;  %v10496_v26 = vld [vmem:[%s17324_s14 + $0x30] sm:$0xff]  ;;  %vm9015_vm11 = vmpackc.low %vm9009_vm4, %vm9009_vm4  ;;  %v15853_v36 = vsel %vm9014_vm3, 65537, %v15850_v33 }
 0x794   : > { %v15856_v31 = vsel %vm9015_vm11, 65537, %v15850_v33  ;;  %v9019_v5 = vshrl.u32 %v15853_v36, 16  ;;  %v9022_v21 = vshll.u32 %v15853_v36, 16  ;;  %vm15860_vm10 = vmpackc.low %vm7723_vm12, %vm7723_vm12 }
 0x795   : > { %v7455_v61 = vmax.f32 %v7378_v3, %v7432_v42  ;;  %v7456_v2 = vmax.f32 %v7379_v1, %v7434_v45  ;;  %v9027_v58 = vshrl.u32 %v15856_v31, 16  ;;  %v9030_v55 = vshll.u32 %v15856_v31, 16  ;;  %vm15869_vm0 = vmpackc.low %vm7724_vm14, %vm7724_vm14 }
 0x796   : > { %v9209_v12 = vrot.slane %v9019_v5, 5  ;;  %v9210_v38 = vrot.slane %v9022_v21, 6  ;;  %v7778_v49 = vsel %vm15860_vm10, 65537, %v15850_v33  ;;  %v7779_v52 = vsel %vm15869_vm0, 65537, %v15850_v33  ;;  %vm15885_vm4 = vmand %vm7683_vm13, %vm7684_vm15 }
 0x797   : > { %v7532_v19 = vmax.f32 %v7455_v61, %v7509_v56  ;;  %v7533_v46 = vmax.f32 %v7456_v2, %v7511_v11  ;;  %v7686_v28 = vld [vmem:[#allocation3] sm:$0xc]  ;;  %v9213_v17 = vrot.slane %v9027_v58, 5  ;;  %v9214_v45 = vrot.slane %v9030_v55, 6  ;;  %vm15903_vm13 = vmor %vm7654_vm6, %vm7659_vm2 }
 0x798   : > { %v15889_v7 = vor.u32 %v9210_v38, %v9209_v12  ;;  %v7783_v24 = vrot.slane %v7778_v49, 6  ;;  %v7785_v1 = vrot.slane %v7779_v52, 6  ;;  %vm17525_vm14 = vcmask 257024  }
 0x799   : > { %v7540_v41 = vpack.c.bf16 %v7533_v46, %v7532_v19  ;;  %v15896_v61 = vor.u32 %v9214_v45, %v9213_v17  ;;  %vm7725_vm2 = vcmp.eq.s32.totalorder %v15841_v43, 3  ;;  %v18461_v49 = vmov 0  ;;  %v10565_v46 = vld [vmem:[%s17330_s20 + $0x74] sm:$0xf0] }
 0x79a   : > { %v9212_v42 = vrot.slane %v15889_v7, 4  ;;  %v7784_v2 = vrot.slane %v7783_v24, 4  ;;  %v7788_v56 = vunpack.c.l.b16 %v7783_v24  ;;  %v18463_v52 = vmov 0 }
 0x79b   : > { %7559 = vmatpush.bf16.msrb.mxu2 %v7540_v41  ;;  %v7789_v41 = vunpack.c.h.b16 %v7783_v24 }
 0x79c   : > { %vm15913_vm3 = vcmp.ne.s32.totalorder %v7788_v56, %v17832_v63 }
 0x79d   : > { %vm15918_vm6 = vcmp.ne.s32.totalorder %v7789_v41, %v17833_v35 }
 0x79e   : > { %9975 = vmatmul.msk.bf16.vlgmr.msrb.gmra.mxu2 %vm18442_vm9, %v10489_v32  ;;  %vm17524_vm9 = vcmask 1041408   ;;  %vm17526_vm15 = vmpackc.low %vm15918_vm6, %vm15913_vm3 }
 0x79f   : > { %7635 = vmatpush.bf16.msra.mxu2 %v10497_v37  ;;  %vm7782_vm12 = vmor %vm17524_vm9, %vm7781_vm1  ;;  %v15910_v37 = vsel %vm15903_vm13, %v9212_v42, %v15896_v61 }
 0x7a0   : > { %vm15940_vm1 = vmpackc.low %vm7725_vm2, %vm7725_vm2 }
 0x7a1   : > { %v7745_v45 = vsel %vm15940_vm1, 65537, %v15850_v33 }
 0x7a2   : > { %v15987_v56 = vrot.slane %v7745_v45, 5 }
 0x7a3   : > { %7636 = vmatpush.bf16.msra.mxu2 %v10496_v26 }
 0x7a7   : > { %7637 = vmatpush.bf16.msra.mxu2 %v10495_v27  ;;  %v7786_v27 = vsel %vm7782_vm12, %v7784_v2, %v7785_v1 }
 0x7a8   : > { %v7795_v39 = vunpack.c.l.b16 %v7786_v27  ;;  %v7796_v14 = vunpack.c.h.b16 %v7786_v27 }
 0x7aa   : > { %vm15949_vm12 = vcmp.ne.s32.totalorder %v7795_v39, %v17832_v63  ;;  %vm15954_vm9 = vcmp.ne.s32.totalorder %v7796_v14, %v17833_v35  ;;  %v10540_v39 = vld [vmem:[%s17328_s18 + $0x30] sm:$0xff] }
 0x7ab   : > { %7638 = vmatpush.bf16.msra.mxu2 %v10494_v57  ;;  %v7787_v57 = vrot.slane %v7785_v1, 4  ;;  %v18462_v49 = vsel %vm15949_vm12, 4294967295, %v18461_v49  ;;  %v18464_v52 = vsel %vm15954_vm9, 4294967295, %v18463_v52  ;;  %v7747_v1 = vrot.slane %v7745_v45, 7 }
 0x7ad   : > { %v7752_v41 = vunpack.c.l.b16 %v7747_v1 }
 0x7af   : > { %7639 = vmatpush.bf16.msra.mxu2 %v10493_v10  ;;  %v18455_v10 = vmov 0 }
 0x7b0   : > { %v18456_v10 = vsel %vm15913_vm3, 4294967295, %v18455_v10 }
 0x7b3   : > { %7640 = vmatpush.bf16.msra.mxu2 %v10492_v22  ;;  %v18457_v22 = vmov 0 }
 0x7b4   : > { %v18458_v22 = vsel %vm15918_vm6, 4294967295, %v18457_v22 }
 0x7b7   : > { %7641 = vmatpush.bf16.msra.mxu2 %v10491_v34 }
 0x7bb   : > { %7642 = vmatpush.bf16.msra.mxu2 %v10490_v6 }
 0x821   : > { %v7561_v40 = vpop.f32.mrf.mxu2 }
 0x829   : > { %v7563_v16 = vpop.f32.mrf.mxu2 }
 0x82a   : > { %v7566_v8 = vpack.c.bf16 %v7563_v16, %v7561_v40  ;;  %v10146_v40 = vld [vmem:[%s17326_s16 + $0x110] sm:$0xf]  ;;  %v10533_v16 = vld [vmem:[%s17326_s16 + $0x114] sm:$0xf0] }
 0x82c   : > { %7643 = vmatmul.bf16.vlgmr.msra.gmra.mxu2 %v7566_v8 }
 0x8af   : > { %v7644_v4 = vpop.f32.mrf.mxu2 }
 0x8b0   : > { %v7645_v53 = vadd.f32 %v10680_v23, %v7644_v4  ;;  %v7802_v4 = vunpack.c.l.b16 %v7787_v57 }
 0x8b2   : > { %v7649_v60 = vmax.f32 %v7645_v53, 0.0  ;;  %v7803_v53 = vunpack.c.h.b16 %v7787_v57  ;;  %v7818_v57 = vrot.slane %v15987_v56, 4 }
 0x8b4   : > { %v7651_v44 = vpack.c.bf16 %v7649_v60, %v7649_v60  ;;  %v7691_v60 = vld [vmem:[#allocation3 + $0x8] sm:$0x7]  ;;  %vm7807_vm11 = vcmp.ne.s32.totalorder %v7803_v53, %v17833_v35 }
 0x8b6   : > { %v7662_v18 = vshrl.u32 %v7651_v44, 16  ;;  %v7665_v48 = vshll.u32 %v7651_v44, 16 }
 0x8b7   : > { %v7646_v62 = vpop.f32.mrf.mxu2 }
 0x8b8   : > { %v7664_v15 = vrot.slane %v7662_v18, 5  ;;  %v7667_v30 = vrot.slane %v7665_v48, 6  ;;  %v7647_v59 = vadd.f32 %v10680_v23, %v7646_v62  ;;  %v10147_v18 = vor.u32 %v10533_v16, %v10146_v40 }
 0x8b9   : > { %v18467_v40 = vmov 0 }
 0x8ba   : > { %v7668_v20 = vor.u32 %v7667_v30, %v7664_v15  ;;  %v7650_v3 = vmax.f32 %v7647_v59, 0.0  ;;  %8259 = vmatpush.bf16.msrb.mxu2 %v10147_v18 }
 0x8bc   : > { %v7687_v11 = vsel %vm15885_vm4, %v7668_v20, %v7686_v28  ;;  %v7652_v19 = vpack.c.bf16 %v7650_v3, %v7650_v3  ;;  %v7669_v8 = vrot.slane %v7668_v20, 4  ;;  %v10139_v28 = vor.u32 %v10531_v50, %v10138_v47 }
 0x8bd   : > { %7688 = vst [vmem:[#allocation3] sm:$0xc] %v7687_v11 }
 0x8be   : > { %v7671_v32 = vshrl.u32 %v7652_v19, 16  ;;  %v7674_v26 = vshll.u32 %v7652_v19, 16  ;;  %v7748_v19 = vrot.slane %v7747_v1, 4  ;;  %8260 = vmatpush.bf16.msrb.mxu2 %v10139_v28 }
 0x8c0   : > { %v7673_v34 = vrot.slane %v7671_v32, 5  ;;  %v7676_v6 = vrot.slane %v7674_v26, 6  ;;  %v7753_v32 = vunpack.c.h.b16 %v7747_v1  ;;  %v10541_v26 = vld [vmem:[%s17328_s18 + $0x38] sm:$0xff] }
 0x8c1   : > { %8447 = vmatpush.bf16.msrb.mxu0 %v10541_v26 }
 0x8c2   : > { %v7677_v23 = vor.u32 %v7676_v6, %v7673_v34  ;;  %v7822_v6 = vunpack.c.l.b16 %v15987_v56 }
 0x8c4   : > { %v8479_v48 = vld [vmem:[#allocation3] sm:$0x7]  ;;  %v7678_v62 = vsel %vm15903_vm13, %v7669_v8, %v7677_v23  ;;  %v7679_v12 = vrot.slane %v7677_v23, 4  ;;  %v7823_v8 = vunpack.c.h.b16 %v15987_v56  ;;  %v18469_v23 = vmov 0 }
 0x8c5   : > { %v15946_v38 = vld [vmem:[#allocation3] sm:$0xc]  ;;  %v8480_v15 = vsel %vm15831_vm5, 0, %v8479_v48  ;;  %7690 = vst.msk [vmem:[#allocation3 + $0x4] sm:$0xf] %vm17525_vm14, %v7678_v62  ;;  %vm18465_vm14 = vcmp.eq.s32.totalorder %v15844_v0, 3  ;;  %8448 = vmatpush.bf16.msrb.mxu0 %v10540_v39 }
 0x8c6   : > { %v15968_v30 = vsel %vm17526_vm15, 0, %v15946_v38  ;;  %v7738_v59 = vld [vmem:[#allocation3] sm:$0xe]  ;;  %v7692_v17 = vsel %vm15831_vm5, %v7679_v12, %v7691_v60  ;;  %vm7744_vm2 = vmpackc.low %vm18465_vm14, %vm18465_vm14  ;;  %vm17527_vm15 = vcmask 253952   ;;  %vm18466_vm14 = vcmp.ne.s32.totalorder %v7802_v4, %v17832_v63 }
 0x8c7   : > { %v15979_v24 = vld [vmem:[#allocation3] sm:$0xf]  ;;  %7693 = vst [vmem:[#allocation3 + $0x8] sm:$0x7] %v7692_v17  ;;  %v7897_v20 = vunpack.c.l.b16 %v15968_v30  ;;  %v15983_v3 = vsel %vm7744_vm2, 65537, %v15850_v33  ;;  %vm16009_vm1 = vmpackc.low %vm7807_vm11, %vm18466_vm14  ;;  %vm7757_vm2 = vcmp.ne.s32.totalorder %v7753_v32, %v17833_v35  ;;  %v18472_v17 = vmov 0 }
 0x8c8   : > { %v7862_v42 = vunpack.c.l.b16 %v15979_v24  ;;  %v7749_v2 = vrot.slane %v15983_v3, 7  ;;  %8481 = vst [vmem:[#allocation3] sm:$0x7] %v8480_v15  ;;  %v7819_v11 = vrot.slane %v15983_v3, 5  ;;  %v18468_v40 = vsel %vm16009_vm1, 4294967295, %v18467_v40  ;;  %vm18471_vm14 = vmpackc.low %vm15954_vm9, %vm15949_vm12 }
 0x8c9   : > { %7698 = vst.msk [vmem:[#allocation3 + $0xc] sm:$0x1] %vm17527_vm15, %v15850_v33  ;;  %vm7756_vm15 = vcmp.ne.s32.totalorder %v7752_v41, %v17832_v63  ;;  %v18474_v41 = vmov 0  ;;  %vm18487_vm9 = vsmask.f32 7424 }
 0x8ca   : > { %v7751_v27 = vrot.slane %v7749_v2, 4  ;;  %v16002_v34 = vrot.slane %v7819_v11, 4  ;;  %v7750_v16 = vsel %vm18348_vm8, %v7748_v19, %v7749_v2  ;;  %vm16023_vm11 = vmpackc.low %vm7757_vm2, %vm7756_vm15  ;;  %v10563_v3 = vld [vmem:[%s17330_s20 + $0x64] sm:$0xf0] }
 0x8cb   : > { %v18470_v23 = vsel %vm16023_vm11, 4294967295, %v18469_v23  ;;  %v7759_v4 = vunpack.c.l.b16 %v7750_v16  ;;  %v7760_v53 = vunpack.c.h.b16 %v7750_v16  ;;  %v7773_v44 = vsel %vm16023_vm11, 0, %v7738_v59 }
 0x8cc   : > { %v16021_v14 = vld [vmem:[#allocation3 + $0x4] sm:$0xf]  ;;  %v7766_v47 = vunpack.c.l.b16 %v7751_v27  ;;  %v7767_v50 = vunpack.c.h.b16 %v7751_v27  ;;  %v7884_v45 = vunpack.c.l.b16 %v7773_v44 }
 0x8cd   : > { %v7810_v60 = vsel %vm18471_vm14, 0, %v16021_v14  ;;  %v16036_v18 = vunpack.c.l.b16 %v16021_v14  ;;  %v7847_v48 = vsel %vm15860_vm10, 0, %v16021_v14  ;;  %vm7763_vm15 = vcmp.ne.s32.totalorder %v7759_v4, %v17832_v63  ;;  %v7850_v1 = vld [vmem:[#allocation3 + $0x4] sm:$0xe] }
 0x8ce   : > { %v7694_v62 = vld [vmem:[#allocation3 + $0x8] sm:$0xc]  ;;  %v7777_v12 = vld [vmem:[#allocation3 + $0x8] sm:$0x3]  ;;  %v7898_v15 = vunpack.c.l.b16 %v7810_v60  ;;  %vm7764_vm2 = vcmp.ne.s32.totalorder %v7760_v53, %v17833_v35  ;;  %vm7770_vm14 = vcmp.ne.s32.totalorder %v7766_v47, %v17832_v63  ;;  %vm7771_vm7 = vcmp.ne.s32.totalorder %v7767_v50, %v17833_v35 }
 0x8cf   : > { %v7737_v30 = vld [vmem:[#allocation3 + $0x8] sm:$0x1]  ;;  %v7695_v59 = vsel %vm15885_vm4, 0, %v7694_v62  ;;  %v7811_v28 = vsel %vm16009_vm1, 0, %v7777_v12  ;;  %vm16048_vm8 = vmpackc.low %vm7764_vm2, %vm7763_vm15  ;;  %v7865_v39 = vpack.c.b16 %v16036_v18, %v7862_v42  ;;  %v16065_v53 = vunpack.c.l.b16 %v7847_v48 }
 0x8d0   : > { %v18473_v17 = vsel %vm16048_vm8, 4294967295, %v18472_v17  ;;  %7696 = vst [vmem:[#allocation3 + $0x8] sm:$0xc] %v7695_v59  ;;  %v7899_v2 = vunpack.c.l.b16 %v7811_v28  ;;  %v7900_v19 = vpack.c.b16 %v7898_v15, %v7897_v20  ;;  %vm16053_vm12 = vmpackc.low %vm7771_vm7, %vm7770_vm14  ;;  %v7774_v32 = vsel %vm16048_vm8, 0, %v16021_v14  ;;  %v16060_v27 = vld [vmem:[#allocation3 + $0xc] sm:$0x1] }
 0x8d1   : > { %v18475_v41 = vsel %vm16053_vm12, 4294967295, %v18474_v41  ;;  %v7864_v26 = vunpack.c.l.b16 %v7737_v30  ;;  %v7775_v16 = vsel %vm16053_vm12, 0, %v7737_v30  ;;  %v7885_v4 = vunpack.c.l.b16 %v7774_v32  ;;  %v10042_v30 = vld [vmem:[%s17326_s16 + $0x40] sm:$0xf] }
 0x8d2   : > { %vm18476_vm7 = vcmask 253952   ;;  %v7901_v20 = vpack.c.b16 %v7899_v2, %v7899_v2  ;;  %v7903_v47 = vrot.slane %v7900_v19, 2  ;;  %v7886_v50 = vunpack.c.l.b16 %v7775_v16 }
 0x8d3   : > { %8514 = vst.msk [vmem:[#allocation3 + $0xc] sm:$0x1] %vm18476_vm7, %v15850_v33  ;;  %v7866_v60 = vpack.c.b16 %v7864_v26, %v7864_v26  ;;  %v7887_v44 = vpack.c.b16 %v7885_v4, %v7884_v45  ;;  %v7868_v62 = vshrl.u32 %v7865_v39, 16  ;;  %v7870_v12 = vshll.u32 %v7865_v39, 16 }
 0x8d4   : > { %v7851_v15 = vsel %vm16023_vm11, 0, %v7850_v1  ;;  %vm18477_vm15 = vcmask 1046532   ;;  %vm18478_vm2 = vcmask 1042432   ;;  %v7904_v42 = vrot.slane %v7901_v20, 2 }
 0x8d5   : > { %vm16073_vm14 = vmor %vm18478_vm2, %vm18477_vm15  ;;  %v7888_v48 = vpack.c.b16 %v7886_v50, %v7886_v50  ;;  %v7875_v59 = vshll.u32 %v7866_v60, 16  ;;  %v7853_v28 = vsel %vm16053_vm12, 0, %v16060_v27  ;;  %v7889_v2 = vrot.slane %v7887_v44, 1  ;;  %v7813_v44 = vld [vmem:[#allocation3] sm:$0x8] }
 0x8d6   : > { %v7872_v45 = vrot.slane %v7870_v12, 1  ;;  %v7976_v19 = vunpack.c.l.b16 %v7851_v15  ;;  %v7978_v32 = vunpack.c.l.b16 %v7853_v28  ;;  %vm18481_vm7 = vcmask 1045504  }
 0x8d7   : > { %v7905_v26 = vsel %vm18481_vm7, %v7903_v47, %v7904_v42  ;;  %v7890_v1 = vrot.slane %v7888_v48, 1  ;;  %v7877_v16 = vrot.slane %v7875_v59, 1  ;;  %v7820_v4 = vsel %vm16073_vm14, %v7818_v57, %v7819_v11  ;;  %v7846_v20 = vld [vmem:[#allocation3 + $0x8] sm:$0xf]  ;;  %v10581_v42 = vld [vmem:[%s17330_s20 + $0xf4] sm:$0xf0] }
 0x8d8   : > { %7906 = vrot.lane.b32.xlu1 %v7905_v26, %s18264_s4  ;;  %v7873_v39 = vor.u32 %v7872_v45, %v7868_v62  ;;  %v7980_v50 = vpack.c.b16 %v7978_v32, %v7978_v32  ;;  %vm16091_vm15 = vcmp.ne.s32.totalorder %v7822_v6, %v17832_v63  ;;  %v18482_v60 = vmov 0  ;;  %v10066_v32 = vld [vmem:[%s17326_s16 + $0x70] sm:$0xf]  ;;  %v10513_v26 = vld [vmem:[%s17326_s16 + $0x74] sm:$0xf0] }
 0x8d9   : > { %v18483_v60 = vsel %vm16091_vm15, 4294967295, %v18482_v60  ;;  %vm16098_vm2 = vcmp.ne.s32.totalorder %v7823_v8, %v17833_v35  ;;  %vm18486_vm7 = vcmask 1046528   ;;  %v7848_v57 = vsel %vm15869_vm0, 0, %v7846_v20 }
 0x8da   : > { %v7891_v11 = vsel %vm18486_vm7, %v7889_v2, %v7890_v1  ;;  %v7852_v47 = vsel %vm16048_vm8, 0, %v7846_v20  ;;  %vm17535_vm1 = vmpackc.low %vm16098_vm2, %vm16091_vm15  ;;  %v7829_v6 = vunpack.c.l.b16 %v7820_v4  ;;  %v7878_v56 = vsel %vm18487_vm9, %v7873_v39, %v7877_v16 }
 0x8db   : > { %7892 = vrot.lane.b32.xlu0 %v7891_v11, %s18281_s25  ;;  %v7949_v8 = vunpack.c.l.b16 %v7848_v57  ;;  %v7977_v62 = vunpack.c.l.b16 %v7852_v47  ;;  %v7982_v12 = vrot.slane %v7980_v50, 1  ;;  %7879 = vrot.lane.b32.xlu2 %v7878_v56, %s18267_s1  ;;  %v7830_v15 = vunpack.c.h.b16 %v7820_v4  ;;  %v10058_v56 = vld [vmem:[%s17326_s16 + $0x60] sm:$0xf] }
 0x8dc   : > { %vm16115_vm7 = vcmp.ne.s32.totalorder %v7829_v6, %v17832_v63  ;;  %v7836_v48 = vunpack.c.l.b16 %v16002_v34  ;;  %v7837_v59 = vunpack.c.h.b16 %v16002_v34  ;;  %v7843_v45 = vsel %vm17535_vm1, 0, %v7813_v44  ;;  %v16134_v34 = vld [vmem:[#allocation3 + $0x8] sm:$0x7] }
 0x8dd   : > { %v7950_v28 = vpack.c.b16 %v7949_v8, %v16065_v53  ;;  %v7979_v2 = vpack.c.b16 %v7977_v62, %v7976_v19  ;;  %vm9096_vm9 = vcmp.ge.s32.totalorder %v15841_v43, 2  ;;  %vm16137_vm3 = vcmp.ne.s32.totalorder %v7830_v15, %v17833_v35  ;;  %v10340_v53 = vld [vmem:[%s17330_s20 + $0xf0] sm:$0xf] }
 0x8de   : > { %vm16142_vm6 = vcmp.ne.s32.totalorder %v7836_v48, %v17832_v63  ;;  %vm16147_vm1 = vcmp.ne.s32.totalorder %v7837_v59, %v17833_v35  ;;  %v7935_v1 = vunpack.c.l.b16 %v7843_v45  ;;  %vm9102_vm12 = vmpackc.low %vm9096_vm9, %vm9096_vm9  ;;  %vm9097_vm11 = vcmp.ge.s32.totalorder %v15844_v0, 2  ;;  %v10050_v45 = vld [vmem:[%s17326_s16 + $0x50] sm:$0xf] }
 0x8df   : > { %v7981_v16 = vrot.slane %v7979_v2, 1  ;;  %vm7835_vm8 = vmpackc.low %vm16137_vm3, %vm16115_vm7  ;;  %v16157_v4 = vsel %vm9102_vm12, 65537, %v15850_v33  ;;  %v7955_v39 = vunpack.c.l.b16 %v7846_v20  ;;  %v7956_v0 = vunpack.c.l.b16 %v16060_v27  ;;  %v10511_v27 = vld [vmem:[%s17326_s16 + $0x64] sm:$0xf0] }
 0x8e0   : > { %vm17544_vm15 = vmpackc.low %vm16147_vm1, %vm16142_vm6  ;;  %v7844_v50 = vsel %vm7835_vm8, 0, %v16021_v14  ;;  %v16170_v11 = vrot.slane %v16157_v4, 5  ;;  %v10067_v57 = vor.u32 %v10513_v26, %v10066_v32  ;;  %vm18496_vm12 = vcmask 1046528   ;;  %v10509_v32 = vld [vmem:[%s17326_s16 + $0x54] sm:$0xf0] }
 0x8e1   : > { %v16174_v20 = vsel %vm18496_vm12, %v7981_v16, %v7982_v12  ;;  %v7845_v47 = vsel %vm17544_vm15, 0, %v16134_v34  ;;  %v7936_v44 = vunpack.c.l.b16 %v7844_v50  ;;  %vm9103_vm9 = vmpackc.low %vm9097_vm11, %vm9097_vm11  ;;  %v7957_v6 = vpack.c.b16 %v7955_v39, %v16036_v18  ;;  %v10512_v39 = vld [vmem:[%s17326_s16 + $0x74] sm:$0xf] }
 0x8e2   : > { %vm18497_vm12 = vcmask 261120   ;;  %v7937_v8 = vunpack.c.l.b16 %v7845_v47  ;;  %v16192_v62 = vsel %vm9103_vm9, 65537, %v15850_v33  ;;  %v9281_v12 = vrot.slane %v16170_v11, 4  ;;  %8225 = vmatpush.bf16.msrb.mxu3 %v10067_v57  ;;  %v10510_v57 = vld [vmem:[%s17326_s16 + $0x64] sm:$0xf] }
 0x8e3   : > { %10152 = vmatmul.msk.bf16.vlgmr.msrb.gmra.mxu2 %vm18497_vm12, %v16174_v20  ;;  %v7958_v15 = vpack.c.b16 %v7956_v0, %v7956_v0  ;;  %7951 = vrot.lane.b32.xlu0 %v7950_v28, %s18281_s25  ;;  %v7938_v48 = vpack.c.b16 %v7936_v44, %v7935_v1  ;;  %v9282_v59 = vrot.slane %v16192_v62, 5  ;;  %v7962_v2 = vshll.u32 %v7957_v6, 16  ;;  %v10068_v28 = vld [vmem:[%s17326_s16 + $0x78] sm:$0xf0]  ;;  %vm18499_vm9 = vmmov %vm18497_vm12 }
 0x8e4   : > { %v7939_v33 = vpack.c.b16 %v7937_v8, %v7937_v8  ;;  %v10059_v16 = vor.u32 %v10511_v27, %v10058_v56  ;;  %vm17543_vm11 = vcmask 1044480   ;;  %v7960_v50 = vshrl.u32 %v7957_v6, 16  ;;  %v10060_v8 = vld [vmem:[%s17326_s16 + $0x68] sm:$0xf0]  ;;  %v10507_v6 = vld [vmem:[%s17326_s16 + $0x44] sm:$0xf0] }
 0x8e5   : > { %v7967_v26 = vshll.u32 %v7958_v15, 16  ;;  %v16213_v1 = vsel %vm16073_vm14, %v9281_v12, %v9282_v59  ;;  %v7964_v0 = vrot.slane %v7962_v2, 1  ;;  %v7941_v47 = vrot.slane %v7938_v48, 3 }
 0x8e6   : > { %v7942_v44 = vrot.slane %v7939_v33, 3  ;;  %8226 = vmatpush.bf16.msrb.mxu3 %v10059_v16  ;;  %v10051_v27 = vor.u32 %v10509_v32, %v10050_v45  ;;  %v10071_v12 = vor.u32 %v10512_v39, %v10068_v28  ;;  %vm18498_vm14 = vsmask.f32 7424  ;;  %v10034_v33 = vld [vmem:[%s17326_s16 + $0x30] sm:$0xf] }
 0x8e7   : > { %v7969_v56 = vrot.slane %v7967_v26, 1  ;;  %v7965_v15 = vor.u32 %v7964_v0, %v7960_v50  ;;  %v10063_v45 = vor.u32 %v10510_v57, %v10060_v8  ;;  %v10043_v32 = vor.u32 %v10507_v6, %v10042_v30  ;;  %v10505_v26 = vld [vmem:[%s17326_s16 + $0x34] sm:$0xf0]  ;;  %v10026_v39 = vld [vmem:[%s17326_s16 + $0x20] sm:$0xf] }
 0x8e8   : > { %v7943_v48 = vsel %vm17543_vm11, %v7941_v47, %v7942_v44  ;;  %8267 = vmatpush.bf16.msra.mxu2 %v10071_v12  ;;  %v10035_v16 = vor.u32 %v10505_v26, %v10034_v33  ;;  %v10503_v28 = vld [vmem:[%s17326_s16 + $0x24] sm:$0xf0]  ;;  %v10130_v50 = vld [vmem:[%s17326_s16 + $0xf0] sm:$0xf]  ;;  %v10529_v57 = vld [vmem:[%s17326_s16 + $0xf4] sm:$0xf0]  ;;  %vm18511_vm3 = vnez %v18475_v41  ;;  %vm18513_vm7 = vnez %v18456_v10 }
 0x8e9   : > { %7944 = vrot.lane.b32.xlu2 %v7943_v48, %s18267_s1  ;;  %v7970_v2 = vsel %vm18498_vm14, %v7965_v15, %v7969_v56  ;;  %v10027_v0 = vor.u32 %v10503_v28, %v10026_v39  ;;  %v10508_v47 = vld [vmem:[%s17326_s16 + $0x54] sm:$0xf]  ;;  %v10052_v44 = vld [vmem:[%s17326_s16 + $0x58] sm:$0xf0]  ;;  %v10131_v56 = vor.u32 %v10529_v57, %v10130_v50  ;;  %v10018_v8 = vld [vmem:[%s17326_s16 + $0x10] sm:$0xf] }
 0x8ea   : > { %7971 = vrot.lane.b32.xlu1 %v7970_v2, %s18264_s4  ;;  %8227 = vmatpush.bf16.msrb.mxu3 %v10051_v27  ;;  %v10055_v27 = vor.u32 %v10508_v47, %v10052_v44  ;;  %v10501_v15 = vld [vmem:[%s17326_s16 + $0x14] sm:$0xf0]  ;;  %v10506_v30 = vld [vmem:[%s17326_s16 + $0x44] sm:$0xf]  ;;  %v10044_v12 = vld [vmem:[%s17326_s16 + $0x48] sm:$0xf0] }
 0x8eb   : > { %v10019_v6 = vor.u32 %v10501_v15, %v10018_v8  ;;  %v10122_v48 = vld [vmem:[%s17326_s16 + $0xe0] sm:$0xf]  ;;  %v10527_v2 = vld [vmem:[%s17326_s16 + $0xe4] sm:$0xf0]  ;;  %8239 = vmatpush.bf16.msrb.mxu1 %v10131_v56  ;;  %v10036_v28 = vld [vmem:[%s17326_s16 + $0x38] sm:$0xf0] }
 0x8ec   : > { %8268 = vmatpush.bf16.msra.mxu2 %v10063_v45  ;;  %v10047_v45 = vor.u32 %v10506_v30, %v10044_v12  ;;  %v10010_v33 = vld [vmem:[%s17326_s16] sm:$0xf]  ;;  %v10499_v26 = vld [vmem:[%s17326_s16 + $0x4] sm:$0xf0]  ;;  %v10528_v50 = vld [vmem:[%s17326_s16 + $0xf4] sm:$0xf] }
 0x8ed   : > { %v10011_v39 = vor.u32 %v10499_v26, %v10010_v33  ;;  %v10539_v44 = vld [vmem:[%s17328_s18 + $0x28] sm:$0xff]  ;;  %v10114_v56 = vld [vmem:[%s17326_s16 + $0xd0] sm:$0xf]  ;;  %v10502_v15 = vld [vmem:[%s17326_s16 + $0x24] sm:$0xf]  ;;  %vm18500_vm12 = vcmask 523264  }
 0x8ee   : > { %8228 = vmatpush.bf16.msrb.mxu3 %v10043_v32  ;;  %v10123_v32 = vor.u32 %v10527_v2, %v10122_v48  ;;  %v10028_v30 = vld [vmem:[%s17326_s16 + $0x28] sm:$0xf0]  ;;  %v10106_v2 = vld [vmem:[%s17326_s16 + $0xc0] sm:$0xf]  ;;  %8449 = vmatpush.bf16.msrb.mxu0 %v10539_v44  ;;  %v10500_v26 = vld [vmem:[%s17326_s16 + $0x14] sm:$0xf] }
 0x8ef   : > { %v10031_v12 = vor.u32 %v10502_v15, %v10028_v30  ;;  %v10124_v48 = vld [vmem:[%s17326_s16 + $0xe8] sm:$0xf0]  ;;  %v10498_v44 = vld [vmem:[%s17326_s16 + $0x4] sm:$0xf]  ;;  %vm18501_vm14 = vcmask 785408   ;;  %vm18504_vm11 = vcmask 785408  }
 0x8f0   : > { %8269 = vmatpush.bf16.msra.mxu2 %v10055_v27  ;;  %8240 = vmatpush.bf16.msrb.mxu1 %v10123_v32  ;;  %v10525_v27 = vld [vmem:[%s17326_s16 + $0xd4] sm:$0xf0]  ;;  %v10108_v15 = vld [vmem:[%s17326_s16 + $0xc8] sm:$0xf0]  ;;  %v9284_v36 = vrot.slane %v9282_v59, 4 }
 0x8f1   : > { %v10115_v8 = vor.u32 %v10525_v27, %v10114_v56  ;;  %v10012_v27 = vld [vmem:[%s17326_s16 + $0x8] sm:$0xf0]  ;;  %v16836_v59 = vld [vmem:[#allocation6 + $0x18] sm:$0x33] }
 0x8f2   : > { %8229 = vmatpush.bf16.msrb.mxu3 %v10035_v16  ;;  %v10504_v16 = vld [vmem:[%s17326_s16 + $0x34] sm:$0xf]  ;;  %v10015_v30 = vor.u32 %v10498_v44, %v10012_v27  ;;  %v10084_v27 = vld [vmem:[%s17326_s16 + $0x98] sm:$0xf0] }
 0x8f3   : > { %v10039_v57 = vor.u32 %v10504_v16, %v10036_v28  ;;  %v10020_v16 = vld [vmem:[%s17326_s16 + $0x18] sm:$0xf0] }
 0x8f4   : > { %8270 = vmatpush.bf16.msra.mxu2 %v10047_v45  ;;  %v10523_v45 = vld [vmem:[%s17326_s16 + $0xc4] sm:$0xf0]  ;;  %8241 = vmatpush.bf16.msrb.mxu1 %v10115_v8  ;;  %v10116_v28 = vld [vmem:[%s17326_s16 + $0xd8] sm:$0xf0]  ;;  %v10522_v8 = vld [vmem:[%s17326_s16 + $0xc4] sm:$0xf] }
 0x8f5   : > { %v10107_v33 = vor.u32 %v10523_v45, %v10106_v2  ;;  %v10520_v45 = vld [vmem:[%s17326_s16 + $0xb4] sm:$0xf] }
 0x8f6   : > { %8230 = vmatpush.bf16.msrb.mxu3 %v10027_v0  ;;  %v10132_v0 = vld [vmem:[%s17326_s16 + $0xf8] sm:$0xf0] }
 0x8f7   : > { %v10135_v47 = vor.u32 %v10528_v50, %v10132_v0  ;;  %v10098_v50 = vld [vmem:[%s17326_s16 + $0xb0] sm:$0xf]  ;;  %v10521_v0 = vld [vmem:[%s17326_s16 + $0xb4] sm:$0xf0] }
 0x8f8   : > { %8271 = vmatpush.bf16.msra.mxu2 %v10039_v57  ;;  %v10023_v57 = vor.u32 %v10500_v26, %v10020_v16  ;;  %8242 = vmatpush.bf16.msrb.mxu1 %v10107_v33  ;;  %v10099_v56 = vor.u32 %v10521_v0, %v10098_v50  ;;  %v10082_v33 = vld [vmem:[%s17326_s16 + $0x90] sm:$0xf]  ;;  %v10517_v26 = vld [vmem:[%s17326_s16 + $0x94] sm:$0xf0]  ;;  %v10092_v50 = vld [vmem:[%s17326_s16 + $0xa8] sm:$0xf0] }
 0x8f9   : > { %v10074_v0 = vld [vmem:[%s17326_s16 + $0x80] sm:$0xf] }
 0x8fa   : > { %8231 = vmatpush.bf16.msrb.mxu3 %v10019_v6  ;;  %v10526_v6 = vld [vmem:[%s17326_s16 + $0xe4] sm:$0xf] }
 0x8fb   : > { %v10127_v32 = vor.u32 %v10526_v6, %v10124_v48  ;;  %v10111_v6 = vor.u32 %v10522_v8, %v10108_v15  ;;  %v10519_v48 = vld [vmem:[%s17326_s16 + $0xa4] sm:$0xf0]  ;;  %v10514_v15 = vld [vmem:[%s17326_s16 + $0x84] sm:$0xf] }
 0x8fc   : > { %8272 = vmatpush.bf16.msra.mxu2 %v10031_v12  ;;  %v10090_v12 = vld [vmem:[%s17326_s16 + $0xa0] sm:$0xf]  ;;  %8243 = vmatpush.bf16.msrb.mxu1 %v10099_v56  ;;  %v10516_v56 = vld [vmem:[%s17326_s16 + $0x94] sm:$0xf] }
 0x8fd   : > { %v10091_v2 = vor.u32 %v10519_v48, %v10090_v12  ;;  %v10087_v8 = vor.u32 %v10516_v56, %v10084_v27  ;;  %v10538_v12 = vld [vmem:[%s17328_s18 + $0x20] sm:$0xff]  ;;  %v10532_v48 = vld [vmem:[%s17326_s16 + $0x114] sm:$0xf] }
 0x8fe   : > { %8232 = vmatpush.bf16.msrb.mxu3 %v10011_v39  ;;  %v10524_v39 = vld [vmem:[%s17326_s16 + $0xd4] sm:$0xf]  ;;  %8450 = vmatpush.bf16.msrb.mxu0 %v10538_v12 }
 0x900   : > { %8273 = vmatpush.bf16.msra.mxu2 %v10023_v57  ;;  %8244 = vmatpush.bf16.msrb.mxu1 %v10091_v2  ;;  %v10515_v57 = vld [vmem:[%s17326_s16 + $0x84] sm:$0xf0]  ;;  %v10148_v2 = vld [vmem:[%s17326_s16 + $0x118] sm:$0xf0] }
 0x901   : > { %v10075_v44 = vor.u32 %v10515_v57, %v10074_v0  ;;  %v7910_v57 = vunpack.c.l.b16 %v15946_v38 }
 0x902   : > { %8281 = vmatpush.bf16.msra.mxu3 %v10135_v47  ;;  %v10119_v47 = vor.u32 %v10524_v39, %v10116_v28  ;;  %v10083_v39 = vor.u32 %v10517_v26, %v10082_v33  ;;  %v10518_v28 = vld [vmem:[%s17326_s16 + $0xa4] sm:$0xf]  ;;  %v10140_v26 = vld [vmem:[%s17326_s16 + $0x108] sm:$0xf0] }
 0x903   : > { %v10530_v33 = vld [vmem:[%s17326_s16 + $0x104] sm:$0xf]  ;;  %v7912_v56 = vpack.c.b16 %v16036_v18, %v7910_v57  ;;  %v10536_v18 = vld [vmem:[%s17328_s18 + $0x10] sm:$0xff] }
 0x904   : > { %8274 = vmatpush.bf16.msra.mxu2 %v10015_v30  ;;  %8245 = vmatpush.bf16.msrb.mxu1 %v10083_v39  ;;  %v10076_v30 = vld [vmem:[%s17326_s16 + $0x88] sm:$0xf0]  ;;  %v7911_v39 = vunpack.c.l.b16 %v16134_v34  ;;  %v10537_v34 = vld [vmem:[%s17328_s18 + $0x18] sm:$0xff] }
 0x905   : > { %v7919_v38 = vshll.u32 %v7912_v56, 16  ;;  %8451 = vmatpush.bf16.msrb.mxu0 %v10537_v34  ;;  %v10544_v34 = vld [vmem:[%s17328_s18 + $0x50] sm:$0xff] }
 0x906   : > { %8282 = vmatpush.bf16.msra.mxu3 %v10127_v32  ;;  %v10100_v32 = vld [vmem:[%s17326_s16 + $0xb8] sm:$0xf0] }
 0x907   : > { %v10103_v16 = vor.u32 %v10520_v45, %v10100_v32  ;;  %v10151_v45 = vor.u32 %v10532_v48, %v10148_v2  ;;  %v7736_v32 = vsel %vm15869_vm0, 0, %v16021_v14  ;;  %v7916_v48 = vshrl.u32 %v7912_v56, 16  ;;  %v10549_v56 = vld [vmem:[%s17328_s18 + $0x78] sm:$0xff] }
 0x908   : > { %8246 = vmatpush.bf16.msrb.mxu1 %v10075_v44 }
 0x909   : > { %8452 = vmatpush.bf16.msrb.mxu0 %v10536_v18 }
 0x90a   : > { %8283 = vmatpush.bf16.msra.mxu3 %v10119_v47  ;;  %v10095_v47 = vor.u32 %v10518_v28, %v10092_v50  ;;  %v10143_v28 = vor.u32 %v10530_v33, %v10140_v26  ;;  %v7857_v50 = vunpack.c.l.b16 %v7736_v32  ;;  %v7918_v32 = vrot.slane %v7916_v48, 2  ;;  %v10535_v26 = vld [vmem:[%s17328_s18 + $0x8] sm:$0xff] }
 0x90b   : > { %v7921_v33 = vrot.slane %v7919_v38, 3  ;;  %v10543_v48 = vld [vmem:[%s17328_s18 + $0x48] sm:$0xff] }
 0x90c   : > { %8301 = vmatpush.bf16.msra.mxu1 %v10151_v45 }
 0x90d   : > { %8453 = vmatpush.bf16.msrb.mxu0 %v10535_v26 }
 0x90e   : > { %8284 = vmatpush.bf16.msra.mxu3 %v10111_v6  ;;  %v10079_v6 = vor.u32 %v10514_v15, %v10076_v30 }
 0x910   : > { %8302 = vmatpush.bf16.msra.mxu1 %v10143_v28 }
 0x912   : > { %8285 = vmatpush.bf16.msra.mxu3 %v10103_v16  ;;  %v7735_v16 = vsel %vm15860_vm10, 0, %v15979_v24 }
 0x913   : > { %v7856_v0 = vunpack.c.l.b16 %v7735_v16 }
 0x915   : > { %v7858_v44 = vpack.c.b16 %v7857_v50, %v7856_v0 }
 0x916   : > { %8286 = vmatpush.bf16.msra.mxu3 %v10095_v47  ;;  %v7913_v47 = vpack.c.b16 %v7911_v39, %v7911_v39  ;;  %v7922_v39 = vor.u32 %v7921_v33, %v7918_v32  ;;  %v10542_v32 = vld [vmem:[%s17328_s18 + $0x40] sm:$0xff] }
 0x918   : > { %v7924_v30 = vshrl.u32 %v7913_v47, 16 }
 0x91a   : > { %8287 = vmatpush.bf16.msra.mxu3 %v10087_v8  ;;  %v7926_v2 = vrot.slane %v7924_v30, 2 }
 0x91e   : > { %8288 = vmatpush.bf16.msra.mxu3 %v10079_v6  ;;  %v7927_v6 = vshll.u32 %v7913_v47, 16 }
 0x920   : > { %v7929_v45 = vrot.slane %v7927_v6, 3  ;;  %v10545_v6 = vld [vmem:[%s17328_s18 + $0x58] sm:$0xff] }
 0x922   : > { %v7930_v16 = vor.u32 %v7929_v45, %v7926_v2 }
 0x935   : > { %v7880_v14 = vpop.permute.xlu2 %7879 }
 0x936   : > { %v7986_v8 = vsel %vm18499_vm9, %v7858_v44, %v7880_v14  ;;  %vm7914_vm9 = vsmask.f32 5376 }
 0x937   : > { %v7931_v0 = vsel %vm7914_vm9, %v7922_v39, %v7930_v16 }
 0x943   : > { %v7945_v28 = vpop.permute.xlu2 %7944 }
 0x94a   : > { %v7907_v27 = vpop.permute.xlu1 %7906 }
 0x94d   : > { %v7893_v15 = vpop.permute.xlu0 %7892 }
 0x94e   : > { %v7988_v24 = vsel %vm18500_vm12, %v7986_v8, %v7893_v15  ;;  %vm18502_vm12 = vcmask 261120   ;;  %v10547_v8 = vld [vmem:[%s17328_s18 + $0x68] sm:$0xff]  ;;  %v10534_v15 = vld [vmem:[%s17328_s18] sm:$0xff] }
 0x94f   : > { %v7990_v12 = vsel %vm18501_vm14, %v7988_v24, %v7907_v27  ;;  %v7994_v14 = vsel %vm18502_vm12, %v7931_v0, %v7945_v28  ;;  %vm18503_vm14 = vcmask 523264   ;;  %vm18505_vm15 = vmmov %vm18502_vm12  ;;  %v10548_v27 = vld [vmem:[%s17328_s18 + $0x70] sm:$0xff]  ;;  %8454 = vmatpush.bf16.msrb.mxu0 %v10534_v15  ;;  %vm18515_vm12 = vnez %v18464_v52 }
 0x950   : > { %8233 = vmatmul.bf16.vlgmr.msrb.gmra.mxu3 %v7990_v12  ;;  %8275 = vmatmul.bf16.vlgmr.msra.gmra.mxu2 %v7990_v12  ;;  %v8036_v12 = vld [vmem:[%s17327_s17] sm:$0x3] }
 0x951   : > { %v8038_v18 = vperm.slane %v8036_v12, 0 }
 0x955   : > { %v7952_v50 = vpop.permute.xlu0 %7951 }
 0x956   : > { %v7996_v57 = vsel %vm18503_vm14, %v7994_v14, %v7952_v50  ;;  %vm18516_vm14 = vnez %v18462_v49 }
 0x95c   : > { %v7972_v47 = vpop.permute.xlu1 %7971 }
 0x95d   : > { %v7998_v44 = vsel %vm18504_vm11, %v7996_v57, %v7972_v47 }
 0x95e   : > { %8247 = vmatmul.bf16.vlgmr.msrb.gmra.mxu1 %v7998_v44 }
 0x95f   : > { %8461 = vmatpush.bf16.msrb.mxu1 %v10549_v56  ;;  %v8039_v56 = vperm.slane %v8036_v12, 1  ;;  %v10681_v12 = vld [vmem:[%s17329_s19] ss:$0 sm:$0xff] }
 0x960   : > { %8289 = vmatmul.bf16.vlgmr.msra.gmra.mxu3 %v7998_v44 }
 0x963   : > { %8462 = vmatpush.bf16.msrb.mxu1 %v10548_v27 }
 0x966   : > { %v8262_v30 = vpop.f32.mrf.mxu2 }
 0x967   : > { %8463 = vmatpush.bf16.msrb.mxu1 %v10547_v8 }
 0x96e   : > { %10153 = vmatmul.msk.bf16.vlgmr.msra.gmra.mxu1 %vm18505_vm15, %v16174_v20  ;;  %v10546_v20 = vld [vmem:[%s17328_s18 + $0x60] sm:$0xff]  ;;  %v8264_v38 = vpop.f32.mrf.mxu2  ;;  %vm18506_vm15 = vcmask 257024  }
 0x96f   : > { %8464 = vmatpush.bf16.msrb.mxu1 %v10546_v20 }
 0x973   : > { %8465 = vmatpush.bf16.msrb.mxu1 %v10545_v6 }
 0x977   : > { %8466 = vmatpush.bf16.msrb.mxu1 %v10544_v34 }
 0x97b   : > { %8467 = vmatpush.bf16.msrb.mxu1 %v10543_v48 }
 0x97f   : > { %8468 = vmatpush.bf16.msrb.mxu1 %v10542_v32 }
 0x9d3   : > { %v8234_v24 = vpop.f32.mrf.mxu3  ;;  %v8276_v39 = vpop.f32.mrf.mxu2 }
 0x9d4   : > { %v8235_v33 = vadd.f32 %v8234_v24, %v8038_v18  ;;  %v8277_v20 = vadd.f32 %v8276_v39, %v8039_v56 }
 0x9db   : > { %v8248_v2 = vpop.f32.mrf.mxu1  ;;  %v8236_v45 = vpop.f32.mrf.mxu3 }
 0x9dc   : > { %v8249_v26 = vadd.f32 %v8248_v2, %v8235_v33  ;;  %v8237_v16 = vadd.f32 %v8236_v45, %v8038_v18  ;;  %v8278_v15 = vpop.f32.mrf.mxu2 }
 0x9dd   : > { %v8279_v34 = vadd.f32 %v8278_v15, %v8039_v56 }
 0x9de   : > { %v8263_v50 = vadd.f32 %v8262_v30, %v8249_v26 }
 0x9e0   : > { %v8309_v47 = vmax.f32 %v8263_v50, 0.0 }
 0x9e3   : > { %v8250_v28 = vpop.f32.mrf.mxu1  ;;  %v8290_v14 = vpop.f32.mrf.mxu3 }
 0x9e4   : > { %v8251_v0 = vadd.f32 %v8250_v28, %v8237_v16  ;;  %v8291_v24 = vadd.f32 %v8290_v14, %v8277_v20 }
 0x9e6   : > { %v8265_v57 = vadd.f32 %v8264_v38, %v8251_v0 }
 0x9e8   : > { %v8311_v44 = vmax.f32 %v8265_v57, 0.0 }
 0x9ea   : > { %v8313_v27 = vpack.c.bf16 %v8311_v44, %v8309_v47 }
 0x9eb   : > { %v8304_v8 = vpop.f32.mrf.mxu1  ;;  %v8292_v6 = vpop.f32.mrf.mxu3 }
 0x9ec   : > { %8455 = vmatmul.bf16.vlgmr.msrb.gmra.mxu0 %v8313_v27  ;;  %v8305_v48 = vadd.f32 %v8304_v8, %v8291_v24  ;;  %v8293_v2 = vadd.f32 %v8292_v6, %v8279_v34  ;;  %v8504_v6 = vld [vmem:[#allocation3] sm:$0xc] }
 0x9ee   : > { %v8310_v32 = vmax.f32 %v8305_v48, 0.0 }
 0x9f3   : > { %v8306_v18 = vpop.f32.mrf.mxu1 }
 0x9f4   : > { %v8307_v45 = vadd.f32 %v8306_v18, %v8293_v2 }
 0x9f6   : > { %v8312_v30 = vmax.f32 %v8307_v45, 0.0 }
 0x9f8   : > { %v8314_v33 = vpack.c.bf16 %v8312_v30, %v8310_v32 }
 0x9fa   : > { %8469 = vmatmul.bf16.vlgmr.msrb.gmra.mxu1 %v8314_v33 }
 0xa69   : > { %v8456_v38 = vpop.f32.mrf.mxu0 }
 0xa6a   : > { %v8457_v26 = vadd.f32 %v10681_v12, %v8456_v38 }
 0xa71   : > { %v8458_v50 = vpop.f32.mrf.mxu0 }
 0xa72   : > { %v8459_v14 = vadd.f32 %v10681_v12, %v8458_v50  ;;  %v8508_v12 = vld [vmem:[#allocation3 + $0x8] sm:$0x7] }
 0xa77   : > { %v8470_v16 = vpop.f32.mrf.mxu1 }
 0xa78   : > { %v8471_v28 = vadd.f32 %v8470_v16, %v8457_v26  ;;  %v16472_v16 = vld [vmem:[#allocation3 + $0xc] sm:$0x1] }
 0xa7a   : > { %v8475_v39 = vmax.f32 %v8471_v28, 0.0  ;;  %v8641_v28 = vunpack.c.l.b16 %v16472_v16 }
 0xa7c   : > { %v8477_v0 = vpack.c.bf16 %v8475_v39, %v8475_v39  ;;  %v10276_v39 = vld [vmem:[%s17330_s20 + $0x70] sm:$0xf]  ;;  %v8643_v29 = vpack.c.b16 %v8641_v28, %v8641_v28 }
 0xa7e   : > { %v8483_v57 = vshrl.u32 %v8477_v0, 16  ;;  %v8486_v47 = vshll.u32 %v8477_v0, 16 }
 0xa7f   : > { %v8472_v44 = vpop.f32.mrf.mxu1 }
 0xa80   : > { %v8485_v56 = vrot.slane %v8483_v57, 5  ;;  %v8488_v27 = vrot.slane %v8486_v47, 6  ;;  %v8473_v8 = vadd.f32 %v8472_v44, %v8459_v14  ;;  %v10277_v14 = vor.u32 %v10565_v46, %v10276_v39 }
 0xa82   : > { %v8489_v15 = vor.u32 %v8488_v27, %v8485_v56  ;;  %v8476_v20 = vmax.f32 %v8473_v8, 0.0  ;;  %8910 = vmatpush.bf16.msrb.mxu2 %v10277_v14 }
 0xa84   : > { %v8505_v34 = vsel %vm15885_vm4, %v8489_v15, %v8504_v6  ;;  %v8478_v24 = vpack.c.bf16 %v8476_v20, %v8476_v20  ;;  %v8490_v32 = vrot.slane %v8489_v15, 4  ;;  %v8652_v6 = vshll.u32 %v8643_v29, 16 }
 0xa85   : > { %8506 = vst [vmem:[#allocation3] sm:$0xc] %v8505_v34 }
 0xa86   : > { %v8492_v48 = vshrl.u32 %v8478_v24, 16  ;;  %v8495_v2 = vshll.u32 %v8478_v24, 16  ;;  %v8654_v46 = vrot.slane %v8652_v6, 1 }
 0xa88   : > { %v8494_v18 = vrot.slane %v8492_v48, 5  ;;  %v8497_v45 = vrot.slane %v8495_v2, 6 }
 0xa8a   : > { %v8498_v30 = vor.u32 %v8497_v45, %v8494_v18 }
 0xa8c   : > { %v8499_v33 = vsel %vm15903_vm13, %v8490_v32, %v8498_v30  ;;  %v8500_v38 = vrot.slane %v8498_v30, 4  ;;  %v8530_v0 = vld [vmem:[#allocation3] sm:$0x8] }
 0xa8d   : > { %8507 = vst.msk [vmem:[#allocation3 + $0x4] sm:$0xf] %vm18506_vm15, %v8499_v33  ;;  %v8520_v47 = vld [vmem:[#allocation3] sm:$0xe]  ;;  %v10269_v33 = vor.u32 %v10563_v3, %v10268_v51  ;;  %vm18517_vm15 = vmpackc.low %vm18515_vm12, %vm18516_vm14 }
 0xa8e   : > { %v8509_v26 = vsel %vm15831_vm5, %v8500_v38, %v8508_v12  ;;  %vm18507_vm5 = vnez %v18483_v60  ;;  %v8524_v8 = vld [vmem:[#allocation3] sm:$0xc]  ;;  %v10341_v38 = vor.u32 %v10581_v42, %v10340_v53 }
 0xa8f   : > { %8510 = vst [vmem:[#allocation3 + $0x8] sm:$0x7] %v8509_v26  ;;  %vm18508_vm13 = vmpackc.low %vm16098_vm2, %vm18507_vm5  ;;  %v16511_v24 = vld [vmem:[#allocation3] sm:$0xf]  ;;  %v8597_v45 = vunpack.c.l.b16 %v8524_v8  ;;  %vm18512_vm2 = vnez %v18458_v22  ;;  %8911 = vmatpush.bf16.msrb.mxu2 %v10269_v33 }
 0xa90   : > { %v8531_v56 = vsel %vm18508_vm13, 0, %v8530_v0  ;;  %v8550_v26 = vunpack.c.l.b16 %v16511_v24  ;;  %vm18514_vm11 = vmpackc.low %vm18512_vm2, %vm18513_vm7  ;;  %8924 = vmatpush.bf16.msrb.mxu3 %v10341_v38  ;;  %vm18519_vm13 = vnez %v18468_v40  ;;  %vm18522_vm2 = vcmask 1046528  }
 0xa91   : > { %v8621_v2 = vunpack.c.l.b16 %v8531_v56  ;;  %vm18518_vm5 = vmpackc.low %vm16147_vm1, %vm16142_vm6  ;;  %vm18520_vm6 = vcmask 1044480   ;;  %vm18521_vm1 = vsmask.f32 7424 }
 0xa92   : > { %vm18523_vm7 = vmmov %vm18521_vm1 }
 0xa94   : > { %v16481_v50 = vld [vmem:[#allocation3 + $0x4] sm:$0xf] }
 0xa95   : > { %v8532_v27 = vsel %vm7835_vm8, 0, %v16481_v50  ;;  %v8551_v60 = vunpack.c.l.b16 %v16481_v50  ;;  %vm18509_vm8 = vnez %v18470_v23  ;;  %v8535_v48 = vsel %vm15860_vm10, 0, %v16481_v50  ;;  %v10332_v23 = vld [vmem:[%s17330_s20 + $0xe0] sm:$0xf] }
 0xa96   : > { %v8511_v57 = vld [vmem:[#allocation3 + $0x8] sm:$0xc]  ;;  %v8519_v15 = vld [vmem:[#allocation3 + $0x8] sm:$0x1]  ;;  %v8622_v20 = vunpack.c.l.b16 %v8532_v27  ;;  %v8521_v34 = vsel %vm18509_vm8, 0, %v8520_v47  ;;  %v8633_v47 = vunpack.c.l.b16 %v8535_v48  ;;  %v8527_v51 = vsel %vm18517_vm15, 0, %v16481_v50 }
 0xa97   : > { %v8512_v44 = vsel %vm15885_vm4, 0, %v8511_v57  ;;  %vm18510_vm4 = vnez %v18473_v17  ;;  %v8523_v32 = vsel %vm18511_vm3, 0, %v8519_v15  ;;  %v8552_v30 = vunpack.c.l.b16 %v8519_v15  ;;  %v8525_v14 = vld [vmem:[#allocation3 + $0x8] sm:$0x3]  ;;  %v10561_v17 = vld [vmem:[%s17330_s20 + $0x54] sm:$0xf0] }
 0xa98   : > { %8513 = vst [vmem:[#allocation3 + $0x8] sm:$0xc] %v8512_v44  ;;  %v8522_v18 = vsel %vm18510_vm4, 0, %v16481_v50  ;;  %v8572_v12 = vunpack.c.l.b16 %v8521_v34  ;;  %v8599_v28 = vpack.c.b16 %v8551_v60, %v8597_v45  ;;  %v8624_v39 = vpack.c.b16 %v8622_v20, %v8621_v2 }
 0xa99   : > { %v8573_v0 = vunpack.c.l.b16 %v8522_v18  ;;  %v8526_v57 = vsel %vm18514_vm11, 0, %v8524_v8  ;;  %v8574_v56 = vunpack.c.l.b16 %v8523_v32  ;;  %v8553_v27 = vpack.c.b16 %v8551_v60, %v8550_v26 }
 0xa9a   : > { %v8554_v3 = vpack.c.b16 %v8552_v30, %v8552_v30  ;;  %v8602_v42 = vshrl.u32 %v8599_v28, 16  ;;  %v8626_v49 = vrot.slane %v8624_v39, 3  ;;  %v8528_v34 = vsel %vm18519_vm13, 0, %v8525_v14 }
 0xa9b   : > { %v8575_v6 = vpack.c.b16 %v8573_v0, %v8572_v12  ;;  %v8558_v45 = vshll.u32 %v8553_v27, 16  ;;  %v8576_v32 = vpack.c.b16 %v8574_v56, %v8574_v56  ;;  %v8605_v33 = vshll.u32 %v8599_v28, 16 }
 0xa9c   : > { %v8563_v19 = vshll.u32 %v8554_v3, 16  ;;  %v8604_v38 = vrot.slane %v8602_v42, 2  ;;  %v8587_v12 = vunpack.c.l.b16 %v8528_v34  ;;  %v8586_v28 = vunpack.c.l.b16 %v8527_v51 }
 0xa9d   : > { %v8607_v0 = vrot.slane %v8605_v33, 3  ;;  %v8560_v14 = vrot.slane %v8558_v45, 1  ;;  %v8585_v42 = vunpack.c.l.b16 %v8526_v57  ;;  %v8518_v51 = vsel %vm15869_vm0, 0, %v16481_v50 }
 0xa9f   : > { %v16527_v29 = vld [vmem:[#allocation3 + $0x8] sm:$0xf]  ;;  %v8608_v3 = vor.u32 %v8607_v0, %v8604_v38  ;;  %v10252_v0 = vld [vmem:[%s17330_s20 + $0x40] sm:$0xf] }
 0xaa0   : > { %v8529_v44 = vld [vmem:[#allocation3 + $0x8] sm:$0x7]  ;;  %v8536_v10 = vsel %vm15869_vm0, 0, %v16527_v29  ;;  %v8640_v22 = vunpack.c.l.b16 %v16527_v29  ;;  %v8540_v13 = vsel %vm18510_vm4, 0, %v16527_v29  ;;  %vm18526_vm0 = vcmask 261120  }
 0xaa1   : > { %v8533_v8 = vsel %vm18518_vm5, 0, %v8529_v44  ;;  %v8634_v15 = vunpack.c.l.b16 %v8536_v10  ;;  %v8598_v53 = vunpack.c.l.b16 %v8529_v44  ;;  %vm18528_vm4 = vcmask 785408   ;;  %vm18532_vm14 = vmmov %vm18526_vm0 }
 0xaa2   : > { %v8623_v52 = vunpack.c.l.b16 %v8533_v8  ;;  %v8642_v20 = vpack.c.b16 %v8640_v22, %v8551_v60  ;;  %v8578_v22 = vrot.slane %v8576_v32, 1  ;;  %v8556_v8 = vshrl.u32 %v8553_v27, 16  ;;  %vm18531_vm12 = vmmov %vm18528_vm4 }
 0xaa3   : > { %v8635_v48 = vpack.c.b16 %v8634_v15, %v8633_v47  ;;  %v8600_v2 = vpack.c.b16 %v8598_v53, %v8598_v53  ;;  %v8517_v27 = vsel %vm15860_vm10, 0, %v16511_v24  ;;  %v8541_v32 = vsel %vm18511_vm3, 0, %v16472_v16  ;;  %vm18525_vm10 = vmmov %vm18522_vm2 }
 0xaa4   : > { %v8625_v18 = vpack.c.b16 %v8623_v52, %v8623_v52  ;;  %v8647_v43 = vshll.u32 %v8642_v20, 16  ;;  %v8645_v39 = vshrl.u32 %v8642_v20, 16  ;;  %v8577_v52 = vrot.slane %v8575_v6, 1  ;;  %vm18529_vm3 = vmmov %vm18526_vm0 }
 0xaa5   : > { %8636 = vrot.lane.b32.xlu0 %v8635_v48, %s18281_s25  ;;  %v8610_v26 = vshrl.u32 %v8600_v2, 16  ;;  %v8613_v44 = vshll.u32 %v8600_v2, 16  ;;  %v8589_v20 = vpack.c.b16 %v8587_v12, %v8587_v12  ;;  %v8561_v34 = vor.u32 %v8560_v14, %v8556_v8  ;;  %v10579_v12 = vld [vmem:[%s17330_s20 + $0xe4] sm:$0xf0]  ;;  %vm18533_vm15 = vmmov %vm18526_vm0 }
 0xaa6   : > { %v8627_v30 = vrot.slane %v8625_v18, 3  ;;  %v8649_v60 = vrot.slane %v8647_v43, 1  ;;  %v8579_v2 = vsel %vm18522_vm2, %v8577_v52, %v8578_v22  ;;  %v8588_v18 = vpack.c.b16 %v8586_v28, %v8585_v42  ;;  %v10278_v28 = vld [vmem:[%s17330_s20 + $0x78] sm:$0xf0]  ;;  %v10316_v52 = vld [vmem:[%s17330_s20 + $0xc0] sm:$0xf] }
 0xaa7   : > { %v8612_v47 = vrot.slane %v8610_v26, 2  ;;  %v8615_v10 = vrot.slane %v8613_v44, 3  ;;  %v16564_v45 = vunpack.c.l.b16 %v8517_v27  ;;  %v16566_v43 = vunpack.c.l.b16 %v8518_v51  ;;  %v10236_v27 = vld [vmem:[%s17330_s20 + $0x20] sm:$0xf] }
 0xaa8   : > { %v8628_v40 = vsel %vm18520_vm6, %v8626_v49, %v8627_v30  ;;  %v8650_v56 = vor.u32 %v8649_v60, %v8645_v39  ;;  %v8565_v49 = vrot.slane %v8563_v19, 1  ;;  %v8590_v6 = vrot.slane %v8588_v18, 2  ;;  %v8538_v19 = vld [vmem:[#allocation3 + $0x4] sm:$0xe] }
 0xaa9   : > { %8629 = vrot.lane.b32.xlu2 %v8628_v40, %s18267_s1  ;;  %v8616_v15 = vor.u32 %v8615_v10, %v8612_v47  ;;  %v8546_v24 = vpack.c.b16 %v16566_v43, %v16564_v45  ;;  %v8663_v50 = vunpack.c.l.b16 %v8541_v32  ;;  %v8539_v33 = vsel %vm18509_vm8, 0, %v8538_v19  ;;  %v10260_v60 = vld [vmem:[%s17330_s20 + $0x50] sm:$0xf]  ;;  %v10559_v40 = vld [vmem:[%s17330_s20 + $0x44] sm:$0xf0] }
 0xaaa   : > { %v8655_v53 = vsel %vm18521_vm1, %v8650_v56, %v8654_v46  ;;  %v8591_v46 = vrot.slane %v8589_v20, 2  ;;  %v8566_v57 = vsel %vm18523_vm7, %v8561_v34, %v8565_v49  ;;  %v8662_v30 = vunpack.c.l.b16 %v8540_v13  ;;  %v10324_v47 = vld [vmem:[%s17330_s20 + $0xd0] sm:$0xf]  ;;  %v10577_v10 = vld [vmem:[%s17330_s20 + $0xd4] sm:$0xf0] }
 0xaab   : > { %8656 = vrot.lane.b32.xlu1 %v8655_v53, %s18264_s4  ;;  %v16552_v48 = vsel %vm7914_vm9, %v8608_v3, %v8616_v15  ;;  %vm18524_vm9 = vcmask 1045504   ;;  %v8661_v38 = vunpack.c.l.b16 %v8539_v33  ;;  %v8665_v41 = vpack.c.b16 %v8663_v50, %v8663_v50  ;;  %v10564_v56 = vld [vmem:[%s17330_s20 + $0x74] sm:$0xf]  ;;  %v10244_v15 = vld [vmem:[%s17330_s20 + $0x30] sm:$0xf] }
 0xaac   : > { %v8592_v9 = vsel %vm18524_vm9, %v8590_v6, %v8591_v46  ;;  %v10261_v29 = vor.u32 %v10561_v17, %v10260_v60  ;;  %v10333_v14 = vor.u32 %v10579_v12, %v10332_v23  ;;  %v10253_v22 = vor.u32 %v10559_v40, %v10252_v0  ;;  %v10557_v53 = vld [vmem:[%s17330_s20 + $0x34] sm:$0xf0]  ;;  %v10575_v20 = vld [vmem:[%s17330_s20 + $0xc4] sm:$0xf0]  ;;  %v10562_v34 = vld [vmem:[%s17330_s20 + $0x64] sm:$0xf] }
 0xaad   : > { %8580 = vrot.lane.b32.xlu0 %v8579_v2, %s18281_s25  ;;  %v8664_v16 = vpack.c.b16 %v8662_v30, %v8661_v38  ;;  %v8667_v26 = vrot.slane %v8665_v41, 1  ;;  %v10325_v8 = vor.u32 %v10577_v10, %v10324_v47  ;;  %v10281_v3 = vor.u32 %v10564_v56, %v10278_v28  ;;  %v10270_v49 = vld [vmem:[%s17330_s20 + $0x68] sm:$0xf0]  ;;  %v10555_v46 = vld [vmem:[%s17330_s20 + $0x24] sm:$0xf0] }
 0xaae   : > { %8912 = vmatpush.bf16.msrb.mxu2 %v10261_v29  ;;  %8925 = vmatpush.bf16.msrb.mxu3 %v10333_v14  ;;  %v10245_v42 = vor.u32 %v10557_v53, %v10244_v15  ;;  %v10317_v2 = vor.u32 %v10575_v20, %v10316_v52  ;;  %v10273_v18 = vor.u32 %v10562_v34, %v10270_v49  ;;  %v10573_v6 = vld [vmem:[%s17330_s20 + $0xb4] sm:$0xf0]  ;;  %v10560_v32 = vld [vmem:[%s17330_s20 + $0x54] sm:$0xf]  ;;  %v10228_v50 = vld [vmem:[%s17330_s20 + $0x10] sm:$0xf] }
 0xaaf   : > { %v8666_v44 = vrot.slane %v8664_v16, 1  ;;  %8952 = vmatpush.bf16.msra.mxu1 %v10281_v3  ;;  %v10237_v51 = vor.u32 %v10555_v46, %v10236_v27  ;;  %v10553_v33 = vld [vmem:[%s17330_s20 + $0x14] sm:$0xf0]  ;;  %v10300_v30 = vld [vmem:[%s17330_s20 + $0xa0] sm:$0xf]  ;;  %vm18527_vm8 = vcmask 523264   ;;  %vm18534_vm5 = vnez %v17591_v25 }
 0xab0   : > { %v10571_v38 = vld [vmem:[%s17330_s20 + $0xa4] sm:$0xf0]  ;;  %v10558_v41 = vld [vmem:[%s17330_s20 + $0x44] sm:$0xf]  ;;  %v10254_v16 = vld [vmem:[%s17330_s20 + $0x48] sm:$0xf0]  ;;  %vm18537_vm9 = vnez %v18347_v54 }
 0xab1   : > { %8567 = vrot.lane.b32.xlu2 %v8566_v57, %s18267_s1  ;;  %v16581_v39 = vsel %vm18525_vm10, %v8666_v44, %v8667_v26  ;;  %v10308_v57 = vld [vmem:[%s17330_s20 + $0xb0] sm:$0xf]  ;;  %v10229_v26 = vor.u32 %v10553_v33, %v10228_v50  ;;  %v10301_v44 = vor.u32 %v10571_v38, %v10300_v30  ;;  %v10257_v60 = vor.u32 %v10558_v41, %v10254_v16  ;;  %v10220_v17 = vld [vmem:[%s17330_s20] sm:$0xf]  ;;  %v10551_v23 = vld [vmem:[%s17330_s20 + $0x4] sm:$0xf0] }
 0xab2   : > { %8913 = vmatpush.bf16.msrb.mxu2 %v10253_v22  ;;  %8926 = vmatpush.bf16.msrb.mxu3 %v10325_v8  ;;  %v10309_v19 = vor.u32 %v10573_v6, %v10308_v57  ;;  %v10221_v29 = vor.u32 %v10551_v23, %v10220_v17  ;;  %v10292_v12 = vld [vmem:[%s17330_s20 + $0x90] sm:$0xf]  ;;  %v10569_v0 = vld [vmem:[%s17330_s20 + $0x94] sm:$0xf0]  ;;  %v10556_v40 = vld [vmem:[%s17330_s20 + $0x34] sm:$0xf] }
 0xab3   : > { %8593 = vrot.lane.b32.xlu1 %v8592_v9, %s18264_s4  ;;  %v10262_v9 = vld [vmem:[%s17330_s20 + $0x58] sm:$0xf0]  ;;  %8953 = vmatpush.bf16.msra.mxu1 %v10273_v18  ;;  %v10293_v14 = vor.u32 %v10569_v0, %v10292_v12  ;;  %v10580_v10 = vld [vmem:[%s17330_s20 + $0xf4] sm:$0xf]  ;;  %v10284_v8 = vld [vmem:[%s17330_s20 + $0x80] sm:$0xf] }
 0xab4   : > { %v10265_v13 = vor.u32 %v10560_v32, %v10262_v9  ;;  %v10246_v47 = vld [vmem:[%s17330_s20 + $0x38] sm:$0xf0]  ;;  %v10567_v3 = vld [vmem:[%s17330_s20 + $0x84] sm:$0xf0]  ;;  %v10554_v15 = vld [vmem:[%s17330_s20 + $0x24] sm:$0xf] }
 0xab5   : > { %v10342_v56 = vld [vmem:[%s17330_s20 + $0xf8] sm:$0xf0]  ;;  %v10249_v22 = vor.u32 %v10556_v40, %v10246_v47  ;;  %v10285_v53 = vor.u32 %v10567_v3, %v10284_v8  ;;  %v10238_v52 = vld [vmem:[%s17330_s20 + $0x28] sm:$0xf0]  ;;  %v10576_v27 = vld [vmem:[%s17330_s20 + $0xd4] sm:$0xf] }
 0xab6   : > { %8914 = vmatpush.bf16.msrb.mxu2 %v10245_v42  ;;  %8927 = vmatpush.bf16.msrb.mxu3 %v10317_v2  ;;  %v10345_v28 = vor.u32 %v10580_v10, %v10342_v56  ;;  %v10578_v42 = vld [vmem:[%s17330_s20 + $0xe4] sm:$0xf]  ;;  %v10334_v20 = vld [vmem:[%s17330_s20 + $0xe8] sm:$0xf0]  ;;  %v10241_v34 = vor.u32 %v10554_v15, %v10238_v52  ;;  %v10552_v2 = vld [vmem:[%s17330_s20 + $0x14] sm:$0xf] }
 0xab7   : > { %8954 = vmatpush.bf16.msra.mxu1 %v10265_v13  ;;  %v10337_v49 = vor.u32 %v10578_v42, %v10334_v20  ;;  %v10230_v18 = vld [vmem:[%s17330_s20 + $0x18] sm:$0xf0]  ;;  %v10222_v6 = vld [vmem:[%s17330_s20 + $0x8] sm:$0xf0]  ;;  %v10574_v9 = vld [vmem:[%s17330_s20 + $0xc4] sm:$0xf] }
 0xab8   : > { %v10233_v46 = vor.u32 %v10552_v2, %v10230_v18  ;;  %v10326_v57 = vld [vmem:[%s17330_s20 + $0xd8] sm:$0xf0]  ;;  %v10356_v33 = vld [vmem:[%s17330_s20 + $0x110] sm:$0xf]  ;;  %v10585_v30 = vld [vmem:[%s17330_s20 + $0x114] sm:$0xf0] }
 0xab9   : > { %v10329_v32 = vor.u32 %v10576_v27, %v10326_v57  ;;  %v10572_v38 = vld [vmem:[%s17330_s20 + $0xb4] sm:$0xf]  ;;  %v10357_v41 = vor.u32 %v10585_v30, %v10356_v33  ;;  %v10310_v16 = vld [vmem:[%s17330_s20 + $0xb8] sm:$0xf0]  ;;  %v10570_v17 = vld [vmem:[%s17330_s20 + $0xa4] sm:$0xf] }
 0xaba   : > { %8915 = vmatpush.bf16.msrb.mxu2 %v10237_v51  ;;  %8928 = vmatpush.bf16.msrb.mxu3 %v10309_v19  ;;  %v10550_v51 = vld [vmem:[%s17330_s20 + $0x4] sm:$0xf]  ;;  %v10318_v19 = vld [vmem:[%s17330_s20 + $0xc8] sm:$0xf0]  ;;  %v10568_v0 = vld [vmem:[%s17330_s20 + $0x94] sm:$0xf] }
 0xabb   : > { %8955 = vmatpush.bf16.msra.mxu1 %v10257_v60  ;;  %v10225_v13 = vor.u32 %v10550_v51, %v10222_v6  ;;  %v10321_v50 = vor.u32 %v10574_v9, %v10318_v19  ;;  %v10313_v60 = vor.u32 %v10572_v38, %v10310_v16  ;;  %v10302_v23 = vld [vmem:[%s17330_s20 + $0xa8] sm:$0xf0]  ;;  %v10294_v40 = vld [vmem:[%s17330_s20 + $0x98] sm:$0xf0]  ;;  %v10566_v47 = vld [vmem:[%s17330_s20 + $0x84] sm:$0xf] }
 0xabc   : > { %v10305_v12 = vor.u32 %v10570_v17, %v10302_v23  ;;  %v10286_v10 = vld [vmem:[%s17330_s20 + $0x88] sm:$0xf0]  ;;  %v10584_v8 = vld [vmem:[%s17330_s20 + $0x114] sm:$0xf]  ;;  %v10358_v3 = vld [vmem:[%s17330_s20 + $0x118] sm:$0xf0]  ;;  %v9226_v17 = vunpack.c.h.b16 %v15910_v37 }
 0xabd   : > { %v10289_v56 = vor.u32 %v10566_v47, %v10286_v10  ;;  %v10582_v20 = vld [vmem:[%s17330_s20 + $0x104] sm:$0xf]  ;;  %vm18530_vm11 = vmmov %vm18527_vm8  ;;  %v9029_v43 = vrot.slane %v9027_v58, 7  ;;  %v8721_v19 = vld [vmem:[%s17331_s21] sm:$0x3]  ;;  %s10716_s1 = scalar_lea.hbm %s10715_s30, 1 }
 0xabe   : > { %8916 = vmatpush.bf16.msrb.mxu2 %v10229_v26  ;;  %8929 = vmatpush.bf16.msrb.mxu3 %v10301_v44  ;;  %v10348_v26 = vld [vmem:[%s17330_s20 + $0x100] sm:$0xf]  ;;  %v10583_v44 = vld [vmem:[%s17330_s20 + $0x104] sm:$0xf0]  ;;  %v16810_v23 = vld [vmem:[#allocation6 + $0x18] sm:$0x11]  ;;  %p10717_p11 = scmp.ne.s32.totalorder %s10715_s30, %s10716_s1 }
 0xabf   : > { %8956 = vmatpush.bf16.msra.mxu1 %v10249_v22  ;;  %v9034_v33 = vrot.slane %v9029_v43, 4  ;;  %v10601_v10 = vld [vmem:[%s17332_s22 + $0x78] sm:$0xff]  ;;  %s10720_s4 = scalar_lea.hbm %s17334_s24, 2 }
 0xac0   : > { %p10718_p12 = pnand %p10717_p11, %p10937_p5  ;;  %p10722_p1 = scmp.lt.s32.totalorder %s10720_s4, %s10716_s1 }
 0xac2   : > { %8917 = vmatpush.bf16.msrb.mxu2 %v10221_v29  ;;  %8930 = vmatpush.bf16.msrb.mxu3 %v10293_v14  ;;  %v10349_v29 = vor.u32 %v10583_v44, %v10348_v26  ;;  %v10297_v14 = vor.u32 %v10568_v0, %v10294_v40  ;;  %v9050_v44 = vunpack.c.h.b16 %v9034_v33  ;;  %v9108_v0 = vrot.slane %v16192_v62, 7  ;;  %p10719_p13 = pneg %p10718_p12  ;;  %p10723_p2 = por %p10722_p1, %p10721_p0 }
 0xac3   : > { %8957 = vmatpush.bf16.msra.mxu1 %v10241_v34  ;;  %v10350_v34 = vld [vmem:[%s17330_s20 + $0x108] sm:$0xf0] }
 0xac4   : > { %v10353_v2 = vor.u32 %v10582_v20, %v10350_v34  ;;  %vm9054_vm1 = vcmp.ne.s32.totalorder %v9050_v44, %v17833_v35  ;;  %p10724_p3 = pnand %p10723_p2, %p10719_p13 }
 0xac6   : > { %8966 = vmatpush.bf16.msra.mxu2 %v10345_v28  ;;  %8931 = vmatpush.bf16.msrb.mxu3 %v10285_v53  ;;  %v10361_v53 = vor.u32 %v10584_v8, %v10358_v3 }
 0xac7   : > { %8958 = vmatpush.bf16.msra.mxu1 %v10233_v46 }
 0xaca   : > { %8967 = vmatpush.bf16.msra.mxu2 %v10337_v49  ;;  %8944 = vmatpush.bf16.msra.mxu3 %v10357_v41 }
 0xacb   : > { %8959 = vmatpush.bf16.msra.mxu1 %v10225_v13  ;;  %v8723_v13 = vperm.slane %v8721_v19, 0 }
 0xace   : > { %8968 = vmatpush.bf16.msra.mxu2 %v10329_v32  ;;  %8945 = vmatpush.bf16.msra.mxu3 %v10349_v29 }
 0xacf   : > { %9615 = vmatpush.bf16.msrb.mxu1 %v10601_v10 }
 0xad2   : > { %8969 = vmatpush.bf16.msra.mxu2 %v10321_v50  ;;  %v9032_v50 = vor.u32 %v9030_v55, %v9029_v43  ;;  %v8724_v55 = vperm.slane %v8721_v19, 1  ;;  %v9208_v19 = vld [vmem:[#allocation6 + $0x18] sm:$0x77] }
 0xad6   : > { %8970 = vmatpush.bf16.msra.mxu2 %v10313_v60  ;;  %v9225_v60 = vunpack.c.l.b16 %v15910_v37 }
 0xada   : > { %8971 = vmatpush.bf16.msra.mxu2 %v10305_v12  ;;  %v9106_v12 = vrot.slane %v16157_v4, 7 }
 0xadc   : > { %v9107_v4 = vrot.slane %v9106_v12, 4  ;;  %v9112_v43 = vunpack.c.h.b16 %v9106_v12 }
 0xade   : > { %8972 = vmatpush.bf16.msra.mxu2 %v10297_v14  ;;  %v9109_v62 = vsel %vm18537_vm9, %v9107_v4, %v9108_v0  ;;  %v9286_v4 = vunpack.c.h.b16 %v16170_v11 }
 0xae2   : > { %8973 = vmatpush.bf16.msra.mxu2 %v10289_v56  ;;  %v9110_v56 = vrot.slane %v9108_v0, 4  ;;  %v9218_v0 = vunpack.c.l.b16 %v15889_v7 }
 0xae4   : > { %v9126_v54 = vunpack.c.h.b16 %v9110_v56 }
 0xb03   : > { %v8630_v22 = vpop.permute.xlu2 %8629 }
 0xb04   : > { %v8679_v15 = vsel %vm18526_vm0, %v16552_v48, %v8630_v22  ;;  %v9292_v22 = vunpack.c.l.b16 %v16213_v1 }
 0xb0b   : > { %v8568_v18 = vpop.permute.xlu2 %8567 }
 0xb0c   : > { %v8671_v48 = vsel %vm18529_vm3, %v8546_v24, %v8568_v18  ;;  %v9217_v24 = vrot.slane %v15896_v61, 4  ;;  %v9049_v61 = vunpack.c.l.b16 %v9034_v33 }
 0xb0e   : > { %v9232_v30 = vunpack.c.l.b16 %v9217_v24  ;;  %v9233_v58 = vunpack.c.h.b16 %v9217_v24  ;;  %vm9053_vm6 = vcmp.ne.s32.totalorder %v9049_v61, %v17832_v63 }
 0xb0f   : > { %vm16819_vm7 = vmpackc.low %vm9054_vm1, %vm9053_vm6  ;;  %vm16909_vm1 = vcmp.ne.s32.totalorder %v9112_v43, %v17833_v35 }
 0xb10   : > { %vm9236_vm13 = vcmp.ne.s32.totalorder %v9232_v30, %v17832_v63  ;;  %vm9237_vm2 = vcmp.ne.s32.totalorder %v9233_v58, %v17833_v35 }
 0xb11   : > { %vm9238_vm3 = vmpackc.low %vm9237_vm2, %vm9236_vm13 }
 0xb17   : > { %v8637_v28 = vpop.permute.xlu0 %8636 }
 0xb18   : > { %v8681_v52 = vsel %vm18527_vm8, %v8679_v15, %v8637_v28  ;;  %v9293_v28 = vunpack.c.h.b16 %v16213_v1 }
 0xb1d   : > { %v8657_v42 = vpop.permute.xlu1 %8656 }
 0xb1e   : > { %v8683_v49 = vsel %vm18528_vm4, %v8681_v52, %v8657_v42  ;;  %vm16858_vm4 = vcmp.ne.s32.totalorder %v9126_v54, %v17833_v35 }
 0xb1f   : > { %8932 = vmatmul.bf16.vlgmr.msrb.gmra.mxu3 %v8683_v49  ;;  %v8581_v27 = vpop.permute.xlu0 %8580 }
 0xb20   : > { %8986 = vmatpush.bf16.msrb.mxu3 %v10361_v53  ;;  %v8673_v46 = vsel %vm18530_vm11, %v8671_v48, %v8581_v27  ;;  %v9118_v27 = vunpack.c.l.b16 %v9109_v62  ;;  %v9119_v48 = vunpack.c.h.b16 %v9109_v62 }
 0xb24   : > { %8987 = vmatpush.bf16.msrb.mxu3 %v10353_v2 }
 0xb25   : > { %v8594_v57 = vpop.permute.xlu1 %8593 }
 0xb26   : > { %v8675_v51 = vsel %vm18531_vm12, %v8673_v46, %v8594_v57  ;;  %v9125_v46 = vunpack.c.l.b16 %v9110_v56 }
 0xb27   : > { %8918 = vmatmul.bf16.vlgmr.msrb.gmra.mxu2 %v8675_v51  ;;  %8960 = vmatmul.bf16.vlgmr.msra.gmra.mxu1 %v8675_v51 }
 0xb28   : > { %vm16853_vm8 = vcmp.ne.s32.totalorder %v9125_v46, %v17832_v63 }
 0xb29   : > { %vm17545_vm13 = vmpackc.low %vm16858_vm4, %vm16853_vm8 }
 0xb2f   : > { %10362 = vmatmul.msk.bf16.vlgmr.msra.gmra.mxu3 %vm18532_vm14, %v16581_v39 }
 0xb37   : > { %8974 = vmatmul.bf16.vlgmr.msra.gmra.mxu2 %v8683_v49 }
 0xb3f   : > { %10363 = vmatmul.msk.bf16.vlgmr.msrb.gmra.mxu3 %vm18533_vm15, %v16581_v39  ;;  %v9021_v39 = vrot.slane %v9019_v5, 7  ;;  %vm16883_vm15 = vcmp.ne.s32.totalorder %v9118_v27, %v17832_v63 }
 0xb41   : > { %v9025_v16 = vrot.slane %v9021_v39, 4  ;;  %v9024_v29 = vor.u32 %v9022_v21, %v9021_v39  ;;  %v9058_v21 = vsel %vm16819_vm7, 0, %v16810_v23  ;;  %v18548_v39 = vmov 0 }
 0xb42   : > { %v9067_v18 = vunpack.c.l.bf16 %v9058_v21 }
 0xb43   : > { %v9033_v31 = vsel %vm18534_vm5, %v9025_v16, %v9032_v50  ;;  %v9035_v42 = vunpack.c.l.b16 %v9024_v29  ;;  %v9036_v34 = vunpack.c.h.b16 %v9024_v29  ;;  %v18546_v50 = vmov 0  ;;  %v10599_v29 = vld [vmem:[%s17332_s22 + $0x68] sm:$0xff] }
 0xb44   : > { %v9042_v14 = vunpack.c.l.b16 %v9033_v31  ;;  %v9043_v47 = vunpack.c.h.b16 %v9033_v31  ;;  %v16880_v33 = vrot.slane %v9067_v18, 1  ;;  %vm16888_vm5 = vcmp.ne.s32.totalorder %v9119_v48, %v17833_v35 }
 0xb45   : > { %vm16867_vm11 = vcmp.ne.s32.totalorder %v9035_v42, %v17832_v63  ;;  %vm16872_vm12 = vcmp.ne.s32.totalorder %v9036_v34, %v17833_v35  ;;  %v9300_v16 = vunpack.c.h.b16 %v9284_v36  ;;  %v16901_v31 = vsel %vm9238_vm3, 0, %v9208_v19 }
 0xb46   : > { %vm16839_vm10 = vcmp.ne.s32.totalorder %v9042_v14, %v17832_v63  ;;  %vm16844_vm0 = vcmp.ne.s32.totalorder %v9043_v47, %v17833_v35  ;;  %v18547_v50 = vsel %vm16867_vm11, 4294967295, %v18546_v50  ;;  %v18549_v39 = vsel %vm16872_vm12, 4294967295, %v18548_v39  ;;  %v16928_v47 = vld [vmem:[#allocation6 + $0x18] sm:$0xff]  ;;  %vm17548_vm2 = vmpackc.low %vm16872_vm12, %vm16867_vm11 }
 0xb47   : > { %vm17546_vm14 = vmpackc.low %vm16844_vm0, %vm16839_vm10  ;;  %v9134_v14 = vsel %vm17545_vm13, 0, %v16810_v23  ;;  %vm9304_vm3 = vcmp.ne.s32.totalorder %v9300_v16, %v17833_v35  ;;  %vm18572_vm11 = vcmask 1046528  }
 0xb48   : > { %v9143_v62 = vunpack.c.l.bf16 %v9134_v14  ;;  %v9144_v34 = vunpack.c.h.bf16 %v9134_v14 }
 0xba2   : > { %v8933_v6 = vpop.f32.mrf.mxu3 }
 0xba4   : > { %v8961_v9 = vpop.f32.mrf.mxu1 }
 0xba5   : > { %v8962_v8 = vadd.f32 %v8961_v9, %v8724_v55 }
 0xbaa   : > { %v8919_v32 = vpop.f32.mrf.mxu2  ;;  %v8935_v45 = vpop.f32.mrf.mxu3 }
 0xbab   : > { %v8920_v26 = vadd.f32 %v8919_v32, %v8723_v13  ;;  %v9179_v32 = vunpack.c.l.bf16 %v16836_v59 }
 0xbac   : > { %v8963_v25 = vpop.f32.mrf.mxu1 }
 0xbad   : > { %v8934_v40 = vadd.f32 %v8933_v6, %v8920_v26  ;;  %v16832_v53 = vadd.f32 %v8963_v25, %v8724_v55  ;;  %v9068_v6 = vunpack.c.h.bf16 %v9058_v21  ;;  %v16899_v44 = vrot.slane %v9179_v32, 4  ;;  %v9359_v55 = vld [vmem:[#allocation6 + $0x8] sm:$0x11] }
 0xbae   : > { %v9219_v25 = vunpack.c.h.b16 %v15889_v7  ;;  %v16936_v7 = vsel %vm17546_vm14, 0, %v16928_v47  ;;  %v9250_v21 = vunpack.c.l.bf16 %v16901_v31  ;;  %v16942_v23 = vsel %vm16819_vm7, 0, %v9359_v55 }
 0xbaf   : > { %v16897_v61 = vrot.slane %v9068_v6, 1  ;;  %vm16961_vm7 = vcmp.ne.s32.totalorder %v9225_v60, %v17832_v63  ;;  %v9351_v6 = vunpack.c.l.bf16 %v16928_v47 }
 0xbb0   : > { %vm16988_vm14 = vcmp.ne.s32.totalorder %v9219_v25, %v17833_v35  ;;  %v17036_v25 = vrot.slane %v9144_v34, 2 }
 0xbb2   : > { %v8921_v38 = vpop.f32.mrf.mxu2  ;;  %v8947_v41 = vpop.f32.mrf.mxu3 }
 0xbb3   : > { %v8922_v5 = vadd.f32 %v8921_v38, %v8723_v13  ;;  %v16830_v3 = vadd.f32 %v8947_v41, %v8934_v40  ;;  %v9299_v41 = vunpack.c.l.b16 %v9284_v36  ;;  %v9285_v40 = vunpack.c.l.b16 %v16170_v11 }
 0xbb5   : > { %v8936_v52 = vadd.f32 %v8935_v45, %v8922_v5  ;;  %v8994_v57 = vmax.f32 %v16830_v3, 0.0  ;;  %v9111_v45 = vunpack.c.l.b16 %v9106_v12  ;;  %vm9303_vm9 = vcmp.ne.s32.totalorder %v9299_v41, %v17832_v63 }
 0xbb6   : > { %vm9305_vm13 = vmpackc.low %vm9304_vm3, %vm9303_vm9  ;;  %v9369_v3 = vunpack.c.l.bf16 %v16936_v7  ;;  %v18575_v41 = vmov 0 }
 0xbb7   : > { %vm16904_vm6 = vcmp.ne.s32.totalorder %v9111_v45, %v17832_v63  ;;  %vm18558_vm9 = vmpackc.low %vm16888_vm5, %vm16883_vm15 }
 0xbb8   : > { %v16956_v11 = vsel %vm18558_vm9, 0, %v16928_v47  ;;  %vm18563_vm3 = vmpackc.low %vm16858_vm4, %vm16853_vm8  ;;  %vm16983_vm9 = vcmp.ne.s32.totalorder %v9218_v0, %v17832_v63  ;;  %v16992_v18 = vrot.slane %v9369_v3, 1  ;;  %vm17005_vm4 = vcmp.ne.s32.totalorder %v9285_v40, %v17832_v63 }
 0xbb9   : > { %v9409_v60 = vunpack.c.l.bf16 %v16956_v11  ;;  %vm17030_vm8 = vcmp.ne.s32.totalorder %v9293_v28, %v17833_v35  ;;  %v9157_v0 = vrot.slane %v9143_v62, 2  ;;  %vm9117_vm12 = vmpackc.low %vm16909_vm1, %vm16904_vm6  ;;  %v9370_v62 = vunpack.c.h.bf16 %v16936_v7 }
 0xbba   : > { %v8949_v15 = vpop.f32.mrf.mxu3  ;;  %v8975_v20 = vpop.f32.mrf.mxu2  ;;  %v18576_v41 = vsel %vm17030_vm8, 4294967295, %v18575_v41  ;;  %v9410_v34 = vunpack.c.h.bf16 %v16956_v11  ;;  %vm18579_vm8 = vmpackc.low %vm16888_vm5, %vm16883_vm15  ;;  %vm18580_vm15 = vcmask 1043456   ;;  %v10592_v11 = vld [vmem:[%s17332_s22 + $0x30] sm:$0xff] }
 0xbbb   : > { %v16849_v51 = vadd.f32 %v8949_v15, %v8936_v52  ;;  %v8976_v13 = vadd.f32 %v8975_v20, %v8962_v8  ;;  %v9308_v8 = vsel %vm9305_vm13, 0, %v9208_v19  ;;  %v9371_v15 = vunpack.c.l.bf16 %v16942_v23 }
 0xbbc   : > { %vm16968_vm13 = vcmp.ne.s32.totalorder %v9226_v17, %v17833_v35  ;;  %v16979_v20 = vsel %vm18563_vm3, 0, %v9359_v55  ;;  %vm17010_vm3 = vcmp.ne.s32.totalorder %v9286_v4, %v17833_v35  ;;  %v17018_v19 = vrot.slane %v9409_v60, 2 }
 0xbbd   : > { %v8996_v58 = vmax.f32 %v16849_v51, 0.0  ;;  %v9385_v27 = vrot.slane %v9371_v15, 1  ;;  %v9411_v48 = vunpack.c.l.bf16 %v16979_v20  ;;  %v9180_v55 = vunpack.c.h.bf16 %v16836_v59  ;;  %vm9291_vm5 = vmpackc.low %vm17010_vm3, %vm17005_vm4 }
 0xbbe   : > { %v9372_v60 = vunpack.c.h.bf16 %v16942_v23  ;;  %vm18584_vm4 = vcmask 1045504  }
 0xbbf   : > { %v17016_v9 = vsel %vm18572_vm11, %v16992_v18, %v9385_v27  ;;  %vm18577_vm11 = vcmask 1045504   ;;  %v17059_v4 = vrot.slane %v9180_v55, 4  ;;  %v9412_v27 = vunpack.c.h.bf16 %v16979_v20  ;;  %vm18585_vm3 = vmmov %vm18584_vm4 }
 0xbc0   : > { %vm18596_vm1 = vmmov %vm18585_vm3 }
 0xbc1   : > { %v9427_v23 = vrot.slane %v9412_v27, 2 }
 0xbc2   : > { %v8989_v26 = vpop.f32.mrf.mxu3  ;;  %v8977_v56 = vpop.f32.mrf.mxu2 }
 0xbc3   : > { %v8990_v5 = vadd.f32 %v8989_v26, %v8976_v13  ;;  %v8978_v46 = vadd.f32 %v8977_v56, %v16832_v53  ;;  %v9425_v26 = vrot.slane %v9411_v48, 2  ;;  %v10600_v13 = vld [vmem:[%s17332_s22 + $0x70] sm:$0xff] }
 0xbc4   : > { %9616 = vmatpush.bf16.msrb.mxu1 %v10600_v13 }
 0xbc5   : > { %v8995_v36 = vmax.f32 %v8990_v5, 0.0  ;;  %v9251_v5 = vunpack.c.h.bf16 %v16901_v31  ;;  %v17044_v1 = vsel %vm18577_vm11, %v17018_v19, %v9425_v26  ;;  %v9352_v31 = vunpack.c.h.bf16 %v16928_v47  ;;  %vm18578_vm11 = vmpackc.low %vm16844_vm0, %vm16839_vm10  ;;  %v10590_v47 = vld [vmem:[%s17332_s22 + $0x20] sm:$0xff] }
 0xbc6   : > { %vm9231_vm10 = vmpackc.low %vm16968_vm13, %vm16961_vm7  ;;  %vm18586_vm7 = vnez %v18549_v39  ;;  %vm18587_vm13 = vnez %v18547_v50 }
 0xbc7   : > { %v16972_v42 = vpack.c.bf16 %v8995_v36, %v8994_v57  ;;  %v9317_v57 = vunpack.c.l.bf16 %v9308_v8  ;;  %v17061_v56 = vrot.slane %v9251_v5, 5  ;;  %vm9224_vm0 = vmpackc.low %vm16988_vm14, %vm16983_vm9  ;;  %vm18581_vm14 = vnez %v18576_v41 }
 0xbc8   : > { %9617 = vmatpush.bf16.msrb.mxu1 %v10599_v29 }
 0xbc9   : > { %9001 = vst [vmem:[#allocation6 + $0x10] sm:$0xff] %v16972_v42  ;;  %v9056_v54 = vsel %vm17548_vm2, 0, %v16972_v42  ;;  %vm17023_vm2 = vcmp.ne.s32.totalorder %v9292_v22, %v17832_v63  ;;  %v17038_v63 = vrot.slane %v9250_v21, 5  ;;  %v9318_v22 = vunpack.c.h.bf16 %v9308_v8 }
 0xbca   : > { %v8991_v32 = vpop.f32.mrf.mxu3  ;;  %v9063_v45 = vunpack.c.l.bf16 %v9056_v54  ;;  %v9064_v43 = vunpack.c.h.bf16 %v9056_v54  ;;  %v9059_v14 = vunpack.c.l.bf16 %v16972_v42  ;;  %v9060_v35 = vunpack.c.h.bf16 %v16972_v42  ;;  %vm9298_vm9 = vmpackc.low %vm18581_vm14, %vm17023_vm2 }
 0xbcb   : > { %v8992_v16 = vadd.f32 %v8991_v32, %v8978_v46  ;;  %v17052_v59 = vrot.slane %v9317_v57, 6  ;;  %v17063_v8 = vrot.slane %v9318_v22, 6  ;;  %vm18589_vm2 = vcmask 1042432  }
 0xbcc   : > { %v9075_v28 = vrot.slane %v9063_v45, 1  ;;  %v17046_v36 = vrot.slane %v9064_v43, 1 }
 0xbcd   : > { %v8997_v40 = vmax.f32 %v8992_v16, 0.0 }
 0xbcf   : > { %v17057_v21 = vpack.c.bf16 %v8997_v40, %v8996_v58 }
 0xbd0   : > { %v9095_v3 = vld [vmem:[#allocation6 + $0x10] sm:$0xee] }
 0xbd1   : > { %v17065_v15 = vld [vmem:[#allocation6 + $0x10] sm:$0xcc]  ;;  %9002 = vst [vmem:[#allocation6] sm:$0xff] %v17057_v21  ;;  %v9057_v51 = vsel %vm18578_vm11, 0, %v17057_v21  ;;  %v17079_v58 = vunpack.c.l.bf16 %v17057_v21  ;;  %v9132_v48 = vsel %vm9117_vm12, 0, %v9095_v3  ;;  %v9133_v2 = vsel %vm18579_vm8, 0, %v17057_v21 }
 0xbd2   : > { %v9065_v49 = vunpack.c.l.bf16 %v9057_v51  ;;  %v9066_v46 = vunpack.c.h.bf16 %v9057_v51  ;;  %v9139_v54 = vunpack.c.l.bf16 %v9132_v48  ;;  %v9140_v57 = vunpack.c.h.bf16 %v9132_v48  ;;  %v9279_v51 = vld [vmem:[#allocation6 + $0x10] sm:$0x88] }
 0xbd3   : > { %v9141_v32 = vunpack.c.l.bf16 %v9133_v2  ;;  %v9142_v45 = vunpack.c.h.bf16 %v9133_v2  ;;  %v9177_v43 = vunpack.c.l.bf16 %v17065_v15  ;;  %v9189_v16 = vrot.slane %v17079_v58, 4 }
 0xbd4   : > { %v9076_v30 = vrot.slane %v9065_v49, 1  ;;  %v9079_v38 = vrot.slane %v9066_v46, 1  ;;  %v9151_v26 = vrot.slane %v9139_v54, 2  ;;  %v9154_v55 = vrot.slane %v9140_v57, 2 }
 0xbd5   : > { %v9152_v5 = vrot.slane %v9141_v32, 2  ;;  %v9155_v22 = vrot.slane %v9142_v45, 2  ;;  %v9188_v40 = vrot.slane %v9177_v43, 4  ;;  %v9195_v3 = vsel %vm18580_vm15, %v9189_v16, %v16899_v44 }
 0xbd6   : > { %vm18582_vm8 = vcmask 1046528   ;;  %v17116_v48 = vsel %vm9224_vm0, 0, %v17065_v15  ;;  %v17124_v44 = vsel %vm9231_vm10, 0, %v17057_v21  ;;  %v17132_v54 = vsel %vm9291_vm5, 0, %v9279_v51  ;;  %vm18588_vm10 = vmpackc.low %vm18586_vm7, %vm18587_vm13 }
 0xbd7   : > { %v9077_v37 = vsel %vm18582_vm8, %v9075_v28, %v9076_v30  ;;  %vm18583_vm11 = vmmov %vm18582_vm8  ;;  %v9153_v2 = vsel %vm18584_vm4, %v9151_v26, %v9152_v5  ;;  %v9158_v28 = vsel %vm18585_vm3, %v9152_v5, %v9157_v0  ;;  %v9246_v49 = vunpack.c.l.bf16 %v17116_v48 }
 0xbd8   : > { %v9082_v17 = vsel %vm18583_vm11, %v9076_v30, %v16880_v33  ;;  %v9089_v24 = vmax.f32 %v9059_v14, %v9077_v37  ;;  %v9190_v33 = vsel %vm18580_vm15, %v9188_v40, %v9189_v16  ;;  %v9248_v46 = vunpack.c.l.bf16 %v17124_v44  ;;  %v9399_v32 = vld [vmem:[#allocation6] sm:$0xee]  ;;  %vm18590_vm0 = vmmov %vm18589_vm2 }
 0xbd9   : > { %v9091_v53 = vmax.f32 %v17079_v58, %v9082_v17  ;;  %v17143_v0 = vsel %vm9298_vm9, 0, %v17057_v21  ;;  %v9313_v57 = vunpack.c.l.bf16 %v17132_v54  ;;  %v9259_v45 = vrot.slane %v9246_v49, 5  ;;  %vm18593_vm9 = vmmov %vm18582_vm8 }
 0xbda   : > { %v9165_v52 = vmax.f32 %v9089_v24, %v9153_v2  ;;  %v9260_v43 = vrot.slane %v9248_v46, 5  ;;  %v9315_v16 = vunpack.c.l.bf16 %v17143_v0  ;;  %v17153_v30 = vsel %vm18588_vm10, 0, %v17057_v21  ;;  %vm18595_vm6 = vmmov %vm18582_vm8 }
 0xbdb   : > { %v9167_v14 = vmax.f32 %v9091_v53, %v9158_v28  ;;  %v9326_v5 = vrot.slane %v9313_v57, 6  ;;  %v9367_v40 = vunpack.c.l.bf16 %v17153_v30  ;;  %v17167_v50 = vsel %vm9117_vm12, 0, %v9399_v32  ;;  %vm18594_vm12 = vmmov %vm18582_vm8 }
 0xbdc   : > { %v9202_v41 = vmax.f32 %v9165_v52, %v9190_v33  ;;  %v9261_v51 = vsel %vm18589_vm2, %v9259_v45, %v9260_v43  ;;  %v9266_v39 = vsel %vm18590_vm0, %v9260_v43, %v17038_v63  ;;  %v9327_v37 = vrot.slane %v9315_v16, 6  ;;  %vm18597_vm8 = vmmov %vm18596_vm1 }
 0xbdd   : > { %v9204_v26 = vmax.f32 %v9167_v14, %v9195_v3  ;;  %v9379_v53 = vrot.slane %v9367_v40, 1  ;;  %v9407_v3 = vunpack.c.l.bf16 %v17167_v50  ;;  %vm18591_vm5 = vcmask 1041408   ;;  %vm18598_vm11 = vmmov %vm18596_vm1 }
 0xbde   : > { %v9273_v17 = vmax.f32 %v9202_v41, %v9261_v51  ;;  %v9328_v2 = vsel %vm18591_vm5, %v9326_v5, %v9327_v37  ;;  %vm18592_vm14 = vmmov %vm18591_vm5  ;;  %v17174_v63 = vunpack.c.h.bf16 %v17057_v21  ;;  %v9080_v12 = vsel %vm18593_vm9, %v17046_v36, %v9079_v38 }
 0xbdf   : > { %v9275_v24 = vmax.f32 %v9204_v26, %v9266_v39  ;;  %v9333_v28 = vsel %vm18592_vm14, %v9327_v37, %v17052_v59  ;;  %v9381_v46 = vsel %vm18594_vm12, %v9379_v53, %v16992_v18  ;;  %v9419_v10 = vrot.slane %v9407_v3, 2  ;;  %vm18599_vm4 = vmmov %vm18580_vm15 }
 0xbe0   : > { %v9340_v33 = vmax.f32 %v9273_v17, %v9328_v2  ;;  %v9084_v59 = vsel %vm18595_vm6, %v9079_v38, %v16897_v61  ;;  %v9090_v21 = vmax.f32 %v9060_v35, %v9080_v12  ;;  %v9156_v52 = vsel %vm18596_vm1, %v9154_v55, %v9155_v22  ;;  %vm18600_vm3 = vmmov %vm18599_vm4 }
 0xbe1   : > { %v9342_v49 = vmax.f32 %v9275_v24, %v9333_v28  ;;  %v9160_v36 = vsel %vm18597_vm8, %v9155_v22, %v17036_v25  ;;  %v9421_v18 = vsel %vm18598_vm11, %v9419_v10, %v17018_v19  ;;  %v9092_v32 = vmax.f32 %v17174_v63, %v9084_v59  ;;  %v10598_v25 = vld [vmem:[%s17332_s22 + $0x60] sm:$0xff]  ;;  %vm18601_vm15 = vmmov %vm18590_vm0 }
 0xbe2   : > { %v9353_v14 = vmax.f32 %v9340_v33, %v17079_v58  ;;  %v9166_v45 = vmax.f32 %v9090_v21, %v9156_v52  ;;  %v9178_v61 = vunpack.c.h.bf16 %v17065_v15  ;;  %v9192_v42 = vrot.slane %v17174_v63, 4  ;;  %9618 = vmatpush.bf16.msrb.mxu1 %v10598_v25  ;;  %vm18602_vm7 = vmmov %vm18590_vm0 }
 0xbe3   : > { %v9355_v57 = vmax.f32 %v9342_v49, %v9351_v6  ;;  %v9247_v35 = vunpack.c.h.bf16 %v17116_v48  ;;  %v9168_v38 = vmax.f32 %v9092_v32, %v9160_v36  ;;  %v9249_v19 = vunpack.c.h.bf16 %v17124_v44  ;;  %v10593_v44 = vld [vmem:[%s17332_s22 + $0x38] sm:$0xff]  ;;  %vm18604_vm13 = vmmov %vm18591_vm5  ;;  %v10591_v49 = vld [vmem:[%s17332_s22 + $0x28] sm:$0xff] }
 0xbe4   : > { %v9393_v58 = vmax.f32 %v9353_v14, %v9381_v46  ;;  %v9191_v55 = vrot.slane %v9178_v61, 4  ;;  %v9197_v22 = vsel %vm18599_vm4, %v9192_v42, %v17059_v4  ;;  %v9314_v43 = vunpack.c.h.bf16 %v17132_v54  ;;  %v10597_v4 = vld [vmem:[%s17332_s22 + $0x58] sm:$0xff]  ;;  %vm18605_vm10 = vmmov %vm18591_vm5  ;;  %v10595_v46 = vld [vmem:[%s17332_s22 + $0x48] sm:$0xff] }
 0xbe5   : > { %v9395_v6 = vmax.f32 %v9355_v57, %v17016_v9  ;;  %v9262_v15 = vrot.slane %v9247_v35, 5  ;;  %v9205_v13 = vmax.f32 %v9168_v38, %v9197_v22  ;;  %v9263_v41 = vrot.slane %v9249_v19, 5  ;;  %vm18606_vm2 = vmmov %vm18595_vm6  ;;  %v10588_v36 = vld [vmem:[%s17332_s22 + $0x10] sm:$0xff]  ;;  %v10587_v14 = vld [vmem:[%s17332_s22 + $0x8] sm:$0xff] }
 0xbe6   : > { %v9433_v16 = vmax.f32 %v9393_v58, %v9421_v18  ;;  %v9193_v26 = vsel %vm18600_vm3, %v9191_v55, %v9192_v42  ;;  %v9316_v5 = vunpack.c.h.bf16 %v17143_v0  ;;  %v9329_v9 = vrot.slane %v9314_v43, 6  ;;  %9619 = vmatpush.bf16.msrb.mxu1 %v10597_v4  ;;  %vm18607_vm0 = vmmov %vm18606_vm2  ;;  %v10586_v57 = vld [vmem:[%s17332_s22] sm:$0xff] }
 0xbe7   : > { %v9435_v48 = vmax.f32 %v9395_v6, %v17044_v1  ;;  %v9368_v40 = vunpack.c.h.bf16 %v17153_v30  ;;  %v9203_v1 = vmax.f32 %v9166_v45, %v9193_v26  ;;  %v9264_v51 = vsel %vm18601_vm15, %v9262_v15, %v9263_v41  ;;  %vm18608_vm5 = vmmov %vm18596_vm1  ;;  %v10594_v18 = vld [vmem:[%s17332_s22 + $0x40] sm:$0xff] }
 0xbe8   : > { %v9268_v39 = vsel %vm18602_vm7, %v9263_v41, %v17061_v56  ;;  %v9330_v37 = vrot.slane %v9316_v5, 6  ;;  %v9383_v30 = vrot.slane %v9370_v62, 1  ;;  %v9387_v53 = vrot.slane %v9372_v60, 1  ;;  %v8998_v56 = vld [vmem:[%s18603_s8] sm:$0x3]  ;;  %v10596_v60 = vld [vmem:[%s17332_s22 + $0x50] sm:$0xff]  ;;  %vm18610_vm9 = vmmov %vm18596_vm1 }
 0xbe9   : > { %v9437_v54 = vpack.c.bf16 %v9435_v48, %v9433_v16  ;;  %v9276_v0 = vmax.f32 %v9205_v13, %v9268_v39  ;;  %v9382_v17 = vrot.slane %v9368_v40, 1  ;;  %v9274_v24 = vmax.f32 %v9203_v1, %v9264_v51  ;;  %v10682_v19 = vld [vmem:[%s17333_s23] ss:$0 sm:$0xff]  ;;  %vm18612_vm6 = vmmov %vm18600_vm3  ;;  %s9646_s8 = scalar_lea.sflag [#allocation8], %s728_s2 }
 0xbea   : > { %v9408_v3 = vunpack.c.h.bf16 %v17167_v50  ;;  %v9423_v2 = vrot.slane %v9410_v34, 2  ;;  %v9331_v28 = vsel %vm18604_vm13, %v9329_v9, %v9330_v37  ;;  %v9335_v7 = vsel %vm18605_vm10, %v9330_v37, %v17063_v8  ;;  %9620 = vmatpush.bf16.msrb.mxu1 %v10596_v60 }
 0xbeb   : > { %9449 = vmatpush.bf16.msra.mxu0 %v9437_v54  ;;  %v9384_v62 = vsel %vm18606_vm2, %v9382_v17, %v9383_v30  ;;  %v9341_v34 = vmax.f32 %v9274_v24, %v9331_v28  ;;  %v9343_v50 = vmax.f32 %v9276_v0, %v9335_v7  ;;  %v9388_v12 = vsel %vm18607_vm0, %v9383_v30, %v9387_v53 }
 0xbec   : > { %v9422_v8 = vrot.slane %v9408_v3, 2  ;;  %v9428_v29 = vsel %vm18608_vm5, %v9423_v2, %v9427_v23  ;;  %vm18609_vm14 = vcmask 130048   ;;  %v10773_v38 = vmov 4.0  }
 0xbed   : > { %v9354_v20 = vmax.f32 %v9341_v34, %v17174_v63  ;;  %v9356_v27 = vmax.f32 %v9343_v50, %v9352_v31  ;;  %v10589_v63 = vld [vmem:[%s17332_s22 + $0x18] sm:$0xff]  ;;  %vm18611_vm12 = vmmov %vm18609_vm14  ;;  %10683 = vrcp.f32 %v10773_v38 }
 0xbee   : > { %10364 = vmatmul.msk.bf16.vlgmr.msra.gmra.mxu0 %vm18609_vm14, %v8998_v56  ;;  %v9424_v33 = vsel %vm18610_vm9, %v9422_v8, %v9423_v2  ;;  %9621 = vmatpush.bf16.msrb.mxu1 %v10595_v46 }
 0xbef   : > { %9602 = vmatpush.bf16.msrb.mxu0 %v10593_v44  ;;  %v9394_v10 = vmax.f32 %v9354_v20, %v9384_v62  ;;  %v9396_v59 = vmax.f32 %v9356_v27, %v9388_v12 }
 0xbf1   : > { %v9434_v21 = vmax.f32 %v9394_v10, %v9424_v33  ;;  %v9436_v52 = vmax.f32 %v9396_v59, %v9428_v29 }
 0xbf2   : > { %9622 = vmatpush.bf16.msrb.mxu1 %v10594_v18 }
 0xbf3   : > { %9603 = vmatpush.bf16.msrb.mxu0 %v10592_v11  ;;  %v9438_v31 = vpack.c.bf16 %v9436_v52, %v9434_v21  ;;  %v10684_v55 = vpop.eup %10683 }
 0xbf4   : > { %v9637_v15 = vmul.f32 4.0, %v10684_v55  ;;  %vm9641_vm1 = vweird.f32 %v10684_v55 }
 0xbf5   : > { %9462 = vmatpush.bf16.msra.mxu3 %v9438_v31 }
 0xbf6   : > { %v9638_v13 = vsub.f32 1.0, %v9637_v15 }
 0xbf7   : > { %9604 = vmatpush.bf16.msrb.mxu0 %v10591_v49 }
 0xbf8   : > { %10365 = vmatmul.msk.bf16.vlgmr.msra.gmra.mxu3 %vm18611_vm12, %v8998_v56  ;;  %v9639_v5 = vmul.f32 %v10684_v55, %v9638_v13 }
 0xbfa   : > { %v9640_v4 = vadd.f32 %v10684_v55, %v9639_v5 }
 0xbfb   : > { %9605 = vmatpush.bf16.msrb.mxu0 %v10590_v47 }
 0xbfc   : > { %v9642_v51 = vsel %vm9641_vm1, %v10684_v55, %v9640_v4 }
 0xbff   : > { %9606 = vmatpush.bf16.msrb.mxu0 %v10589_v63 }
 0xc03   : > { %9607 = vmatpush.bf16.msrb.mxu0 %v10588_v36 }
 0xc07   : > { %9608 = vmatpush.bf16.msrb.mxu0 %v10587_v14 }
 0xc0b   : > { %9609 = vmatpush.bf16.msrb.mxu0 %v10586_v57 }
 0xc6b   : > { %v9451_v32 = vpop.f32.mrf.mxu0 }
 0xc6c   : > { %v9468_v45 = vpack.c.bf16 %v9451_v32, %v9451_v32 }
 0xc6e   : > { %9610 = vmatmul.bf16.vlgmr.msrb.gmra.mxu0 %v9468_v45 }
 0xc73   : > { %v9453_v61 = vpop.f32.mrf.mxu0 }
 0xc7b   : > { %v9464_v42 = vpop.f32.mrf.mxu3 }
 0xc7c   : > { %v9469_v35 = vpack.c.bf16 %v9464_v42, %v9464_v42 }
 0xc7e   : > { %9623 = vmatmul.bf16.vlgmr.msrb.gmra.mxu1 %v9469_v35 }
 0xc83   : > { %v9466_v25 = vpop.f32.mrf.mxu3 }
 0xceb   : > { %v9611_v58 = vpop.f32.mrf.mxu0 }
 0xcec   : > { %v9612_v22 = vadd.f32 %v10682_v19, %v9611_v58 }
 0xcf3   : > { %v9613_v6 = vpop.f32.mrf.mxu0 }
 0xcfb   : > { %v9624_v43 = vpop.f32.mrf.mxu1 }
 0xcfc   : > { %v9625_v16 = vadd.f32 %v9624_v43, %v9612_v22 }
 0xcfe   : > { %v9628_v48 = vmax.f32 %v9625_v16, 0.0 }
 0xd00   : > { %v9629_v41 = vsel %vm18612_vm6, %v9628_v48, 0.0 }
 0xd01   : > { %v9630_v26 = vrot.slane %v9629_v41, 4 }
 0xd03   : > { %v9631_v9 = vadd.f32 %v9630_v26, %v9629_v41  ;;  %v9626_v40 = vpop.f32.mrf.mxu1 }
 0xd05   : > { %v9632_v44 = vrot.slane %v9631_v9, 2 }
 0xd07   : > { %v9633_v54 = vadd.f32 %v9632_v44, %v9631_v9 }
 0xd09   : > { %v9634_v1 = vrot.slane %v9633_v54, 1 }
 0xd0b   : > { %v9635_v39 = vadd.f32 %v9634_v1, %v9633_v54 }
 0xd0d   : > { %v9643_v0 = vmul.f32 %v9642_v51, %v9635_v39 }
 0xd0f   : > { %9644 = vst [vmem:[%s729_s7] sm:$0x1] %v9643_v0 }
 0xd10   : > { %10727 = shalt.err (!%p10724_p3)
}
 0xd11   : > { %10626 = dma.vmem_to_hbm [thread:$0]  (%p10937_p5), %s9657_s10, 16, %s9659_s11, %s9646_s8  }
 0xd12 PF: > { %s18613_s27 = sld [smem:[#allocation12_spill]] }
 0xd13   : > { %s18614_s2 = sld [smem:[#allocation10_spill]] }
 0xd18   : > { %p10632_p4 = scmp.ge.s32.totalorder %s18613_s27, 2 }
 0xd19   : > { %s9670_s0 = sand.u32 1, %s18614_s2  }
 0xd1a   : > { %p10629_p7 = pnand %p10632_p4, %p10941_p6  ;;  %s9671_s9 = scalar_lea.sflag [#allocation8], %s9670_s0 }
 0xd1c   : > { %p10630_p8 = pneg %p10629_p7 }
 0xd1e   : > { %10745 = dma.done.wait (%p10630_p8), %s9671_s9, 16  }
 0xd1f   : > { %10747 = vsyncadd (%p10630_p8), %s9671_s9, 4294967280  ;;  %s18616_s28 = sld [smem:[#allocation13_spill]]  ;;  %s18619_s5 = smov %s10754_s26 }
 0xd20   : > { %s18617_s7 = sld [smem:[#allocation11_spill]] }
 0xd21   : > { %s18618_s27 = sld [smem:[#allocation14_spill]] }
 0xd25   : > { %p34_p9 = scmp.ge.s32.totalorder %s18616_s28, 4  }
 0xd26   : > { %s18620_s26 = smov %s18617_s7 }
 0xd27   :  { %36 = sbr.rel (!%p34_p9) target bundleno = 17 (0x11), region = 151 }
 0xd2c   :  { %9676 = vsyncpa [#allocation8], 1 }
 0xd2d   :  { %9678 = vsyncpa [#allocation8 + $0x1], 1 }

</bundles_post_ra>
